<compile_context>
chip_gen: v5e
topology: v5e:2x2
jax: 0.10.0
libtpu: 0.0.40
codegen_flags: <defaults>
</compile_context>

<pallas_src>
import functools

import jax
import jax.numpy as jnp
from jax import lax
from jax.experimental import pallas as pl
from jax.experimental.pallas import tpu as pltpu

BN_EPS = 1e-5
LEAKY_SLOPE = 0.01

_VMEM_SPEC = pl.BlockSpec(memory_space=pltpu.MemorySpace.VMEM)


# ----------------------------------------------------------------------------
# Fused wavefront kernel
# ----------------------------------------------------------------------------
def _fused_mlstm_kernel(x_ref, wbig_ref, bbig_ref, fcw_ref, fcb_ref, out_ref,
                        *, T, B, Din, hidden):
    """x_ref: (T, B, Din) time-major input.
    wbig_ref: (Din + Htot + (Htot - H_last), 4*Htot) block-diagonal fused weights,
              gate-column layout [i_all | f_all | o_all | g_all], g-columns pre-scaled by 2.
    bbig_ref: (1, 4*Htot) fused biases (same layout / scaling).
    fcw_ref:  (H_last, Dout) fc weight (transposed).   fcb_ref: (1, Dout).
    out_ref:  (B, Dout).
    """
    n = len(hidden)
    Hs = list(hidden)
    Htot = sum(Hs)
    cum = [0]
    for h in Hs:
        cum.append(cum[-1] + h)
    D = T + n - 1  # number of wavefront diagonals

    # Hoisted loop-invariant loads / broadcasts (unrolled loop would re-issue them).
    W = wbig_ref[...]
    bias = jnp.broadcast_to(bbig_ref[...], (B, 4 * Htot))
    fc_w = fcw_ref[...]
    fc_b = fcb_ref[...]
    lane = lax.broadcasted_iota(jnp.int32, (1, Htot), 1)
    zeros_x = jnp.zeros((B, Din), jnp.float32)

    def bn_act(h):
        # BatchNorm1d(sequence_size) train mode, gamma=1/beta=0: scalar mean/var per time
        # step over (batch, feature).  One-pass variance keeps the two reduces independent.
        m = jnp.mean(h, axis=(0, 1), keepdims=True)
        v = jnp.mean(h * h, axis=(0, 1), keepdims=True) - m * m
        a = (h - m) * lax.rsqrt(v + BN_EPS)
        return jnp.where(a >= 0, a, LEAKY_SLOPE * a)

    h_all = jnp.zeros((B, Htot), jnp.float32)               # [h0 | h1 | ... ]
    c_all = jnp.zeros((B, Htot), jnp.float32)
    a_prev = jnp.zeros((B, Htot - Hs[-1]), jnp.float32)     # BN'd outputs feeding layers 1..n-1

    for d in range(D):  # fully unrolled: layer l processes time t = d - l
        x_t = x_ref[d] if d < T else zeros_x
        in_vec = jnp.concatenate([x_t, h_all, a_prev], axis=1)        # (B, K)
        gates = jnp.dot(in_vec, W, preferred_element_type=jnp.float32) + bias  # (B, 4*Htot)

        # One wide sigmoid; g recovered via tanh(z) = 2*sigmoid(2z) - 1 (2x folded into W/b).
        s = jax.nn.sigmoid(gates)
        i_a = s[:, 0 * Htot:1 * Htot]
        f_a = s[:, 1 * Htot:2 * Htot]
        o_a = s[:, 2 * Htot:3 * Htot]
        g_a = 2.0 * s[:, 3 * Htot:4 * Htot] - 1.0

        c_new = f_a * c_all + i_a * g_a
        h_new = o_a * jnp.tanh(c_new)

        if d < n - 1:
            # Ramp-up: layers l > d have not started yet -> keep their state at zero.
            m_up = lane < cum[d + 1]
            c_all = jnp.where(m_up, c_new, c_all)
            h_all = jnp.where(m_up, h_new, h_all)
        else:
            # Ramp-down garbage in finished layers is never consumed by an active layer.
            c_all, h_all = c_new, h_new

        if d < D - 1:
            # BN + LeakyReLU of layers 0..n-2 -> inputs of layers 1..n-1 on next diagonal.
            a_prev = jnp.concatenate(
                [bn_act(h_all[:, cum[l]:cum[l + 1]]) for l in range(n - 1)], axis=1)

    # Last layer, last time step: BN + LeakyReLU + fused Linear.
    a_last = bn_act(h_all[:, cum[n - 1]:cum[n]])
    out_ref[...] = (jnp.dot(a_last, fc_w, preferred_element_type=jnp.float32)
                    + fc_b).astype(out_ref.dtype)


# ----------------------------------------------------------------------------
# One-time parameter preparation (gate reorder, tanh fold, block-diagonal fuse)
# ----------------------------------------------------------------------------
def prepare_params(lstm_params, fc_params, input_size):
    """Build the fused block-diagonal weight/bias for the wavefront kernel.

    Row layout of W_big (K = Din + Htot + (Htot - H_last)):
      [0, Din)                       : x          -> layer 0 gates (W_ih1)
      [Din + cum[l], +H_l)           : h_l        -> layer l gates (W_hh_{l+1})
      [Din + Htot + cum[l-1], +H_{l-1}): a_{l-1}  -> layer l gates (W_ih_{l+1}), l >= 1
    Column layout (N = 4*Htot): gate groups [i | f | o | g], each group holds all layers
    contiguously; g-gate columns and biases scaled by 2 (tanh-as-sigmoid fold).
    """
    n = len(lstm_params)
    Hs = tuple(int(w_hh.shape[1]) for (_, w_hh, _, _) in lstm_params)
    Htot = sum(Hs)
    cum = [0]
    for h in Hs:
        cum.append(cum[-1] + h)
    K = input_size + Htot + (Htot - Hs[-1])
    N = 4 * Htot

    W_big = jnp.zeros((K, N), jnp.float32)
    b_big = jnp.zeros((1, N), jnp.float32)

    for l in range(n):
        w_ih, w_hh, b_ih, b_hh = lstm_params[l]
        H = Hs[l]
        wih_t = jnp.transpose(w_ih)                 # (Din_l, 4H), pytorch col order i,f,g,o
        whh_t = jnp.transpose(w_hh)                 # (H, 4H)
        b = (b_ih + b_hh).reshape(1, 4 * H)
        if l == 0:
            in_r0, in_w = 0, input_size
        else:
            in_r0, in_w = input_size + Htot + cum[l - 1], Hs[l - 1]
        hh_r0 = input_size + cum[l]
        # target gate groups: i, f, o, g  <-  pytorch gate indices 0, 1, 3, 2
        for gidx, sidx in enumerate((0, 1, 3, 2)):
            scale = 2.0 if gidx == 3 else 1.0       # fold tanh(z) = 2*sigmoid(2z) - 1
            c0 = gidx * Htot + cum[l]
            src = slice(sidx * H, (sidx + 1) * H)
            W_big = W_big.at[in_r0:in_r0 + in_w, c0:c0 + H].set(scale * wih_t[:, src])
            W_big = W_big.at[hh_r0:hh_r0 + H, c0:c0 + H].set(scale * whh_t[:, src])
            b_big = b_big.at[:, c0:c0 + H].set(scale * b[:, src])

    fc_w, fc_b = fc_params
    return (W_big, b_big, jnp.transpose(fc_w), fc_b.reshape(1, -1)), Hs


# ----------------------------------------------------------------------------
# Forward wrapper
# ----------------------------------------------------------------------------
def multiple_lstm_forward(x_btf, W_big, b_big, fc_w_t, fc_b, *, hidden):
    """x_btf: (B, T, input_size), batch_first like the PyTorch module."""
    B, T, Din = x_btf.shape
    Dout = int(fc_w_t.shape[1])
    x_tbf = jnp.transpose(x_btf, (1, 0, 2))  # (T, B, Din) time-major

    kernel = functools.partial(_fused_mlstm_kernel, T=T, B=B, Din=Din, hidden=tuple(hidden))
    return pl.pallas_call(
        kernel,
        out_shape=jax.ShapeDtypeStruct((B, Dout), jnp.float32),
        in_specs=[_VMEM_SPEC] * 5,
        out_specs=_VMEM_SPEC,
    )(x_tbf, W_big, b_big, fc_w_t, fc_b)


# ----------------------------------------------------------------------------
# Deterministic parameter initialization (mirrors _reinitialize)
# ----------------------------------------------------------------------------
def _xavier_uniform(key, shape):
    fan_out, fan_in = shape
    limit = (6.0 / (fan_in + fan_out)) ** 0.5
    return jax.random.uniform(key, shape, jnp.float32, -limit, limit)


def _orthogonal(key, shape):
    rows, cols = shape
    a = jax.random.normal(key, (rows, cols), jnp.float32)
    q, r = jnp.linalg.qr(a)
    return q * jnp.sign(jnp.diagonal(r))


def init_params(key, input_size, output_size, hidden):
    dims = [input_size] + list(hidden)
    keys = jax.random.split(key, 2 * len(hidden) + 1)
    lstm_params = []
    for l, h in enumerate(hidden):
        din = dims[l]
        w_ih = _xavier_uniform(keys[2 * l], (4 * h, din))
        w_hh = _orthogonal(keys[2 * l + 1], (4 * h, h))
        b_ih = jnp.zeros((4 * h,), jnp.float32).at[h:2 * h].set(1.0)  # forget bias = 1
        b_hh = jnp.zeros((4 * h,), jnp.float32)
        lstm_params.append((w_ih, w_hh, b_ih, b_hh))
    fc_w = _xavier_uniform(keys[-1], (output_size, hidden[-1]))
    fc_b = jnp.zeros((output_size,), jnp.float32)
    return lstm_params, (fc_w, fc_b)


# ----------------------------------------------------------------------------
# Pure-JAX reference (PyTorch-layout params / gate order) for sanity check
# ----------------------------------------------------------------------------
def reference_forward(x_btf, lstm_params, fc_params):
    x = x_btf
    for (w_ih, w_hh, b_ih, b_hh) in lstm_params:
        B, T, _ = x.shape
        H = w_hh.shape[1]
        h = jnp.zeros((B, H), jnp.float32)
        c = jnp.zeros((B, H), jnp.float32)
        ys = []
        for t in range(T):
            gates = x[:, t, :] @ w_ih.T + h @ w_hh.T + b_ih + b_hh
            i = jax.nn.sigmoid(gates[:, :H])
            f = jax.nn.sigmoid(gates[:, H:2 * H])
            g = jnp.tanh(gates[:, 2 * H:3 * H])
            o = jax.nn.sigmoid(gates[:, 3 * H:])
            c = f * c + i * g
            h = o * jnp.tanh(c)
            ys.append(h)
        y = jnp.stack(ys, axis=1)                                  # (B, T, H)
        mean = jnp.mean(y, axis=(0, 2), keepdims=True)
        var = jnp.mean((y - mean) ** 2, axis=(0, 2), keepdims=True)
        yn = (y - mean) / jnp.sqrt(var + BN_EPS)
        x = jnp.where(yn >= 0, yn, LEAKY_SLOPE * yn)
    fc_w, fc_b = fc_params
    return x[:, -1, :] @ fc_w.T + fc_b


# ----------------------------------------------------------------------------
if __name__ == "__main__":
    B, T = 2, 8
    input_size, output_size = 16, 4
    hidden = [32, 32, 32, 32]

    key = jax.random.PRNGKey(0)
    k_x, k_p = jax.random.split(key)
    x = jax.random.normal(k_x, (B, T, input_size), jnp.float32)
    lstm_params, fc_params = init_params(k_p, input_size, output_size, hidden)

    # One-time weight prep (gate reorder / tanh fold / block-diagonal fuse) outside forward.
    (W_big, b_big, fc_w_t, fc_b), Hs = prepare_params(lstm_params, fc_params, input_size)

    fwd = jax.jit(multiple_lstm_forward, static_argnames=("hidden",))
    out = fwd(x, W_big, b_big, fc_w_t, fc_b, hidden=Hs)
    out = jax.block_until_ready(out)

    ref = reference_forward(x, lstm_params, fc_params)
    assert out.shape == (B, output_size)
    assert jnp.allclose(out, ref, atol=2e-3, rtol=2e-3), "mismatch vs reference"

    print("KERNEL_OK")
</pallas_src>

<mosaic_0001>
module attributes {stable_mosaic.version = 11 : i64} {
  func.func @_fused_mlstm_kernel(%arg0: memref<8x2x16xf32, #tpu.memory_space<vmem>>, %arg1: memref<240x512xf32, #tpu.memory_space<vmem>>, %arg2: memref<1x512xf32, #tpu.memory_space<vmem>>, %arg3: memref<32x4xf32, #tpu.memory_space<vmem>>, %arg4: memref<1x4xf32, #tpu.memory_space<vmem>>, %arg5: memref<2x4xf32, #tpu.memory_space<vmem>>) attributes {dimension_semantics = [], scalar_prefetch = 0 : i64, scratch_operands = 0 : i64, tpu.core_type = #tpu.core_type<tc>} {
    %c0 = arith.constant 0 : index
    %c0_0 = arith.constant 0 : index
    %0 = vector.load %arg1[%c0, %c0_0] : memref<240x512xf32, #tpu.memory_space<vmem>>, vector<240x512xf32>
    %c0_1 = arith.constant 0 : index
    %c0_2 = arith.constant 0 : index
    %1 = vector.load %arg2[%c0_1, %c0_2] : memref<1x512xf32, #tpu.memory_space<vmem>>, vector<1x512xf32>
    %2 = vector.shape_cast %1 : vector<1x512xf32> to vector<1x512xf32>
    %3 = vector.broadcast %2 : vector<1x512xf32> to vector<2x512xf32>
    %c0_3 = arith.constant 0 : index
    %c0_4 = arith.constant 0 : index
    %4 = vector.load %arg3[%c0_3, %c0_4] : memref<32x4xf32, #tpu.memory_space<vmem>>, vector<32x4xf32>
    %c0_5 = arith.constant 0 : index
    %c0_6 = arith.constant 0 : index
    %5 = vector.load %arg4[%c0_5, %c0_6] : memref<1x4xf32, #tpu.memory_space<vmem>>, vector<1x4xf32>
    %6 = tpu.iota {dimensions = array<i32: 1>} : vector<1x128xi32>
    %cst = arith.constant 0.000000e+00 : f32
    %7 = vector.broadcast %cst : f32 to vector<2x16xf32>
    %cst_7 = arith.constant 0.000000e+00 : f32
    %8 = vector.broadcast %cst_7 : f32 to vector<2x128xf32>
    %cst_8 = arith.constant 0.000000e+00 : f32
    %9 = vector.broadcast %cst_8 : f32 to vector<2x128xf32>
    %cst_9 = arith.constant 0.000000e+00 : f32
    %10 = vector.broadcast %cst_9 : f32 to vector<2x96xf32>
    %c0_10 = arith.constant 0 : index
    %c0_11 = arith.constant 0 : index
    %c0_12 = arith.constant 0 : index
    %11 = vector.load %arg0[%c0_10, %c0_11, %c0_12] : memref<8x2x16xf32, #tpu.memory_space<vmem>>, vector<1x2x16xf32>
    %12 = vector.shape_cast %11 : vector<1x2x16xf32> to vector<2x16xf32>
    %13 = tpu.concatenate %12, %8, %10 in 1 : vector<2x16xf32>, vector<2x128xf32>, vector<2x96xf32> -> vector<2x240xf32>
    %cst_13 = arith.constant dense<0.000000e+00> : vector<2x512xf32>
    %14 = tpu.matmul %13, %0, %cst_13 {dimension_numbers = #tpu.dot_dimension_numbers<[1], [0], [0], [1], [0, 0, 1, 1], [], []>} : vector<2x240xf32>, vector<240x512xf32>, vector<2x512xf32> -> vector<2x512xf32>
    %15 = arith.addf %14, %3 : vector<2x512xf32>
    %16 = arith.negf %15 : vector<2x512xf32>
    %17 = math.exp %16 : vector<2x512xf32>
    %cst_14 = arith.constant 1.000000e+00 : f32
    %18 = vector.broadcast %cst_14 : f32 to vector<2x512xf32>
    %19 = arith.addf %18, %17 : vector<2x512xf32>
    %20 = arith.divf %18, %19 : vector<2x512xf32>
    %21 = vector.extract_strided_slice %20 {offsets = [0, 0], sizes = [2, 128], strides = [1, 1]} : vector<2x512xf32> to vector<2x128xf32>
    %22 = vector.extract_strided_slice %20 {offsets = [0, 128], sizes = [2, 128], strides = [1, 1]} : vector<2x512xf32> to vector<2x128xf32>
    %23 = vector.extract_strided_slice %20 {offsets = [0, 256], sizes = [2, 128], strides = [1, 1]} : vector<2x512xf32> to vector<2x128xf32>
    %24 = vector.extract_strided_slice %20 {offsets = [0, 384], sizes = [2, 128], strides = [1, 1]} : vector<2x512xf32> to vector<2x128xf32>
    %cst_15 = arith.constant 2.000000e+00 : f32
    %25 = vector.broadcast %cst_15 : f32 to vector<2x128xf32>
    %26 = arith.mulf %25, %24 : vector<2x128xf32>
    %cst_16 = arith.constant 1.000000e+00 : f32
    %27 = vector.broadcast %cst_16 : f32 to vector<2x128xf32>
    %28 = arith.subf %26, %27 : vector<2x128xf32>
    %29 = arith.mulf %22, %9 : vector<2x128xf32>
    %30 = arith.mulf %21, %28 : vector<2x128xf32>
    %31 = arith.addf %29, %30 : vector<2x128xf32>
    %32 = math.tanh %31 : vector<2x128xf32>
    %33 = arith.mulf %23, %32 : vector<2x128xf32>
    %c32_i32 = arith.constant 32 : i32
    %34 = vector.broadcast %c32_i32 : i32 to vector<1x128xi32>
    %35 = arith.cmpi slt, %6, %34 : vector<1x128xi32>
    %36 = vector.shape_cast %35 : vector<1x128xi1> to vector<1x128xi1>
    %37 = vector.broadcast %36 : vector<1x128xi1> to vector<2x128xi1>
    %38 = arith.select %37, %31, %9 : vector<2x128xi1>, vector<2x128xf32>
    %39 = vector.shape_cast %35 : vector<1x128xi1> to vector<1x128xi1>
    %40 = vector.broadcast %39 : vector<1x128xi1> to vector<2x128xi1>
    %41 = arith.select %40, %33, %8 : vector<2x128xi1>, vector<2x128xf32>
    %42 = vector.extract_strided_slice %41 {offsets = [0, 0], sizes = [2, 32], strides = [1, 1]} : vector<2x128xf32> to vector<2x32xf32>
    %43 = vector.shape_cast %42 : vector<2x32xf32> to vector<1x2x32xf32>
    %cst_17 = arith.constant dense<0.000000e+00> : vector<1xf32>
    %44 = vector.multi_reduction <add>, %43, %cst_17 [1, 2] : vector<1x2x32xf32> to vector<1xf32>
    %45 = vector.shape_cast %44 : vector<1xf32> to vector<1x1x1xf32>
    %46 = vector.extract %45[0, 0, 0] : f32 from vector<1x1x1xf32>
    %47 = vector.broadcast %46 : f32 to vector<1x1xf32>
    %cst_18 = arith.constant 6.400000e+01 : f32
    %48 = vector.broadcast %cst_18 : f32 to vector<1x1xf32>
    %49 = arith.divf %47, %48 : vector<1x1xf32>
    %50 = arith.mulf %42, %42 : vector<2x32xf32>
    %51 = vector.shape_cast %50 : vector<2x32xf32> to vector<1x2x32xf32>
    %cst_19 = arith.constant dense<0.000000e+00> : vector<1xf32>
    %52 = vector.multi_reduction <add>, %51, %cst_19 [1, 2] : vector<1x2x32xf32> to vector<1xf32>
    %53 = vector.shape_cast %52 : vector<1xf32> to vector<1x1x1xf32>
    %54 = vector.extract %53[0, 0, 0] : f32 from vector<1x1x1xf32>
    %55 = vector.broadcast %54 : f32 to vector<1x1xf32>
    %cst_20 = arith.constant 6.400000e+01 : f32
    %56 = vector.broadcast %cst_20 : f32 to vector<1x1xf32>
    %57 = arith.divf %55, %56 : vector<1x1xf32>
    %58 = arith.mulf %49, %49 : vector<1x1xf32>
    %59 = arith.subf %57, %58 : vector<1x1xf32>
    %60 = vector.broadcast %49 : vector<1x1xf32> to vector<2x32xf32>
    %61 = arith.subf %42, %60 : vector<2x32xf32>
    %cst_21 = arith.constant 9.99999974E-6 : f32
    %62 = vector.broadcast %cst_21 : f32 to vector<1x1xf32>
    %63 = arith.addf %59, %62 : vector<1x1xf32>
    %64 = math.rsqrt %63 : vector<1x1xf32>
    %65 = vector.broadcast %64 : vector<1x1xf32> to vector<2x32xf32>
    %66 = arith.mulf %61, %65 : vector<2x32xf32>
    %cst_22 = arith.constant 0.000000e+00 : f32
    %67 = vector.broadcast %cst_22 : f32 to vector<2x32xf32>
    %68 = arith.cmpf oge, %66, %67 : vector<2x32xf32>
    %cst_23 = arith.constant 0.00999999977 : f32
    %69 = vector.broadcast %cst_23 : f32 to vector<2x32xf32>
    %70 = arith.mulf %69, %66 : vector<2x32xf32>
    %71 = arith.select %68, %66, %70 : vector<2x32xi1>, vector<2x32xf32>
    %72 = vector.extract_strided_slice %41 {offsets = [0, 32], sizes = [2, 32], strides = [1, 1]} : vector<2x128xf32> to vector<2x32xf32>
    %73 = vector.shape_cast %72 : vector<2x32xf32> to vector<1x2x32xf32>
    %cst_24 = arith.constant dense<0.000000e+00> : vector<1xf32>
    %74 = vector.multi_reduction <add>, %73, %cst_24 [1, 2] : vector<1x2x32xf32> to vector<1xf32>
    %75 = vector.shape_cast %74 : vector<1xf32> to vector<1x1x1xf32>
    %76 = vector.extract %75[0, 0, 0] : f32 from vector<1x1x1xf32>
    %77 = vector.broadcast %76 : f32 to vector<1x1xf32>
    %cst_25 = arith.constant 6.400000e+01 : f32
    %78 = vector.broadcast %cst_25 : f32 to vector<1x1xf32>
    %79 = arith.divf %77, %78 : vector<1x1xf32>
    %80 = arith.mulf %72, %72 : vector<2x32xf32>
    %81 = vector.shape_cast %80 : vector<2x32xf32> to vector<1x2x32xf32>
    %cst_26 = arith.constant dense<0.000000e+00> : vector<1xf32>
    %82 = vector.multi_reduction <add>, %81, %cst_26 [1, 2] : vector<1x2x32xf32> to vector<1xf32>
    %83 = vector.shape_cast %82 : vector<1xf32> to vector<1x1x1xf32>
    %84 = vector.extract %83[0, 0, 0] : f32 from vector<1x1x1xf32>
    %85 = vector.broadcast %84 : f32 to vector<1x1xf32>
    %cst_27 = arith.constant 6.400000e+01 : f32
    %86 = vector.broadcast %cst_27 : f32 to vector<1x1xf32>
    %87 = arith.divf %85, %86 : vector<1x1xf32>
    %88 = arith.mulf %79, %79 : vector<1x1xf32>
    %89 = arith.subf %87, %88 : vector<1x1xf32>
    %90 = vector.broadcast %79 : vector<1x1xf32> to vector<2x32xf32>
    %91 = arith.subf %72, %90 : vector<2x32xf32>
    %cst_28 = arith.constant 9.99999974E-6 : f32
    %92 = vector.broadcast %cst_28 : f32 to vector<1x1xf32>
    %93 = arith.addf %89, %92 : vector<1x1xf32>
    %94 = math.rsqrt %93 : vector<1x1xf32>
    %95 = vector.broadcast %94 : vector<1x1xf32> to vector<2x32xf32>
    %96 = arith.mulf %91, %95 : vector<2x32xf32>
    %cst_29 = arith.constant 0.000000e+00 : f32
    %97 = vector.broadcast %cst_29 : f32 to vector<2x32xf32>
    %98 = arith.cmpf oge, %96, %97 : vector<2x32xf32>
    %cst_30 = arith.constant 0.00999999977 : f32
    %99 = vector.broadcast %cst_30 : f32 to vector<2x32xf32>
    %100 = arith.mulf %99, %96 : vector<2x32xf32>
    %101 = arith.select %98, %96, %100 : vector<2x32xi1>, vector<2x32xf32>
    %102 = vector.extract_strided_slice %41 {offsets = [0, 64], sizes = [2, 32], strides = [1, 1]} : vector<2x128xf32> to vector<2x32xf32>
    %103 = vector.shape_cast %102 : vector<2x32xf32> to vector<1x2x32xf32>
    %cst_31 = arith.constant dense<0.000000e+00> : vector<1xf32>
    %104 = vector.multi_reduction <add>, %103, %cst_31 [1, 2] : vector<1x2x32xf32> to vector<1xf32>
    %105 = vector.shape_cast %104 : vector<1xf32> to vector<1x1x1xf32>
    %106 = vector.extract %105[0, 0, 0] : f32 from vector<1x1x1xf32>
    %107 = vector.broadcast %106 : f32 to vector<1x1xf32>
    %cst_32 = arith.constant 6.400000e+01 : f32
    %108 = vector.broadcast %cst_32 : f32 to vector<1x1xf32>
    %109 = arith.divf %107, %108 : vector<1x1xf32>
    %110 = arith.mulf %102, %102 : vector<2x32xf32>
    %111 = vector.shape_cast %110 : vector<2x32xf32> to vector<1x2x32xf32>
    %cst_33 = arith.constant dense<0.000000e+00> : vector<1xf32>
    %112 = vector.multi_reduction <add>, %111, %cst_33 [1, 2] : vector<1x2x32xf32> to vector<1xf32>
    %113 = vector.shape_cast %112 : vector<1xf32> to vector<1x1x1xf32>
    %114 = vector.extract %113[0, 0, 0] : f32 from vector<1x1x1xf32>
    %115 = vector.broadcast %114 : f32 to vector<1x1xf32>
    %cst_34 = arith.constant 6.400000e+01 : f32
    %116 = vector.broadcast %cst_34 : f32 to vector<1x1xf32>
    %117 = arith.divf %115, %116 : vector<1x1xf32>
    %118 = arith.mulf %109, %109 : vector<1x1xf32>
    %119 = arith.subf %117, %118 : vector<1x1xf32>
    %120 = vector.broadcast %109 : vector<1x1xf32> to vector<2x32xf32>
    %121 = arith.subf %102, %120 : vector<2x32xf32>
    %cst_35 = arith.constant 9.99999974E-6 : f32
    %122 = vector.broadcast %cst_35 : f32 to vector<1x1xf32>
    %123 = arith.addf %119, %122 : vector<1x1xf32>
    %124 = math.rsqrt %123 : vector<1x1xf32>
    %125 = vector.broadcast %124 : vector<1x1xf32> to vector<2x32xf32>
    %126 = arith.mulf %121, %125 : vector<2x32xf32>
    %cst_36 = arith.constant 0.000000e+00 : f32
    %127 = vector.broadcast %cst_36 : f32 to vector<2x32xf32>
    %128 = arith.cmpf oge, %126, %127 : vector<2x32xf32>
    %cst_37 = arith.constant 0.00999999977 : f32
    %129 = vector.broadcast %cst_37 : f32 to vector<2x32xf32>
    %130 = arith.mulf %129, %126 : vector<2x32xf32>
    %131 = arith.select %128, %126, %130 : vector<2x32xi1>, vector<2x32xf32>
    %132 = tpu.concatenate %71, %101, %131 in 1 : vector<2x32xf32>, vector<2x32xf32>, vector<2x32xf32> -> vector<2x96xf32>
    %c1 = arith.constant 1 : index
    %c0_38 = arith.constant 0 : index
    %c0_39 = arith.constant 0 : index
    %133 = vector.load %arg0[%c1, %c0_38, %c0_39] : memref<8x2x16xf32, #tpu.memory_space<vmem>>, vector<1x2x16xf32>
    %134 = vector.shape_cast %133 : vector<1x2x16xf32> to vector<2x16xf32>
    %135 = tpu.concatenate %134, %41, %132 in 1 : vector<2x16xf32>, vector<2x128xf32>, vector<2x96xf32> -> vector<2x240xf32>
    %cst_40 = arith.constant dense<0.000000e+00> : vector<2x512xf32>
    %136 = tpu.matmul %135, %0, %cst_40 {dimension_numbers = #tpu.dot_dimension_numbers<[1], [0], [0], [1], [0, 0, 1, 1], [], []>} : vector<2x240xf32>, vector<240x512xf32>, vector<2x512xf32> -> vector<2x512xf32>
    %137 = arith.addf %136, %3 : vector<2x512xf32>
    %138 = arith.negf %137 : vector<2x512xf32>
    %139 = math.exp %138 : vector<2x512xf32>
    %cst_41 = arith.constant 1.000000e+00 : f32
    %140 = vector.broadcast %cst_41 : f32 to vector<2x512xf32>
    %141 = arith.addf %140, %139 : vector<2x512xf32>
    %142 = arith.divf %140, %141 : vector<2x512xf32>
    %143 = vector.extract_strided_slice %142 {offsets = [0, 0], sizes = [2, 128], strides = [1, 1]} : vector<2x512xf32> to vector<2x128xf32>
    %144 = vector.extract_strided_slice %142 {offsets = [0, 128], sizes = [2, 128], strides = [1, 1]} : vector<2x512xf32> to vector<2x128xf32>
    %145 = vector.extract_strided_slice %142 {offsets = [0, 256], sizes = [2, 128], strides = [1, 1]} : vector<2x512xf32> to vector<2x128xf32>
    %146 = vector.extract_strided_slice %142 {offsets = [0, 384], sizes = [2, 128], strides = [1, 1]} : vector<2x512xf32> to vector<2x128xf32>
    %cst_42 = arith.constant 2.000000e+00 : f32
    %147 = vector.broadcast %cst_42 : f32 to vector<2x128xf32>
    %148 = arith.mulf %147, %146 : vector<2x128xf32>
    %cst_43 = arith.constant 1.000000e+00 : f32
    %149 = vector.broadcast %cst_43 : f32 to vector<2x128xf32>
    %150 = arith.subf %148, %149 : vector<2x128xf32>
    %151 = arith.mulf %144, %38 : vector<2x128xf32>
    %152 = arith.mulf %143, %150 : vector<2x128xf32>
    %153 = arith.addf %151, %152 : vector<2x128xf32>
    %154 = math.tanh %153 : vector<2x128xf32>
    %155 = arith.mulf %145, %154 : vector<2x128xf32>
    %c64_i32 = arith.constant 64 : i32
    %156 = vector.broadcast %c64_i32 : i32 to vector<1x128xi32>
    %157 = arith.cmpi slt, %6, %156 : vector<1x128xi32>
    %158 = vector.shape_cast %157 : vector<1x128xi1> to vector<1x128xi1>
    %159 = vector.broadcast %158 : vector<1x128xi1> to vector<2x128xi1>
    %160 = arith.select %159, %153, %38 : vector<2x128xi1>, vector<2x128xf32>
    %161 = vector.shape_cast %157 : vector<1x128xi1> to vector<1x128xi1>
    %162 = vector.broadcast %161 : vector<1x128xi1> to vector<2x128xi1>
    %163 = arith.select %162, %155, %41 : vector<2x128xi1>, vector<2x128xf32>
    %164 = vector.extract_strided_slice %163 {offsets = [0, 0], sizes = [2, 32], strides = [1, 1]} : vector<2x128xf32> to vector<2x32xf32>
    %165 = vector.shape_cast %164 : vector<2x32xf32> to vector<1x2x32xf32>
    %cst_44 = arith.constant dense<0.000000e+00> : vector<1xf32>
    %166 = vector.multi_reduction <add>, %165, %cst_44 [1, 2] : vector<1x2x32xf32> to vector<1xf32>
    %167 = vector.shape_cast %166 : vector<1xf32> to vector<1x1x1xf32>
    %168 = vector.extract %167[0, 0, 0] : f32 from vector<1x1x1xf32>
    %169 = vector.broadcast %168 : f32 to vector<1x1xf32>
    %cst_45 = arith.constant 6.400000e+01 : f32
    %170 = vector.broadcast %cst_45 : f32 to vector<1x1xf32>
    %171 = arith.divf %169, %170 : vector<1x1xf32>
    %172 = arith.mulf %164, %164 : vector<2x32xf32>
    %173 = vector.shape_cast %172 : vector<2x32xf32> to vector<1x2x32xf32>
    %cst_46 = arith.constant dense<0.000000e+00> : vector<1xf32>
    %174 = vector.multi_reduction <add>, %173, %cst_46 [1, 2] : vector<1x2x32xf32> to vector<1xf32>
    %175 = vector.shape_cast %174 : vector<1xf32> to vector<1x1x1xf32>
    %176 = vector.extract %175[0, 0, 0] : f32 from vector<1x1x1xf32>
    %177 = vector.broadcast %176 : f32 to vector<1x1xf32>
    %cst_47 = arith.constant 6.400000e+01 : f32
    %178 = vector.broadcast %cst_47 : f32 to vector<1x1xf32>
    %179 = arith.divf %177, %178 : vector<1x1xf32>
    %180 = arith.mulf %171, %171 : vector<1x1xf32>
    %181 = arith.subf %179, %180 : vector<1x1xf32>
    %182 = vector.broadcast %171 : vector<1x1xf32> to vector<2x32xf32>
    %183 = arith.subf %164, %182 : vector<2x32xf32>
    %cst_48 = arith.constant 9.99999974E-6 : f32
    %184 = vector.broadcast %cst_48 : f32 to vector<1x1xf32>
    %185 = arith.addf %181, %184 : vector<1x1xf32>
    %186 = math.rsqrt %185 : vector<1x1xf32>
    %187 = vector.broadcast %186 : vector<1x1xf32> to vector<2x32xf32>
    %188 = arith.mulf %183, %187 : vector<2x32xf32>
    %cst_49 = arith.constant 0.000000e+00 : f32
    %189 = vector.broadcast %cst_49 : f32 to vector<2x32xf32>
    %190 = arith.cmpf oge, %188, %189 : vector<2x32xf32>
    %cst_50 = arith.constant 0.00999999977 : f32
    %191 = vector.broadcast %cst_50 : f32 to vector<2x32xf32>
    %192 = arith.mulf %191, %188 : vector<2x32xf32>
    %193 = arith.select %190, %188, %192 : vector<2x32xi1>, vector<2x32xf32>
    %194 = vector.extract_strided_slice %163 {offsets = [0, 32], sizes = [2, 32], strides = [1, 1]} : vector<2x128xf32> to vector<2x32xf32>
    %195 = vector.shape_cast %194 : vector<2x32xf32> to vector<1x2x32xf32>
    %cst_51 = arith.constant dense<0.000000e+00> : vector<1xf32>
    %196 = vector.multi_reduction <add>, %195, %cst_51 [1, 2] : vector<1x2x32xf32> to vector<1xf32>
    %197 = vector.shape_cast %196 : vector<1xf32> to vector<1x1x1xf32>
    %198 = vector.extract %197[0, 0, 0] : f32 from vector<1x1x1xf32>
    %199 = vector.broadcast %198 : f32 to vector<1x1xf32>
    %cst_52 = arith.constant 6.400000e+01 : f32
    %200 = vector.broadcast %cst_52 : f32 to vector<1x1xf32>
    %201 = arith.divf %199, %200 : vector<1x1xf32>
    %202 = arith.mulf %194, %194 : vector<2x32xf32>
    %203 = vector.shape_cast %202 : vector<2x32xf32> to vector<1x2x32xf32>
    %cst_53 = arith.constant dense<0.000000e+00> : vector<1xf32>
    %204 = vector.multi_reduction <add>, %203, %cst_53 [1, 2] : vector<1x2x32xf32> to vector<1xf32>
    %205 = vector.shape_cast %204 : vector<1xf32> to vector<1x1x1xf32>
    %206 = vector.extract %205[0, 0, 0] : f32 from vector<1x1x1xf32>
    %207 = vector.broadcast %206 : f32 to vector<1x1xf32>
    %cst_54 = arith.constant 6.400000e+01 : f32
    %208 = vector.broadcast %cst_54 : f32 to vector<1x1xf32>
    %209 = arith.divf %207, %208 : vector<1x1xf32>
    %210 = arith.mulf %201, %201 : vector<1x1xf32>
    %211 = arith.subf %209, %210 : vector<1x1xf32>
    %212 = vector.broadcast %201 : vector<1x1xf32> to vector<2x32xf32>
    %213 = arith.subf %194, %212 : vector<2x32xf32>
    %cst_55 = arith.constant 9.99999974E-6 : f32
    %214 = vector.broadcast %cst_55 : f32 to vector<1x1xf32>
    %215 = arith.addf %211, %214 : vector<1x1xf32>
    %216 = math.rsqrt %215 : vector<1x1xf32>
    %217 = vector.broadcast %216 : vector<1x1xf32> to vector<2x32xf32>
    %218 = arith.mulf %213, %217 : vector<2x32xf32>
    %cst_56 = arith.constant 0.000000e+00 : f32
    %219 = vector.broadcast %cst_56 : f32 to vector<2x32xf32>
    %220 = arith.cmpf oge, %218, %219 : vector<2x32xf32>
    %cst_57 = arith.constant 0.00999999977 : f32
    %221 = vector.broadcast %cst_57 : f32 to vector<2x32xf32>
    %222 = arith.mulf %221, %218 : vector<2x32xf32>
    %223 = arith.select %220, %218, %222 : vector<2x32xi1>, vector<2x32xf32>
    %224 = vector.extract_strided_slice %163 {offsets = [0, 64], sizes = [2, 32], strides = [1, 1]} : vector<2x128xf32> to vector<2x32xf32>
    %225 = vector.shape_cast %224 : vector<2x32xf32> to vector<1x2x32xf32>
    %cst_58 = arith.constant dense<0.000000e+00> : vector<1xf32>
    %226 = vector.multi_reduction <add>, %225, %cst_58 [1, 2] : vector<1x2x32xf32> to vector<1xf32>
    %227 = vector.shape_cast %226 : vector<1xf32> to vector<1x1x1xf32>
    %228 = vector.extract %227[0, 0, 0] : f32 from vector<1x1x1xf32>
    %229 = vector.broadcast %228 : f32 to vector<1x1xf32>
    %cst_59 = arith.constant 6.400000e+01 : f32
    %230 = vector.broadcast %cst_59 : f32 to vector<1x1xf32>
    %231 = arith.divf %229, %230 : vector<1x1xf32>
    %232 = arith.mulf %224, %224 : vector<2x32xf32>
    %233 = vector.shape_cast %232 : vector<2x32xf32> to vector<1x2x32xf32>
    %cst_60 = arith.constant dense<0.000000e+00> : vector<1xf32>
    %234 = vector.multi_reduction <add>, %233, %cst_60 [1, 2] : vector<1x2x32xf32> to vector<1xf32>
    %235 = vector.shape_cast %234 : vector<1xf32> to vector<1x1x1xf32>
    %236 = vector.extract %235[0, 0, 0] : f32 from vector<1x1x1xf32>
    %237 = vector.broadcast %236 : f32 to vector<1x1xf32>
    %cst_61 = arith.constant 6.400000e+01 : f32
    %238 = vector.broadcast %cst_61 : f32 to vector<1x1xf32>
    %239 = arith.divf %237, %238 : vector<1x1xf32>
    %240 = arith.mulf %231, %231 : vector<1x1xf32>
    %241 = arith.subf %239, %240 : vector<1x1xf32>
    %242 = vector.broadcast %231 : vector<1x1xf32> to vector<2x32xf32>
    %243 = arith.subf %224, %242 : vector<2x32xf32>
    %cst_62 = arith.constant 9.99999974E-6 : f32
    %244 = vector.broadcast %cst_62 : f32 to vector<1x1xf32>
    %245 = arith.addf %241, %244 : vector<1x1xf32>
    %246 = math.rsqrt %245 : vector<1x1xf32>
    %247 = vector.broadcast %246 : vector<1x1xf32> to vector<2x32xf32>
    %248 = arith.mulf %243, %247 : vector<2x32xf32>
    %cst_63 = arith.constant 0.000000e+00 : f32
    %249 = vector.broadcast %cst_63 : f32 to vector<2x32xf32>
    %250 = arith.cmpf oge, %248, %249 : vector<2x32xf32>
    %cst_64 = arith.constant 0.00999999977 : f32
    %251 = vector.broadcast %cst_64 : f32 to vector<2x32xf32>
    %252 = arith.mulf %251, %248 : vector<2x32xf32>
    %253 = arith.select %250, %248, %252 : vector<2x32xi1>, vector<2x32xf32>
    %254 = tpu.concatenate %193, %223, %253 in 1 : vector<2x32xf32>, vector<2x32xf32>, vector<2x32xf32> -> vector<2x96xf32>
    %c2 = arith.constant 2 : index
    %c0_65 = arith.constant 0 : index
    %c0_66 = arith.constant 0 : index
    %255 = vector.load %arg0[%c2, %c0_65, %c0_66] : memref<8x2x16xf32, #tpu.memory_space<vmem>>, vector<1x2x16xf32>
    %256 = vector.shape_cast %255 : vector<1x2x16xf32> to vector<2x16xf32>
    %257 = tpu.concatenate %256, %163, %254 in 1 : vector<2x16xf32>, vector<2x128xf32>, vector<2x96xf32> -> vector<2x240xf32>
    %cst_67 = arith.constant dense<0.000000e+00> : vector<2x512xf32>
    %258 = tpu.matmul %257, %0, %cst_67 {dimension_numbers = #tpu.dot_dimension_numbers<[1], [0], [0], [1], [0, 0, 1, 1], [], []>} : vector<2x240xf32>, vector<240x512xf32>, vector<2x512xf32> -> vector<2x512xf32>
    %259 = arith.addf %258, %3 : vector<2x512xf32>
    %260 = arith.negf %259 : vector<2x512xf32>
    %261 = math.exp %260 : vector<2x512xf32>
    %cst_68 = arith.constant 1.000000e+00 : f32
    %262 = vector.broadcast %cst_68 : f32 to vector<2x512xf32>
    %263 = arith.addf %262, %261 : vector<2x512xf32>
    %264 = arith.divf %262, %263 : vector<2x512xf32>
    %265 = vector.extract_strided_slice %264 {offsets = [0, 0], sizes = [2, 128], strides = [1, 1]} : vector<2x512xf32> to vector<2x128xf32>
    %266 = vector.extract_strided_slice %264 {offsets = [0, 128], sizes = [2, 128], strides = [1, 1]} : vector<2x512xf32> to vector<2x128xf32>
    %267 = vector.extract_strided_slice %264 {offsets = [0, 256], sizes = [2, 128], strides = [1, 1]} : vector<2x512xf32> to vector<2x128xf32>
    %268 = vector.extract_strided_slice %264 {offsets = [0, 384], sizes = [2, 128], strides = [1, 1]} : vector<2x512xf32> to vector<2x128xf32>
    %cst_69 = arith.constant 2.000000e+00 : f32
    %269 = vector.broadcast %cst_69 : f32 to vector<2x128xf32>
    %270 = arith.mulf %269, %268 : vector<2x128xf32>
    %cst_70 = arith.constant 1.000000e+00 : f32
    %271 = vector.broadcast %cst_70 : f32 to vector<2x128xf32>
    %272 = arith.subf %270, %271 : vector<2x128xf32>
    %273 = arith.mulf %266, %160 : vector<2x128xf32>
    %274 = arith.mulf %265, %272 : vector<2x128xf32>
    %275 = arith.addf %273, %274 : vector<2x128xf32>
    %276 = math.tanh %275 : vector<2x128xf32>
    %277 = arith.mulf %267, %276 : vector<2x128xf32>
    %c96_i32 = arith.constant 96 : i32
    %278 = vector.broadcast %c96_i32 : i32 to vector<1x128xi32>
    %279 = arith.cmpi slt, %6, %278 : vector<1x128xi32>
    %280 = vector.shape_cast %279 : vector<1x128xi1> to vector<1x128xi1>
    %281 = vector.broadcast %280 : vector<1x128xi1> to vector<2x128xi1>
    %282 = arith.select %281, %275, %160 : vector<2x128xi1>, vector<2x128xf32>
    %283 = vector.shape_cast %279 : vector<1x128xi1> to vector<1x128xi1>
    %284 = vector.broadcast %283 : vector<1x128xi1> to vector<2x128xi1>
    %285 = arith.select %284, %277, %163 : vector<2x128xi1>, vector<2x128xf32>
    %286 = vector.extract_strided_slice %285 {offsets = [0, 0], sizes = [2, 32], strides = [1, 1]} : vector<2x128xf32> to vector<2x32xf32>
    %287 = vector.shape_cast %286 : vector<2x32xf32> to vector<1x2x32xf32>
    %cst_71 = arith.constant dense<0.000000e+00> : vector<1xf32>
    %288 = vector.multi_reduction <add>, %287, %cst_71 [1, 2] : vector<1x2x32xf32> to vector<1xf32>
    %289 = vector.shape_cast %288 : vector<1xf32> to vector<1x1x1xf32>
    %290 = vector.extract %289[0, 0, 0] : f32 from vector<1x1x1xf32>
    %291 = vector.broadcast %290 : f32 to vector<1x1xf32>
    %cst_72 = arith.constant 6.400000e+01 : f32
    %292 = vector.broadcast %cst_72 : f32 to vector<1x1xf32>
    %293 = arith.divf %291, %292 : vector<1x1xf32>
    %294 = arith.mulf %286, %286 : vector<2x32xf32>
    %295 = vector.shape_cast %294 : vector<2x32xf32> to vector<1x2x32xf32>
    %cst_73 = arith.constant dense<0.000000e+00> : vector<1xf32>
    %296 = vector.multi_reduction <add>, %295, %cst_73 [1, 2] : vector<1x2x32xf32> to vector<1xf32>
    %297 = vector.shape_cast %296 : vector<1xf32> to vector<1x1x1xf32>
    %298 = vector.extract %297[0, 0, 0] : f32 from vector<1x1x1xf32>
    %299 = vector.broadcast %298 : f32 to vector<1x1xf32>
    %cst_74 = arith.constant 6.400000e+01 : f32
    %300 = vector.broadcast %cst_74 : f32 to vector<1x1xf32>
    %301 = arith.divf %299, %300 : vector<1x1xf32>
    %302 = arith.mulf %293, %293 : vector<1x1xf32>
    %303 = arith.subf %301, %302 : vector<1x1xf32>
    %304 = vector.broadcast %293 : vector<1x1xf32> to vector<2x32xf32>
    %305 = arith.subf %286, %304 : vector<2x32xf32>
    %cst_75 = arith.constant 9.99999974E-6 : f32
    %306 = vector.broadcast %cst_75 : f32 to vector<1x1xf32>
    %307 = arith.addf %303, %306 : vector<1x1xf32>
    %308 = math.rsqrt %307 : vector<1x1xf32>
    %309 = vector.broadcast %308 : vector<1x1xf32> to vector<2x32xf32>
    %310 = arith.mulf %305, %309 : vector<2x32xf32>
    %cst_76 = arith.constant 0.000000e+00 : f32
    %311 = vector.broadcast %cst_76 : f32 to vector<2x32xf32>
    %312 = arith.cmpf oge, %310, %311 : vector<2x32xf32>
    %cst_77 = arith.constant 0.00999999977 : f32
    %313 = vector.broadcast %cst_77 : f32 to vector<2x32xf32>
    %314 = arith.mulf %313, %310 : vector<2x32xf32>
    %315 = arith.select %312, %310, %314 : vector<2x32xi1>, vector<2x32xf32>
    %316 = vector.extract_strided_slice %285 {offsets = [0, 32], sizes = [2, 32], strides = [1, 1]} : vector<2x128xf32> to vector<2x32xf32>
    %317 = vector.shape_cast %316 : vector<2x32xf32> to vector<1x2x32xf32>
    %cst_78 = arith.constant dense<0.000000e+00> : vector<1xf32>
    %318 = vector.multi_reduction <add>, %317, %cst_78 [1, 2] : vector<1x2x32xf32> to vector<1xf32>
    %319 = vector.shape_cast %318 : vector<1xf32> to vector<1x1x1xf32>
    %320 = vector.extract %319[0, 0, 0] : f32 from vector<1x1x1xf32>
    %321 = vector.broadcast %320 : f32 to vector<1x1xf32>
    %cst_79 = arith.constant 6.400000e+01 : f32
    %322 = vector.broadcast %cst_79 : f32 to vector<1x1xf32>
    %323 = arith.divf %321, %322 : vector<1x1xf32>
    %324 = arith.mulf %316, %316 : vector<2x32xf32>
    %325 = vector.shape_cast %324 : vector<2x32xf32> to vector<1x2x32xf32>
    %cst_80 = arith.constant dense<0.000000e+00> : vector<1xf32>
    %326 = vector.multi_reduction <add>, %325, %cst_80 [1, 2] : vector<1x2x32xf32> to vector<1xf32>
    %327 = vector.shape_cast %326 : vector<1xf32> to vector<1x1x1xf32>
    %328 = vector.extract %327[0, 0, 0] : f32 from vector<1x1x1xf32>
    %329 = vector.broadcast %328 : f32 to vector<1x1xf32>
    %cst_81 = arith.constant 6.400000e+01 : f32
    %330 = vector.broadcast %cst_81 : f32 to vector<1x1xf32>
    %331 = arith.divf %329, %330 : vector<1x1xf32>
    %332 = arith.mulf %323, %323 : vector<1x1xf32>
    %333 = arith.subf %331, %332 : vector<1x1xf32>
    %334 = vector.broadcast %323 : vector<1x1xf32> to vector<2x32xf32>
    %335 = arith.subf %316, %334 : vector<2x32xf32>
    %cst_82 = arith.constant 9.99999974E-6 : f32
    %336 = vector.broadcast %cst_82 : f32 to vector<1x1xf32>
    %337 = arith.addf %333, %336 : vector<1x1xf32>
    %338 = math.rsqrt %337 : vector<1x1xf32>
    %339 = vector.broadcast %338 : vector<1x1xf32> to vector<2x32xf32>
    %340 = arith.mulf %335, %339 : vector<2x32xf32>
    %cst_83 = arith.constant 0.000000e+00 : f32
    %341 = vector.broadcast %cst_83 : f32 to vector<2x32xf32>
    %342 = arith.cmpf oge, %340, %341 : vector<2x32xf32>
    %cst_84 = arith.constant 0.00999999977 : f32
    %343 = vector.broadcast %cst_84 : f32 to vector<2x32xf32>
    %344 = arith.mulf %343, %340 : vector<2x32xf32>
    %345 = arith.select %342, %340, %344 : vector<2x32xi1>, vector<2x32xf32>
    %346 = vector.extract_strided_slice %285 {offsets = [0, 64], sizes = [2, 32], strides = [1, 1]} : vector<2x128xf32> to vector<2x32xf32>
    %347 = vector.shape_cast %346 : vector<2x32xf32> to vector<1x2x32xf32>
    %cst_85 = arith.constant dense<0.000000e+00> : vector<1xf32>
    %348 = vector.multi_reduction <add>, %347, %cst_85 [1, 2] : vector<1x2x32xf32> to vector<1xf32>
    %349 = vector.shape_cast %348 : vector<1xf32> to vector<1x1x1xf32>
    %350 = vector.extract %349[0, 0, 0] : f32 from vector<1x1x1xf32>
    %351 = vector.broadcast %350 : f32 to vector<1x1xf32>
    %cst_86 = arith.constant 6.400000e+01 : f32
    %352 = vector.broadcast %cst_86 : f32 to vector<1x1xf32>
    %353 = arith.divf %351, %352 : vector<1x1xf32>
    %354 = arith.mulf %346, %346 : vector<2x32xf32>
    %355 = vector.shape_cast %354 : vector<2x32xf32> to vector<1x2x32xf32>
    %cst_87 = arith.constant dense<0.000000e+00> : vector<1xf32>
    %356 = vector.multi_reduction <add>, %355, %cst_87 [1, 2] : vector<1x2x32xf32> to vector<1xf32>
    %357 = vector.shape_cast %356 : vector<1xf32> to vector<1x1x1xf32>
    %358 = vector.extract %357[0, 0, 0] : f32 from vector<1x1x1xf32>
    %359 = vector.broadcast %358 : f32 to vector<1x1xf32>
    %cst_88 = arith.constant 6.400000e+01 : f32
    %360 = vector.broadcast %cst_88 : f32 to vector<1x1xf32>
    %361 = arith.divf %359, %360 : vector<1x1xf32>
    %362 = arith.mulf %353, %353 : vector<1x1xf32>
    %363 = arith.subf %361, %362 : vector<1x1xf32>
    %364 = vector.broadcast %353 : vector<1x1xf32> to vector<2x32xf32>
    %365 = arith.subf %346, %364 : vector<2x32xf32>
    %cst_89 = arith.constant 9.99999974E-6 : f32
    %366 = vector.broadcast %cst_89 : f32 to vector<1x1xf32>
    %367 = arith.addf %363, %366 : vector<1x1xf32>
    %368 = math.rsqrt %367 : vector<1x1xf32>
    %369 = vector.broadcast %368 : vector<1x1xf32> to vector<2x32xf32>
    %370 = arith.mulf %365, %369 : vector<2x32xf32>
    %cst_90 = arith.constant 0.000000e+00 : f32
    %371 = vector.broadcast %cst_90 : f32 to vector<2x32xf32>
    %372 = arith.cmpf oge, %370, %371 : vector<2x32xf32>
    %cst_91 = arith.constant 0.00999999977 : f32
    %373 = vector.broadcast %cst_91 : f32 to vector<2x32xf32>
    %374 = arith.mulf %373, %370 : vector<2x32xf32>
    %375 = arith.select %372, %370, %374 : vector<2x32xi1>, vector<2x32xf32>
    %376 = tpu.concatenate %315, %345, %375 in 1 : vector<2x32xf32>, vector<2x32xf32>, vector<2x32xf32> -> vector<2x96xf32>
    %c3 = arith.constant 3 : index
    %c0_92 = arith.constant 0 : index
    %c0_93 = arith.constant 0 : index
    %377 = vector.load %arg0[%c3, %c0_92, %c0_93] : memref<8x2x16xf32, #tpu.memory_space<vmem>>, vector<1x2x16xf32>
    %378 = vector.shape_cast %377 : vector<1x2x16xf32> to vector<2x16xf32>
    %379 = tpu.concatenate %378, %285, %376 in 1 : vector<2x16xf32>, vector<2x128xf32>, vector<2x96xf32> -> vector<2x240xf32>
    %cst_94 = arith.constant dense<0.000000e+00> : vector<2x512xf32>
    %380 = tpu.matmul %379, %0, %cst_94 {dimension_numbers = #tpu.dot_dimension_numbers<[1], [0], [0], [1], [0, 0, 1, 1], [], []>} : vector<2x240xf32>, vector<240x512xf32>, vector<2x512xf32> -> vector<2x512xf32>
    %381 = arith.addf %380, %3 : vector<2x512xf32>
    %382 = arith.negf %381 : vector<2x512xf32>
    %383 = math.exp %382 : vector<2x512xf32>
    %cst_95 = arith.constant 1.000000e+00 : f32
    %384 = vector.broadcast %cst_95 : f32 to vector<2x512xf32>
    %385 = arith.addf %384, %383 : vector<2x512xf32>
    %386 = arith.divf %384, %385 : vector<2x512xf32>
    %387 = vector.extract_strided_slice %386 {offsets = [0, 0], sizes = [2, 128], strides = [1, 1]} : vector<2x512xf32> to vector<2x128xf32>
    %388 = vector.extract_strided_slice %386 {offsets = [0, 128], sizes = [2, 128], strides = [1, 1]} : vector<2x512xf32> to vector<2x128xf32>
    %389 = vector.extract_strided_slice %386 {offsets = [0, 256], sizes = [2, 128], strides = [1, 1]} : vector<2x512xf32> to vector<2x128xf32>
    %390 = vector.extract_strided_slice %386 {offsets = [0, 384], sizes = [2, 128], strides = [1, 1]} : vector<2x512xf32> to vector<2x128xf32>
    %cst_96 = arith.constant 2.000000e+00 : f32
    %391 = vector.broadcast %cst_96 : f32 to vector<2x128xf32>
    %392 = arith.mulf %391, %390 : vector<2x128xf32>
    %cst_97 = arith.constant 1.000000e+00 : f32
    %393 = vector.broadcast %cst_97 : f32 to vector<2x128xf32>
    %394 = arith.subf %392, %393 : vector<2x128xf32>
    %395 = arith.mulf %388, %282 : vector<2x128xf32>
    %396 = arith.mulf %387, %394 : vector<2x128xf32>
    %397 = arith.addf %395, %396 : vector<2x128xf32>
    %398 = math.tanh %397 : vector<2x128xf32>
    %399 = arith.mulf %389, %398 : vector<2x128xf32>
    %400 = vector.extract_strided_slice %399 {offsets = [0, 0], sizes = [2, 32], strides = [1, 1]} : vector<2x128xf32> to vector<2x32xf32>
    %401 = vector.shape_cast %400 : vector<2x32xf32> to vector<1x2x32xf32>
    %cst_98 = arith.constant dense<0.000000e+00> : vector<1xf32>
    %402 = vector.multi_reduction <add>, %401, %cst_98 [1, 2] : vector<1x2x32xf32> to vector<1xf32>
    %403 = vector.shape_cast %402 : vector<1xf32> to vector<1x1x1xf32>
    %404 = vector.extract %403[0, 0, 0] : f32 from vector<1x1x1xf32>
    %405 = vector.broadcast %404 : f32 to vector<1x1xf32>
    %cst_99 = arith.constant 6.400000e+01 : f32
    %406 = vector.broadcast %cst_99 : f32 to vector<1x1xf32>
    %407 = arith.divf %405, %406 : vector<1x1xf32>
    %408 = arith.mulf %400, %400 : vector<2x32xf32>
    %409 = vector.shape_cast %408 : vector<2x32xf32> to vector<1x2x32xf32>
    %cst_100 = arith.constant dense<0.000000e+00> : vector<1xf32>
    %410 = vector.multi_reduction <add>, %409, %cst_100 [1, 2] : vector<1x2x32xf32> to vector<1xf32>
    %411 = vector.shape_cast %410 : vector<1xf32> to vector<1x1x1xf32>
    %412 = vector.extract %411[0, 0, 0] : f32 from vector<1x1x1xf32>
    %413 = vector.broadcast %412 : f32 to vector<1x1xf32>
    %cst_101 = arith.constant 6.400000e+01 : f32
    %414 = vector.broadcast %cst_101 : f32 to vector<1x1xf32>
    %415 = arith.divf %413, %414 : vector<1x1xf32>
    %416 = arith.mulf %407, %407 : vector<1x1xf32>
    %417 = arith.subf %415, %416 : vector<1x1xf32>
    %418 = vector.broadcast %407 : vector<1x1xf32> to vector<2x32xf32>
    %419 = arith.subf %400, %418 : vector<2x32xf32>
    %cst_102 = arith.constant 9.99999974E-6 : f32
    %420 = vector.broadcast %cst_102 : f32 to vector<1x1xf32>
    %421 = arith.addf %417, %420 : vector<1x1xf32>
    %422 = math.rsqrt %421 : vector<1x1xf32>
    %423 = vector.broadcast %422 : vector<1x1xf32> to vector<2x32xf32>
    %424 = arith.mulf %419, %423 : vector<2x32xf32>
    %cst_103 = arith.constant 0.000000e+00 : f32
    %425 = vector.broadcast %cst_103 : f32 to vector<2x32xf32>
    %426 = arith.cmpf oge, %424, %425 : vector<2x32xf32>
    %cst_104 = arith.constant 0.00999999977 : f32
    %427 = vector.broadcast %cst_104 : f32 to vector<2x32xf32>
    %428 = arith.mulf %427, %424 : vector<2x32xf32>
    %429 = arith.select %426, %424, %428 : vector<2x32xi1>, vector<2x32xf32>
    %430 = vector.extract_strided_slice %399 {offsets = [0, 32], sizes = [2, 32], strides = [1, 1]} : vector<2x128xf32> to vector<2x32xf32>
    %431 = vector.shape_cast %430 : vector<2x32xf32> to vector<1x2x32xf32>
    %cst_105 = arith.constant dense<0.000000e+00> : vector<1xf32>
    %432 = vector.multi_reduction <add>, %431, %cst_105 [1, 2] : vector<1x2x32xf32> to vector<1xf32>
    %433 = vector.shape_cast %432 : vector<1xf32> to vector<1x1x1xf32>
    %434 = vector.extract %433[0, 0, 0] : f32 from vector<1x1x1xf32>
    %435 = vector.broadcast %434 : f32 to vector<1x1xf32>
    %cst_106 = arith.constant 6.400000e+01 : f32
    %436 = vector.broadcast %cst_106 : f32 to vector<1x1xf32>
    %437 = arith.divf %435, %436 : vector<1x1xf32>
    %438 = arith.mulf %430, %430 : vector<2x32xf32>
    %439 = vector.shape_cast %438 : vector<2x32xf32> to vector<1x2x32xf32>
    %cst_107 = arith.constant dense<0.000000e+00> : vector<1xf32>
    %440 = vector.multi_reduction <add>, %439, %cst_107 [1, 2] : vector<1x2x32xf32> to vector<1xf32>
    %441 = vector.shape_cast %440 : vector<1xf32> to vector<1x1x1xf32>
    %442 = vector.extract %441[0, 0, 0] : f32 from vector<1x1x1xf32>
    %443 = vector.broadcast %442 : f32 to vector<1x1xf32>
    %cst_108 = arith.constant 6.400000e+01 : f32
    %444 = vector.broadcast %cst_108 : f32 to vector<1x1xf32>
    %445 = arith.divf %443, %444 : vector<1x1xf32>
    %446 = arith.mulf %437, %437 : vector<1x1xf32>
    %447 = arith.subf %445, %446 : vector<1x1xf32>
    %448 = vector.broadcast %437 : vector<1x1xf32> to vector<2x32xf32>
    %449 = arith.subf %430, %448 : vector<2x32xf32>
    %cst_109 = arith.constant 9.99999974E-6 : f32
    %450 = vector.broadcast %cst_109 : f32 to vector<1x1xf32>
    %451 = arith.addf %447, %450 : vector<1x1xf32>
    %452 = math.rsqrt %451 : vector<1x1xf32>
    %453 = vector.broadcast %452 : vector<1x1xf32> to vector<2x32xf32>
    %454 = arith.mulf %449, %453 : vector<2x32xf32>
    %cst_110 = arith.constant 0.000000e+00 : f32
    %455 = vector.broadcast %cst_110 : f32 to vector<2x32xf32>
    %456 = arith.cmpf oge, %454, %455 : vector<2x32xf32>
    %cst_111 = arith.constant 0.00999999977 : f32
    %457 = vector.broadcast %cst_111 : f32 to vector<2x32xf32>
    %458 = arith.mulf %457, %454 : vector<2x32xf32>
    %459 = arith.select %456, %454, %458 : vector<2x32xi1>, vector<2x32xf32>
    %460 = vector.extract_strided_slice %399 {offsets = [0, 64], sizes = [2, 32], strides = [1, 1]} : vector<2x128xf32> to vector<2x32xf32>
    %461 = vector.shape_cast %460 : vector<2x32xf32> to vector<1x2x32xf32>
    %cst_112 = arith.constant dense<0.000000e+00> : vector<1xf32>
    %462 = vector.multi_reduction <add>, %461, %cst_112 [1, 2] : vector<1x2x32xf32> to vector<1xf32>
    %463 = vector.shape_cast %462 : vector<1xf32> to vector<1x1x1xf32>
    %464 = vector.extract %463[0, 0, 0] : f32 from vector<1x1x1xf32>
    %465 = vector.broadcast %464 : f32 to vector<1x1xf32>
    %cst_113 = arith.constant 6.400000e+01 : f32
    %466 = vector.broadcast %cst_113 : f32 to vector<1x1xf32>
    %467 = arith.divf %465, %466 : vector<1x1xf32>
    %468 = arith.mulf %460, %460 : vector<2x32xf32>
    %469 = vector.shape_cast %468 : vector<2x32xf32> to vector<1x2x32xf32>
    %cst_114 = arith.constant dense<0.000000e+00> : vector<1xf32>
    %470 = vector.multi_reduction <add>, %469, %cst_114 [1, 2] : vector<1x2x32xf32> to vector<1xf32>
    %471 = vector.shape_cast %470 : vector<1xf32> to vector<1x1x1xf32>
    %472 = vector.extract %471[0, 0, 0] : f32 from vector<1x1x1xf32>
    %473 = vector.broadcast %472 : f32 to vector<1x1xf32>
    %cst_115 = arith.constant 6.400000e+01 : f32
    %474 = vector.broadcast %cst_115 : f32 to vector<1x1xf32>
    %475 = arith.divf %473, %474 : vector<1x1xf32>
    %476 = arith.mulf %467, %467 : vector<1x1xf32>
    %477 = arith.subf %475, %476 : vector<1x1xf32>
    %478 = vector.broadcast %467 : vector<1x1xf32> to vector<2x32xf32>
    %479 = arith.subf %460, %478 : vector<2x32xf32>
    %cst_116 = arith.constant 9.99999974E-6 : f32
    %480 = vector.broadcast %cst_116 : f32 to vector<1x1xf32>
    %481 = arith.addf %477, %480 : vector<1x1xf32>
    %482 = math.rsqrt %481 : vector<1x1xf32>
    %483 = vector.broadcast %482 : vector<1x1xf32> to vector<2x32xf32>
    %484 = arith.mulf %479, %483 : vector<2x32xf32>
    %cst_117 = arith.constant 0.000000e+00 : f32
    %485 = vector.broadcast %cst_117 : f32 to vector<2x32xf32>
    %486 = arith.cmpf oge, %484, %485 : vector<2x32xf32>
    %cst_118 = arith.constant 0.00999999977 : f32
    %487 = vector.broadcast %cst_118 : f32 to vector<2x32xf32>
    %488 = arith.mulf %487, %484 : vector<2x32xf32>
    %489 = arith.select %486, %484, %488 : vector<2x32xi1>, vector<2x32xf32>
    %490 = tpu.concatenate %429, %459, %489 in 1 : vector<2x32xf32>, vector<2x32xf32>, vector<2x32xf32> -> vector<2x96xf32>
    %c4 = arith.constant 4 : index
    %c0_119 = arith.constant 0 : index
    %c0_120 = arith.constant 0 : index
    %491 = vector.load %arg0[%c4, %c0_119, %c0_120] : memref<8x2x16xf32, #tpu.memory_space<vmem>>, vector<1x2x16xf32>
    %492 = vector.shape_cast %491 : vector<1x2x16xf32> to vector<2x16xf32>
    %493 = tpu.concatenate %492, %399, %490 in 1 : vector<2x16xf32>, vector<2x128xf32>, vector<2x96xf32> -> vector<2x240xf32>
    %cst_121 = arith.constant dense<0.000000e+00> : vector<2x512xf32>
    %494 = tpu.matmul %493, %0, %cst_121 {dimension_numbers = #tpu.dot_dimension_numbers<[1], [0], [0], [1], [0, 0, 1, 1], [], []>} : vector<2x240xf32>, vector<240x512xf32>, vector<2x512xf32> -> vector<2x512xf32>
    %495 = arith.addf %494, %3 : vector<2x512xf32>
    %496 = arith.negf %495 : vector<2x512xf32>
    %497 = math.exp %496 : vector<2x512xf32>
    %cst_122 = arith.constant 1.000000e+00 : f32
    %498 = vector.broadcast %cst_122 : f32 to vector<2x512xf32>
    %499 = arith.addf %498, %497 : vector<2x512xf32>
    %500 = arith.divf %498, %499 : vector<2x512xf32>
    %501 = vector.extract_strided_slice %500 {offsets = [0, 0], sizes = [2, 128], strides = [1, 1]} : vector<2x512xf32> to vector<2x128xf32>
    %502 = vector.extract_strided_slice %500 {offsets = [0, 128], sizes = [2, 128], strides = [1, 1]} : vector<2x512xf32> to vector<2x128xf32>
    %503 = vector.extract_strided_slice %500 {offsets = [0, 256], sizes = [2, 128], strides = [1, 1]} : vector<2x512xf32> to vector<2x128xf32>
    %504 = vector.extract_strided_slice %500 {offsets = [0, 384], sizes = [2, 128], strides = [1, 1]} : vector<2x512xf32> to vector<2x128xf32>
    %cst_123 = arith.constant 2.000000e+00 : f32
    %505 = vector.broadcast %cst_123 : f32 to vector<2x128xf32>
    %506 = arith.mulf %505, %504 : vector<2x128xf32>
    %cst_124 = arith.constant 1.000000e+00 : f32
    %507 = vector.broadcast %cst_124 : f32 to vector<2x128xf32>
    %508 = arith.subf %506, %507 : vector<2x128xf32>
    %509 = arith.mulf %502, %397 : vector<2x128xf32>
    %510 = arith.mulf %501, %508 : vector<2x128xf32>
    %511 = arith.addf %509, %510 : vector<2x128xf32>
    %512 = math.tanh %511 : vector<2x128xf32>
    %513 = arith.mulf %503, %512 : vector<2x128xf32>
    %514 = vector.extract_strided_slice %513 {offsets = [0, 0], sizes = [2, 32], strides = [1, 1]} : vector<2x128xf32> to vector<2x32xf32>
    %515 = vector.shape_cast %514 : vector<2x32xf32> to vector<1x2x32xf32>
    %cst_125 = arith.constant dense<0.000000e+00> : vector<1xf32>
    %516 = vector.multi_reduction <add>, %515, %cst_125 [1, 2] : vector<1x2x32xf32> to vector<1xf32>
    %517 = vector.shape_cast %516 : vector<1xf32> to vector<1x1x1xf32>
    %518 = vector.extract %517[0, 0, 0] : f32 from vector<1x1x1xf32>
    %519 = vector.broadcast %518 : f32 to vector<1x1xf32>
    %cst_126 = arith.constant 6.400000e+01 : f32
    %520 = vector.broadcast %cst_126 : f32 to vector<1x1xf32>
    %521 = arith.divf %519, %520 : vector<1x1xf32>
    %522 = arith.mulf %514, %514 : vector<2x32xf32>
    %523 = vector.shape_cast %522 : vector<2x32xf32> to vector<1x2x32xf32>
    %cst_127 = arith.constant dense<0.000000e+00> : vector<1xf32>
    %524 = vector.multi_reduction <add>, %523, %cst_127 [1, 2] : vector<1x2x32xf32> to vector<1xf32>
    %525 = vector.shape_cast %524 : vector<1xf32> to vector<1x1x1xf32>
    %526 = vector.extract %525[0, 0, 0] : f32 from vector<1x1x1xf32>
    %527 = vector.broadcast %526 : f32 to vector<1x1xf32>
    %cst_128 = arith.constant 6.400000e+01 : f32
    %528 = vector.broadcast %cst_128 : f32 to vector<1x1xf32>
    %529 = arith.divf %527, %528 : vector<1x1xf32>
    %530 = arith.mulf %521, %521 : vector<1x1xf32>
    %531 = arith.subf %529, %530 : vector<1x1xf32>
    %532 = vector.broadcast %521 : vector<1x1xf32> to vector<2x32xf32>
    %533 = arith.subf %514, %532 : vector<2x32xf32>
    %cst_129 = arith.constant 9.99999974E-6 : f32
    %534 = vector.broadcast %cst_129 : f32 to vector<1x1xf32>
    %535 = arith.addf %531, %534 : vector<1x1xf32>
    %536 = math.rsqrt %535 : vector<1x1xf32>
    %537 = vector.broadcast %536 : vector<1x1xf32> to vector<2x32xf32>
    %538 = arith.mulf %533, %537 : vector<2x32xf32>
    %cst_130 = arith.constant 0.000000e+00 : f32
    %539 = vector.broadcast %cst_130 : f32 to vector<2x32xf32>
    %540 = arith.cmpf oge, %538, %539 : vector<2x32xf32>
    %cst_131 = arith.constant 0.00999999977 : f32
    %541 = vector.broadcast %cst_131 : f32 to vector<2x32xf32>
    %542 = arith.mulf %541, %538 : vector<2x32xf32>
    %543 = arith.select %540, %538, %542 : vector<2x32xi1>, vector<2x32xf32>
    %544 = vector.extract_strided_slice %513 {offsets = [0, 32], sizes = [2, 32], strides = [1, 1]} : vector<2x128xf32> to vector<2x32xf32>
    %545 = vector.shape_cast %544 : vector<2x32xf32> to vector<1x2x32xf32>
    %cst_132 = arith.constant dense<0.000000e+00> : vector<1xf32>
    %546 = vector.multi_reduction <add>, %545, %cst_132 [1, 2] : vector<1x2x32xf32> to vector<1xf32>
    %547 = vector.shape_cast %546 : vector<1xf32> to vector<1x1x1xf32>
    %548 = vector.extract %547[0, 0, 0] : f32 from vector<1x1x1xf32>
    %549 = vector.broadcast %548 : f32 to vector<1x1xf32>
    %cst_133 = arith.constant 6.400000e+01 : f32
    %550 = vector.broadcast %cst_133 : f32 to vector<1x1xf32>
    %551 = arith.divf %549, %550 : vector<1x1xf32>
    %552 = arith.mulf %544, %544 : vector<2x32xf32>
    %553 = vector.shape_cast %552 : vector<2x32xf32> to vector<1x2x32xf32>
    %cst_134 = arith.constant dense<0.000000e+00> : vector<1xf32>
    %554 = vector.multi_reduction <add>, %553, %cst_134 [1, 2] : vector<1x2x32xf32> to vector<1xf32>
    %555 = vector.shape_cast %554 : vector<1xf32> to vector<1x1x1xf32>
    %556 = vector.extract %555[0, 0, 0] : f32 from vector<1x1x1xf32>
    %557 = vector.broadcast %556 : f32 to vector<1x1xf32>
    %cst_135 = arith.constant 6.400000e+01 : f32
    %558 = vector.broadcast %cst_135 : f32 to vector<1x1xf32>
    %559 = arith.divf %557, %558 : vector<1x1xf32>
    %560 = arith.mulf %551, %551 : vector<1x1xf32>
    %561 = arith.subf %559, %560 : vector<1x1xf32>
    %562 = vector.broadcast %551 : vector<1x1xf32> to vector<2x32xf32>
    %563 = arith.subf %544, %562 : vector<2x32xf32>
    %cst_136 = arith.constant 9.99999974E-6 : f32
    %564 = vector.broadcast %cst_136 : f32 to vector<1x1xf32>
    %565 = arith.addf %561, %564 : vector<1x1xf32>
    %566 = math.rsqrt %565 : vector<1x1xf32>
    %567 = vector.broadcast %566 : vector<1x1xf32> to vector<2x32xf32>
    %568 = arith.mulf %563, %567 : vector<2x32xf32>
    %cst_137 = arith.constant 0.000000e+00 : f32
    %569 = vector.broadcast %cst_137 : f32 to vector<2x32xf32>
    %570 = arith.cmpf oge, %568, %569 : vector<2x32xf32>
    %cst_138 = arith.constant 0.00999999977 : f32
    %571 = vector.broadcast %cst_138 : f32 to vector<2x32xf32>
    %572 = arith.mulf %571, %568 : vector<2x32xf32>
    %573 = arith.select %570, %568, %572 : vector<2x32xi1>, vector<2x32xf32>
    %574 = vector.extract_strided_slice %513 {offsets = [0, 64], sizes = [2, 32], strides = [1, 1]} : vector<2x128xf32> to vector<2x32xf32>
    %575 = vector.shape_cast %574 : vector<2x32xf32> to vector<1x2x32xf32>
    %cst_139 = arith.constant dense<0.000000e+00> : vector<1xf32>
    %576 = vector.multi_reduction <add>, %575, %cst_139 [1, 2] : vector<1x2x32xf32> to vector<1xf32>
    %577 = vector.shape_cast %576 : vector<1xf32> to vector<1x1x1xf32>
    %578 = vector.extract %577[0, 0, 0] : f32 from vector<1x1x1xf32>
    %579 = vector.broadcast %578 : f32 to vector<1x1xf32>
    %cst_140 = arith.constant 6.400000e+01 : f32
    %580 = vector.broadcast %cst_140 : f32 to vector<1x1xf32>
    %581 = arith.divf %579, %580 : vector<1x1xf32>
    %582 = arith.mulf %574, %574 : vector<2x32xf32>
    %583 = vector.shape_cast %582 : vector<2x32xf32> to vector<1x2x32xf32>
    %cst_141 = arith.constant dense<0.000000e+00> : vector<1xf32>
    %584 = vector.multi_reduction <add>, %583, %cst_141 [1, 2] : vector<1x2x32xf32> to vector<1xf32>
    %585 = vector.shape_cast %584 : vector<1xf32> to vector<1x1x1xf32>
    %586 = vector.extract %585[0, 0, 0] : f32 from vector<1x1x1xf32>
    %587 = vector.broadcast %586 : f32 to vector<1x1xf32>
    %cst_142 = arith.constant 6.400000e+01 : f32
    %588 = vector.broadcast %cst_142 : f32 to vector<1x1xf32>
    %589 = arith.divf %587, %588 : vector<1x1xf32>
    %590 = arith.mulf %581, %581 : vector<1x1xf32>
    %591 = arith.subf %589, %590 : vector<1x1xf32>
    %592 = vector.broadcast %581 : vector<1x1xf32> to vector<2x32xf32>
    %593 = arith.subf %574, %592 : vector<2x32xf32>
    %cst_143 = arith.constant 9.99999974E-6 : f32
    %594 = vector.broadcast %cst_143 : f32 to vector<1x1xf32>
    %595 = arith.addf %591, %594 : vector<1x1xf32>
    %596 = math.rsqrt %595 : vector<1x1xf32>
    %597 = vector.broadcast %596 : vector<1x1xf32> to vector<2x32xf32>
    %598 = arith.mulf %593, %597 : vector<2x32xf32>
    %cst_144 = arith.constant 0.000000e+00 : f32
    %599 = vector.broadcast %cst_144 : f32 to vector<2x32xf32>
    %600 = arith.cmpf oge, %598, %599 : vector<2x32xf32>
    %cst_145 = arith.constant 0.00999999977 : f32
    %601 = vector.broadcast %cst_145 : f32 to vector<2x32xf32>
    %602 = arith.mulf %601, %598 : vector<2x32xf32>
    %603 = arith.select %600, %598, %602 : vector<2x32xi1>, vector<2x32xf32>
    %604 = tpu.concatenate %543, %573, %603 in 1 : vector<2x32xf32>, vector<2x32xf32>, vector<2x32xf32> -> vector<2x96xf32>
    %c5 = arith.constant 5 : index
    %c0_146 = arith.constant 0 : index
    %c0_147 = arith.constant 0 : index
    %605 = vector.load %arg0[%c5, %c0_146, %c0_147] : memref<8x2x16xf32, #tpu.memory_space<vmem>>, vector<1x2x16xf32>
    %606 = vector.shape_cast %605 : vector<1x2x16xf32> to vector<2x16xf32>
    %607 = tpu.concatenate %606, %513, %604 in 1 : vector<2x16xf32>, vector<2x128xf32>, vector<2x96xf32> -> vector<2x240xf32>
    %cst_148 = arith.constant dense<0.000000e+00> : vector<2x512xf32>
    %608 = tpu.matmul %607, %0, %cst_148 {dimension_numbers = #tpu.dot_dimension_numbers<[1], [0], [0], [1], [0, 0, 1, 1], [], []>} : vector<2x240xf32>, vector<240x512xf32>, vector<2x512xf32> -> vector<2x512xf32>
    %609 = arith.addf %608, %3 : vector<2x512xf32>
    %610 = arith.negf %609 : vector<2x512xf32>
    %611 = math.exp %610 : vector<2x512xf32>
    %cst_149 = arith.constant 1.000000e+00 : f32
    %612 = vector.broadcast %cst_149 : f32 to vector<2x512xf32>
    %613 = arith.addf %612, %611 : vector<2x512xf32>
    %614 = arith.divf %612, %613 : vector<2x512xf32>
    %615 = vector.extract_strided_slice %614 {offsets = [0, 0], sizes = [2, 128], strides = [1, 1]} : vector<2x512xf32> to vector<2x128xf32>
    %616 = vector.extract_strided_slice %614 {offsets = [0, 128], sizes = [2, 128], strides = [1, 1]} : vector<2x512xf32> to vector<2x128xf32>
    %617 = vector.extract_strided_slice %614 {offsets = [0, 256], sizes = [2, 128], strides = [1, 1]} : vector<2x512xf32> to vector<2x128xf32>
    %618 = vector.extract_strided_slice %614 {offsets = [0, 384], sizes = [2, 128], strides = [1, 1]} : vector<2x512xf32> to vector<2x128xf32>
    %cst_150 = arith.constant 2.000000e+00 : f32
    %619 = vector.broadcast %cst_150 : f32 to vector<2x128xf32>
    %620 = arith.mulf %619, %618 : vector<2x128xf32>
    %cst_151 = arith.constant 1.000000e+00 : f32
    %621 = vector.broadcast %cst_151 : f32 to vector<2x128xf32>
    %622 = arith.subf %620, %621 : vector<2x128xf32>
    %623 = arith.mulf %616, %511 : vector<2x128xf32>
    %624 = arith.mulf %615, %622 : vector<2x128xf32>
    %625 = arith.addf %623, %624 : vector<2x128xf32>
    %626 = math.tanh %625 : vector<2x128xf32>
    %627 = arith.mulf %617, %626 : vector<2x128xf32>
    %628 = vector.extract_strided_slice %627 {offsets = [0, 0], sizes = [2, 32], strides = [1, 1]} : vector<2x128xf32> to vector<2x32xf32>
    %629 = vector.shape_cast %628 : vector<2x32xf32> to vector<1x2x32xf32>
    %cst_152 = arith.constant dense<0.000000e+00> : vector<1xf32>
    %630 = vector.multi_reduction <add>, %629, %cst_152 [1, 2] : vector<1x2x32xf32> to vector<1xf32>
    %631 = vector.shape_cast %630 : vector<1xf32> to vector<1x1x1xf32>
    %632 = vector.extract %631[0, 0, 0] : f32 from vector<1x1x1xf32>
    %633 = vector.broadcast %632 : f32 to vector<1x1xf32>
    %cst_153 = arith.constant 6.400000e+01 : f32
    %634 = vector.broadcast %cst_153 : f32 to vector<1x1xf32>
    %635 = arith.divf %633, %634 : vector<1x1xf32>
    %636 = arith.mulf %628, %628 : vector<2x32xf32>
    %637 = vector.shape_cast %636 : vector<2x32xf32> to vector<1x2x32xf32>
    %cst_154 = arith.constant dense<0.000000e+00> : vector<1xf32>
    %638 = vector.multi_reduction <add>, %637, %cst_154 [1, 2] : vector<1x2x32xf32> to vector<1xf32>
    %639 = vector.shape_cast %638 : vector<1xf32> to vector<1x1x1xf32>
    %640 = vector.extract %639[0, 0, 0] : f32 from vector<1x1x1xf32>
    %641 = vector.broadcast %640 : f32 to vector<1x1xf32>
    %cst_155 = arith.constant 6.400000e+01 : f32
    %642 = vector.broadcast %cst_155 : f32 to vector<1x1xf32>
    %643 = arith.divf %641, %642 : vector<1x1xf32>
    %644 = arith.mulf %635, %635 : vector<1x1xf32>
    %645 = arith.subf %643, %644 : vector<1x1xf32>
    %646 = vector.broadcast %635 : vector<1x1xf32> to vector<2x32xf32>
    %647 = arith.subf %628, %646 : vector<2x32xf32>
    %cst_156 = arith.constant 9.99999974E-6 : f32
    %648 = vector.broadcast %cst_156 : f32 to vector<1x1xf32>
    %649 = arith.addf %645, %648 : vector<1x1xf32>
    %650 = math.rsqrt %649 : vector<1x1xf32>
    %651 = vector.broadcast %650 : vector<1x1xf32> to vector<2x32xf32>
    %652 = arith.mulf %647, %651 : vector<2x32xf32>
    %cst_157 = arith.constant 0.000000e+00 : f32
    %653 = vector.broadcast %cst_157 : f32 to vector<2x32xf32>
    %654 = arith.cmpf oge, %652, %653 : vector<2x32xf32>
    %cst_158 = arith.constant 0.00999999977 : f32
    %655 = vector.broadcast %cst_158 : f32 to vector<2x32xf32>
    %656 = arith.mulf %655, %652 : vector<2x32xf32>
    %657 = arith.select %654, %652, %656 : vector<2x32xi1>, vector<2x32xf32>
    %658 = vector.extract_strided_slice %627 {offsets = [0, 32], sizes = [2, 32], strides = [1, 1]} : vector<2x128xf32> to vector<2x32xf32>
    %659 = vector.shape_cast %658 : vector<2x32xf32> to vector<1x2x32xf32>
    %cst_159 = arith.constant dense<0.000000e+00> : vector<1xf32>
    %660 = vector.multi_reduction <add>, %659, %cst_159 [1, 2] : vector<1x2x32xf32> to vector<1xf32>
    %661 = vector.shape_cast %660 : vector<1xf32> to vector<1x1x1xf32>
    %662 = vector.extract %661[0, 0, 0] : f32 from vector<1x1x1xf32>
    %663 = vector.broadcast %662 : f32 to vector<1x1xf32>
    %cst_160 = arith.constant 6.400000e+01 : f32
    %664 = vector.broadcast %cst_160 : f32 to vector<1x1xf32>
    %665 = arith.divf %663, %664 : vector<1x1xf32>
    %666 = arith.mulf %658, %658 : vector<2x32xf32>
    %667 = vector.shape_cast %666 : vector<2x32xf32> to vector<1x2x32xf32>
    %cst_161 = arith.constant dense<0.000000e+00> : vector<1xf32>
    %668 = vector.multi_reduction <add>, %667, %cst_161 [1, 2] : vector<1x2x32xf32> to vector<1xf32>
    %669 = vector.shape_cast %668 : vector<1xf32> to vector<1x1x1xf32>
    %670 = vector.extract %669[0, 0, 0] : f32 from vector<1x1x1xf32>
    %671 = vector.broadcast %670 : f32 to vector<1x1xf32>
    %cst_162 = arith.constant 6.400000e+01 : f32
    %672 = vector.broadcast %cst_162 : f32 to vector<1x1xf32>
    %673 = arith.divf %671, %672 : vector<1x1xf32>
    %674 = arith.mulf %665, %665 : vector<1x1xf32>
    %675 = arith.subf %673, %674 : vector<1x1xf32>
    %676 = vector.broadcast %665 : vector<1x1xf32> to vector<2x32xf32>
    %677 = arith.subf %658, %676 : vector<2x32xf32>
    %cst_163 = arith.constant 9.99999974E-6 : f32
    %678 = vector.broadcast %cst_163 : f32 to vector<1x1xf32>
    %679 = arith.addf %675, %678 : vector<1x1xf32>
    %680 = math.rsqrt %679 : vector<1x1xf32>
    %681 = vector.broadcast %680 : vector<1x1xf32> to vector<2x32xf32>
    %682 = arith.mulf %677, %681 : vector<2x32xf32>
    %cst_164 = arith.constant 0.000000e+00 : f32
    %683 = vector.broadcast %cst_164 : f32 to vector<2x32xf32>
    %684 = arith.cmpf oge, %682, %683 : vector<2x32xf32>
    %cst_165 = arith.constant 0.00999999977 : f32
    %685 = vector.broadcast %cst_165 : f32 to vector<2x32xf32>
    %686 = arith.mulf %685, %682 : vector<2x32xf32>
    %687 = arith.select %684, %682, %686 : vector<2x32xi1>, vector<2x32xf32>
    %688 = vector.extract_strided_slice %627 {offsets = [0, 64], sizes = [2, 32], strides = [1, 1]} : vector<2x128xf32> to vector<2x32xf32>
    %689 = vector.shape_cast %688 : vector<2x32xf32> to vector<1x2x32xf32>
    %cst_166 = arith.constant dense<0.000000e+00> : vector<1xf32>
    %690 = vector.multi_reduction <add>, %689, %cst_166 [1, 2] : vector<1x2x32xf32> to vector<1xf32>
    %691 = vector.shape_cast %690 : vector<1xf32> to vector<1x1x1xf32>
    %692 = vector.extract %691[0, 0, 0] : f32 from vector<1x1x1xf32>
    %693 = vector.broadcast %692 : f32 to vector<1x1xf32>
    %cst_167 = arith.constant 6.400000e+01 : f32
    %694 = vector.broadcast %cst_167 : f32 to vector<1x1xf32>
    %695 = arith.divf %693, %694 : vector<1x1xf32>
    %696 = arith.mulf %688, %688 : vector<2x32xf32>
    %697 = vector.shape_cast %696 : vector<2x32xf32> to vector<1x2x32xf32>
    %cst_168 = arith.constant dense<0.000000e+00> : vector<1xf32>
    %698 = vector.multi_reduction <add>, %697, %cst_168 [1, 2] : vector<1x2x32xf32> to vector<1xf32>
    %699 = vector.shape_cast %698 : vector<1xf32> to vector<1x1x1xf32>
    %700 = vector.extract %699[0, 0, 0] : f32 from vector<1x1x1xf32>
    %701 = vector.broadcast %700 : f32 to vector<1x1xf32>
    %cst_169 = arith.constant 6.400000e+01 : f32
    %702 = vector.broadcast %cst_169 : f32 to vector<1x1xf32>
    %703 = arith.divf %701, %702 : vector<1x1xf32>
    %704 = arith.mulf %695, %695 : vector<1x1xf32>
    %705 = arith.subf %703, %704 : vector<1x1xf32>
    %706 = vector.broadcast %695 : vector<1x1xf32> to vector<2x32xf32>
    %707 = arith.subf %688, %706 : vector<2x32xf32>
    %cst_170 = arith.constant 9.99999974E-6 : f32
    %708 = vector.broadcast %cst_170 : f32 to vector<1x1xf32>
    %709 = arith.addf %705, %708 : vector<1x1xf32>
    %710 = math.rsqrt %709 : vector<1x1xf32>
    %711 = vector.broadcast %710 : vector<1x1xf32> to vector<2x32xf32>
    %712 = arith.mulf %707, %711 : vector<2x32xf32>
    %cst_171 = arith.constant 0.000000e+00 : f32
    %713 = vector.broadcast %cst_171 : f32 to vector<2x32xf32>
    %714 = arith.cmpf oge, %712, %713 : vector<2x32xf32>
    %cst_172 = arith.constant 0.00999999977 : f32
    %715 = vector.broadcast %cst_172 : f32 to vector<2x32xf32>
    %716 = arith.mulf %715, %712 : vector<2x32xf32>
    %717 = arith.select %714, %712, %716 : vector<2x32xi1>, vector<2x32xf32>
    %718 = tpu.concatenate %657, %687, %717 in 1 : vector<2x32xf32>, vector<2x32xf32>, vector<2x32xf32> -> vector<2x96xf32>
    %c6 = arith.constant 6 : index
    %c0_173 = arith.constant 0 : index
    %c0_174 = arith.constant 0 : index
    %719 = vector.load %arg0[%c6, %c0_173, %c0_174] : memref<8x2x16xf32, #tpu.memory_space<vmem>>, vector<1x2x16xf32>
    %720 = vector.shape_cast %719 : vector<1x2x16xf32> to vector<2x16xf32>
    %721 = tpu.concatenate %720, %627, %718 in 1 : vector<2x16xf32>, vector<2x128xf32>, vector<2x96xf32> -> vector<2x240xf32>
    %cst_175 = arith.constant dense<0.000000e+00> : vector<2x512xf32>
    %722 = tpu.matmul %721, %0, %cst_175 {dimension_numbers = #tpu.dot_dimension_numbers<[1], [0], [0], [1], [0, 0, 1, 1], [], []>} : vector<2x240xf32>, vector<240x512xf32>, vector<2x512xf32> -> vector<2x512xf32>
    %723 = arith.addf %722, %3 : vector<2x512xf32>
    %724 = arith.negf %723 : vector<2x512xf32>
    %725 = math.exp %724 : vector<2x512xf32>
    %cst_176 = arith.constant 1.000000e+00 : f32
    %726 = vector.broadcast %cst_176 : f32 to vector<2x512xf32>
    %727 = arith.addf %726, %725 : vector<2x512xf32>
    %728 = arith.divf %726, %727 : vector<2x512xf32>
    %729 = vector.extract_strided_slice %728 {offsets = [0, 0], sizes = [2, 128], strides = [1, 1]} : vector<2x512xf32> to vector<2x128xf32>
    %730 = vector.extract_strided_slice %728 {offsets = [0, 128], sizes = [2, 128], strides = [1, 1]} : vector<2x512xf32> to vector<2x128xf32>
    %731 = vector.extract_strided_slice %728 {offsets = [0, 256], sizes = [2, 128], strides = [1, 1]} : vector<2x512xf32> to vector<2x128xf32>
    %732 = vector.extract_strided_slice %728 {offsets = [0, 384], sizes = [2, 128], strides = [1, 1]} : vector<2x512xf32> to vector<2x128xf32>
    %cst_177 = arith.constant 2.000000e+00 : f32
    %733 = vector.broadcast %cst_177 : f32 to vector<2x128xf32>
    %734 = arith.mulf %733, %732 : vector<2x128xf32>
    %cst_178 = arith.constant 1.000000e+00 : f32
    %735 = vector.broadcast %cst_178 : f32 to vector<2x128xf32>
    %736 = arith.subf %734, %735 : vector<2x128xf32>
    %737 = arith.mulf %730, %625 : vector<2x128xf32>
    %738 = arith.mulf %729, %736 : vector<2x128xf32>
    %739 = arith.addf %737, %738 : vector<2x128xf32>
    %740 = math.tanh %739 : vector<2x128xf32>
    %741 = arith.mulf %731, %740 : vector<2x128xf32>
    %742 = vector.extract_strided_slice %741 {offsets = [0, 0], sizes = [2, 32], strides = [1, 1]} : vector<2x128xf32> to vector<2x32xf32>
    %743 = vector.shape_cast %742 : vector<2x32xf32> to vector<1x2x32xf32>
    %cst_179 = arith.constant dense<0.000000e+00> : vector<1xf32>
    %744 = vector.multi_reduction <add>, %743, %cst_179 [1, 2] : vector<1x2x32xf32> to vector<1xf32>
    %745 = vector.shape_cast %744 : vector<1xf32> to vector<1x1x1xf32>
    %746 = vector.extract %745[0, 0, 0] : f32 from vector<1x1x1xf32>
    %747 = vector.broadcast %746 : f32 to vector<1x1xf32>
    %cst_180 = arith.constant 6.400000e+01 : f32
    %748 = vector.broadcast %cst_180 : f32 to vector<1x1xf32>
    %749 = arith.divf %747, %748 : vector<1x1xf32>
    %750 = arith.mulf %742, %742 : vector<2x32xf32>
    %751 = vector.shape_cast %750 : vector<2x32xf32> to vector<1x2x32xf32>
    %cst_181 = arith.constant dense<0.000000e+00> : vector<1xf32>
    %752 = vector.multi_reduction <add>, %751, %cst_181 [1, 2] : vector<1x2x32xf32> to vector<1xf32>
    %753 = vector.shape_cast %752 : vector<1xf32> to vector<1x1x1xf32>
    %754 = vector.extract %753[0, 0, 0] : f32 from vector<1x1x1xf32>
    %755 = vector.broadcast %754 : f32 to vector<1x1xf32>
    %cst_182 = arith.constant 6.400000e+01 : f32
    %756 = vector.broadcast %cst_182 : f32 to vector<1x1xf32>
    %757 = arith.divf %755, %756 : vector<1x1xf32>
    %758 = arith.mulf %749, %749 : vector<1x1xf32>
    %759 = arith.subf %757, %758 : vector<1x1xf32>
    %760 = vector.broadcast %749 : vector<1x1xf32> to vector<2x32xf32>
    %761 = arith.subf %742, %760 : vector<2x32xf32>
    %cst_183 = arith.constant 9.99999974E-6 : f32
    %762 = vector.broadcast %cst_183 : f32 to vector<1x1xf32>
    %763 = arith.addf %759, %762 : vector<1x1xf32>
    %764 = math.rsqrt %763 : vector<1x1xf32>
    %765 = vector.broadcast %764 : vector<1x1xf32> to vector<2x32xf32>
    %766 = arith.mulf %761, %765 : vector<2x32xf32>
    %cst_184 = arith.constant 0.000000e+00 : f32
    %767 = vector.broadcast %cst_184 : f32 to vector<2x32xf32>
    %768 = arith.cmpf oge, %766, %767 : vector<2x32xf32>
    %cst_185 = arith.constant 0.00999999977 : f32
    %769 = vector.broadcast %cst_185 : f32 to vector<2x32xf32>
    %770 = arith.mulf %769, %766 : vector<2x32xf32>
    %771 = arith.select %768, %766, %770 : vector<2x32xi1>, vector<2x32xf32>
    %772 = vector.extract_strided_slice %741 {offsets = [0, 32], sizes = [2, 32], strides = [1, 1]} : vector<2x128xf32> to vector<2x32xf32>
    %773 = vector.shape_cast %772 : vector<2x32xf32> to vector<1x2x32xf32>
    %cst_186 = arith.constant dense<0.000000e+00> : vector<1xf32>
    %774 = vector.multi_reduction <add>, %773, %cst_186 [1, 2] : vector<1x2x32xf32> to vector<1xf32>
    %775 = vector.shape_cast %774 : vector<1xf32> to vector<1x1x1xf32>
    %776 = vector.extract %775[0, 0, 0] : f32 from vector<1x1x1xf32>
    %777 = vector.broadcast %776 : f32 to vector<1x1xf32>
    %cst_187 = arith.constant 6.400000e+01 : f32
    %778 = vector.broadcast %cst_187 : f32 to vector<1x1xf32>
    %779 = arith.divf %777, %778 : vector<1x1xf32>
    %780 = arith.mulf %772, %772 : vector<2x32xf32>
    %781 = vector.shape_cast %780 : vector<2x32xf32> to vector<1x2x32xf32>
    %cst_188 = arith.constant dense<0.000000e+00> : vector<1xf32>
    %782 = vector.multi_reduction <add>, %781, %cst_188 [1, 2] : vector<1x2x32xf32> to vector<1xf32>
    %783 = vector.shape_cast %782 : vector<1xf32> to vector<1x1x1xf32>
    %784 = vector.extract %783[0, 0, 0] : f32 from vector<1x1x1xf32>
    %785 = vector.broadcast %784 : f32 to vector<1x1xf32>
    %cst_189 = arith.constant 6.400000e+01 : f32
    %786 = vector.broadcast %cst_189 : f32 to vector<1x1xf32>
    %787 = arith.divf %785, %786 : vector<1x1xf32>
    %788 = arith.mulf %779, %779 : vector<1x1xf32>
    %789 = arith.subf %787, %788 : vector<1x1xf32>
    %790 = vector.broadcast %779 : vector<1x1xf32> to vector<2x32xf32>
    %791 = arith.subf %772, %790 : vector<2x32xf32>
    %cst_190 = arith.constant 9.99999974E-6 : f32
    %792 = vector.broadcast %cst_190 : f32 to vector<1x1xf32>
    %793 = arith.addf %789, %792 : vector<1x1xf32>
    %794 = math.rsqrt %793 : vector<1x1xf32>
    %795 = vector.broadcast %794 : vector<1x1xf32> to vector<2x32xf32>
    %796 = arith.mulf %791, %795 : vector<2x32xf32>
    %cst_191 = arith.constant 0.000000e+00 : f32
    %797 = vector.broadcast %cst_191 : f32 to vector<2x32xf32>
    %798 = arith.cmpf oge, %796, %797 : vector<2x32xf32>
    %cst_192 = arith.constant 0.00999999977 : f32
    %799 = vector.broadcast %cst_192 : f32 to vector<2x32xf32>
    %800 = arith.mulf %799, %796 : vector<2x32xf32>
    %801 = arith.select %798, %796, %800 : vector<2x32xi1>, vector<2x32xf32>
    %802 = vector.extract_strided_slice %741 {offsets = [0, 64], sizes = [2, 32], strides = [1, 1]} : vector<2x128xf32> to vector<2x32xf32>
    %803 = vector.shape_cast %802 : vector<2x32xf32> to vector<1x2x32xf32>
    %cst_193 = arith.constant dense<0.000000e+00> : vector<1xf32>
    %804 = vector.multi_reduction <add>, %803, %cst_193 [1, 2] : vector<1x2x32xf32> to vector<1xf32>
    %805 = vector.shape_cast %804 : vector<1xf32> to vector<1x1x1xf32>
    %806 = vector.extract %805[0, 0, 0] : f32 from vector<1x1x1xf32>
    %807 = vector.broadcast %806 : f32 to vector<1x1xf32>
    %cst_194 = arith.constant 6.400000e+01 : f32
    %808 = vector.broadcast %cst_194 : f32 to vector<1x1xf32>
    %809 = arith.divf %807, %808 : vector<1x1xf32>
    %810 = arith.mulf %802, %802 : vector<2x32xf32>
    %811 = vector.shape_cast %810 : vector<2x32xf32> to vector<1x2x32xf32>
    %cst_195 = arith.constant dense<0.000000e+00> : vector<1xf32>
    %812 = vector.multi_reduction <add>, %811, %cst_195 [1, 2] : vector<1x2x32xf32> to vector<1xf32>
    %813 = vector.shape_cast %812 : vector<1xf32> to vector<1x1x1xf32>
    %814 = vector.extract %813[0, 0, 0] : f32 from vector<1x1x1xf32>
    %815 = vector.broadcast %814 : f32 to vector<1x1xf32>
    %cst_196 = arith.constant 6.400000e+01 : f32
    %816 = vector.broadcast %cst_196 : f32 to vector<1x1xf32>
    %817 = arith.divf %815, %816 : vector<1x1xf32>
    %818 = arith.mulf %809, %809 : vector<1x1xf32>
    %819 = arith.subf %817, %818 : vector<1x1xf32>
    %820 = vector.broadcast %809 : vector<1x1xf32> to vector<2x32xf32>
    %821 = arith.subf %802, %820 : vector<2x32xf32>
    %cst_197 = arith.constant 9.99999974E-6 : f32
    %822 = vector.broadcast %cst_197 : f32 to vector<1x1xf32>
    %823 = arith.addf %819, %822 : vector<1x1xf32>
    %824 = math.rsqrt %823 : vector<1x1xf32>
    %825 = vector.broadcast %824 : vector<1x1xf32> to vector<2x32xf32>
    %826 = arith.mulf %821, %825 : vector<2x32xf32>
    %cst_198 = arith.constant 0.000000e+00 : f32
    %827 = vector.broadcast %cst_198 : f32 to vector<2x32xf32>
    %828 = arith.cmpf oge, %826, %827 : vector<2x32xf32>
    %cst_199 = arith.constant 0.00999999977 : f32
    %829 = vector.broadcast %cst_199 : f32 to vector<2x32xf32>
    %830 = arith.mulf %829, %826 : vector<2x32xf32>
    %831 = arith.select %828, %826, %830 : vector<2x32xi1>, vector<2x32xf32>
    %832 = tpu.concatenate %771, %801, %831 in 1 : vector<2x32xf32>, vector<2x32xf32>, vector<2x32xf32> -> vector<2x96xf32>
    %c7 = arith.constant 7 : index
    %c0_200 = arith.constant 0 : index
    %c0_201 = arith.constant 0 : index
    %833 = vector.load %arg0[%c7, %c0_200, %c0_201] : memref<8x2x16xf32, #tpu.memory_space<vmem>>, vector<1x2x16xf32>
    %834 = vector.shape_cast %833 : vector<1x2x16xf32> to vector<2x16xf32>
    %835 = tpu.concatenate %834, %741, %832 in 1 : vector<2x16xf32>, vector<2x128xf32>, vector<2x96xf32> -> vector<2x240xf32>
    %cst_202 = arith.constant dense<0.000000e+00> : vector<2x512xf32>
    %836 = tpu.matmul %835, %0, %cst_202 {dimension_numbers = #tpu.dot_dimension_numbers<[1], [0], [0], [1], [0, 0, 1, 1], [], []>} : vector<2x240xf32>, vector<240x512xf32>, vector<2x512xf32> -> vector<2x512xf32>
    %837 = arith.addf %836, %3 : vector<2x512xf32>
    %838 = arith.negf %837 : vector<2x512xf32>
    %839 = math.exp %838 : vector<2x512xf32>
    %cst_203 = arith.constant 1.000000e+00 : f32
    %840 = vector.broadcast %cst_203 : f32 to vector<2x512xf32>
    %841 = arith.addf %840, %839 : vector<2x512xf32>
    %842 = arith.divf %840, %841 : vector<2x512xf32>
    %843 = vector.extract_strided_slice %842 {offsets = [0, 0], sizes = [2, 128], strides = [1, 1]} : vector<2x512xf32> to vector<2x128xf32>
    %844 = vector.extract_strided_slice %842 {offsets = [0, 128], sizes = [2, 128], strides = [1, 1]} : vector<2x512xf32> to vector<2x128xf32>
    %845 = vector.extract_strided_slice %842 {offsets = [0, 256], sizes = [2, 128], strides = [1, 1]} : vector<2x512xf32> to vector<2x128xf32>
    %846 = vector.extract_strided_slice %842 {offsets = [0, 384], sizes = [2, 128], strides = [1, 1]} : vector<2x512xf32> to vector<2x128xf32>
    %cst_204 = arith.constant 2.000000e+00 : f32
    %847 = vector.broadcast %cst_204 : f32 to vector<2x128xf32>
    %848 = arith.mulf %847, %846 : vector<2x128xf32>
    %cst_205 = arith.constant 1.000000e+00 : f32
    %849 = vector.broadcast %cst_205 : f32 to vector<2x128xf32>
    %850 = arith.subf %848, %849 : vector<2x128xf32>
    %851 = arith.mulf %844, %739 : vector<2x128xf32>
    %852 = arith.mulf %843, %850 : vector<2x128xf32>
    %853 = arith.addf %851, %852 : vector<2x128xf32>
    %854 = math.tanh %853 : vector<2x128xf32>
    %855 = arith.mulf %845, %854 : vector<2x128xf32>
    %856 = vector.extract_strided_slice %855 {offsets = [0, 0], sizes = [2, 32], strides = [1, 1]} : vector<2x128xf32> to vector<2x32xf32>
    %857 = vector.shape_cast %856 : vector<2x32xf32> to vector<1x2x32xf32>
    %cst_206 = arith.constant dense<0.000000e+00> : vector<1xf32>
    %858 = vector.multi_reduction <add>, %857, %cst_206 [1, 2] : vector<1x2x32xf32> to vector<1xf32>
    %859 = vector.shape_cast %858 : vector<1xf32> to vector<1x1x1xf32>
    %860 = vector.extract %859[0, 0, 0] : f32 from vector<1x1x1xf32>
    %861 = vector.broadcast %860 : f32 to vector<1x1xf32>
    %cst_207 = arith.constant 6.400000e+01 : f32
    %862 = vector.broadcast %cst_207 : f32 to vector<1x1xf32>
    %863 = arith.divf %861, %862 : vector<1x1xf32>
    %864 = arith.mulf %856, %856 : vector<2x32xf32>
    %865 = vector.shape_cast %864 : vector<2x32xf32> to vector<1x2x32xf32>
    %cst_208 = arith.constant dense<0.000000e+00> : vector<1xf32>
    %866 = vector.multi_reduction <add>, %865, %cst_208 [1, 2] : vector<1x2x32xf32> to vector<1xf32>
    %867 = vector.shape_cast %866 : vector<1xf32> to vector<1x1x1xf32>
    %868 = vector.extract %867[0, 0, 0] : f32 from vector<1x1x1xf32>
    %869 = vector.broadcast %868 : f32 to vector<1x1xf32>
    %cst_209 = arith.constant 6.400000e+01 : f32
    %870 = vector.broadcast %cst_209 : f32 to vector<1x1xf32>
    %871 = arith.divf %869, %870 : vector<1x1xf32>
    %872 = arith.mulf %863, %863 : vector<1x1xf32>
    %873 = arith.subf %871, %872 : vector<1x1xf32>
    %874 = vector.broadcast %863 : vector<1x1xf32> to vector<2x32xf32>
    %875 = arith.subf %856, %874 : vector<2x32xf32>
    %cst_210 = arith.constant 9.99999974E-6 : f32
    %876 = vector.broadcast %cst_210 : f32 to vector<1x1xf32>
    %877 = arith.addf %873, %876 : vector<1x1xf32>
    %878 = math.rsqrt %877 : vector<1x1xf32>
    %879 = vector.broadcast %878 : vector<1x1xf32> to vector<2x32xf32>
    %880 = arith.mulf %875, %879 : vector<2x32xf32>
    %cst_211 = arith.constant 0.000000e+00 : f32
    %881 = vector.broadcast %cst_211 : f32 to vector<2x32xf32>
    %882 = arith.cmpf oge, %880, %881 : vector<2x32xf32>
    %cst_212 = arith.constant 0.00999999977 : f32
    %883 = vector.broadcast %cst_212 : f32 to vector<2x32xf32>
    %884 = arith.mulf %883, %880 : vector<2x32xf32>
    %885 = arith.select %882, %880, %884 : vector<2x32xi1>, vector<2x32xf32>
    %886 = vector.extract_strided_slice %855 {offsets = [0, 32], sizes = [2, 32], strides = [1, 1]} : vector<2x128xf32> to vector<2x32xf32>
    %887 = vector.shape_cast %886 : vector<2x32xf32> to vector<1x2x32xf32>
    %cst_213 = arith.constant dense<0.000000e+00> : vector<1xf32>
    %888 = vector.multi_reduction <add>, %887, %cst_213 [1, 2] : vector<1x2x32xf32> to vector<1xf32>
    %889 = vector.shape_cast %888 : vector<1xf32> to vector<1x1x1xf32>
    %890 = vector.extract %889[0, 0, 0] : f32 from vector<1x1x1xf32>
    %891 = vector.broadcast %890 : f32 to vector<1x1xf32>
    %cst_214 = arith.constant 6.400000e+01 : f32
    %892 = vector.broadcast %cst_214 : f32 to vector<1x1xf32>
    %893 = arith.divf %891, %892 : vector<1x1xf32>
    %894 = arith.mulf %886, %886 : vector<2x32xf32>
    %895 = vector.shape_cast %894 : vector<2x32xf32> to vector<1x2x32xf32>
    %cst_215 = arith.constant dense<0.000000e+00> : vector<1xf32>
    %896 = vector.multi_reduction <add>, %895, %cst_215 [1, 2] : vector<1x2x32xf32> to vector<1xf32>
    %897 = vector.shape_cast %896 : vector<1xf32> to vector<1x1x1xf32>
    %898 = vector.extract %897[0, 0, 0] : f32 from vector<1x1x1xf32>
    %899 = vector.broadcast %898 : f32 to vector<1x1xf32>
    %cst_216 = arith.constant 6.400000e+01 : f32
    %900 = vector.broadcast %cst_216 : f32 to vector<1x1xf32>
    %901 = arith.divf %899, %900 : vector<1x1xf32>
    %902 = arith.mulf %893, %893 : vector<1x1xf32>
    %903 = arith.subf %901, %902 : vector<1x1xf32>
    %904 = vector.broadcast %893 : vector<1x1xf32> to vector<2x32xf32>
    %905 = arith.subf %886, %904 : vector<2x32xf32>
    %cst_217 = arith.constant 9.99999974E-6 : f32
    %906 = vector.broadcast %cst_217 : f32 to vector<1x1xf32>
    %907 = arith.addf %903, %906 : vector<1x1xf32>
    %908 = math.rsqrt %907 : vector<1x1xf32>
    %909 = vector.broadcast %908 : vector<1x1xf32> to vector<2x32xf32>
    %910 = arith.mulf %905, %909 : vector<2x32xf32>
    %cst_218 = arith.constant 0.000000e+00 : f32
    %911 = vector.broadcast %cst_218 : f32 to vector<2x32xf32>
    %912 = arith.cmpf oge, %910, %911 : vector<2x32xf32>
    %cst_219 = arith.constant 0.00999999977 : f32
    %913 = vector.broadcast %cst_219 : f32 to vector<2x32xf32>
    %914 = arith.mulf %913, %910 : vector<2x32xf32>
    %915 = arith.select %912, %910, %914 : vector<2x32xi1>, vector<2x32xf32>
    %916 = vector.extract_strided_slice %855 {offsets = [0, 64], sizes = [2, 32], strides = [1, 1]} : vector<2x128xf32> to vector<2x32xf32>
    %917 = vector.shape_cast %916 : vector<2x32xf32> to vector<1x2x32xf32>
    %cst_220 = arith.constant dense<0.000000e+00> : vector<1xf32>
    %918 = vector.multi_reduction <add>, %917, %cst_220 [1, 2] : vector<1x2x32xf32> to vector<1xf32>
    %919 = vector.shape_cast %918 : vector<1xf32> to vector<1x1x1xf32>
    %920 = vector.extract %919[0, 0, 0] : f32 from vector<1x1x1xf32>
    %921 = vector.broadcast %920 : f32 to vector<1x1xf32>
    %cst_221 = arith.constant 6.400000e+01 : f32
    %922 = vector.broadcast %cst_221 : f32 to vector<1x1xf32>
    %923 = arith.divf %921, %922 : vector<1x1xf32>
    %924 = arith.mulf %916, %916 : vector<2x32xf32>
    %925 = vector.shape_cast %924 : vector<2x32xf32> to vector<1x2x32xf32>
    %cst_222 = arith.constant dense<0.000000e+00> : vector<1xf32>
    %926 = vector.multi_reduction <add>, %925, %cst_222 [1, 2] : vector<1x2x32xf32> to vector<1xf32>
    %927 = vector.shape_cast %926 : vector<1xf32> to vector<1x1x1xf32>
    %928 = vector.extract %927[0, 0, 0] : f32 from vector<1x1x1xf32>
    %929 = vector.broadcast %928 : f32 to vector<1x1xf32>
    %cst_223 = arith.constant 6.400000e+01 : f32
    %930 = vector.broadcast %cst_223 : f32 to vector<1x1xf32>
    %931 = arith.divf %929, %930 : vector<1x1xf32>
    %932 = arith.mulf %923, %923 : vector<1x1xf32>
    %933 = arith.subf %931, %932 : vector<1x1xf32>
    %934 = vector.broadcast %923 : vector<1x1xf32> to vector<2x32xf32>
    %935 = arith.subf %916, %934 : vector<2x32xf32>
    %cst_224 = arith.constant 9.99999974E-6 : f32
    %936 = vector.broadcast %cst_224 : f32 to vector<1x1xf32>
    %937 = arith.addf %933, %936 : vector<1x1xf32>
    %938 = math.rsqrt %937 : vector<1x1xf32>
    %939 = vector.broadcast %938 : vector<1x1xf32> to vector<2x32xf32>
    %940 = arith.mulf %935, %939 : vector<2x32xf32>
    %cst_225 = arith.constant 0.000000e+00 : f32
    %941 = vector.broadcast %cst_225 : f32 to vector<2x32xf32>
    %942 = arith.cmpf oge, %940, %941 : vector<2x32xf32>
    %cst_226 = arith.constant 0.00999999977 : f32
    %943 = vector.broadcast %cst_226 : f32 to vector<2x32xf32>
    %944 = arith.mulf %943, %940 : vector<2x32xf32>
    %945 = arith.select %942, %940, %944 : vector<2x32xi1>, vector<2x32xf32>
    %946 = tpu.concatenate %885, %915, %945 in 1 : vector<2x32xf32>, vector<2x32xf32>, vector<2x32xf32> -> vector<2x96xf32>
    %947 = tpu.concatenate %7, %855, %946 in 1 : vector<2x16xf32>, vector<2x128xf32>, vector<2x96xf32> -> vector<2x240xf32>
    %cst_227 = arith.constant dense<0.000000e+00> : vector<2x512xf32>
    %948 = tpu.matmul %947, %0, %cst_227 {dimension_numbers = #tpu.dot_dimension_numbers<[1], [0], [0], [1], [0, 0, 1, 1], [], []>} : vector<2x240xf32>, vector<240x512xf32>, vector<2x512xf32> -> vector<2x512xf32>
    %949 = arith.addf %948, %3 : vector<2x512xf32>
    %950 = arith.negf %949 : vector<2x512xf32>
    %951 = math.exp %950 : vector<2x512xf32>
    %cst_228 = arith.constant 1.000000e+00 : f32
    %952 = vector.broadcast %cst_228 : f32 to vector<2x512xf32>
    %953 = arith.addf %952, %951 : vector<2x512xf32>
    %954 = arith.divf %952, %953 : vector<2x512xf32>
    %955 = vector.extract_strided_slice %954 {offsets = [0, 0], sizes = [2, 128], strides = [1, 1]} : vector<2x512xf32> to vector<2x128xf32>
    %956 = vector.extract_strided_slice %954 {offsets = [0, 128], sizes = [2, 128], strides = [1, 1]} : vector<2x512xf32> to vector<2x128xf32>
    %957 = vector.extract_strided_slice %954 {offsets = [0, 256], sizes = [2, 128], strides = [1, 1]} : vector<2x512xf32> to vector<2x128xf32>
    %958 = vector.extract_strided_slice %954 {offsets = [0, 384], sizes = [2, 128], strides = [1, 1]} : vector<2x512xf32> to vector<2x128xf32>
    %cst_229 = arith.constant 2.000000e+00 : f32
    %959 = vector.broadcast %cst_229 : f32 to vector<2x128xf32>
    %960 = arith.mulf %959, %958 : vector<2x128xf32>
    %cst_230 = arith.constant 1.000000e+00 : f32
    %961 = vector.broadcast %cst_230 : f32 to vector<2x128xf32>
    %962 = arith.subf %960, %961 : vector<2x128xf32>
    %963 = arith.mulf %956, %853 : vector<2x128xf32>
    %964 = arith.mulf %955, %962 : vector<2x128xf32>
    %965 = arith.addf %963, %964 : vector<2x128xf32>
    %966 = math.tanh %965 : vector<2x128xf32>
    %967 = arith.mulf %957, %966 : vector<2x128xf32>
    %968 = vector.extract_strided_slice %967 {offsets = [0, 0], sizes = [2, 32], strides = [1, 1]} : vector<2x128xf32> to vector<2x32xf32>
    %969 = vector.shape_cast %968 : vector<2x32xf32> to vector<1x2x32xf32>
    %cst_231 = arith.constant dense<0.000000e+00> : vector<1xf32>
    %970 = vector.multi_reduction <add>, %969, %cst_231 [1, 2] : vector<1x2x32xf32> to vector<1xf32>
    %971 = vector.shape_cast %970 : vector<1xf32> to vector<1x1x1xf32>
    %972 = vector.extract %971[0, 0, 0] : f32 from vector<1x1x1xf32>
    %973 = vector.broadcast %972 : f32 to vector<1x1xf32>
    %cst_232 = arith.constant 6.400000e+01 : f32
    %974 = vector.broadcast %cst_232 : f32 to vector<1x1xf32>
    %975 = arith.divf %973, %974 : vector<1x1xf32>
    %976 = arith.mulf %968, %968 : vector<2x32xf32>
    %977 = vector.shape_cast %976 : vector<2x32xf32> to vector<1x2x32xf32>
    %cst_233 = arith.constant dense<0.000000e+00> : vector<1xf32>
    %978 = vector.multi_reduction <add>, %977, %cst_233 [1, 2] : vector<1x2x32xf32> to vector<1xf32>
    %979 = vector.shape_cast %978 : vector<1xf32> to vector<1x1x1xf32>
    %980 = vector.extract %979[0, 0, 0] : f32 from vector<1x1x1xf32>
    %981 = vector.broadcast %980 : f32 to vector<1x1xf32>
    %cst_234 = arith.constant 6.400000e+01 : f32
    %982 = vector.broadcast %cst_234 : f32 to vector<1x1xf32>
    %983 = arith.divf %981, %982 : vector<1x1xf32>
    %984 = arith.mulf %975, %975 : vector<1x1xf32>
    %985 = arith.subf %983, %984 : vector<1x1xf32>
    %986 = vector.broadcast %975 : vector<1x1xf32> to vector<2x32xf32>
    %987 = arith.subf %968, %986 : vector<2x32xf32>
    %cst_235 = arith.constant 9.99999974E-6 : f32
    %988 = vector.broadcast %cst_235 : f32 to vector<1x1xf32>
    %989 = arith.addf %985, %988 : vector<1x1xf32>
    %990 = math.rsqrt %989 : vector<1x1xf32>
    %991 = vector.broadcast %990 : vector<1x1xf32> to vector<2x32xf32>
    %992 = arith.mulf %987, %991 : vector<2x32xf32>
    %cst_236 = arith.constant 0.000000e+00 : f32
    %993 = vector.broadcast %cst_236 : f32 to vector<2x32xf32>
    %994 = arith.cmpf oge, %992, %993 : vector<2x32xf32>
    %cst_237 = arith.constant 0.00999999977 : f32
    %995 = vector.broadcast %cst_237 : f32 to vector<2x32xf32>
    %996 = arith.mulf %995, %992 : vector<2x32xf32>
    %997 = arith.select %994, %992, %996 : vector<2x32xi1>, vector<2x32xf32>
    %998 = vector.extract_strided_slice %967 {offsets = [0, 32], sizes = [2, 32], strides = [1, 1]} : vector<2x128xf32> to vector<2x32xf32>
    %999 = vector.shape_cast %998 : vector<2x32xf32> to vector<1x2x32xf32>
    %cst_238 = arith.constant dense<0.000000e+00> : vector<1xf32>
    %1000 = vector.multi_reduction <add>, %999, %cst_238 [1, 2] : vector<1x2x32xf32> to vector<1xf32>
    %1001 = vector.shape_cast %1000 : vector<1xf32> to vector<1x1x1xf32>
    %1002 = vector.extract %1001[0, 0, 0] : f32 from vector<1x1x1xf32>
    %1003 = vector.broadcast %1002 : f32 to vector<1x1xf32>
    %cst_239 = arith.constant 6.400000e+01 : f32
    %1004 = vector.broadcast %cst_239 : f32 to vector<1x1xf32>
    %1005 = arith.divf %1003, %1004 : vector<1x1xf32>
    %1006 = arith.mulf %998, %998 : vector<2x32xf32>
    %1007 = vector.shape_cast %1006 : vector<2x32xf32> to vector<1x2x32xf32>
    %cst_240 = arith.constant dense<0.000000e+00> : vector<1xf32>
    %1008 = vector.multi_reduction <add>, %1007, %cst_240 [1, 2] : vector<1x2x32xf32> to vector<1xf32>
    %1009 = vector.shape_cast %1008 : vector<1xf32> to vector<1x1x1xf32>
    %1010 = vector.extract %1009[0, 0, 0] : f32 from vector<1x1x1xf32>
    %1011 = vector.broadcast %1010 : f32 to vector<1x1xf32>
    %cst_241 = arith.constant 6.400000e+01 : f32
    %1012 = vector.broadcast %cst_241 : f32 to vector<1x1xf32>
    %1013 = arith.divf %1011, %1012 : vector<1x1xf32>
    %1014 = arith.mulf %1005, %1005 : vector<1x1xf32>
    %1015 = arith.subf %1013, %1014 : vector<1x1xf32>
    %1016 = vector.broadcast %1005 : vector<1x1xf32> to vector<2x32xf32>
    %1017 = arith.subf %998, %1016 : vector<2x32xf32>
    %cst_242 = arith.constant 9.99999974E-6 : f32
    %1018 = vector.broadcast %cst_242 : f32 to vector<1x1xf32>
    %1019 = arith.addf %1015, %1018 : vector<1x1xf32>
    %1020 = math.rsqrt %1019 : vector<1x1xf32>
    %1021 = vector.broadcast %1020 : vector<1x1xf32> to vector<2x32xf32>
    %1022 = arith.mulf %1017, %1021 : vector<2x32xf32>
    %cst_243 = arith.constant 0.000000e+00 : f32
    %1023 = vector.broadcast %cst_243 : f32 to vector<2x32xf32>
    %1024 = arith.cmpf oge, %1022, %1023 : vector<2x32xf32>
    %cst_244 = arith.constant 0.00999999977 : f32
    %1025 = vector.broadcast %cst_244 : f32 to vector<2x32xf32>
    %1026 = arith.mulf %1025, %1022 : vector<2x32xf32>
    %1027 = arith.select %1024, %1022, %1026 : vector<2x32xi1>, vector<2x32xf32>
    %1028 = vector.extract_strided_slice %967 {offsets = [0, 64], sizes = [2, 32], strides = [1, 1]} : vector<2x128xf32> to vector<2x32xf32>
    %1029 = vector.shape_cast %1028 : vector<2x32xf32> to vector<1x2x32xf32>
    %cst_245 = arith.constant dense<0.000000e+00> : vector<1xf32>
    %1030 = vector.multi_reduction <add>, %1029, %cst_245 [1, 2] : vector<1x2x32xf32> to vector<1xf32>
    %1031 = vector.shape_cast %1030 : vector<1xf32> to vector<1x1x1xf32>
    %1032 = vector.extract %1031[0, 0, 0] : f32 from vector<1x1x1xf32>
    %1033 = vector.broadcast %1032 : f32 to vector<1x1xf32>
    %cst_246 = arith.constant 6.400000e+01 : f32
    %1034 = vector.broadcast %cst_246 : f32 to vector<1x1xf32>
    %1035 = arith.divf %1033, %1034 : vector<1x1xf32>
    %1036 = arith.mulf %1028, %1028 : vector<2x32xf32>
    %1037 = vector.shape_cast %1036 : vector<2x32xf32> to vector<1x2x32xf32>
    %cst_247 = arith.constant dense<0.000000e+00> : vector<1xf32>
    %1038 = vector.multi_reduction <add>, %1037, %cst_247 [1, 2] : vector<1x2x32xf32> to vector<1xf32>
    %1039 = vector.shape_cast %1038 : vector<1xf32> to vector<1x1x1xf32>
    %1040 = vector.extract %1039[0, 0, 0] : f32 from vector<1x1x1xf32>
    %1041 = vector.broadcast %1040 : f32 to vector<1x1xf32>
    %cst_248 = arith.constant 6.400000e+01 : f32
    %1042 = vector.broadcast %cst_248 : f32 to vector<1x1xf32>
    %1043 = arith.divf %1041, %1042 : vector<1x1xf32>
    %1044 = arith.mulf %1035, %1035 : vector<1x1xf32>
    %1045 = arith.subf %1043, %1044 : vector<1x1xf32>
    %1046 = vector.broadcast %1035 : vector<1x1xf32> to vector<2x32xf32>
    %1047 = arith.subf %1028, %1046 : vector<2x32xf32>
    %cst_249 = arith.constant 9.99999974E-6 : f32
    %1048 = vector.broadcast %cst_249 : f32 to vector<1x1xf32>
    %1049 = arith.addf %1045, %1048 : vector<1x1xf32>
    %1050 = math.rsqrt %1049 : vector<1x1xf32>
    %1051 = vector.broadcast %1050 : vector<1x1xf32> to vector<2x32xf32>
    %1052 = arith.mulf %1047, %1051 : vector<2x32xf32>
    %cst_250 = arith.constant 0.000000e+00 : f32
    %1053 = vector.broadcast %cst_250 : f32 to vector<2x32xf32>
    %1054 = arith.cmpf oge, %1052, %1053 : vector<2x32xf32>
    %cst_251 = arith.constant 0.00999999977 : f32
    %1055 = vector.broadcast %cst_251 : f32 to vector<2x32xf32>
    %1056 = arith.mulf %1055, %1052 : vector<2x32xf32>
    %1057 = arith.select %1054, %1052, %1056 : vector<2x32xi1>, vector<2x32xf32>
    %1058 = tpu.concatenate %997, %1027, %1057 in 1 : vector<2x32xf32>, vector<2x32xf32>, vector<2x32xf32> -> vector<2x96xf32>
    %1059 = tpu.concatenate %7, %967, %1058 in 1 : vector<2x16xf32>, vector<2x128xf32>, vector<2x96xf32> -> vector<2x240xf32>
    %cst_252 = arith.constant dense<0.000000e+00> : vector<2x512xf32>
    %1060 = tpu.matmul %1059, %0, %cst_252 {dimension_numbers = #tpu.dot_dimension_numbers<[1], [0], [0], [1], [0, 0, 1, 1], [], []>} : vector<2x240xf32>, vector<240x512xf32>, vector<2x512xf32> -> vector<2x512xf32>
    %1061 = arith.addf %1060, %3 : vector<2x512xf32>
    %1062 = arith.negf %1061 : vector<2x512xf32>
    %1063 = math.exp %1062 : vector<2x512xf32>
    %cst_253 = arith.constant 1.000000e+00 : f32
    %1064 = vector.broadcast %cst_253 : f32 to vector<2x512xf32>
    %1065 = arith.addf %1064, %1063 : vector<2x512xf32>
    %1066 = arith.divf %1064, %1065 : vector<2x512xf32>
    %1067 = vector.extract_strided_slice %1066 {offsets = [0, 0], sizes = [2, 128], strides = [1, 1]} : vector<2x512xf32> to vector<2x128xf32>
    %1068 = vector.extract_strided_slice %1066 {offsets = [0, 128], sizes = [2, 128], strides = [1, 1]} : vector<2x512xf32> to vector<2x128xf32>
    %1069 = vector.extract_strided_slice %1066 {offsets = [0, 256], sizes = [2, 128], strides = [1, 1]} : vector<2x512xf32> to vector<2x128xf32>
    %1070 = vector.extract_strided_slice %1066 {offsets = [0, 384], sizes = [2, 128], strides = [1, 1]} : vector<2x512xf32> to vector<2x128xf32>
    %cst_254 = arith.constant 2.000000e+00 : f32
    %1071 = vector.broadcast %cst_254 : f32 to vector<2x128xf32>
    %1072 = arith.mulf %1071, %1070 : vector<2x128xf32>
    %cst_255 = arith.constant 1.000000e+00 : f32
    %1073 = vector.broadcast %cst_255 : f32 to vector<2x128xf32>
    %1074 = arith.subf %1072, %1073 : vector<2x128xf32>
    %1075 = arith.mulf %1068, %965 : vector<2x128xf32>
    %1076 = arith.mulf %1067, %1074 : vector<2x128xf32>
    %1077 = arith.addf %1075, %1076 : vector<2x128xf32>
    %1078 = math.tanh %1077 : vector<2x128xf32>
    %1079 = arith.mulf %1069, %1078 : vector<2x128xf32>
    %1080 = vector.extract_strided_slice %1079 {offsets = [0, 0], sizes = [2, 32], strides = [1, 1]} : vector<2x128xf32> to vector<2x32xf32>
    %1081 = vector.shape_cast %1080 : vector<2x32xf32> to vector<1x2x32xf32>
    %cst_256 = arith.constant dense<0.000000e+00> : vector<1xf32>
    %1082 = vector.multi_reduction <add>, %1081, %cst_256 [1, 2] : vector<1x2x32xf32> to vector<1xf32>
    %1083 = vector.shape_cast %1082 : vector<1xf32> to vector<1x1x1xf32>
    %1084 = vector.extract %1083[0, 0, 0] : f32 from vector<1x1x1xf32>
    %1085 = vector.broadcast %1084 : f32 to vector<1x1xf32>
    %cst_257 = arith.constant 6.400000e+01 : f32
    %1086 = vector.broadcast %cst_257 : f32 to vector<1x1xf32>
    %1087 = arith.divf %1085, %1086 : vector<1x1xf32>
    %1088 = arith.mulf %1080, %1080 : vector<2x32xf32>
    %1089 = vector.shape_cast %1088 : vector<2x32xf32> to vector<1x2x32xf32>
    %cst_258 = arith.constant dense<0.000000e+00> : vector<1xf32>
    %1090 = vector.multi_reduction <add>, %1089, %cst_258 [1, 2] : vector<1x2x32xf32> to vector<1xf32>
    %1091 = vector.shape_cast %1090 : vector<1xf32> to vector<1x1x1xf32>
    %1092 = vector.extract %1091[0, 0, 0] : f32 from vector<1x1x1xf32>
    %1093 = vector.broadcast %1092 : f32 to vector<1x1xf32>
    %cst_259 = arith.constant 6.400000e+01 : f32
    %1094 = vector.broadcast %cst_259 : f32 to vector<1x1xf32>
    %1095 = arith.divf %1093, %1094 : vector<1x1xf32>
    %1096 = arith.mulf %1087, %1087 : vector<1x1xf32>
    %1097 = arith.subf %1095, %1096 : vector<1x1xf32>
    %1098 = vector.broadcast %1087 : vector<1x1xf32> to vector<2x32xf32>
    %1099 = arith.subf %1080, %1098 : vector<2x32xf32>
    %cst_260 = arith.constant 9.99999974E-6 : f32
    %1100 = vector.broadcast %cst_260 : f32 to vector<1x1xf32>
    %1101 = arith.addf %1097, %1100 : vector<1x1xf32>
    %1102 = math.rsqrt %1101 : vector<1x1xf32>
    %1103 = vector.broadcast %1102 : vector<1x1xf32> to vector<2x32xf32>
    %1104 = arith.mulf %1099, %1103 : vector<2x32xf32>
    %cst_261 = arith.constant 0.000000e+00 : f32
    %1105 = vector.broadcast %cst_261 : f32 to vector<2x32xf32>
    %1106 = arith.cmpf oge, %1104, %1105 : vector<2x32xf32>
    %cst_262 = arith.constant 0.00999999977 : f32
    %1107 = vector.broadcast %cst_262 : f32 to vector<2x32xf32>
    %1108 = arith.mulf %1107, %1104 : vector<2x32xf32>
    %1109 = arith.select %1106, %1104, %1108 : vector<2x32xi1>, vector<2x32xf32>
    %1110 = vector.extract_strided_slice %1079 {offsets = [0, 32], sizes = [2, 32], strides = [1, 1]} : vector<2x128xf32> to vector<2x32xf32>
    %1111 = vector.shape_cast %1110 : vector<2x32xf32> to vector<1x2x32xf32>
    %cst_263 = arith.constant dense<0.000000e+00> : vector<1xf32>
    %1112 = vector.multi_reduction <add>, %1111, %cst_263 [1, 2] : vector<1x2x32xf32> to vector<1xf32>
    %1113 = vector.shape_cast %1112 : vector<1xf32> to vector<1x1x1xf32>
    %1114 = vector.extract %1113[0, 0, 0] : f32 from vector<1x1x1xf32>
    %1115 = vector.broadcast %1114 : f32 to vector<1x1xf32>
    %cst_264 = arith.constant 6.400000e+01 : f32
    %1116 = vector.broadcast %cst_264 : f32 to vector<1x1xf32>
    %1117 = arith.divf %1115, %1116 : vector<1x1xf32>
    %1118 = arith.mulf %1110, %1110 : vector<2x32xf32>
    %1119 = vector.shape_cast %1118 : vector<2x32xf32> to vector<1x2x32xf32>
    %cst_265 = arith.constant dense<0.000000e+00> : vector<1xf32>
    %1120 = vector.multi_reduction <add>, %1119, %cst_265 [1, 2] : vector<1x2x32xf32> to vector<1xf32>
    %1121 = vector.shape_cast %1120 : vector<1xf32> to vector<1x1x1xf32>
    %1122 = vector.extract %1121[0, 0, 0] : f32 from vector<1x1x1xf32>
    %1123 = vector.broadcast %1122 : f32 to vector<1x1xf32>
    %cst_266 = arith.constant 6.400000e+01 : f32
    %1124 = vector.broadcast %cst_266 : f32 to vector<1x1xf32>
    %1125 = arith.divf %1123, %1124 : vector<1x1xf32>
    %1126 = arith.mulf %1117, %1117 : vector<1x1xf32>
    %1127 = arith.subf %1125, %1126 : vector<1x1xf32>
    %1128 = vector.broadcast %1117 : vector<1x1xf32> to vector<2x32xf32>
    %1129 = arith.subf %1110, %1128 : vector<2x32xf32>
    %cst_267 = arith.constant 9.99999974E-6 : f32
    %1130 = vector.broadcast %cst_267 : f32 to vector<1x1xf32>
    %1131 = arith.addf %1127, %1130 : vector<1x1xf32>
    %1132 = math.rsqrt %1131 : vector<1x1xf32>
    %1133 = vector.broadcast %1132 : vector<1x1xf32> to vector<2x32xf32>
    %1134 = arith.mulf %1129, %1133 : vector<2x32xf32>
    %cst_268 = arith.constant 0.000000e+00 : f32
    %1135 = vector.broadcast %cst_268 : f32 to vector<2x32xf32>
    %1136 = arith.cmpf oge, %1134, %1135 : vector<2x32xf32>
    %cst_269 = arith.constant 0.00999999977 : f32
    %1137 = vector.broadcast %cst_269 : f32 to vector<2x32xf32>
    %1138 = arith.mulf %1137, %1134 : vector<2x32xf32>
    %1139 = arith.select %1136, %1134, %1138 : vector<2x32xi1>, vector<2x32xf32>
    %1140 = vector.extract_strided_slice %1079 {offsets = [0, 64], sizes = [2, 32], strides = [1, 1]} : vector<2x128xf32> to vector<2x32xf32>
    %1141 = vector.shape_cast %1140 : vector<2x32xf32> to vector<1x2x32xf32>
    %cst_270 = arith.constant dense<0.000000e+00> : vector<1xf32>
    %1142 = vector.multi_reduction <add>, %1141, %cst_270 [1, 2] : vector<1x2x32xf32> to vector<1xf32>
    %1143 = vector.shape_cast %1142 : vector<1xf32> to vector<1x1x1xf32>
    %1144 = vector.extract %1143[0, 0, 0] : f32 from vector<1x1x1xf32>
    %1145 = vector.broadcast %1144 : f32 to vector<1x1xf32>
    %cst_271 = arith.constant 6.400000e+01 : f32
    %1146 = vector.broadcast %cst_271 : f32 to vector<1x1xf32>
    %1147 = arith.divf %1145, %1146 : vector<1x1xf32>
    %1148 = arith.mulf %1140, %1140 : vector<2x32xf32>
    %1149 = vector.shape_cast %1148 : vector<2x32xf32> to vector<1x2x32xf32>
    %cst_272 = arith.constant dense<0.000000e+00> : vector<1xf32>
    %1150 = vector.multi_reduction <add>, %1149, %cst_272 [1, 2] : vector<1x2x32xf32> to vector<1xf32>
    %1151 = vector.shape_cast %1150 : vector<1xf32> to vector<1x1x1xf32>
    %1152 = vector.extract %1151[0, 0, 0] : f32 from vector<1x1x1xf32>
    %1153 = vector.broadcast %1152 : f32 to vector<1x1xf32>
    %cst_273 = arith.constant 6.400000e+01 : f32
    %1154 = vector.broadcast %cst_273 : f32 to vector<1x1xf32>
    %1155 = arith.divf %1153, %1154 : vector<1x1xf32>
    %1156 = arith.mulf %1147, %1147 : vector<1x1xf32>
    %1157 = arith.subf %1155, %1156 : vector<1x1xf32>
    %1158 = vector.broadcast %1147 : vector<1x1xf32> to vector<2x32xf32>
    %1159 = arith.subf %1140, %1158 : vector<2x32xf32>
    %cst_274 = arith.constant 9.99999974E-6 : f32
    %1160 = vector.broadcast %cst_274 : f32 to vector<1x1xf32>
    %1161 = arith.addf %1157, %1160 : vector<1x1xf32>
    %1162 = math.rsqrt %1161 : vector<1x1xf32>
    %1163 = vector.broadcast %1162 : vector<1x1xf32> to vector<2x32xf32>
    %1164 = arith.mulf %1159, %1163 : vector<2x32xf32>
    %cst_275 = arith.constant 0.000000e+00 : f32
    %1165 = vector.broadcast %cst_275 : f32 to vector<2x32xf32>
    %1166 = arith.cmpf oge, %1164, %1165 : vector<2x32xf32>
    %cst_276 = arith.constant 0.00999999977 : f32
    %1167 = vector.broadcast %cst_276 : f32 to vector<2x32xf32>
    %1168 = arith.mulf %1167, %1164 : vector<2x32xf32>
    %1169 = arith.select %1166, %1164, %1168 : vector<2x32xi1>, vector<2x32xf32>
    %1170 = tpu.concatenate %1109, %1139, %1169 in 1 : vector<2x32xf32>, vector<2x32xf32>, vector<2x32xf32> -> vector<2x96xf32>
    %1171 = tpu.concatenate %7, %1079, %1170 in 1 : vector<2x16xf32>, vector<2x128xf32>, vector<2x96xf32> -> vector<2x240xf32>
    %cst_277 = arith.constant dense<0.000000e+00> : vector<2x512xf32>
    %1172 = tpu.matmul %1171, %0, %cst_277 {dimension_numbers = #tpu.dot_dimension_numbers<[1], [0], [0], [1], [0, 0, 1, 1], [], []>} : vector<2x240xf32>, vector<240x512xf32>, vector<2x512xf32> -> vector<2x512xf32>
    %1173 = arith.addf %1172, %3 : vector<2x512xf32>
    %1174 = arith.negf %1173 : vector<2x512xf32>
    %1175 = math.exp %1174 : vector<2x512xf32>
    %cst_278 = arith.constant 1.000000e+00 : f32
    %1176 = vector.broadcast %cst_278 : f32 to vector<2x512xf32>
    %1177 = arith.addf %1176, %1175 : vector<2x512xf32>
    %1178 = arith.divf %1176, %1177 : vector<2x512xf32>
    %1179 = vector.extract_strided_slice %1178 {offsets = [0, 0], sizes = [2, 128], strides = [1, 1]} : vector<2x512xf32> to vector<2x128xf32>
    %1180 = vector.extract_strided_slice %1178 {offsets = [0, 128], sizes = [2, 128], strides = [1, 1]} : vector<2x512xf32> to vector<2x128xf32>
    %1181 = vector.extract_strided_slice %1178 {offsets = [0, 256], sizes = [2, 128], strides = [1, 1]} : vector<2x512xf32> to vector<2x128xf32>
    %1182 = vector.extract_strided_slice %1178 {offsets = [0, 384], sizes = [2, 128], strides = [1, 1]} : vector<2x512xf32> to vector<2x128xf32>
    %cst_279 = arith.constant 2.000000e+00 : f32
    %1183 = vector.broadcast %cst_279 : f32 to vector<2x128xf32>
    %1184 = arith.mulf %1183, %1182 : vector<2x128xf32>
    %cst_280 = arith.constant 1.000000e+00 : f32
    %1185 = vector.broadcast %cst_280 : f32 to vector<2x128xf32>
    %1186 = arith.subf %1184, %1185 : vector<2x128xf32>
    %1187 = arith.mulf %1180, %1077 : vector<2x128xf32>
    %1188 = arith.mulf %1179, %1186 : vector<2x128xf32>
    %1189 = arith.addf %1187, %1188 : vector<2x128xf32>
    %1190 = math.tanh %1189 : vector<2x128xf32>
    %1191 = arith.mulf %1181, %1190 : vector<2x128xf32>
    %1192 = vector.extract_strided_slice %1191 {offsets = [0, 96], sizes = [2, 32], strides = [1, 1]} : vector<2x128xf32> to vector<2x32xf32>
    %1193 = vector.shape_cast %1192 : vector<2x32xf32> to vector<1x2x32xf32>
    %cst_281 = arith.constant dense<0.000000e+00> : vector<1xf32>
    %1194 = vector.multi_reduction <add>, %1193, %cst_281 [1, 2] : vector<1x2x32xf32> to vector<1xf32>
    %1195 = vector.shape_cast %1194 : vector<1xf32> to vector<1x1x1xf32>
    %1196 = vector.extract %1195[0, 0, 0] : f32 from vector<1x1x1xf32>
    %1197 = vector.broadcast %1196 : f32 to vector<1x1xf32>
    %cst_282 = arith.constant 6.400000e+01 : f32
    %1198 = vector.broadcast %cst_282 : f32 to vector<1x1xf32>
    %1199 = arith.divf %1197, %1198 : vector<1x1xf32>
    %1200 = arith.mulf %1192, %1192 : vector<2x32xf32>
    %1201 = vector.shape_cast %1200 : vector<2x32xf32> to vector<1x2x32xf32>
    %cst_283 = arith.constant dense<0.000000e+00> : vector<1xf32>
    %1202 = vector.multi_reduction <add>, %1201, %cst_283 [1, 2] : vector<1x2x32xf32> to vector<1xf32>
    %1203 = vector.shape_cast %1202 : vector<1xf32> to vector<1x1x1xf32>
    %1204 = vector.extract %1203[0, 0, 0] : f32 from vector<1x1x1xf32>
    %1205 = vector.broadcast %1204 : f32 to vector<1x1xf32>
    %cst_284 = arith.constant 6.400000e+01 : f32
    %1206 = vector.broadcast %cst_284 : f32 to vector<1x1xf32>
    %1207 = arith.divf %1205, %1206 : vector<1x1xf32>
    %1208 = arith.mulf %1199, %1199 : vector<1x1xf32>
    %1209 = arith.subf %1207, %1208 : vector<1x1xf32>
    %1210 = vector.broadcast %1199 : vector<1x1xf32> to vector<2x32xf32>
    %1211 = arith.subf %1192, %1210 : vector<2x32xf32>
    %cst_285 = arith.constant 9.99999974E-6 : f32
    %1212 = vector.broadcast %cst_285 : f32 to vector<1x1xf32>
    %1213 = arith.addf %1209, %1212 : vector<1x1xf32>
    %1214 = math.rsqrt %1213 : vector<1x1xf32>
    %1215 = vector.broadcast %1214 : vector<1x1xf32> to vector<2x32xf32>
    %1216 = arith.mulf %1211, %1215 : vector<2x32xf32>
    %cst_286 = arith.constant 0.000000e+00 : f32
    %1217 = vector.broadcast %cst_286 : f32 to vector<2x32xf32>
    %1218 = arith.cmpf oge, %1216, %1217 : vector<2x32xf32>
    %cst_287 = arith.constant 0.00999999977 : f32
    %1219 = vector.broadcast %cst_287 : f32 to vector<2x32xf32>
    %1220 = arith.mulf %1219, %1216 : vector<2x32xf32>
    %1221 = arith.select %1218, %1216, %1220 : vector<2x32xi1>, vector<2x32xf32>
    %cst_288 = arith.constant dense<0.000000e+00> : vector<2x4xf32>
    %1222 = tpu.matmul %1221, %4, %cst_288 {dimension_numbers = #tpu.dot_dimension_numbers<[1], [0], [0], [1], [0, 0, 1, 1], [], []>} : vector<2x32xf32>, vector<32x4xf32>, vector<2x4xf32> -> vector<2x4xf32>
    %1223 = vector.broadcast %5 : vector<1x4xf32> to vector<2x4xf32>
    %1224 = arith.addf %1222, %1223 : vector<2x4xf32>
    %c0_289 = arith.constant 0 : index
    %c0_290 = arith.constant 0 : index
    %1225 = vector.load %arg5[%c0_289, %c0_290] : memref<2x4xf32, #tpu.memory_space<vmem>>, vector<2x4xf32>
    tpu.vector_store %arg5[%c0_289, %c0_290], %1224 {strides = array<i32>} : memref<2x4xf32, #tpu.memory_space<vmem>>, vector<2x4xf32>,
    return
  }
}

</mosaic_0001>

<bundles_post_ra>
// kernel: multiple_lstm_forward.1
= control target key start
LH: loop header
LB: loop body
LE: loop exit
PB: predicated region body
PF: predicated region fallthrough
CT: control target
= control target key end

     0   :  { %10 = vsyncpa [#allocation3], 0  ;;  %s8945_s0 = inlined_call_operand.vmem [shape: f32[8,2,16], index: 0, kind: input, shape index: {}]   ;;  %s8946_s1 = inlined_call_operand.hbm [shape: f32[240,512], index: 1, kind: input, shape index: {}]   ;;  %s8947_s2 = inlined_call_operand.vmem [shape: f32[1,512], index: 2, kind: input, shape index: {}]   ;;  %s8948_s3 = inlined_call_operand.vmem [shape: f32[32,4], index: 3, kind: input, shape index: {}]   ;;  %s8949_s4 = inlined_call_operand.vmem [shape: f32[1,4], index: 4, kind: input, shape index: {}]   ;;  %s8950_s5 = inlined_call_operand.hbm [shape: f32[2,4], index: 5, kind: output, shape index: {}]  }
   0x1   :  { %11 = vsyncpa [#allocation4], 0  ;;  %s18_s20 = sshll.u32 %s8946_s1, 4  ;;  %s5712_s21 = smov [#allocation2]   ;;  %s19_s20 = int_to_ptr.hbm [resolvable:$true] %s18_s20 }
   0x2   :  { %s20_s22 = sshll.u32 %s5712_s21, 4  ;;  %s5713_s23 = smov 512   ;;  %s21_s22 = int_to_ptr.vmem [resolvable:$true] %s20_s22 }
   0x3   :  { %s5714_s24 = smov 32  }
   0x4   :  { %26 = dma.hbm_to_vmem [thread:$0]  %s19_s20, 15360, %s21_s22, [#allocation3], %s5713_s23, %s5713_s23, %s5714_s24  }
   0x5   :  { %5708 = dma.done.wait [#allocation3], 15360  }
   0x6   :  { %5709 = vsyncadd [#allocation3], 4294951936  ;;  %v5755_v0 = vld [vmem:[#allocation2 + $0x1e0] sm:$0xff]  ;;  %v5757_v1 = vld [vmem:[#allocation2 + $0x1e8] sm:$0xff]  ;;  %vm175_vm0 = vcmask 130048   ;;  %s5717_s28 = smov 96  }
   0x7   :  { %v5759_v2 = vld [vmem:[#allocation2 + $0x1c0] sm:$0xff]  ;;  %181 = vmatpush.msra.mxu0 %v5755_v0  ;;  %221 = vmatpush.msra.mxu2 %v5757_v1  ;;  %v5763_v3 = vld [vmem:[#allocation2 + $0x1c8] sm:$0xff]  ;;  %v5931_v60 = vld [vmem:[#allocation2 + $0x1f8] sm:$0xff]  ;;  %s5718_s29 = smov 16  }
   0x8   :  { %v5765_v4 = vld [vmem:[#allocation2 + $0x1a0] sm:$0xff]  ;;  %v5767_v5 = vld [vmem:[#allocation2 + $0x1a8] sm:$0xff]  ;;  %9367 = vst [vmem:[#allocation17_spill] sm:$0xff] %v5931_v60  ;;  %v5933_v61 = vld [vmem:[#allocation2 + $0x3b8] sm:$0xff] }
   0x9   :  { %v5769_v6 = vld [vmem:[#allocation2 + $0x3a0] sm:$0xff]  ;;  %182 = vmatpush.msra.mxu0 %v5759_v2  ;;  %222 = vmatpush.msra.mxu2 %v5763_v3  ;;  %v5773_v7 = vld [vmem:[#allocation2 + $0x3a8] sm:$0xff]  ;;  %9368 = vst [vmem:[#allocation18_spill] sm:$0xff] %v5933_v61  ;;  %v5937_v62 = vld [vmem:[#allocation2 + $0x1f0] sm:$0xff] }
   0xa   :  { %v5775_v8 = vld [vmem:[#allocation2 + $0x380] sm:$0xff]  ;;  %203 = vmatpush.msra.mxu1 %v5769_v6  ;;  %v5780_v10 = vld [vmem:[#allocation2 + $0x188] sm:$0xff]  ;;  %243 = vmatpush.msra.mxu3 %v5773_v7  ;;  %9369 = vst [vmem:[#allocation19_spill] sm:$0xff] %v5937_v62  ;;  %v5939_v63 = vld [vmem:[#allocation2 + $0x3b0] sm:$0xff] }
   0xb   :  { %v5777_v9 = vld [vmem:[#allocation2 + $0x180] sm:$0xff]  ;;  %v5783_v11 = vld [vmem:[#allocation2 + $0x388] sm:$0xff]  ;;  %183 = vmatpush.msra.mxu0 %v5765_v4  ;;  %223 = vmatpush.msra.mxu2 %v5767_v5  ;;  %9370 = vst [vmem:[#allocation20_spill] sm:$0xff] %v5939_v63 }
   0xc   :  { %v5787_v12 = vld [vmem:[#allocation2 + $0x360] sm:$0xff]  ;;  %v5789_v13 = vld [vmem:[#allocation2 + $0x368] sm:$0xff]  ;;  %204 = vmatpush.msra.mxu1 %v5775_v8  ;;  %244 = vmatpush.msra.mxu3 %v5783_v11 }
   0xd   :  { %v5791_v14 = vld [vmem:[#allocation2 + $0x160] sm:$0xff]  ;;  %v5794_v15 = vld [vmem:[#allocation2 + $0x168] sm:$0xff]  ;;  %184 = vmatpush.msra.mxu0 %v5777_v9  ;;  %224 = vmatpush.msra.mxu2 %v5780_v10 }
   0xe   :  { %v5799_v16 = vld [vmem:[#allocation2 + $0x340] sm:$0xff]  ;;  %v5801_v17 = vld [vmem:[#allocation2 + $0x348] sm:$0xff]  ;;  %205 = vmatpush.msra.mxu1 %v5787_v12  ;;  %245 = vmatpush.msra.mxu3 %v5789_v13 }
   0xf   :  { %v5803_v18 = vld [vmem:[#allocation2 + $0x140] sm:$0xff]  ;;  %v5806_v19 = vld [vmem:[#allocation2 + $0x148] sm:$0xff]  ;;  %185 = vmatpush.msra.mxu0 %v5791_v14  ;;  %225 = vmatpush.msra.mxu2 %v5794_v15 }
  0x10   :  { %v5811_v20 = vld [vmem:[#allocation2 + $0x320] sm:$0xff]  ;;  %v5813_v21 = vld [vmem:[#allocation2 + $0x328] sm:$0xff]  ;;  %206 = vmatpush.msra.mxu1 %v5799_v16  ;;  %246 = vmatpush.msra.mxu3 %v5801_v17 }
  0x11   :  { %v5815_v22 = vld [vmem:[#allocation2 + $0x120] sm:$0xff]  ;;  %v5818_v23 = vld [vmem:[#allocation2 + $0x128] sm:$0xff]  ;;  %186 = vmatpush.msra.mxu0 %v5803_v18  ;;  %226 = vmatpush.msra.mxu2 %v5806_v19 }
  0x12   :  { %v5823_v24 = vld [vmem:[#allocation2 + $0x300] sm:$0xff]  ;;  %v5825_v25 = vld [vmem:[#allocation2 + $0x308] sm:$0xff]  ;;  %207 = vmatpush.msra.mxu1 %v5811_v20  ;;  %247 = vmatpush.msra.mxu3 %v5813_v21 }
  0x13   :  { %v5827_v26 = vld [vmem:[#allocation2 + $0x100] sm:$0xff]  ;;  %v5830_v27 = vld [vmem:[#allocation2 + $0x108] sm:$0xff]  ;;  %187 = vmatpush.msra.mxu0 %v5815_v22  ;;  %227 = vmatpush.msra.mxu2 %v5818_v23 }
  0x14   :  { %v5835_v28 = vld [vmem:[#allocation2 + $0x2e0] sm:$0xff]  ;;  %v5837_v29 = vld [vmem:[#allocation2 + $0x2e8] sm:$0xff]  ;;  %208 = vmatpush.msra.mxu1 %v5823_v24  ;;  %248 = vmatpush.msra.mxu3 %v5825_v25 }
  0x15   :  { %v5839_v30 = vld [vmem:[#allocation2 + $0xe0] sm:$0xff]  ;;  %v5842_v31 = vld [vmem:[#allocation2 + $0xe8] sm:$0xff]  ;;  %188 = vmatpush.msra.mxu0 %v5827_v26  ;;  %228 = vmatpush.msra.mxu2 %v5830_v27 }
  0x16   :  { %v5847_v32 = vld [vmem:[#allocation2 + $0x2c0] sm:$0xff]  ;;  %v5849_v33 = vld [vmem:[#allocation2 + $0x2c8] sm:$0xff]  ;;  %209 = vmatpush.msra.mxu1 %v5835_v28  ;;  %249 = vmatpush.msra.mxu3 %v5837_v29 }
  0x17   :  { %v5851_v34 = vld [vmem:[#allocation2 + $0xc0] sm:$0xff]  ;;  %v5854_v35 = vld [vmem:[#allocation2 + $0xc8] sm:$0xff]  ;;  %189 = vmatpush.msra.mxu0 %v5839_v30  ;;  %229 = vmatpush.msra.mxu2 %v5842_v31 }
  0x18   :  { %v5859_v36 = vld [vmem:[#allocation2 + $0x2a0] sm:$0xff]  ;;  %v5861_v37 = vld [vmem:[#allocation2 + $0x2a8] sm:$0xff]  ;;  %210 = vmatpush.msra.mxu1 %v5847_v32  ;;  %250 = vmatpush.msra.mxu3 %v5849_v33 }
  0x19   :  { %v5863_v38 = vld [vmem:[#allocation2 + $0xa0] sm:$0xff]  ;;  %v5866_v39 = vld [vmem:[#allocation2 + $0xa8] sm:$0xff]  ;;  %190 = vmatpush.msra.mxu0 %v5851_v34  ;;  %230 = vmatpush.msra.mxu2 %v5854_v35 }
  0x1a   :  { %v5871_v40 = vld [vmem:[#allocation2 + $0x280] sm:$0xff]  ;;  %v5873_v41 = vld [vmem:[#allocation2 + $0x288] sm:$0xff]  ;;  %211 = vmatpush.msra.mxu1 %v5859_v36  ;;  %251 = vmatpush.msra.mxu3 %v5861_v37 }
  0x1b   :  { %v5875_v42 = vld [vmem:[#allocation2 + $0x80] sm:$0xff]  ;;  %v5878_v43 = vld [vmem:[#allocation2 + $0x88] sm:$0xff]  ;;  %191 = vmatpush.msra.mxu0 %v5863_v38  ;;  %231 = vmatpush.msra.mxu2 %v5866_v39 }
  0x1c   :  { %v5883_v44 = vld [vmem:[#allocation2 + $0x260] sm:$0xff]  ;;  %v5885_v45 = vld [vmem:[#allocation2 + $0x268] sm:$0xff]  ;;  %212 = vmatpush.msra.mxu1 %v5871_v40  ;;  %252 = vmatpush.msra.mxu3 %v5873_v41 }
  0x1d   :  { %v5887_v46 = vld [vmem:[#allocation2 + $0x60] sm:$0xff]  ;;  %v5890_v47 = vld [vmem:[#allocation2 + $0x68] sm:$0xff]  ;;  %192 = vmatpush.msra.mxu0 %v5875_v42  ;;  %232 = vmatpush.msra.mxu2 %v5878_v43 }
  0x1e   :  { %v5895_v48 = vld [vmem:[#allocation2 + $0x240] sm:$0xff]  ;;  %v5897_v49 = vld [vmem:[#allocation2 + $0x248] sm:$0xff]  ;;  %213 = vmatpush.msra.mxu1 %v5883_v44  ;;  %253 = vmatpush.msra.mxu3 %v5885_v45 }
  0x1f   :  { %v5899_v50 = vld [vmem:[#allocation2 + $0x40] sm:$0xff]  ;;  %v5902_v51 = vld [vmem:[#allocation2 + $0x48] sm:$0xff]  ;;  %193 = vmatpush.msra.mxu0 %v5887_v46  ;;  %233 = vmatpush.msra.mxu2 %v5890_v47 }
  0x20   :  { %9358 = vst [vmem:[#allocation8_spill] sm:$0xff] %v5902_v51  ;;  %v5907_v52 = vld [vmem:[#allocation2 + $0x220] sm:$0xff]  ;;  %v5909_v53 = vld [vmem:[#allocation2 + $0x228] sm:$0xff]  ;;  %214 = vmatpush.msra.mxu1 %v5895_v48  ;;  %254 = vmatpush.msra.mxu3 %v5897_v49 }
  0x21   :  { %9359 = vst [vmem:[#allocation9_spill] sm:$0xff] %v5907_v52  ;;  %v5911_v54 = vld [vmem:[#allocation2 + $0x20] sm:$0xff]  ;;  %v5914_v55 = vld [vmem:[#allocation2 + $0x28] sm:$0xff]  ;;  %194 = vmatpush.msra.mxu0 %v5899_v50  ;;  %234 = vmatpush.msra.mxu2 %v5902_v51  ;;  %v6022_v51 = vld [vmem:[#allocation2 + $0x2f0] sm:$0xff] }
  0x22   :  { %9360 = vst [vmem:[#allocation10_spill] sm:$0xff] %v5909_v53  ;;  %v5919_v56 = vld [vmem:[#allocation2 + $0x200] sm:$0xff]  ;;  %v5921_v57 = vld [vmem:[#allocation2 + $0x208] sm:$0xff]  ;;  %215 = vmatpush.msra.mxu1 %v5907_v52  ;;  %255 = vmatpush.msra.mxu3 %v5909_v53  ;;  %v5943_v53 = vld [vmem:[#allocation2 + $0x1d8] sm:$0xff] }
  0x23   :  { %9361 = vst [vmem:[#allocation11_spill] sm:$0xff] %v5911_v54  ;;  %v5923_v58 = vld [vmem:[#allocation2] sm:$0xff]  ;;  %v5926_v59 = vld [vmem:[#allocation2 + $0x8] sm:$0xff]  ;;  %195 = vmatpush.msra.mxu0 %v5911_v54  ;;  %235 = vmatpush.msra.mxu2 %v5914_v55  ;;  %v5945_v54 = vld [vmem:[#allocation2 + $0x398] sm:$0xff] }
  0x24   :  { %9362 = vst [vmem:[#allocation12_spill] sm:$0xff] %v5914_v55  ;;  %216 = vmatpush.msra.mxu1 %v5919_v56  ;;  %256 = vmatpush.msra.mxu3 %v5921_v57  ;;  %v5949_v55 = vld [vmem:[#allocation2 + $0x1d0] sm:$0xff]  ;;  %v6038_v52 = vld [vmem:[#allocation2 + $0xf8] sm:$0xff] }
  0x25   :  { %9363 = vst [vmem:[#allocation13_spill] sm:$0xff] %v5919_v56  ;;  %196 = vmatpush.msra.mxu0 %v5923_v58  ;;  %236 = vmatpush.msra.mxu2 %v5926_v59  ;;  %v5951_v56 = vld [vmem:[#allocation2 + $0x390] sm:$0xff] }
  0x26   :  { %9364 = vst [vmem:[#allocation14_spill] sm:$0xff] %v5921_v57  ;;  %261 = vmatpush.msrb.mxu1 %v5937_v62  ;;  %283 = vmatpush.msrb.mxu3 %v5939_v63  ;;  %v5955_v57 = vld [vmem:[#allocation2 + $0x1b8] sm:$0xff]  ;;  %v5970_v63 = vld [vmem:[#allocation2 + $0x370] sm:$0xff] }
  0x27   :  { %9365 = vst [vmem:[#allocation15_spill] sm:$0xff] %v5923_v58  ;;  %301 = vmatpush.msrb.mxu0 %v5931_v60  ;;  %323 = vmatpush.msrb.mxu2 %v5933_v61  ;;  %v5957_v58 = vld [vmem:[#allocation2 + $0x378] sm:$0xff]  ;;  %v5964_v60 = vld [vmem:[%s8945_s0] sm:$0x3]  ;;  %v5966_v61 = vld [vmem:[#allocation2 + $0x1b0] sm:$0xff] }
  0x28   :  { %9366 = vst [vmem:[#allocation16_spill] sm:$0xff] %v5926_v59  ;;  %262 = vmatpush.msrb.mxu1 %v5949_v55  ;;  %284 = vmatpush.msrb.mxu3 %v5951_v56  ;;  %v5972_v59 = vld [vmem:[#allocation2 + $0x198] sm:$0xff]  ;;  %v5993_v62 = vld [vmem:[#allocation2 + $0x170] sm:$0xff] }
  0x29   :  { %9371 = vst [vmem:[#allocation21_spill] sm:$0xff] %v5943_v53  ;;  %302 = vmatpush.msrb.mxu0 %v5943_v53  ;;  %324 = vmatpush.msrb.mxu2 %v5945_v54  ;;  %v5976_v53 = vld [vmem:[#allocation2 + $0x358] sm:$0xff] }
  0x2a   :  { %9372 = vst [vmem:[#allocation22_spill] sm:$0xff] %v5945_v54  ;;  %4542 = vmatmul.msk.f32.vlgmr.msra.gmra.mxu2 %vm175_vm0, %v5964_v60  ;;  %263 = vmatpush.msrb.mxu1 %v5966_v61  ;;  %v5981_v54 = vld [vmem:[#allocation2 + $0x190] sm:$0xff] }
  0x2b   :  { %9373 = vst [vmem:[#allocation23_spill] sm:$0xff] %v5949_v55  ;;  %303 = vmatpush.msrb.mxu0 %v5955_v57  ;;  %325 = vmatpush.msrb.mxu2 %v5957_v58  ;;  %v5983_v55 = vld [vmem:[#allocation2 + $0x350] sm:$0xff] }
  0x2c   :  { %9374 = vst [vmem:[#allocation24_spill] sm:$0xff] %v5951_v56  ;;  %285 = vmatpush.msrb.mxu3 %v5970_v63  ;;  %v5987_v56 = vld [vmem:[#allocation2 + $0x178] sm:$0xff]  ;;  %264 = vmatpush.msrb.mxu1 %v5981_v54 }
  0x2d   :  { %9375 = vst [vmem:[#allocation25_spill] sm:$0xff] %v5955_v57  ;;  %304 = vmatpush.msrb.mxu0 %v5972_v59  ;;  %v5989_v57 = vld [vmem:[#allocation2 + $0x338] sm:$0xff]  ;;  %326 = vmatpush.msrb.mxu2 %v5976_v53 }
  0x2e   :  { %9376 = vst [vmem:[#allocation26_spill] sm:$0xff] %v5957_v58  ;;  %v8975_v58 = vmov 0.0   ;;  %286 = vmatpush.msrb.mxu3 %v5983_v55  ;;  %4541 = vmatmul.msk.f32.vlgmr.msra.gmra.mxu0 %vm175_vm0, %v5964_v60 }
  0x2f   :  { %9377 = vst [vmem:[#allocation27_spill] sm:$0xff] %v5966_v61  ;;  %257 = vmatmul.f32.vlgmr.msra.gmra.mxu3 %v8975_v58  ;;  %v5997_v61 = vld [vmem:[#allocation2 + $0x330] sm:$0xff]  ;;  %305 = vmatpush.msrb.mxu0 %v5987_v56 }
  0x30   :  { %9378 = vst [vmem:[#allocation28_spill] sm:$0xff] %v5970_v63  ;;  %v5999_v63 = vld [vmem:[#allocation2 + $0x158] sm:$0xff]  ;;  %327 = vmatpush.msrb.mxu2 %v5989_v57  ;;  %265 = vmatpush.msrb.mxu1 %v5993_v62  ;;  %v6008_v58 = vld [vmem:[#allocation2 + $0x150] sm:$0xff] }
  0x31   :  { %9379 = vst [vmem:[#allocation29_spill] sm:$0xff] %v5972_v59  ;;  %v6003_v59 = vld [vmem:[#allocation2 + $0x318] sm:$0xff]  ;;  %287 = vmatpush.msrb.mxu3 %v5997_v61  ;;  %306 = vmatpush.msrb.mxu0 %v5999_v63 }
  0x32   :  { %9380 = vst [vmem:[#allocation30_spill] sm:$0xff] %v5976_v53  ;;  %v6010_v53 = vld [vmem:[#allocation2 + $0x310] sm:$0xff]  ;;  %328 = vmatpush.msrb.mxu2 %v6003_v59  ;;  %266 = vmatpush.msrb.mxu1 %v6008_v58 }
  0x33   :  { %9381 = vst [vmem:[#allocation31_spill] sm:$0xff] %v5981_v54  ;;  %v6014_v54 = vld [vmem:[#allocation2 + $0x138] sm:$0xff]  ;;  %288 = vmatpush.msrb.mxu3 %v6010_v53 }
  0x34   :  { %9382 = vst [vmem:[#allocation32_spill] sm:$0xff] %v5983_v55  ;;  %v6020_v55 = vld [vmem:[#allocation2 + $0x130] sm:$0xff]  ;;  %307 = vmatpush.msrb.mxu0 %v6014_v54 }
  0x35   :  { %9383 = vst [vmem:[#allocation33_spill] sm:$0xff] %v5987_v56  ;;  %v6016_v56 = vld [vmem:[#allocation2 + $0x2f8] sm:$0xff]  ;;  %267 = vmatpush.msrb.mxu1 %v6020_v55  ;;  %289 = vmatpush.msrb.mxu3 %v6022_v51 }
  0x36   :  { %9384 = vst [vmem:[#allocation34_spill] sm:$0xff] %v5989_v57  ;;  %v9393_v57 = vmov 0.0   ;;  %329 = vmatpush.msrb.mxu2 %v6016_v56 }
  0x37   :  { %9385 = vst [vmem:[#allocation35_spill] sm:$0xff] %v5993_v62  ;;  %217 = vmatmul.f32.vlgmr.msra.gmra.mxu1 %v9393_v57  ;;  %v6026_v62 = vld [vmem:[#allocation2 + $0x118] sm:$0xff] }
  0x38   :  { %9386 = vst [vmem:[#allocation36_spill] sm:$0xff] %v5997_v61  ;;  %v6028_v61 = vld [vmem:[#allocation2 + $0x2d8] sm:$0xff]  ;;  %308 = vmatpush.msrb.mxu0 %v6026_v62 }
  0x39   :  { %9387 = vst [vmem:[#allocation37_spill] sm:$0xff] %v5999_v63  ;;  %v6032_v63 = vld [vmem:[#allocation2 + $0x110] sm:$0xff]  ;;  %330 = vmatpush.msrb.mxu2 %v6028_v61 }
  0x3a   :  { %9388 = vst [vmem:[#allocation38_spill] sm:$0xff] %v6003_v59  ;;  %v6034_v59 = vld [vmem:[#allocation2 + $0x2d0] sm:$0xff]  ;;  %268 = vmatpush.msrb.mxu1 %v6032_v63  ;;  %309 = vmatpush.msrb.mxu0 %v6038_v52 }
  0x3b   :  { %9389 = vst [vmem:[#allocation39_spill] sm:$0xff] %v6008_v58  ;;  %v6040_v58 = vld [vmem:[#allocation2 + $0x2b8] sm:$0xff]  ;;  %290 = vmatpush.msrb.mxu3 %v6034_v59 }
  0x3c   :  { %9390 = vst [vmem:[#allocation40_spill] sm:$0xff] %v6010_v53  ;;  %v6044_v53 = vld [vmem:[#allocation2 + $0xf0] sm:$0xff]  ;;  %331 = vmatpush.msrb.mxu2 %v6040_v58 }
  0x3d   :  { %9391 = vst [vmem:[#allocation41_spill] sm:$0xff] %v6014_v54  ;;  %v6046_v54 = vld [vmem:[#allocation2 + $0x2b0] sm:$0xff]  ;;  %269 = vmatpush.msrb.mxu1 %v6044_v53 }
  0x3e   :  { %9392 = vst [vmem:[#allocation42_spill] sm:$0xff] %v6016_v56  ;;  %v6050_v56 = vld [vmem:[#allocation2 + $0xd8] sm:$0xff]  ;;  %291 = vmatpush.msrb.mxu3 %v6046_v54 }
  0x3f   :  { %9394 = vst [vmem:[#allocation43_spill] sm:$0xff] %v6020_v55  ;;  %v6052_v55 = vld [vmem:[#allocation2 + $0x298] sm:$0xff]  ;;  %310 = vmatpush.msrb.mxu0 %v6050_v56 }
  0x40   :  { %9395 = vst [vmem:[#allocation44_spill] sm:$0xff] %v6022_v51  ;;  %v6056_v51 = vld [vmem:[#allocation2 + $0xd0] sm:$0xff]  ;;  %332 = vmatpush.msrb.mxu2 %v6052_v55 }
  0x41   :  { %9396 = vst [vmem:[#allocation45_spill] sm:$0xff] %v6026_v62  ;;  %v6058_v62 = vld [vmem:[#allocation2 + $0x290] sm:$0xff]  ;;  %270 = vmatpush.msrb.mxu1 %v6056_v51 }
  0x42   :  { %9397 = vst [vmem:[#allocation46_spill] sm:$0xff] %v6028_v61  ;;  %v6062_v61 = vld [vmem:[#allocation2 + $0xb8] sm:$0xff]  ;;  %292 = vmatpush.msrb.mxu3 %v6058_v62 }
  0x43   :  { %9398 = vst [vmem:[#allocation47_spill] sm:$0xff] %v6032_v63  ;;  %v6064_v63 = vld [vmem:[#allocation2 + $0x278] sm:$0xff]  ;;  %311 = vmatpush.msrb.mxu0 %v6062_v61 }
  0x44   :  { %9399 = vst [vmem:[#allocation48_spill] sm:$0xff] %v6034_v59  ;;  %v6068_v59 = vld [vmem:[#allocation2 + $0xb0] sm:$0xff]  ;;  %333 = vmatpush.msrb.mxu2 %v6064_v63 }
  0x45   :  { %9400 = vst [vmem:[#allocation49_spill] sm:$0xff] %v6038_v52  ;;  %v6070_v52 = vld [vmem:[#allocation2 + $0x270] sm:$0xff]  ;;  %271 = vmatpush.msrb.mxu1 %v6068_v59 }
  0x46   :  { %9401 = vst [vmem:[#allocation50_spill] sm:$0xff] %v6040_v58  ;;  %v6074_v58 = vld [vmem:[#allocation2 + $0x98] sm:$0xff]  ;;  %293 = vmatpush.msrb.mxu3 %v6070_v52 }
  0x47   :  { %9402 = vst [vmem:[#allocation51_spill] sm:$0xff] %v6044_v53  ;;  %v6076_v53 = vld [vmem:[#allocation2 + $0x258] sm:$0xff]  ;;  %312 = vmatpush.msrb.mxu0 %v6074_v58 }
  0x48   :  { %9403 = vst [vmem:[#allocation52_spill] sm:$0xff] %v6046_v54  ;;  %v6080_v54 = vld [vmem:[#allocation2 + $0x90] sm:$0xff]  ;;  %334 = vmatpush.msrb.mxu2 %v6076_v53 }
  0x49   :  { %9404 = vst [vmem:[#allocation53_spill] sm:$0xff] %v6050_v56  ;;  %v6082_v56 = vld [vmem:[#allocation2 + $0x250] sm:$0xff]  ;;  %272 = vmatpush.msrb.mxu1 %v6080_v54 }
  0x4a   :  { %9405 = vst [vmem:[#allocation54_spill] sm:$0xff] %v6052_v55  ;;  %v6086_v55 = vld [vmem:[#allocation2 + $0x78] sm:$0xff]  ;;  %294 = vmatpush.msrb.mxu3 %v6082_v56 }
  0x4b   :  { %9406 = vst [vmem:[#allocation55_spill] sm:$0xff] %v6056_v51  ;;  %v6088_v51 = vld [vmem:[#allocation2 + $0x238] sm:$0xff]  ;;  %313 = vmatpush.msrb.mxu0 %v6086_v55 }
  0x4c   :  { %9407 = vst [vmem:[#allocation56_spill] sm:$0xff] %v6058_v62  ;;  %v6092_v62 = vld [vmem:[#allocation2 + $0x70] sm:$0xff]  ;;  %335 = vmatpush.msrb.mxu2 %v6088_v51 }
  0x4d   :  { %9408 = vst [vmem:[#allocation57_spill] sm:$0xff] %v6062_v61  ;;  %v6094_v61 = vld [vmem:[#allocation2 + $0x230] sm:$0xff]  ;;  %273 = vmatpush.msrb.mxu1 %v6092_v62 }
  0x4e   :  { %9409 = vst [vmem:[#allocation58_spill] sm:$0xff] %v6064_v63  ;;  %v6098_v63 = vld [vmem:[#allocation2 + $0x58] sm:$0xff]  ;;  %295 = vmatpush.msrb.mxu3 %v6094_v61 }
  0x4f   :  { %9410 = vst [vmem:[#allocation59_spill] sm:$0xff] %v6068_v59  ;;  %v6100_v59 = vld [vmem:[#allocation2 + $0x218] sm:$0xff]  ;;  %314 = vmatpush.msrb.mxu0 %v6098_v63 }
  0x50   :  { %9411 = vst [vmem:[#allocation60_spill] sm:$0xff] %v6070_v52  ;;  %v6104_v52 = vld [vmem:[#allocation2 + $0x50] sm:$0xff]  ;;  %336 = vmatpush.msrb.mxu2 %v6100_v59 }
  0x51   :  { %9412 = vst [vmem:[#allocation61_spill] sm:$0xff] %v6074_v58  ;;  %v6108_v58 = vld [vmem:[#allocation2 + $0x210] sm:$0xff]  ;;  %337 = vmatmul.f32.vlgmr.msrb.gmra.mxu2 %v9393_v57  ;;  %274 = vmatpush.msrb.mxu1 %v6104_v52 }
  0x52   :  { %9413 = vst [vmem:[#allocation62_spill] sm:$0xff] %v6076_v53  ;;  %v6110_v53 = vld [vmem:[#allocation2 + $0x38] sm:$0xff]  ;;  %296 = vmatpush.msrb.mxu3 %v6108_v58  ;;  %636 = vmatpush.msra.mxu2 %v5757_v1  ;;  %v9418_v1 = vld [vmem:[#allocation8_spill] sm:$0xff] }
  0x53   :  { %9414 = vst [vmem:[#allocation63_spill] sm:$0xff] %v6080_v54  ;;  %v6114_v54 = vld [vmem:[#allocation2 + $0x30] sm:$0xff]  ;;  %315 = vmatpush.msrb.mxu0 %v6110_v53  ;;  %297 = vmatmul.f32.vlgmr.msrb.gmra.mxu3 %v9393_v57 }
  0x54   :  { %9415 = vst [vmem:[#allocation64_spill] sm:$0xff] %v6086_v55  ;;  %v6118_v55 = vld [vmem:[#allocation2 + $0x18] sm:$0xff]  ;;  %275 = vmatpush.msrb.mxu1 %v6114_v54  ;;  %596 = vmatpush.msra.mxu3 %v5755_v0  ;;  %v9417_v0 = vld [vmem:[#allocation9_spill] sm:$0xff] }
  0x55   :  { %9416 = vst [vmem:[#allocation65_spill] sm:$0xff] %v6088_v51  ;;  %v6122_v51 = vld [vmem:[#allocation2 + $0x10] sm:$0xff]  ;;  %316 = vmatpush.msrb.mxu0 %v6118_v55  ;;  %637 = vmatpush.msra.mxu2 %v5763_v3  ;;  %v9420_v3 = vld [vmem:[#allocation11_spill] sm:$0xff] }
  0x56   :  { %4544 = vmatmul.msk.f32.vlgmr.msrb.gmra.mxu0 %vm175_vm0, %v5964_v60  ;;  %276 = vmatpush.msrb.mxu1 %v6122_v51  ;;  %v9465_v57 = vld [vmem:[#allocation53_spill] sm:$0xff] }
  0x57   :  { %4543 = vmatmul.msk.f32.vlgmr.msrb.gmra.mxu1 %vm175_vm0, %v5964_v60  ;;  %597 = vmatpush.msra.mxu3 %v5759_v2  ;;  %v9419_v2 = vld [vmem:[#allocation10_spill] sm:$0xff]  ;;  %v9466_v60 = vld [vmem:[#allocation60_spill] sm:$0xff] }
  0x58   :  { %618 = vmatpush.msra.mxu1 %v5769_v6  ;;  %658 = vmatpush.msra.mxu0 %v5773_v7  ;;  %v9423_v6 = vld [vmem:[#allocation14_spill] sm:$0xff]  ;;  %v9424_v7 = vld [vmem:[#allocation15_spill] sm:$0xff] }
  0x59   :  { %598 = vmatpush.msra.mxu3 %v5765_v4  ;;  %638 = vmatpush.msra.mxu2 %v5767_v5  ;;  %v9421_v4 = vld [vmem:[#allocation13_spill] sm:$0xff]  ;;  %v9422_v5 = vld [vmem:[#allocation12_spill] sm:$0xff] }
  0x5a   :  { %619 = vmatpush.msra.mxu1 %v5775_v8  ;;  %659 = vmatpush.msra.mxu0 %v5783_v11  ;;  %v9425_v8 = vld [vmem:[#allocation19_spill] sm:$0xff]  ;;  %v9428_v11 = vld [vmem:[#allocation18_spill] sm:$0xff] }
  0x5b   :  { %599 = vmatpush.msra.mxu3 %v5777_v9  ;;  %639 = vmatpush.msra.mxu2 %v5780_v10  ;;  %v9426_v9 = vld [vmem:[#allocation16_spill] sm:$0xff] }
  0x5c   :  { %620 = vmatpush.msra.mxu1 %v5787_v12  ;;  %660 = vmatpush.msra.mxu0 %v5789_v13  ;;  %v9427_v10 = vld [vmem:[#allocation20_spill] sm:$0xff]  ;;  %v9429_v12 = vld [vmem:[#allocation17_spill] sm:$0xff] }
  0x5d   :  { %600 = vmatpush.msra.mxu3 %v5791_v14  ;;  %640 = vmatpush.msra.mxu2 %v5794_v15  ;;  %v9430_v13 = vld [vmem:[#allocation24_spill] sm:$0xff]  ;;  %v9431_v14 = vld [vmem:[#allocation23_spill] sm:$0xff]  ;;  %v9432_v15 = vld [vmem:[#allocation22_spill] sm:$0xff] }
  0x5e   :  { %621 = vmatpush.msra.mxu1 %v5799_v16  ;;  %661 = vmatpush.msra.mxu0 %v5801_v17  ;;  %v9433_v16 = vld [vmem:[#allocation21_spill] sm:$0xff]  ;;  %v9434_v17 = vld [vmem:[#allocation28_spill] sm:$0xff] }
  0x5f   :  { %601 = vmatpush.msra.mxu3 %v5803_v18  ;;  %641 = vmatpush.msra.mxu2 %v5806_v19  ;;  %v9435_v18 = vld [vmem:[#allocation27_spill] sm:$0xff]  ;;  %v9436_v19 = vld [vmem:[#allocation26_spill] sm:$0xff] }
  0x60   :  { %622 = vmatpush.msra.mxu1 %v5811_v20  ;;  %662 = vmatpush.msra.mxu0 %v5813_v21  ;;  %v9437_v20 = vld [vmem:[#allocation25_spill] sm:$0xff]  ;;  %v9438_v21 = vld [vmem:[#allocation32_spill] sm:$0xff] }
  0x61   :  { %602 = vmatpush.msra.mxu3 %v5815_v22  ;;  %642 = vmatpush.msra.mxu2 %v5818_v23  ;;  %v9439_v22 = vld [vmem:[#allocation31_spill] sm:$0xff]  ;;  %v9440_v23 = vld [vmem:[#allocation30_spill] sm:$0xff] }
  0x62   :  { %623 = vmatpush.msra.mxu1 %v5823_v24  ;;  %663 = vmatpush.msra.mxu0 %v5825_v25  ;;  %v9441_v24 = vld [vmem:[#allocation29_spill] sm:$0xff]  ;;  %v9442_v25 = vld [vmem:[#allocation36_spill] sm:$0xff] }
  0x63   :  { %603 = vmatpush.msra.mxu3 %v5827_v26  ;;  %643 = vmatpush.msra.mxu2 %v5830_v27  ;;  %v9443_v26 = vld [vmem:[#allocation35_spill] sm:$0xff]  ;;  %v9444_v27 = vld [vmem:[#allocation34_spill] sm:$0xff] }
  0x64   :  { %624 = vmatpush.msra.mxu1 %v5835_v28  ;;  %664 = vmatpush.msra.mxu0 %v5837_v29  ;;  %v9445_v28 = vld [vmem:[#allocation33_spill] sm:$0xff]  ;;  %v9446_v29 = vld [vmem:[#allocation40_spill] sm:$0xff] }
  0x65   :  { %604 = vmatpush.msra.mxu3 %v5839_v30  ;;  %644 = vmatpush.msra.mxu2 %v5842_v31  ;;  %v9447_v30 = vld [vmem:[#allocation39_spill] sm:$0xff]  ;;  %v9448_v31 = vld [vmem:[#allocation38_spill] sm:$0xff] }
  0x66   :  { %625 = vmatpush.msra.mxu1 %v5847_v32  ;;  %665 = vmatpush.msra.mxu0 %v5849_v33  ;;  %v9449_v32 = vld [vmem:[#allocation37_spill] sm:$0xff]  ;;  %v9450_v33 = vld [vmem:[#allocation44_spill] sm:$0xff] }
  0x67   :  { %605 = vmatpush.msra.mxu3 %v5851_v34  ;;  %645 = vmatpush.msra.mxu2 %v5854_v35  ;;  %v9451_v34 = vld [vmem:[#allocation43_spill] sm:$0xff]  ;;  %v9452_v35 = vld [vmem:[#allocation42_spill] sm:$0xff] }
  0x68   :  { %626 = vmatpush.msra.mxu1 %v5859_v36  ;;  %666 = vmatpush.msra.mxu0 %v5861_v37  ;;  %v9453_v36 = vld [vmem:[#allocation41_spill] sm:$0xff]  ;;  %v9454_v37 = vld [vmem:[#allocation48_spill] sm:$0xff] }
  0x69   :  { %606 = vmatpush.msra.mxu3 %v5863_v38  ;;  %646 = vmatpush.msra.mxu2 %v5866_v39  ;;  %v9455_v38 = vld [vmem:[#allocation47_spill] sm:$0xff]  ;;  %v9456_v39 = vld [vmem:[#allocation46_spill] sm:$0xff] }
  0x6a   :  { %627 = vmatpush.msra.mxu1 %v5871_v40  ;;  %667 = vmatpush.msra.mxu0 %v5873_v41  ;;  %v9457_v40 = vld [vmem:[#allocation45_spill] sm:$0xff]  ;;  %v9458_v41 = vld [vmem:[#allocation52_spill] sm:$0xff] }
  0x6b   :  { %607 = vmatpush.msra.mxu3 %v5875_v42  ;;  %647 = vmatpush.msra.mxu2 %v5878_v43  ;;  %v9459_v42 = vld [vmem:[#allocation51_spill] sm:$0xff]  ;;  %v9460_v43 = vld [vmem:[#allocation50_spill] sm:$0xff] }
  0x6c   :  { %628 = vmatpush.msra.mxu1 %v5883_v44  ;;  %668 = vmatpush.msra.mxu0 %v5885_v45  ;;  %v9461_v44 = vld [vmem:[#allocation49_spill] sm:$0xff]  ;;  %v9462_v45 = vld [vmem:[#allocation56_spill] sm:$0xff] }
  0x6d   :  { %608 = vmatpush.msra.mxu3 %v5887_v46  ;;  %648 = vmatpush.msra.mxu2 %v5890_v47 }
  0x6e   :  { %629 = vmatpush.msra.mxu1 %v5895_v48  ;;  %669 = vmatpush.msra.mxu0 %v5897_v49  ;;  %v9463_v48 = vld [vmem:[#allocation55_spill] sm:$0xff]  ;;  %v9464_v49 = vld [vmem:[#allocation54_spill] sm:$0xff] }
  0x6f   :  { %609 = vmatpush.msra.mxu3 %v5899_v50  ;;  %649 = vmatpush.msra.mxu2 %v9418_v1 }
  0x70   :  { %630 = vmatpush.msra.mxu1 %v9417_v0  ;;  %670 = vmatpush.msra.mxu0 %v9419_v2  ;;  %v9467_v0 = vld [vmem:[#allocation59_spill] sm:$0xff]  ;;  %v9468_v2 = vld [vmem:[#allocation58_spill] sm:$0xff] }
  0x71   :  { %610 = vmatpush.msra.mxu3 %v9420_v3  ;;  %650 = vmatpush.msra.mxu2 %v9422_v5 }
  0x72   :  { %631 = vmatpush.msra.mxu1 %v9421_v4  ;;  %671 = vmatpush.msra.mxu0 %v9423_v6  ;;  %v9469_v4 = vld [vmem:[#allocation57_spill] sm:$0xff]  ;;  %v9470_v6 = vld [vmem:[#allocation63_spill] sm:$0xff] }
  0x73   :  { %611 = vmatpush.msra.mxu3 %v9424_v7  ;;  %651 = vmatpush.msra.mxu2 %v9426_v9 }
  0x74   :  { %676 = vmatpush.msrb.mxu1 %v9425_v8  ;;  %716 = vmatpush.msrb.mxu0 %v9429_v12  ;;  %v9471_v8 = vld [vmem:[#allocation62_spill] sm:$0xff]  ;;  %v9474_v12 = vld [vmem:[#allocation64_spill] sm:$0xff] }
  0x75   :  { %698 = vmatpush.msrb.mxu3 %v9427_v10  ;;  %738 = vmatpush.msrb.mxu2 %v9428_v11  ;;  %v9472_v10 = vld [vmem:[#allocation61_spill] sm:$0xff] }
  0x76   :  { %677 = vmatpush.msrb.mxu1 %v9431_v14  ;;  %717 = vmatpush.msrb.mxu0 %v9433_v16  ;;  %v9473_v11 = vld [vmem:[#allocation65_spill] sm:$0xff] }
  0x77   :  { %699 = vmatpush.msrb.mxu3 %v9430_v13  ;;  %739 = vmatpush.msrb.mxu2 %v9432_v15 }
  0x78   :  { %678 = vmatpush.msrb.mxu1 %v9435_v18  ;;  %718 = vmatpush.msrb.mxu0 %v9437_v20 }
  0x79   :  { %700 = vmatpush.msrb.mxu3 %v9434_v17  ;;  %740 = vmatpush.msrb.mxu2 %v9436_v19 }
  0x7a   :  { %679 = vmatpush.msrb.mxu1 %v9439_v22  ;;  %719 = vmatpush.msrb.mxu0 %v9441_v24 }
  0x7b   :  { %701 = vmatpush.msrb.mxu3 %v9438_v21  ;;  %741 = vmatpush.msrb.mxu2 %v9440_v23 }
  0x7c   :  { %680 = vmatpush.msrb.mxu1 %v9443_v26  ;;  %720 = vmatpush.msrb.mxu0 %v9445_v28 }
  0x7d   :  { %702 = vmatpush.msrb.mxu3 %v9442_v25  ;;  %742 = vmatpush.msrb.mxu2 %v9444_v27 }
  0x7e   :  { %681 = vmatpush.msrb.mxu1 %v9447_v30  ;;  %721 = vmatpush.msrb.mxu0 %v9449_v32 }
  0x7f   :  { %703 = vmatpush.msrb.mxu3 %v9446_v29  ;;  %743 = vmatpush.msrb.mxu2 %v9448_v31 }
  0x80   :  { %682 = vmatpush.msrb.mxu1 %v9451_v34  ;;  %722 = vmatpush.msrb.mxu0 %v9453_v36 }
  0x81   :  { %704 = vmatpush.msrb.mxu3 %v9450_v33  ;;  %744 = vmatpush.msrb.mxu2 %v9452_v35 }
  0x82   :  { %683 = vmatpush.msrb.mxu1 %v9455_v38  ;;  %723 = vmatpush.msrb.mxu0 %v9457_v40 }
  0x83   :  { %705 = vmatpush.msrb.mxu3 %v9454_v37  ;;  %745 = vmatpush.msrb.mxu2 %v9456_v39 }
  0x84   :  { %684 = vmatpush.msrb.mxu1 %v9459_v42  ;;  %724 = vmatpush.msrb.mxu0 %v9461_v44 }
  0x85   :  { %706 = vmatpush.msrb.mxu3 %v9458_v41  ;;  %746 = vmatpush.msrb.mxu2 %v9460_v43 }
  0x86   :  { %685 = vmatpush.msrb.mxu1 %v9463_v48  ;;  %725 = vmatpush.msrb.mxu0 %v9465_v57 }
  0x87   :  { %707 = vmatpush.msrb.mxu3 %v9462_v45  ;;  %747 = vmatpush.msrb.mxu2 %v9464_v49 }
  0x88   :  { %686 = vmatpush.msrb.mxu1 %v9467_v0  ;;  %726 = vmatpush.msrb.mxu0 %v9469_v4 }
  0x89   :  { %708 = vmatpush.msrb.mxu3 %v9466_v60  ;;  %748 = vmatpush.msrb.mxu2 %v9468_v2 }
  0x8a   :  { %687 = vmatpush.msrb.mxu1 %v9470_v6  ;;  %727 = vmatpush.msrb.mxu0 %v9472_v10 }
  0x8b   :  { %709 = vmatpush.msrb.mxu3 %v6082_v56  ;;  %749 = vmatpush.msrb.mxu2 %v9471_v8  ;;  %v157_v56 = vld [vmem:[%s8947_s2] sm:$0xf]  ;;  %s5716_s2 = smov 64  }
  0x8c   :  { %688 = vmatpush.msrb.mxu1 %v6092_v62  ;;  %728 = vmatpush.msrb.mxu0 %v9474_v12  ;;  %v6261_v15 = vperm.slane %v157_v56, 3  ;;  %v6263_v16 = vperm.slane %v157_v56, 2 }
  0x8d   :  { %710 = vmatpush.msrb.mxu3 %v6094_v61  ;;  %750 = vmatpush.msrb.mxu2 %v9473_v11  ;;  %v6255_v61 = vperm.slane %v157_v56, 1 }
  0x8e   :  { %689 = vmatpush.msrb.mxu1 %v6104_v52  ;;  %729 = vmatpush.msrb.mxu0 %v6098_v63  ;;  %v6257_v52 = vperm.slane %v157_v56, 0  ;;  %9477 = vst [vmem:[#allocation10_spill] sm:$0xff] %v6261_v15 }
  0x8f   :  { %711 = vmatpush.msrb.mxu3 %v6108_v58  ;;  %751 = vmatpush.msrb.mxu2 %v6100_v59  ;;  %9475 = vst [vmem:[#allocation9_spill] sm:$0xff] %v6255_v61 }
  0x90   :  { %690 = vmatpush.msrb.mxu1 %v6114_v54  ;;  %730 = vmatpush.msrb.mxu0 %v6110_v53  ;;  %9476 = vst [vmem:[#allocation8_spill] sm:$0xff] %v6257_v52 }
  0x91   :  { %9478 = vst [vmem:[#allocation11_spill] sm:$0xff] %v6263_v16 }
  0x92   :  { %691 = vmatpush.msrb.mxu1 %v6122_v51  ;;  %731 = vmatpush.msrb.mxu0 %v6118_v55 }
  0xab   :  { %v198_v59 = vpop.f32.mrf.mxu0 }
  0xac   :  { %v199_v54 = vadd.f32 %v198_v59, %v6257_v52 }
  0xad   :  { %v238_v58 = vpop.f32.mrf.mxu2 }
  0xae   :  { %v239_v62 = vadd.f32 %v238_v58, %v6255_v61 }
  0xb2   :  { %v258_v63 = vpop.f32.mrf.mxu3 }
  0xb3   :  { %v259_v13 = vadd.f32 %v258_v63, %v239_v62  ;;  %v172_v63 = vlaneseq }
  0xb4   :  { %v218_v53 = vpop.f32.mrf.mxu1 }
  0xb5   :  { %v219_v51 = vadd.f32 %v218_v53, %v199_v54  ;;  %v4546_v14 = vmul.f32 -1.442695, %v259_v13 }
  0xb7   :  { %v4545_v55 = vmul.f32 -1.442695, %v219_v51  ;;  %4806 = vpow2.f32 %v4546_v14 }
  0xb9   :  { %4808 = vpow2.f32 %v4545_v55 }
  0xbd   :  { %v4807_v17 = vpop.eup %4806 }
  0xbe   :  { %v354_v22 = vadd.f32 1.0, %v4807_v17 }
  0xbf   :  { %v4809_v19 = vpop.eup %4808 }
  0xc0   :  { %v353_v26 = vadd.f32 1.0, %v4809_v19  ;;  %4810 = vrcp.f32 %v354_v22  ;;  %vm377_vm2 = vweird.f32 %v354_v22  ;;  %v381_v49 = vand.u32 2147483647, %v354_v22 }
  0xc1   :  { %v383_v57 = vand.u32 2147483648, %v354_v22  ;;  %v6284_v19 = vand.u32 127, %v172_v63 }
  0xc2   :  { %vm362_vm1 = vweird.f32 %v353_v26  ;;  %v368_v6 = vand.u32 2147483648, %v353_v26  ;;  %v366_v56 = vand.u32 2147483647, %v353_v26  ;;  %vm382_vm10 = vcmp.eq.f32.partialorder %v381_v49, 8.507059e+37 }
  0xc3   :  { %v384_v59 = vor.u32 1.1754944e-38, %v383_v57  ;;  %vm424_vm15 = vcmp.lt.s32.totalorder %v6284_v19, 32 }
  0xc4   :  { %v369_v13 = vor.u32 1.1754944e-38, %v368_v6  ;;  %vm367_vm12 = vcmp.eq.f32.partialorder %v366_v56, 8.507059e+37 }
  0xc6   :  { %v4811_v31 = vpop.eup %4810 }
  0xc7   :  { %v373_v36 = vmul.f32 %v4811_v31, %v354_v22  ;;  %vm378_vm3 = vweird.f32 %v4811_v31 }
  0xc8   :  { %vm6270_vm6 = vmor %vm377_vm2, %vm378_vm3  ;;  %vm429_vm3 = vcmask 254976  }
  0xc9   :  { %v374_v39 = vsub.f32 1.0, %v373_v36 }
  0xcb   :  { %v375_v42 = vmul.f32 %v4811_v31, %v374_v39 }
  0xcd   :  { %v376_v0 = vadd.f32 %v4811_v31, %v375_v42 }
  0xcf   :  { %v380_v54 = vsel %vm6270_vm6, %v4811_v31, %v376_v0 }
  0xd3   :  { %v318_v18 = vpop.f32.mrf.mxu0 }
  0xd4   :  { %v319_v20 = vadd.f32 %v318_v18, %v6261_v15  ;;  %v278_v21 = vpop.f32.mrf.mxu1  ;;  %v338_v24 = vpop.f32.mrf.mxu2  ;;  %v385_v18 = vsel %vm382_vm10, %v384_v59, %v380_v54 }
  0xd5   :  { %v279_v23 = vadd.f32 %v278_v21, %v6263_v16 }
  0xd6   :  { %v339_v25 = vadd.f32 %v338_v24, %v319_v20  ;;  %v298_v27 = vpop.f32.mrf.mxu3 }
  0xd7   :  { %v299_v29 = vadd.f32 %v298_v27, %v279_v23  ;;  %v419_v23 = vmul.f32 0.0, %v385_v18 }
  0xd8   :  { %v4548_v28 = vmul.f32 -1.442695, %v339_v25 }
  0xd9   :  { %v4547_v30 = vmul.f32 -1.442695, %v299_v29 }
  0xda   :  { %4812 = vpow2.f32 %v4548_v28 }
  0xdb   :  { %4814 = vrcp.f32 %v353_v26 }
  0xdc   :  { %4816 = vpow2.f32 %v4547_v30 }
  0xe0   :  { %v4813_v32 = vpop.eup %4812 }
  0xe1   :  { %v4815_v33 = vpop.eup %4814  ;;  %v356_v34 = vadd.f32 1.0, %v4813_v32 }
  0xe2   :  { %v4817_v35 = vpop.eup %4816  ;;  %v358_v37 = vmul.f32 %v4815_v33, %v353_v26  ;;  %vm363_vm4 = vweird.f32 %v4815_v33 }
  0xe3   :  { %4818 = vrcp.f32 %v356_v34  ;;  %v6267_v38 = vadd.f32 1.0, %v4817_v35  ;;  %v413_v60 = vand.u32 2147483648, %v356_v34  ;;  %v411_v4 = vand.u32 2147483647, %v356_v34  ;;  %vm6276_vm7 = vmor %vm362_vm1, %vm363_vm4 }
  0xe4   :  { %v359_v40 = vsub.f32 1.0, %v358_v37  ;;  %vm407_vm8 = vweird.f32 %v356_v34 }
  0xe5   :  { %4820 = vrcp.f32 %v6267_v38  ;;  %v414_v62 = vor.u32 1.1754944e-38, %v413_v60  ;;  %vm412_vm11 = vcmp.eq.f32.partialorder %v411_v4, 8.507059e+37  ;;  %vm392_vm13 = vweird.f32 %v6267_v38 }
  0xe6   :  { %v360_v45 = vmul.f32 %v4815_v33, %v359_v40  ;;  %v398_v26 = vand.u32 2147483648, %v6267_v38  ;;  %v396_v28 = vand.u32 2147483647, %v6267_v38 }
  0xe8   :  { %v361_v11 = vadd.f32 %v4815_v33, %v360_v45  ;;  %v399_v30 = vor.u32 1.1754944e-38, %v398_v26  ;;  %vm397_vm2 = vcmp.eq.f32.partialorder %v396_v28, 8.507059e+37 }
  0xe9   :  { %v4819_v41 = vpop.eup %4818 }
  0xea   :  { %v403_v43 = vmul.f32 %v4819_v41, %v356_v34  ;;  %vm408_vm5 = vweird.f32 %v4819_v41  ;;  %v365_v55 = vsel %vm6276_vm7, %v4815_v33, %v361_v11 }
  0xeb   :  { %v4821_v44 = vpop.eup %4820  ;;  %vm409_vm9 = vmor %vm407_vm8, %vm408_vm5  ;;  %v370_v21 = vsel %vm367_vm12, %v369_v13, %v365_v55 }
  0xec   :  { %v404_v48 = vsub.f32 1.0, %v403_v43  ;;  %v388_v10 = vmul.f32 %v4821_v44, %v6267_v38  ;;  %vm393_vm14 = vweird.f32 %v4821_v44 }
  0xed   :  { %vm394_vm1 = vmor %vm392_vm13, %vm393_vm14 }
  0xee   :  { %v405_v2 = vmul.f32 %v4819_v41, %v404_v48  ;;  %v389_v14 = vsub.f32 1.0, %v388_v10 }
  0xf0   :  { %v406_v58 = vadd.f32 %v4819_v41, %v405_v2  ;;  %v390_v22 = vmul.f32 %v4821_v44, %v389_v14 }
  0xf2   :  { %v410_v53 = vsel %vm409_vm9, %v4819_v41, %v406_v58  ;;  %v391_v27 = vadd.f32 %v4821_v44, %v390_v22 }
  0xf3   :  { %v415_v51 = vsel %vm412_vm11, %v414_v62, %v410_v53 }
  0xf4   :  { %v417_v17 = vmul.f32 2.0, %v415_v51  ;;  %v395_v31 = vsel %vm394_vm1, %v4821_v44, %v391_v27  ;;  %vm578_vm1 = vcmask 261120  }
  0xf5   :  { %v400_v33 = vsel %vm397_vm2, %v399_v30, %v395_v31  ;;  %v4550_v31 = vld [vmem:[%s8945_s0 + $0x2] sm:$0x3] }
  0xf6   :  { %v4549_v20 = vadd.f32 -1.0, %v417_v17 }
  0xf8   :  { %v420_v24 = vmul.f32 %v4549_v20, %v370_v21 }
  0xfa   :  { %v421_v25 = vadd.f32 %v420_v24, %v419_v23 }
  0xfc   :  { %4822 = vtanh.f32 %v421_v25  ;;  %v6290_v29 = vsel %vm424_vm15, %v421_v25, 0.0 }
 0x102   :  { %v4823_v32 = vpop.eup %4822 }
 0x103   :  { %v423_v34 = vmul.f32 %v4823_v32, %v400_v33 }
 0x105   :  { %v6292_v35 = vsel %vm424_vm15, %v423_v34, 0.0 }
 0x106   :  { %530 = vrot.lane.b32.xlu1 %v6292_v35, %s5716_s2  ;;  %481 = vrot.lane.b32.xlu0 %v6292_v35, %s5717_s28  ;;  %v430_v36 = vsel %vm429_vm3, %v6292_v35, 0.0  ;;  %v449_v37 = vmul.f32 %v6292_v35, %v6292_v35 }
 0x107   :  { %431 = vadd.xlane.f32.xlu2 %v430_v36 }
 0x108   :  { %v450_v38 = vsel %vm429_vm3, %v449_v37, 0.0 }
 0x10e   :  { %545 = vrot.lane.b32.xlu1 %v449_v37, %s5716_s2  ;;  %497 = vrot.lane.b32.xlu0 %v449_v37, %s5717_s28 }
 0x10f   :  { %451 = vadd.xlane.f32.xlu2 %v450_v38 }
 0x178   :  { %v531_v39 = vpop.permute.xlu1 %530  ;;  %v482_v40 = vpop.permute.xlu0 %481 }
 0x179   :  { %v484_v41 = vsel %vm429_vm3, %v482_v40, 0.0  ;;  %v533_v42 = vsel %vm429_vm3, %v531_v39, 0.0  ;;  %v5719_v40 = vmov 64.0  }
 0x17a   :  { %485 = vadd.xlane.f32.xlu0 %v484_v41  ;;  %534 = vadd.xlane.f32.xlu2 %v533_v42  ;;  %v432_v43 = vpop.xlane.xlu2 %431  ;;  %4824 = vrcp.f32 %v5719_v40 }
 0x17b   :  { %v433_v44 = vrot.slane %v432_v43, 4 }
 0x17d   :  { %v434_v45 = vadd.f32 %v433_v44, %v432_v43  ;;  %v6322_v43 = vld [vmem:[#allocation2 + $0x1e0] sm:$0xff]  ;;  %v6325_v44 = vld [vmem:[#allocation2 + $0x1e8] sm:$0xff] }
 0x17f   :  { %v435_v48 = vrot.slane %v434_v45, 2 }
 0x180   :  { %v546_v49 = vpop.permute.xlu1 %545  ;;  %v498_v57 = vpop.permute.xlu0 %497 }
 0x181   :  { %v500_v60 = vsel %vm429_vm3, %v498_v57, 0.0  ;;  %v548_v0 = vsel %vm429_vm3, %v546_v49, 0.0  ;;  %v436_v2 = vadd.f32 %v435_v48, %v434_v45  ;;  %v6328_v48 = vld [vmem:[#allocation2 + $0x1c0] sm:$0xff]  ;;  %v6331_v49 = vld [vmem:[#allocation2 + $0x1c8] sm:$0xff] }
 0x182   :  { %501 = vadd.xlane.f32.xlu1 %v500_v60  ;;  %549 = vadd.xlane.f32.xlu2 %v548_v0  ;;  %v452_v4 = vpop.xlane.xlu2 %451  ;;  %v6334_v57 = vld [vmem:[#allocation2 + $0x1a0] sm:$0xff]  ;;  %v6337_v60 = vld [vmem:[#allocation2 + $0x1a8] sm:$0xff]  ;;  %v4825_v0 = vpop.eup %4824 }
 0x183   :  { %v453_v6 = vrot.slane %v452_v4, 4  ;;  %v437_v8 = vrot.slane %v436_v2, 1  ;;  %vm446_vm4 = vweird.f32 %v4825_v0 }
 0x185   :  { %v454_v10 = vadd.f32 %v453_v6, %v452_v4  ;;  %v438_v11 = vadd.f32 %v437_v8, %v436_v2  ;;  %v6340_v2 = vld [vmem:[#allocation2 + $0x180] sm:$0xff]  ;;  %v6343_v4 = vld [vmem:[#allocation2 + $0x188] sm:$0xff]  ;;  %v442_v6 = vmul.f32 64.0, %v4825_v0 }
 0x186   :  { %v6346_v8 = vld [vmem:[#allocation2 + $0x160] sm:$0xff] }
 0x187   :  { %v455_v12 = vrot.slane %v454_v10, 2  ;;  %4672 = vpush %v438_v11  ;;  %v6352_v11 = vld [vmem:[#allocation2 + $0x140] sm:$0xff] }
 0x189   :  { %v456_v56 = vadd.f32 %v455_v12, %v454_v10  ;;  %v6349_v10 = vld [vmem:[#allocation2 + $0x168] sm:$0xff] }
 0x18a   :  { %v6355_v12 = vld [vmem:[#allocation2 + $0x148] sm:$0xff] }
 0x18b   :  { %v457_v58 = vrot.slane %v456_v56, 1 }
 0x18d   :  { %v458_v59 = vadd.f32 %v457_v58, %v456_v56  ;;  %v443_v56 = vsub.f32 1.0, %v442_v6  ;;  %v6358_v58 = vld [vmem:[#allocation2 + $0x120] sm:$0xff] }
 0x18f   :  { %4674 = vpush %v458_v59  ;;  %v6361_v59 = vld [vmem:[#allocation2 + $0x128] sm:$0xff] }
 0x19a   :  { %584 = vrot.lane.b32.xlu2 %v6292_v35, %s5718_s29 }
 0x1b8   :  { %s4673_s7 = spop %4672 }
 0x1c0   :  { %s4675_s8 = spop %4674 }
 0x1ed   :  { %v486_v62 = vpop.xlane.xlu0 %485  ;;  %v535_v63 = vpop.xlane.xlu2 %534 }
 0x1ee   :  { %v487_v54 = vrot.slane %v486_v62, 4  ;;  %v536_v53 = vrot.slane %v535_v63, 4 }
 0x1f0   :  { %v488_v13 = vadd.f32 %v487_v54, %v486_v62  ;;  %v537_v51 = vadd.f32 %v536_v53, %v535_v63  ;;  %v6364_v62 = vld [vmem:[#allocation2 + $0x100] sm:$0xff]  ;;  %v6367_v63 = vld [vmem:[#allocation2 + $0x108] sm:$0xff]  ;;  %v444_v54 = vmul.f32 %v4825_v0, %v443_v56 }
 0x1f1   :  { %v6370_v53 = vld [vmem:[#allocation2 + $0xe0] sm:$0xff] }
 0x1f2   :  { %v489_v14 = vrot.slane %v488_v13, 2  ;;  %v538_v17 = vrot.slane %v537_v51, 2 }
 0x1f4   :  { %v490_v55 = vadd.f32 %v489_v14, %v488_v13  ;;  %v539_v27 = vadd.f32 %v538_v17, %v537_v51  ;;  %v6373_v13 = vld [vmem:[#allocation2 + $0xe8] sm:$0xff]  ;;  %v6376_v51 = vld [vmem:[#allocation2 + $0xc0] sm:$0xff] }
 0x1f5   :  { %v502_v18 = vpop.xlane.xlu1 %501  ;;  %v550_v20 = vpop.xlane.xlu2 %549  ;;  %v6379_v14 = vld [vmem:[#allocation2 + $0xc8] sm:$0xff]  ;;  %v6382_v17 = vld [vmem:[#allocation2 + $0xa0] sm:$0xff] }
 0x1f6   :  { %v503_v21 = vrot.slane %v502_v18, 4  ;;  %v551_v22 = vrot.slane %v550_v20, 4  ;;  %v491_v23 = vrot.slane %v490_v55, 1  ;;  %v540_v36 = vrot.slane %v539_v27, 1 }
 0x1f8   :  { %v504_v24 = vadd.f32 %v503_v21, %v502_v18  ;;  %v552_v25 = vadd.f32 %v551_v22, %v550_v20  ;;  %v492_v26 = vadd.f32 %v491_v23, %v490_v55  ;;  %v541_v45 = vadd.f32 %v540_v36, %v539_v27  ;;  %v6385_v18 = vld [vmem:[#allocation2 + $0xa8] sm:$0xff]  ;;  %v6388_v20 = vld [vmem:[#allocation2 + $0x80] sm:$0xff] }
 0x1f9   :  { %v445_v55 = vadd.f32 %v4825_v0, %v444_v54  ;;  %v6391_v21 = vld [vmem:[#allocation2 + $0x88] sm:$0xff]  ;;  %v440_v22 = vstv %s4673_s7 }
 0x1fa   :  { %v505_v28 = vrot.slane %v504_v24, 2  ;;  %v553_v30 = vrot.slane %v552_v25, 2  ;;  %4676 = vpush %v492_v26 }
 0x1fb   :  { %v6394_v23 = vsel %vm446_vm4, %v4825_v0, %v445_v55  ;;  %vm580_vm4 = vcmask 523264  }
 0x1fc   :  { %v506_v32 = vadd.f32 %v505_v28, %v504_v24  ;;  %v554_v33 = vadd.f32 %v553_v30, %v552_v25  ;;  %v460_v24 = vstv %s4675_s8  ;;  %v448_v25 = vmul.f32 %v6394_v23, %v440_v22 }
 0x1fd   :  { %v6314_v34 = vpop.permute.xlu2 %584  ;;  %v461_v26 = vmul.f32 %v460_v24, %v6394_v23 }
 0x1fe   :  { %v6318_v37 = vsel %vm175_vm0, %v4550_v31, %v6314_v34  ;;  %v507_v38 = vrot.slane %v506_v32, 1  ;;  %v555_v39 = vrot.slane %v554_v33, 1 }
 0x1ff   :  { %612 = vmatmul.f32.vlgmr.msra.gmra.mxu3 %v6318_v37  ;;  %652 = vmatmul.f32.vlgmr.msra.gmra.mxu2 %v6318_v37 }
 0x200   :  { %v508_v41 = vadd.f32 %v507_v38, %v506_v32  ;;  %v556_v42 = vadd.f32 %v555_v39, %v554_v33  ;;  %1001 = vmatpush.msra.mxu3 %v6322_v43  ;;  %1041 = vmatpush.msra.mxu2 %v6325_v44 }
 0x202   :  { %4678 = vpush %v508_v41  ;;  %1002 = vmatpush.msra.mxu3 %v6328_v48  ;;  %1042 = vmatpush.msra.mxu2 %v6331_v49 }
 0x203   :  { %4680 = vpush %v541_v45 }
 0x204   :  { %4682 = vpush %v556_v42  ;;  %1003 = vmatpush.msra.mxu3 %v6334_v57  ;;  %1043 = vmatpush.msra.mxu2 %v6337_v60 }
 0x206   :  { %1004 = vmatpush.msra.mxu3 %v6340_v2  ;;  %1044 = vmatpush.msra.mxu2 %v6343_v4 }
 0x208   :  { %1005 = vmatpush.msra.mxu3 %v6346_v8  ;;  %1045 = vmatpush.msra.mxu2 %v6349_v10 }
 0x20a   :  { %1006 = vmatpush.msra.mxu3 %v6352_v11  ;;  %1046 = vmatpush.msra.mxu2 %v6355_v12 }
 0x20c   :  { %1007 = vmatpush.msra.mxu3 %v6358_v58  ;;  %1047 = vmatpush.msra.mxu2 %v6361_v59 }
 0x20e   :  { %1008 = vmatpush.msra.mxu3 %v6364_v62  ;;  %1048 = vmatpush.msra.mxu2 %v6367_v63 }
 0x210   :  { %1009 = vmatpush.msra.mxu3 %v6370_v53  ;;  %1049 = vmatpush.msra.mxu2 %v6373_v13 }
 0x212   :  { %1010 = vmatpush.msra.mxu3 %v6376_v51  ;;  %1050 = vmatpush.msra.mxu2 %v6379_v14 }
 0x214   :  { %1011 = vmatpush.msra.mxu3 %v6382_v17  ;;  %1051 = vmatpush.msra.mxu2 %v6385_v18 }
 0x216   :  { %1012 = vmatpush.msra.mxu3 %v6388_v20  ;;  %1052 = vmatpush.msra.mxu2 %v6391_v21 }
 0x218   :  { %1013 = vmatpush.msra.mxu3 %v5887_v46  ;;  %1053 = vmatpush.msra.mxu2 %v5890_v47  ;;  %v462_v46 = vmul.f32 %v448_v25, %v448_v25 }
 0x21a   :  { %1014 = vmatpush.msra.mxu3 %v5899_v50  ;;  %1054 = vmatpush.msra.mxu2 %v9418_v1  ;;  %v463_v27 = vsub.f32 %v461_v26, %v462_v46 }
 0x21c   :  { %1015 = vmatpush.msra.mxu3 %v9420_v3  ;;  %1055 = vmatpush.msra.mxu2 %v9422_v5  ;;  %v465_v47 = vadd.f32 1e-05, %v463_v27  ;;  %v464_v27 = vsub.f32 %v6292_v35, %v448_v25 }
 0x21e   :  { %1016 = vmatpush.msra.mxu3 %v9424_v7  ;;  %1056 = vmatpush.msra.mxu2 %v9426_v9  ;;  %4826 = vrsqrt.f32 %v465_v47  ;;  %vm472_vm6 = vweird.f32 %v465_v47 }
 0x224   :  { %v4827_v28 = vpop.eup %4826 }
 0x225   :  { %v467_v30 = vmul.f32 %v4827_v28, %v465_v47  ;;  %vm473_vm5 = vweird.f32 %v4827_v28 }
 0x226   :  { %vm474_vm7 = vmor %vm472_vm6, %vm473_vm5  ;;  %vm177_vm5 = vcmask 916480  }
 0x227   :  { %v468_v7 = vmul.f32 %v4827_v28, %v467_v30 }
 0x229   :  { %v469_v41 = vmul.f32 0.5, %v468_v7 }
 0x22b   :  { %s4677_s9 = spop %4676  ;;  %v470_v0 = vsub.f32 1.5, %v469_v41 }
 0x22c   :  { %v494_v50 = vstv %s4677_s9 }
 0x22d   :  { %v495_v1 = vmul.f32 %v494_v50, %v6394_v23  ;;  %v471_v56 = vmul.f32 %v4827_v28, %v470_v0 }
 0x22f   :  { %v512_v5 = vmul.f32 %v495_v1, %v495_v1  ;;  %v475_v46 = vsel %vm474_vm7, %v4827_v28, %v471_v56 }
 0x233   :  { %s4679_s10 = spop %4678 }
 0x234   :  { %v510_v3 = vstv %s4679_s10  ;;  %s4681_s11 = spop %4680 }
 0x235   :  { %v511_v31 = vmul.f32 %v510_v3, %v6394_v23  ;;  %v543_v32 = vstv %s4681_s11  ;;  %s4683_s12 = spop %4682 }
 0x236   :  { %v544_v9 = vmul.f32 %v543_v32, %v6394_v23  ;;  %v558_v33 = vstv %s4683_s12  ;;  %v514_v32 = vsub.f32 %v6292_v35, %v495_v1 }
 0x237   :  { %v513_v36 = vsub.f32 %v511_v31, %v512_v5  ;;  %v559_v39 = vmul.f32 %v558_v33, %v6394_v23  ;;  %v476_v5 = vmul.f32 %v475_v46, %v464_v27  ;;  %v6440_v46 = vld [vmem:[#allocation2 + $0x390] sm:$0xff]  ;;  %v6443_v27 = vld [vmem:[#allocation2 + $0x398] sm:$0xff] }
 0x238   :  { %v560_v38 = vmul.f32 %v544_v9, %v544_v9  ;;  %v562_v28 = vsub.f32 %v6292_v35, %v544_v9  ;;  %9483 = vst [vmem:[#allocation13_spill] sm:$0xff] %v6440_v46 }
 0x239   :  { %v515_v40 = vadd.f32 1e-05, %v513_v36  ;;  %v478_v36 = vmul.f32 0.01, %v476_v5  ;;  %vm477_vm14 = vcmp.ge.f32.partialorder %v476_v5, 0.0  ;;  %9484 = vst [vmem:[#allocation12_spill] sm:$0xff] %v6443_v27 }
 0x23a   :  { %v561_v42 = vsub.f32 %v559_v39, %v560_v38 }
 0x23b   :  { %4828 = vrsqrt.f32 %v515_v40  ;;  %vm522_vm9 = vweird.f32 %v515_v40 }
 0x23c   :  { %v563_v45 = vadd.f32 1e-05, %v561_v42 }
 0x23e   :  { %4830 = vrsqrt.f32 %v563_v45  ;;  %vm570_vm12 = vweird.f32 %v563_v45 }
 0x241   :  { %v4829_v6 = vpop.eup %4828 }
 0x242   :  { %v517_v54 = vmul.f32 %v4829_v6, %v515_v40  ;;  %vm523_vm8 = vweird.f32 %v4829_v6  ;;  %v479_v40 = vsel %vm477_vm14, %v476_v5, %v478_v36  ;;  %v6455_v5 = vld [vmem:[#allocation2 + $0x378] sm:$0xff]  ;;  %v6478_v36 = vld [vmem:[#allocation2 + $0x330] sm:$0xff] }
 0x243   :  { %vm524_vm10 = vmor %vm522_vm9, %vm523_vm8  ;;  %9488 = vst [vmem:[#allocation16_spill] sm:$0xff] %v6455_v5 }
 0x244   :  { %v4831_v55 = vpop.eup %4830  ;;  %v518_v22 = vmul.f32 %v4829_v6, %v517_v54  ;;  %v6422_v54 = vld [vmem:[#allocation2 + $0x3a0] sm:$0xff]  ;;  %9495 = vst [vmem:[#allocation21_spill] sm:$0xff] %v6478_v36 }
 0x245   :  { %v565_v24 = vmul.f32 %v4831_v55, %v563_v45  ;;  %vm571_vm11 = vweird.f32 %v4831_v55 }
 0x246   :  { %v519_v26 = vmul.f32 0.5, %v518_v22  ;;  %vm572_vm13 = vmor %vm570_vm12, %vm571_vm11  ;;  %v6428_v22 = vld [vmem:[#allocation2 + $0x3b0] sm:$0xff] }
 0x247   :  { %v566_v50 = vmul.f32 %v4831_v55, %v565_v24  ;;  %v6434_v24 = vld [vmem:[#allocation2 + $0x380] sm:$0xff] }
 0x248   :  { %v520_v30 = vsub.f32 1.5, %v519_v26  ;;  %v6437_v26 = vld [vmem:[#allocation2 + $0x388] sm:$0xff] }
 0x249   :  { %v567_v3 = vmul.f32 0.5, %v566_v50  ;;  %v6446_v50 = vld [vmem:[#allocation2 + $0x360] sm:$0xff] }
 0x24a   :  { %v521_v31 = vmul.f32 %v4829_v6, %v520_v30  ;;  %9485 = vst [vmem:[#allocation14_spill] sm:$0xff] %v6446_v50  ;;  %v6449_v30 = vld [vmem:[#allocation2 + $0x368] sm:$0xff] }
 0x24b   :  { %v568_v7 = vsub.f32 1.5, %v567_v3  ;;  %9486 = vst [vmem:[#allocation15_spill] sm:$0xff] %v6449_v30  ;;  %v6452_v3 = vld [vmem:[#allocation2 + $0x370] sm:$0xff] }
 0x24c   :  { %v525_v47 = vsel %vm524_vm10, %v4829_v6, %v521_v31  ;;  %9487 = vst [vmem:[#allocation19_spill] sm:$0xff] %v6452_v3  ;;  %v6460_v31 = vld [vmem:[#allocation2 + $0x340] sm:$0xff] }
 0x24d   :  { %v569_v33 = vmul.f32 %v4831_v55, %v568_v7  ;;  %v526_v38 = vmul.f32 %v525_v47, %v514_v32  ;;  %9489 = vst [vmem:[#allocation20_spill] sm:$0xff] %v6460_v31  ;;  %v6463_v32 = vld [vmem:[#allocation2 + $0x348] sm:$0xff]  ;;  %v6466_v7 = vld [vmem:[#allocation2 + $0x350] sm:$0xff]  ;;  %v6469_v47 = vld [vmem:[#allocation2 + $0x358] sm:$0xff] }
 0x24e   :  { %9490 = vst [vmem:[#allocation18_spill] sm:$0xff] %v6463_v32 }
 0x24f   :  { %vm527_vm15 = vcmp.ge.f32.partialorder %v526_v38, 0.0  ;;  %v528_v25 = vmul.f32 0.01, %v526_v38  ;;  %v573_v39 = vsel %vm572_vm13, %v4831_v55, %v569_v33  ;;  %v6425_v55 = vld [vmem:[#allocation2 + $0x3a8] sm:$0xff]  ;;  %9491 = vst [vmem:[#allocation17_spill] sm:$0xff] %v6466_v7  ;;  %v6472_v33 = vld [vmem:[#allocation2 + $0x320] sm:$0xff] }
 0x250   :  { %v574_v41 = vmul.f32 %v573_v39, %v562_v28  ;;  %9492 = vst [vmem:[#allocation24_spill] sm:$0xff] %v6469_v47  ;;  %v6484_v28 = vld [vmem:[#allocation2 + $0x300] sm:$0xff]  ;;  %v6490_v39 = vld [vmem:[#allocation2 + $0x310] sm:$0xff] }
 0x251   :  { %v529_v42 = vsel %vm527_vm15, %v526_v38, %v528_v25  ;;  %9493 = vst [vmem:[#allocation23_spill] sm:$0xff] %v6472_v33  ;;  %v6481_v38 = vld [vmem:[#allocation2 + $0x338] sm:$0xff]  ;;  %v6487_v25 = vld [vmem:[#allocation2 + $0x308] sm:$0xff] }
 0x252   :  { %vm575_vm2 = vcmp.ge.f32.partialorder %v574_v41, 0.0  ;;  %v576_v1 = vmul.f32 0.01, %v574_v41  ;;  %v579_v0 = vsel %vm578_vm1, %v479_v40, %v529_v42  ;;  %9496 = vst [vmem:[#allocation28_spill] sm:$0xff] %v6481_v38  ;;  %v6496_v40 = vld [vmem:[#allocation2 + $0x2e0] sm:$0xff]  ;;  %v6499_v42 = vld [vmem:[#allocation2 + $0x2e8] sm:$0xff] }
 0x253   :  { %9497 = vst [vmem:[#allocation27_spill] sm:$0xff] %v6484_v28 }
 0x254   :  { %v577_v6 = vsel %vm575_vm2, %v574_v41, %v576_v1  ;;  %9498 = vst [vmem:[#allocation26_spill] sm:$0xff] %v6487_v25  ;;  %v6493_v41 = vld [vmem:[#allocation2 + $0x318] sm:$0xff]  ;;  %v6502_v1 = vld [vmem:[#allocation2 + $0x2f0] sm:$0xff] }
 0x255   :  { %v581_v45 = vsel %vm580_vm4, %v579_v0, %v577_v6  ;;  %9499 = vst [vmem:[#allocation25_spill] sm:$0xff] %v6490_v39  ;;  %v6505_v0 = vld [vmem:[#allocation2 + $0x2f8] sm:$0xff]  ;;  %v6508_v6 = vld [vmem:[#allocation2 + $0x2c0] sm:$0xff] }
 0x256   :  { %588 = vrot.lane.b32.xlu2 %v581_v45, %s5718_s29  ;;  %9500 = vst [vmem:[#allocation32_spill] sm:$0xff] %v6493_v41  ;;  %v6511_v45 = vld [vmem:[#allocation2 + $0x2c8] sm:$0xff] }
 0x257   :  { %9501 = vst [vmem:[#allocation31_spill] sm:$0xff] %v6496_v40 }
 0x258   :  { %9502 = vst [vmem:[#allocation30_spill] sm:$0xff] %v6499_v42 }
 0x259   :  { %9503 = vst [vmem:[#allocation29_spill] sm:$0xff] %v6502_v1 }
 0x25a   :  { %9504 = vst [vmem:[#allocation36_spill] sm:$0xff] %v6505_v0 }
 0x25b   :  { %9505 = vst [vmem:[#allocation35_spill] sm:$0xff] %v6508_v6 }
 0x25c   :  { %9506 = vst [vmem:[#allocation34_spill] sm:$0xff] %v6511_v45 }
 0x2b0   :  { %v589_v9 = vpop.permute.xlu2 %588 }
 0x2b1   :  { %v592_v56 = vsel %vm175_vm0, %v6314_v34, %v589_v9  ;;  %v6431_v34 = vld [vmem:[#allocation2 + $0x3b8] sm:$0xff]  ;;  %v6514_v9 = vld [vmem:[#allocation2 + $0x2d0] sm:$0xff] }
 0x2b2   :  { %4551 = vmatmul.msk.f32.vlgmr.msra.gmra.mxu1 %vm177_vm5, %v592_v56  ;;  %4552 = vmatmul.msk.f32.vlgmr.msra.gmra.mxu0 %vm177_vm5, %v592_v56  ;;  %9507 = vst [vmem:[#allocation33_spill] sm:$0xff] %v6514_v9 }
 0x2b3   :  { %4553 = vmatmul.msk.f32.vlgmr.msrb.gmra.mxu3 %vm177_vm5, %v592_v56  ;;  %4554 = vmatmul.msk.f32.vlgmr.msrb.gmra.mxu2 %vm177_vm5, %v592_v56  ;;  %v6517_v56 = vld [vmem:[#allocation2 + $0x2d8] sm:$0xff] }
 0x2b4   :  { %1023 = vmatpush.msra.mxu1 %v6422_v54  ;;  %1063 = vmatpush.msra.mxu0 %v6425_v55  ;;  %9508 = vst [vmem:[#allocation40_spill] sm:$0xff] %v6517_v56 }
 0x2b5   :  { %1103 = vmatpush.msrb.mxu3 %v6428_v22  ;;  %1143 = vmatpush.msrb.mxu2 %v6431_v34 }
 0x2b6   :  { %1024 = vmatpush.msra.mxu1 %v6434_v24  ;;  %1064 = vmatpush.msra.mxu0 %v6437_v26 }
 0x2b7   :  { %1104 = vmatpush.msrb.mxu3 %v6440_v46  ;;  %1144 = vmatpush.msrb.mxu2 %v6443_v27 }
 0x2b8   :  { %1025 = vmatpush.msra.mxu1 %v6446_v50  ;;  %1065 = vmatpush.msra.mxu0 %v6449_v30 }
 0x2b9   :  { %1105 = vmatpush.msrb.mxu3 %v6452_v3  ;;  %1145 = vmatpush.msrb.mxu2 %v6455_v5 }
 0x2ba   :  { %692 = vmatmul.f32.vlgmr.msrb.gmra.mxu1 %v6318_v37  ;;  %732 = vmatmul.f32.vlgmr.msrb.gmra.mxu0 %v6318_v37  ;;  %v6475_v37 = vld [vmem:[#allocation2 + $0x328] sm:$0xff] }
 0x2bb   :  { %1026 = vmatpush.msra.mxu1 %v6460_v31  ;;  %1066 = vmatpush.msra.mxu0 %v6463_v32  ;;  %9494 = vst [vmem:[#allocation22_spill] sm:$0xff] %v6475_v37 }
 0x2bc   :  { %1106 = vmatpush.msrb.mxu3 %v6466_v7  ;;  %1146 = vmatpush.msrb.mxu2 %v6469_v47 }
 0x2bd   :  { %1027 = vmatpush.msra.mxu1 %v6472_v33  ;;  %1067 = vmatpush.msra.mxu0 %v6475_v37 }
 0x2be   :  { %1107 = vmatpush.msrb.mxu3 %v6478_v36  ;;  %1147 = vmatpush.msrb.mxu2 %v6481_v38 }
 0x2bf   :  { %1028 = vmatpush.msra.mxu1 %v6484_v28  ;;  %1068 = vmatpush.msra.mxu0 %v6487_v25 }
 0x2c0   :  { %1108 = vmatpush.msrb.mxu3 %v6490_v39  ;;  %1148 = vmatpush.msrb.mxu2 %v6493_v41 }
 0x2c1   :  { %1029 = vmatpush.msra.mxu1 %v6496_v40  ;;  %1069 = vmatpush.msra.mxu0 %v6499_v42  ;;  %v653_v42 = vpop.f32.mrf.mxu2 }
 0x2c2   :  { %1109 = vmatpush.msrb.mxu3 %v6502_v1  ;;  %1149 = vmatpush.msrb.mxu2 %v6505_v0  ;;  %v6520_v1 = vld [vmem:[#allocation2 + $0x2a0] sm:$0xff]  ;;  %v6523_v0 = vld [vmem:[#allocation2 + $0x2a8] sm:$0xff]  ;;  %v654_v40 = vadd.f32 %v653_v42, %v6255_v61 }
 0x2c3   :  { %1030 = vmatpush.msra.mxu1 %v6508_v6  ;;  %1070 = vmatpush.msra.mxu0 %v6511_v45  ;;  %9509 = vst [vmem:[#allocation39_spill] sm:$0xff] %v6520_v1  ;;  %v6526_v6 = vld [vmem:[#allocation2 + $0x2b0] sm:$0xff]  ;;  %v6529_v45 = vld [vmem:[#allocation2 + $0x2b8] sm:$0xff] }
 0x2c4   :  { %1110 = vmatpush.msrb.mxu3 %v6514_v9  ;;  %1150 = vmatpush.msrb.mxu2 %v6517_v56  ;;  %9510 = vst [vmem:[#allocation38_spill] sm:$0xff] %v6523_v0  ;;  %v6532_v9 = vld [vmem:[#allocation2 + $0x280] sm:$0xff]  ;;  %v6535_v56 = vld [vmem:[#allocation2 + $0x288] sm:$0xff] }
 0x2c5   :  { %1031 = vmatpush.msra.mxu1 %v6520_v1  ;;  %1071 = vmatpush.msra.mxu0 %v6523_v0  ;;  %9511 = vst [vmem:[#allocation37_spill] sm:$0xff] %v6526_v6  ;;  %v6538_v1 = vld [vmem:[#allocation2 + $0x290] sm:$0xff]  ;;  %v6541_v0 = vld [vmem:[#allocation2 + $0x298] sm:$0xff] }
 0x2c6   :  { %1111 = vmatpush.msrb.mxu3 %v6526_v6  ;;  %9512 = vst [vmem:[#allocation44_spill] sm:$0xff] %v6529_v45  ;;  %1151 = vmatpush.msrb.mxu2 %v6529_v45  ;;  %v6544_v6 = vld [vmem:[#allocation2 + $0x260] sm:$0xff]  ;;  %v6547_v45 = vld [vmem:[#allocation2 + $0x268] sm:$0xff] }
 0x2c7   :  { %9513 = vst [vmem:[#allocation43_spill] sm:$0xff] %v6532_v9  ;;  %1032 = vmatpush.msra.mxu1 %v6532_v9  ;;  %1072 = vmatpush.msra.mxu0 %v6535_v56  ;;  %v6550_v9 = vld [vmem:[#allocation2 + $0x270] sm:$0xff] }
 0x2c8   :  { %9514 = vst [vmem:[#allocation42_spill] sm:$0xff] %v6535_v56  ;;  %1112 = vmatpush.msrb.mxu3 %v6538_v1  ;;  %1152 = vmatpush.msrb.mxu2 %v6541_v0  ;;  %v6553_v56 = vld [vmem:[#allocation2 + $0x278] sm:$0xff] }
 0x2c9   :  { %9515 = vst [vmem:[#allocation41_spill] sm:$0xff] %v6538_v1  ;;  %1033 = vmatpush.msra.mxu1 %v6544_v6  ;;  %1073 = vmatpush.msra.mxu0 %v6547_v45  ;;  %v6556_v1 = vld [vmem:[#allocation2 + $0x240] sm:$0xff] }
 0x2ca   :  { %9516 = vst [vmem:[#allocation48_spill] sm:$0xff] %v6541_v0  ;;  %1113 = vmatpush.msrb.mxu3 %v6550_v9  ;;  %1153 = vmatpush.msrb.mxu2 %v6553_v56  ;;  %v6559_v0 = vld [vmem:[#allocation2 + $0x248] sm:$0xff] }
 0x2cb   :  { %9517 = vst [vmem:[#allocation47_spill] sm:$0xff] %v6544_v6  ;;  %1034 = vmatpush.msra.mxu1 %v6556_v1  ;;  %1074 = vmatpush.msra.mxu0 %v6559_v0  ;;  %v6562_v6 = vld [vmem:[#allocation2 + $0x250] sm:$0xff] }
 0x2cc   :  { %9518 = vst [vmem:[#allocation46_spill] sm:$0xff] %v6547_v45  ;;  %1114 = vmatpush.msrb.mxu3 %v6562_v6  ;;  %v6565_v45 = vld [vmem:[#allocation2 + $0x258] sm:$0xff] }
 0x2cd   :  { %9519 = vst [vmem:[#allocation45_spill] sm:$0xff] %v6550_v9  ;;  %1154 = vmatpush.msrb.mxu2 %v6565_v45  ;;  %v6568_v9 = vld [vmem:[#allocation2 + $0x220] sm:$0xff] }
 0x2ce   :  { %9520 = vst [vmem:[#allocation52_spill] sm:$0xff] %v6553_v56  ;;  %1035 = vmatpush.msra.mxu1 %v6568_v9  ;;  %v6571_v56 = vld [vmem:[#allocation2 + $0x228] sm:$0xff] }
 0x2cf   :  { %9521 = vst [vmem:[#allocation51_spill] sm:$0xff] %v6556_v1  ;;  %1075 = vmatpush.msra.mxu0 %v6571_v56  ;;  %v6574_v1 = vld [vmem:[#allocation2 + $0x230] sm:$0xff] }
 0x2d0   :  { %9522 = vst [vmem:[#allocation50_spill] sm:$0xff] %v6559_v0  ;;  %1115 = vmatpush.msrb.mxu3 %v6574_v1  ;;  %v6577_v0 = vld [vmem:[#allocation2 + $0x238] sm:$0xff] }
 0x2d1   :  { %9523 = vst [vmem:[#allocation49_spill] sm:$0xff] %v6562_v6  ;;  %1155 = vmatpush.msrb.mxu2 %v6577_v0  ;;  %v6580_v6 = vld [vmem:[#allocation2 + $0x200] sm:$0xff] }
 0x2d2   :  { %9524 = vst [vmem:[#allocation56_spill] sm:$0xff] %v6565_v45  ;;  %1036 = vmatpush.msra.mxu1 %v6580_v6  ;;  %v6583_v45 = vld [vmem:[#allocation2 + $0x208] sm:$0xff] }
 0x2d3   :  { %9525 = vst [vmem:[#allocation55_spill] sm:$0xff] %v6568_v9  ;;  %1076 = vmatpush.msra.mxu0 %v6583_v45  ;;  %v6586_v9 = vld [vmem:[#allocation2 + $0x1f0] sm:$0xff] }
 0x2d4   :  { %9526 = vst [vmem:[#allocation54_spill] sm:$0xff] %v6571_v56  ;;  %1081 = vmatpush.msrb.mxu1 %v6586_v9  ;;  %v6589_v56 = vld [vmem:[#allocation2 + $0x1f8] sm:$0xff] }
 0x2d5   :  { %9527 = vst [vmem:[#allocation53_spill] sm:$0xff] %v6574_v1  ;;  %1121 = vmatpush.msrb.mxu0 %v6589_v56  ;;  %v6592_v1 = vld [vmem:[#allocation2 + $0x210] sm:$0xff] }
 0x2d6   :  { %9528 = vst [vmem:[#allocation60_spill] sm:$0xff] %v6577_v0  ;;  %1116 = vmatpush.msrb.mxu3 %v6592_v1  ;;  %v6595_v0 = vld [vmem:[#allocation2 + $0x218] sm:$0xff] }
 0x2d7   :  { %9529 = vst [vmem:[#allocation59_spill] sm:$0xff] %v6580_v6  ;;  %1156 = vmatpush.msrb.mxu2 %v6595_v0  ;;  %v6598_v6 = vld [vmem:[#allocation2 + $0x1d0] sm:$0xff] }
 0x2d8   :  { %9530 = vst [vmem:[#allocation58_spill] sm:$0xff] %v6583_v45  ;;  %1082 = vmatpush.msrb.mxu1 %v6598_v6  ;;  %v6601_v45 = vld [vmem:[#allocation2 + $0x1d8] sm:$0xff] }
 0x2d9   :  { %9531 = vst [vmem:[#allocation57_spill] sm:$0xff] %v6586_v9  ;;  %1122 = vmatpush.msrb.mxu0 %v6601_v45  ;;  %v6604_v9 = vld [vmem:[#allocation2 + $0x1b0] sm:$0xff] }
 0x2da   :  { %9532 = vst [vmem:[#allocation63_spill] sm:$0xff] %v6589_v56  ;;  %1083 = vmatpush.msrb.mxu1 %v6604_v9  ;;  %v6607_v56 = vld [vmem:[#allocation2 + $0x1b8] sm:$0xff] }
 0x2db   :  { %9533 = vst [vmem:[#allocation62_spill] sm:$0xff] %v6592_v1  ;;  %1123 = vmatpush.msrb.mxu0 %v6607_v56  ;;  %v6610_v1 = vld [vmem:[#allocation2 + $0x190] sm:$0xff] }
 0x2dc   :  { %9534 = vst [vmem:[#allocation61_spill] sm:$0xff] %v6595_v0  ;;  %1084 = vmatpush.msrb.mxu1 %v6610_v1  ;;  %v6613_v0 = vld [vmem:[#allocation2 + $0x198] sm:$0xff] }
 0x2dd   :  { %9535 = vst [vmem:[#allocation65_spill] sm:$0xff] %v6598_v6  ;;  %1124 = vmatpush.msrb.mxu0 %v6613_v0  ;;  %v6616_v6 = vld [vmem:[#allocation2 + $0x170] sm:$0xff] }
 0x2de   :  { %9536 = vst [vmem:[#allocation64_spill] sm:$0xff] %v6601_v45  ;;  %1085 = vmatpush.msrb.mxu1 %v6616_v6  ;;  %v6619_v45 = vld [vmem:[#allocation2 + $0x178] sm:$0xff] }
 0x2df   :  { %9537 = vst [vmem:[#allocation66_spill] sm:$0xff] %v6604_v9  ;;  %1125 = vmatpush.msrb.mxu0 %v6619_v45  ;;  %v6622_v9 = vld [vmem:[#allocation2 + $0x150] sm:$0xff] }
 0x2e0   :  { %9538 = vst [vmem:[#allocation67_spill] sm:$0xff] %v6607_v56  ;;  %1086 = vmatpush.msrb.mxu1 %v6622_v9  ;;  %v6625_v56 = vld [vmem:[#allocation2 + $0x158] sm:$0xff] }
 0x2e1   :  { %9539 = vst [vmem:[#allocation68_spill] sm:$0xff] %v6610_v1  ;;  %1126 = vmatpush.msrb.mxu0 %v6625_v56  ;;  %v6628_v1 = vld [vmem:[#allocation2 + $0x130] sm:$0xff] }
 0x2e2   :  { %9540 = vst [vmem:[#allocation69_spill] sm:$0xff] %v6613_v0  ;;  %1087 = vmatpush.msrb.mxu1 %v6628_v1  ;;  %v6631_v0 = vld [vmem:[#allocation2 + $0x138] sm:$0xff] }
 0x2e3   :  { %9541 = vst [vmem:[#allocation70_spill] sm:$0xff] %v6616_v6  ;;  %1127 = vmatpush.msrb.mxu0 %v6631_v0  ;;  %v6634_v6 = vld [vmem:[#allocation2 + $0x110] sm:$0xff] }
 0x2e4   :  { %9542 = vst [vmem:[#allocation71_spill] sm:$0xff] %v6619_v45  ;;  %1088 = vmatpush.msrb.mxu1 %v6634_v6  ;;  %v6637_v45 = vld [vmem:[#allocation2 + $0x118] sm:$0xff] }
 0x2e5   :  { %9543 = vst [vmem:[#allocation72_spill] sm:$0xff] %v6622_v9  ;;  %1128 = vmatpush.msrb.mxu0 %v6637_v45  ;;  %v6640_v9 = vld [vmem:[#allocation2 + $0xf0] sm:$0xff] }
 0x2e6   :  { %9544 = vst [vmem:[#allocation73_spill] sm:$0xff] %v6625_v56  ;;  %1089 = vmatpush.msrb.mxu1 %v6640_v9  ;;  %v6643_v56 = vld [vmem:[#allocation2 + $0xf8] sm:$0xff] }
 0x2e7   :  { %9545 = vst [vmem:[#allocation74_spill] sm:$0xff] %v6628_v1  ;;  %1129 = vmatpush.msrb.mxu0 %v6643_v56  ;;  %v6646_v1 = vld [vmem:[#allocation2 + $0xd0] sm:$0xff] }
 0x2e8   :  { %9546 = vst [vmem:[#allocation75_spill] sm:$0xff] %v6631_v0  ;;  %1090 = vmatpush.msrb.mxu1 %v6646_v1  ;;  %v6649_v0 = vld [vmem:[#allocation2 + $0xd8] sm:$0xff] }
 0x2e9   :  { %9547 = vst [vmem:[#allocation76_spill] sm:$0xff] %v6634_v6  ;;  %1130 = vmatpush.msrb.mxu0 %v6649_v0  ;;  %v6652_v6 = vld [vmem:[#allocation2 + $0xb0] sm:$0xff] }
 0x2ea   :  { %9548 = vst [vmem:[#allocation77_spill] sm:$0xff] %v6637_v45  ;;  %1091 = vmatpush.msrb.mxu1 %v6652_v6  ;;  %v6655_v45 = vld [vmem:[#allocation2 + $0xb8] sm:$0xff] }
 0x2eb   :  { %9549 = vst [vmem:[#allocation78_spill] sm:$0xff] %v6640_v9  ;;  %1131 = vmatpush.msrb.mxu0 %v6655_v45  ;;  %v6658_v9 = vld [vmem:[#allocation2 + $0x90] sm:$0xff] }
 0x2ec   :  { %9550 = vst [vmem:[#allocation79_spill] sm:$0xff] %v6643_v56  ;;  %1092 = vmatpush.msrb.mxu1 %v6658_v9  ;;  %v6661_v56 = vld [vmem:[#allocation2 + $0x98] sm:$0xff] }
 0x2ed   :  { %9551 = vst [vmem:[#allocation80_spill] sm:$0xff] %v6646_v1  ;;  %1132 = vmatpush.msrb.mxu0 %v6661_v56  ;;  %v6664_v1 = vld [vmem:[#allocation2 + $0x70] sm:$0xff] }
 0x2ee   :  { %9552 = vst [vmem:[#allocation81_spill] sm:$0xff] %v6649_v0  ;;  %1093 = vmatpush.msrb.mxu1 %v6664_v1  ;;  %v6667_v0 = vld [vmem:[#allocation2 + $0x78] sm:$0xff] }
 0x2ef   :  { %9553 = vst [vmem:[#allocation82_spill] sm:$0xff] %v6652_v6  ;;  %1133 = vmatpush.msrb.mxu0 %v6667_v0  ;;  %v6670_v6 = vld [vmem:[#allocation2 + $0x50] sm:$0xff] }
 0x2f0   :  { %9554 = vst [vmem:[#allocation83_spill] sm:$0xff] %v6655_v45  ;;  %1094 = vmatpush.msrb.mxu1 %v6670_v6  ;;  %v6673_v45 = vld [vmem:[#allocation2 + $0x58] sm:$0xff] }
 0x2f1   :  { %9555 = vst [vmem:[#allocation84_spill] sm:$0xff] %v6658_v9  ;;  %1134 = vmatpush.msrb.mxu0 %v6673_v45  ;;  %v6676_v9 = vld [vmem:[#allocation2 + $0x30] sm:$0xff] }
 0x2f2   :  { %9556 = vst [vmem:[#allocation85_spill] sm:$0xff] %v6661_v56  ;;  %1095 = vmatpush.msrb.mxu1 %v6676_v9  ;;  %v6679_v56 = vld [vmem:[#allocation2 + $0x38] sm:$0xff] }
 0x2f3   :  { %9557 = vst [vmem:[#allocation86_spill] sm:$0xff] %v6664_v1  ;;  %1135 = vmatpush.msrb.mxu0 %v6679_v56  ;;  %v6682_v1 = vld [vmem:[#allocation2 + $0x10] sm:$0xff] }
 0x2f4   :  { %9558 = vst [vmem:[#allocation87_spill] sm:$0xff] %v6667_v0  ;;  %1096 = vmatpush.msrb.mxu1 %v6682_v1  ;;  %v6685_v0 = vld [vmem:[#allocation2 + $0x18] sm:$0xff] }
 0x2f5   :  { %9559 = vst [vmem:[#allocation88_spill] sm:$0xff] %v6670_v6  ;;  %1136 = vmatpush.msrb.mxu0 %v6685_v0  ;;  %v613_v6 = vpop.f32.mrf.mxu3 }
 0x2f6   :  { %9560 = vst [vmem:[#allocation89_spill] sm:$0xff] %v6673_v45  ;;  %v614_v45 = vadd.f32 %v613_v6, %v6257_v52 }
 0x2f7   :  { %9561 = vst [vmem:[#allocation90_spill] sm:$0xff] %v6676_v9 }
 0x2f8   :  { %9562 = vst [vmem:[#allocation91_spill] sm:$0xff] %v6679_v56 }
 0x2f9   :  { %9563 = vst [vmem:[#allocation92_spill] sm:$0xff] %v6682_v1 }
 0x2fa   :  { %9564 = vst [vmem:[#allocation93_spill] sm:$0xff] %v6685_v0 }
 0x32f   :  { %v633_v41 = vpop.f32.mrf.mxu1  ;;  %v673_v9 = vpop.f32.mrf.mxu0 }
 0x330   :  { %v634_v39 = vadd.f32 %v633_v41, %v614_v45  ;;  %v674_v25 = vadd.f32 %v673_v9, %v654_v40 }
 0x332   :  { %v4555_v28 = vmul.f32 -1.442695, %v634_v39  ;;  %v4556_v56 = vmul.f32 -1.442695, %v674_v25 }
 0x334   :  { %4832 = vpow2.f32 %v4555_v28 }
 0x335   :  { %4834 = vpow2.f32 %v4556_v56 }
 0x336   :  { %v713_v37 = vpop.f32.mrf.mxu3  ;;  %v753_v33 = vpop.f32.mrf.mxu2 }
 0x337   :  { %v693_v38 = vpop.f32.mrf.mxu1  ;;  %v733_v1 = vpop.f32.mrf.mxu0 }
 0x338   :  { %v694_v36 = vadd.f32 %v693_v38, %v6263_v16  ;;  %v734_v0 = vadd.f32 %v733_v1, %v6261_v15 }
 0x33a   :  { %v4833_v47 = vpop.eup %4832  ;;  %v714_v6 = vadd.f32 %v713_v37, %v694_v36  ;;  %v754_v52 = vadd.f32 %v753_v33, %v734_v0 }
 0x33b   :  { %v4835_v42 = vpop.eup %4834  ;;  %v768_v40 = vadd.f32 1.0, %v4833_v47 }
 0x33c   :  { %v769_v61 = vadd.f32 1.0, %v4835_v42  ;;  %v4557_v7 = vmul.f32 -1.442695, %v714_v6  ;;  %v4558_v41 = vmul.f32 -1.442695, %v754_v52 }
 0x33d   :  { %vm777_vm12 = vweird.f32 %v768_v40 }
 0x33e   :  { %4836 = vrcp.f32 %v769_v61  ;;  %vm792_vm8 = vweird.f32 %v769_v61 }
 0x33f   :  { %4838 = vpow2.f32 %v4557_v7 }
 0x340   :  { %4840 = vpow2.f32 %v4558_v41 }
 0x341   :  { %4842 = vrcp.f32 %v768_v40 }
 0x344   :  { %v4837_v28 = vpop.eup %4836 }
 0x345   :  { %v4839_v25 = vpop.eup %4838  ;;  %v788_v1 = vmul.f32 %v4837_v28, %v769_v61  ;;  %vm793_vm6 = vweird.f32 %v4837_v28 }
 0x346   :  { %v4841_v39 = vpop.eup %4840  ;;  %v770_v9 = vadd.f32 1.0, %v4839_v25  ;;  %v798_v25 = vand.u32 2147483648, %v769_v61  ;;  %vm6692_vm10 = vmor %vm792_vm8, %vm793_vm6 }
 0x347   :  { %v4843_v38 = vpop.eup %4842  ;;  %v771_v45 = vadd.f32 1.0, %v4841_v39  ;;  %v789_v37 = vsub.f32 1.0, %v788_v1  ;;  %v796_v39 = vand.u32 2147483647, %v769_v61 }
 0x348   :  { %v773_v56 = vmul.f32 %v4843_v38, %v768_v40  ;;  %vm778_vm9 = vweird.f32 %v4843_v38  ;;  %v799_v61 = vor.u32 1.1754944e-38, %v798_v25 }
 0x349   :  { %4844 = vrcp.f32 %v771_v45  ;;  %v790_v0 = vmul.f32 %v4837_v28, %v789_v37  ;;  %v828_v42 = vand.u32 2147483648, %v771_v45  ;;  %v826_v16 = vand.u32 2147483647, %v771_v45  ;;  %vm779_vm15 = vmor %vm777_vm12, %vm778_vm9 }
 0x34a   :  { %4846 = vrcp.f32 %v770_v9  ;;  %v774_v33 = vsub.f32 1.0, %v773_v56  ;;  %vm822_vm11 = vweird.f32 %v771_v45  ;;  %v783_v37 = vand.u32 2147483648, %v768_v40 }
 0x34b   :  { %v791_v41 = vadd.f32 %v4837_v28, %v790_v0  ;;  %v781_v0 = vand.u32 2147483647, %v768_v40  ;;  %vm827_vm14 = vcmp.eq.f32.partialorder %v826_v16, 8.507059e+37  ;;  %vm797_vm2 = vcmp.eq.f32.partialorder %v796_v39, 8.507059e+37 }
 0x34c   :  { %v775_v6 = vmul.f32 %v4843_v38, %v774_v33  ;;  %v829_v33 = vor.u32 1.1754944e-38, %v828_v42  ;;  %v784_v50 = vor.u32 1.1754944e-38, %v783_v37  ;;  %vm807_vm9 = vweird.f32 %v770_v9 }
 0x34d   :  { %vm782_vm6 = vcmp.eq.f32.partialorder %v781_v0, 8.507059e+37 }
 0x34e   :  { %v776_v31 = vadd.f32 %v4843_v38, %v775_v6 }
 0x34f   :  { %v4845_v36 = vpop.eup %4844 }
 0x350   :  { %v818_v52 = vmul.f32 %v4845_v36, %v771_v45  ;;  %v4847_v47 = vpop.eup %4846  ;;  %vm823_vm7 = vweird.f32 %v4845_v36  ;;  %v780_v3 = vsel %vm779_vm15, %v4843_v38, %v776_v31  ;;  %v811_v31 = vand.u32 2147483647, %v770_v9 }
 0x351   :  { %v803_v32 = vmul.f32 %v4847_v47, %v770_v9  ;;  %vm824_vm13 = vmor %vm822_vm11, %vm823_vm7  ;;  %v785_v27 = vsel %vm782_vm6, %v784_v50, %v780_v3  ;;  %vm839_vm7 = vcmp.lt.s32.totalorder %v6284_v19, 64  ;;  %vm808_vm8 = vweird.f32 %v4847_v47 }
 0x352   :  { %v819_v7 = vsub.f32 1.0, %v818_v52  ;;  %v795_v52 = vsel %vm6692_vm10, %v4837_v28, %v791_v41  ;;  %vm809_vm10 = vmor %vm807_vm9, %vm808_vm8  ;;  %vm812_vm11 = vcmp.eq.f32.partialorder %v811_v31, 8.507059e+37 }
 0x353   :  { %v804_v6 = vsub.f32 1.0, %v803_v32 }
 0x354   :  { %v820_v15 = vmul.f32 %v4845_v36, %v819_v7 }
 0x355   :  { %v805_v46 = vmul.f32 %v4847_v47, %v804_v6 }
 0x356   :  { %v821_v56 = vadd.f32 %v4845_v36, %v820_v15  ;;  %v800_v15 = vsel %vm797_vm2, %v799_v61, %v795_v52 }
 0x357   :  { %v834_v40 = vmul.f32 %v800_v15, %v6290_v29  ;;  %v806_v16 = vadd.f32 %v4847_v47, %v805_v46 }
 0x358   :  { %v825_v7 = vsel %vm824_vm13, %v4845_v36, %v821_v56  ;;  %v813_v36 = vand.u32 2147483648, %v770_v9 }
 0x359   :  { %v830_v5 = vsel %vm827_vm14, %v829_v33, %v825_v7  ;;  %v810_v50 = vsel %vm809_vm10, %v4847_v47, %v806_v16 }
 0x35a   :  { %v832_v30 = vmul.f32 2.0, %v830_v5 }
 0x35c   :  { %v4559_v45 = vadd.f32 -1.0, %v832_v30  ;;  %v814_v30 = vor.u32 1.1754944e-38, %v813_v36 }
 0x35e   :  { %v835_v42 = vmul.f32 %v4559_v45, %v785_v27  ;;  %v815_v27 = vsel %vm812_vm11, %v814_v30, %v810_v50 }
 0x360   :  { %v836_v28 = vadd.f32 %v835_v42, %v834_v40 }
 0x362   :  { %4848 = vtanh.f32 %v836_v28  ;;  %v6703_v5 = vsel %vm839_vm7, %v836_v28, %v6290_v29 }
 0x368   :  { %v4849_v3 = vpop.eup %4848 }
 0x369   :  { %v838_v32 = vmul.f32 %v4849_v3, %v815_v27 }
 0x36b   :  { %v6708_v46 = vsel %vm839_vm7, %v838_v32, %v6292_v35 }
 0x36c   :  { %937 = vrot.lane.b32.xlu2 %v6708_v46, %s5716_s2  ;;  %888 = vrot.lane.b32.xlu0 %v6708_v46, %s5717_s28  ;;  %v856_v29 = vmul.f32 %v6708_v46, %v6708_v46  ;;  %v844_v38 = vsel %vm429_vm3, %v6708_v46, 0.0 }
 0x36e   :  { %904 = vrot.lane.b32.xlu1 %v856_v29, %s5717_s28  ;;  %v857_v35 = vsel %vm429_vm3, %v856_v29, 0.0 }
 0x374   :  { %952 = vrot.lane.b32.xlu2 %v856_v29, %s5716_s2 }
 0x396   :  { %845 = vadd.xlane.f32.xlu0 %v844_v38 }
 0x39d   :  { %858 = vadd.xlane.f32.xlu2 %v857_v35 }
 0x3c6   :  { %v938_v9 = vpop.permute.xlu2 %937 }
 0x3c7   :  { %v940_v47 = vsel %vm429_vm3, %v938_v9, 0.0 }
 0x3c8   :  { %941 = vadd.xlane.f32.xlu2 %v940_v47 }
 0x3ce   :  { %v953_v56 = vpop.permute.xlu2 %952 }
 0x3cf   :  { %v955_v37 = vsel %vm429_vm3, %v953_v56, 0.0 }
 0x3de   :  { %v889_v41 = vpop.permute.xlu0 %888 }
 0x3df   :  { %v891_v39 = vsel %vm429_vm3, %v889_v41, 0.0 }
 0x3e0   :  { %892 = vadd.xlane.f32.xlu1 %v891_v39  ;;  %v905_v25 = vpop.permute.xlu1 %904 }
 0x3e1   :  { %v907_v1 = vsel %vm429_vm3, %v905_v25, 0.0 }
 0x3e2   :  { %908 = vadd.xlane.f32.xlu0 %v907_v1 }
 0x3e8   :  { %956 = vadd.xlane.f32.xlu1 %v955_v37 }
 0x3f6   :  { %989 = vrot.lane.b32.xlu0 %v6708_v46, %s5718_s29 }
 0x409   :  { %v846_v33 = vpop.xlane.xlu0 %845 }
 0x40a   :  { %v847_v0 = vrot.slane %v846_v33, 4 }
 0x40c   :  { %v848_v52 = vadd.f32 %v847_v0, %v846_v33 }
 0x40e   :  { %v849_v7 = vrot.slane %v848_v52, 2 }
 0x410   :  { %v859_v61 = vpop.xlane.xlu2 %858  ;;  %v850_v6 = vadd.f32 %v849_v7, %v848_v52 }
 0x411   :  { %v860_v15 = vrot.slane %v859_v61, 4 }
 0x412   :  { %v851_v45 = vrot.slane %v850_v6, 1 }
 0x413   :  { %v861_v40 = vadd.f32 %v860_v15, %v859_v61 }
 0x414   :  { %v852_v42 = vadd.f32 %v851_v45, %v850_v6 }
 0x415   :  { %v862_v28 = vrot.slane %v861_v40, 2 }
 0x416   :  { %4684 = vpush %v852_v42 }
 0x417   :  { %v863_v16 = vadd.f32 %v862_v28, %v861_v40 }
 0x419   :  { %v864_v36 = vrot.slane %v863_v16, 1 }
 0x41b   :  { %v865_v31 = vadd.f32 %v864_v36, %v863_v16  ;;  %v4560_v36 = vld [vmem:[%s8945_s0 + $0x4] sm:$0x3] }
 0x41d   :  { %4686 = vpush %v865_v31 }
 0x43b   :  { %v942_v50 = vpop.xlane.xlu2 %941 }
 0x43c   :  { %v943_v30 = vrot.slane %v942_v50, 4 }
 0x43e   :  { %v944_v3 = vadd.f32 %v943_v30, %v942_v50 }
 0x440   :  { %v945_v29 = vrot.slane %v944_v3, 2 }
 0x442   :  { %v946_v39 = vadd.f32 %v945_v29, %v944_v3 }
 0x444   :  { %v947_v52 = vrot.slane %v946_v39, 1 }
 0x446   :  { %v948_v40 = vadd.f32 %v947_v52, %v946_v39 }
 0x447   :  { %s4685_s15 = spop %4684 }
 0x44e   :  { %s4687_s16 = spop %4686 }
 0x453   :  { %v893_v27 = vpop.xlane.xlu1 %892 }
 0x454   :  { %v894_v32 = vrot.slane %v893_v27, 4 }
 0x455   :  { %v909_v38 = vpop.xlane.xlu0 %908 }
 0x456   :  { %v895_v35 = vadd.f32 %v894_v32, %v893_v27  ;;  %v910_v9 = vrot.slane %v909_v38, 4 }
 0x458   :  { %v896_v47 = vrot.slane %v895_v35, 2  ;;  %v911_v41 = vadd.f32 %v910_v9, %v909_v38 }
 0x45a   :  { %v912_v25 = vrot.slane %v911_v41, 2  ;;  %v897_v1 = vadd.f32 %v896_v47, %v895_v35 }
 0x45b   :  { %v957_v56 = vpop.xlane.xlu1 %956 }
 0x45c   :  { %v958_v37 = vrot.slane %v957_v56, 4  ;;  %v898_v33 = vrot.slane %v897_v1, 1  ;;  %v913_v0 = vadd.f32 %v912_v25, %v911_v41 }
 0x45e   :  { %v959_v7 = vadd.f32 %v958_v37, %v957_v56  ;;  %v899_v61 = vadd.f32 %v898_v33, %v897_v1  ;;  %v914_v6 = vrot.slane %v913_v0, 1 }
 0x460   :  { %v960_v15 = vrot.slane %v959_v7, 2  ;;  %4688 = vpush %v899_v61  ;;  %v915_v45 = vadd.f32 %v914_v6, %v913_v0 }
 0x462   :  { %4690 = vpush %v915_v45  ;;  %v961_v42 = vadd.f32 %v960_v15, %v959_v7 }
 0x463   :  { %4692 = vpush %v948_v40 }
 0x464   :  { %v962_v28 = vrot.slane %v961_v42, 1 }
 0x466   :  { %v963_v16 = vadd.f32 %v962_v28, %v961_v42 }
 0x468   :  { %4694 = vpush %v963_v16  ;;  %v6730_v31 = vpop.permute.xlu0 %989 }
 0x469   :  { %v6734_v50 = vsel %vm175_vm0, %v4560_v36, %v6730_v31 }
 0x46a   :  { %1017 = vmatmul.f32.vlgmr.msra.gmra.mxu3 %v6734_v50  ;;  %1057 = vmatmul.f32.vlgmr.msra.gmra.mxu2 %v6734_v50 }
 0x46b   :  { %1406 = vmatpush.msra.mxu3 %v6322_v43  ;;  %1446 = vmatpush.msra.mxu2 %v6325_v44  ;;  %v854_v43 = vstv %s4685_s15  ;;  %v867_v44 = vstv %s4687_s16 }
 0x46d   :  { %1407 = vmatpush.msra.mxu3 %v6328_v48  ;;  %1447 = vmatpush.msra.mxu2 %v6331_v49  ;;  %v6761_v48 = vmul.f32 %v854_v43, %v6394_v23  ;;  %v868_v49 = vmul.f32 %v867_v44, %v6394_v23 }
 0x46f   :  { %1408 = vmatpush.msra.mxu3 %v6334_v57  ;;  %1448 = vmatpush.msra.mxu2 %v6337_v60  ;;  %v6766_v57 = vld [vmem:[#allocation2 + $0x60] sm:$0xff]  ;;  %v6769_v60 = vld [vmem:[#allocation2 + $0x68] sm:$0xff]  ;;  %v871_v45 = vsub.f32 %v6708_v46, %v6761_v48 }
 0x471   :  { %1409 = vmatpush.msra.mxu3 %v6340_v2  ;;  %1449 = vmatpush.msra.mxu2 %v6343_v4  ;;  %v869_v2 = vmul.f32 %v6761_v48, %v6761_v48  ;;  %v6774_v4 = vld [vmem:[#allocation2 + $0x40] sm:$0xff] }
 0x473   :  { %1410 = vmatpush.msra.mxu3 %v6346_v8  ;;  %1450 = vmatpush.msra.mxu2 %v6349_v10  ;;  %v6777_v8 = vld [vmem:[#allocation2 + $0x48] sm:$0xff]  ;;  %v870_v10 = vsub.f32 %v868_v49, %v869_v2 }
 0x475   :  { %1411 = vmatpush.msra.mxu3 %v6352_v11  ;;  %1451 = vmatpush.msra.mxu2 %v6355_v12  ;;  %v6780_v11 = vld [vmem:[#allocation2 + $0x20] sm:$0xff]  ;;  %v6783_v12 = vld [vmem:[#allocation2 + $0x28] sm:$0xff] }
 0x477   :  { %1412 = vmatpush.msra.mxu3 %v6358_v58  ;;  %1452 = vmatpush.msra.mxu2 %v6361_v59  ;;  %v6786_v58 = vld [vmem:[#allocation2] sm:$0xff]  ;;  %v6789_v59 = vld [vmem:[#allocation2 + $0x8] sm:$0xff] }
 0x479   :  { %1413 = vmatpush.msra.mxu3 %v6364_v62  ;;  %1453 = vmatpush.msra.mxu2 %v6367_v63  ;;  %v872_v62 = vadd.f32 1e-05, %v870_v10 }
 0x47b   :  { %1414 = vmatpush.msra.mxu3 %v6370_v53  ;;  %1454 = vmatpush.msra.mxu2 %v6373_v13  ;;  %4850 = vrsqrt.f32 %v872_v62  ;;  %vm879_vm14 = vweird.f32 %v872_v62 }
 0x47d   :  { %1415 = vmatpush.msra.mxu3 %v6376_v51  ;;  %1455 = vmatpush.msra.mxu2 %v6379_v14 }
 0x47f   :  { %1416 = vmatpush.msra.mxu3 %v6382_v17  ;;  %1456 = vmatpush.msra.mxu2 %v6385_v18 }
 0x481   :  { %1417 = vmatpush.msra.mxu3 %v6388_v20  ;;  %1457 = vmatpush.msra.mxu2 %v6391_v21  ;;  %v4851_v13 = vpop.eup %4850 }
 0x482   :  { %v874_v20 = vmul.f32 %v4851_v13, %v872_v62  ;;  %vm880_vm12 = vweird.f32 %v4851_v13 }
 0x483   :  { %1418 = vmatpush.msra.mxu3 %v6766_v57  ;;  %1458 = vmatpush.msra.mxu2 %v6769_v60  ;;  %vm881_vm15 = vmor %vm879_vm14, %vm880_vm12 }
 0x484   :  { %v875_v32 = vmul.f32 %v4851_v13, %v874_v20  ;;  %v9568_v20 = vld [vmem:[#allocation12_spill] sm:$0xff] }
 0x485   :  { %1419 = vmatpush.msra.mxu3 %v6774_v4  ;;  %1459 = vmatpush.msra.mxu2 %v6777_v8 }
 0x486   :  { %v876_v9 = vmul.f32 0.5, %v875_v32  ;;  %v9579_v32 = vld [vmem:[#allocation21_spill] sm:$0xff] }
 0x487   :  { %1420 = vmatpush.msra.mxu3 %v6780_v11  ;;  %1460 = vmatpush.msra.mxu2 %v6783_v12 }
 0x488   :  { %v877_v25 = vsub.f32 1.5, %v876_v9  ;;  %v9584_v9 = vld [vmem:[#allocation32_spill] sm:$0xff] }
 0x489   :  { %1421 = vmatpush.msra.mxu3 %v6786_v58  ;;  %1461 = vmatpush.msra.mxu2 %v6789_v59 }
 0x48a   :  { %v878_v33 = vmul.f32 %v4851_v13, %v877_v25  ;;  %v9588_v25 = vld [vmem:[#allocation36_spill] sm:$0xff] }
 0x48c   :  { %v882_v15 = vsel %vm881_vm15, %v4851_v13, %v878_v33  ;;  %v9592_v33 = vld [vmem:[#allocation40_spill] sm:$0xff] }
 0x48d   :  { %v883_v36 = vmul.f32 %v882_v15, %v871_v45  ;;  %v9598_v15 = vld [vmem:[#allocation42_spill] sm:$0xff]  ;;  %v9599_v45 = vld [vmem:[#allocation41_spill] sm:$0xff] }
 0x48f   :  { %v885_v2 = vmul.f32 0.01, %v883_v36  ;;  %vm884_vm11 = vcmp.ge.f32.partialorder %v883_v36, 0.0 }
 0x491   :  { %s4689_s17 = spop %4688 }
 0x492   :  { %v901_v63 = vstv %s4689_s17 }
 0x493   :  { %v902_v53 = vmul.f32 %v901_v63, %v6394_v23  ;;  %s4691_s18 = spop %4690 }
 0x494   :  { %v917_v51 = vstv %s4691_s18  ;;  %s4693_s19 = spop %4692 }
 0x495   :  { %v919_v14 = vmul.f32 %v902_v53, %v902_v53  ;;  %v918_v17 = vmul.f32 %v917_v51, %v6394_v23  ;;  %v950_v18 = vstv %s4693_s19  ;;  %v921_v6 = vsub.f32 %v6708_v46, %v902_v53 }
 0x496   :  { %v951_v30 = vmul.f32 %v950_v18, %v6394_v23  ;;  %v886_v53 = vsel %vm884_vm11, %v883_v36, %v885_v2  ;;  %v9604_v36 = vld [vmem:[#allocation52_spill] sm:$0xff] }
 0x497   :  { %v920_v21 = vsub.f32 %v918_v17, %v919_v14  ;;  %v9608_v2 = vld [vmem:[#allocation56_spill] sm:$0xff] }
 0x498   :  { %v967_v29 = vmul.f32 %v951_v30, %v951_v30  ;;  %v969_v49 = vsub.f32 %v6708_v46, %v951_v30  ;;  %v9570_v30 = vld [vmem:[#allocation15_spill] sm:$0xff] }
 0x499   :  { %v922_v3 = vadd.f32 1e-05, %v920_v21  ;;  %s4695_s20 = spop %4694  ;;  %v9569_v21 = vld [vmem:[#allocation14_spill] sm:$0xff] }
 0x49a   :  { %v965_v27 = vstv %s4695_s20 }
 0x49b   :  { %4852 = vrsqrt.f32 %v922_v3  ;;  %v966_v38 = vmul.f32 %v965_v27, %v6394_v23  ;;  %vm929_vm2 = vweird.f32 %v922_v3  ;;  %v9578_v27 = vld [vmem:[#allocation22_spill] sm:$0xff] }
 0x49d   :  { %v968_v35 = vsub.f32 %v966_v38, %v967_v29  ;;  %v9580_v29 = vld [vmem:[#allocation28_spill] sm:$0xff]  ;;  %v9581_v38 = vld [vmem:[#allocation27_spill] sm:$0xff] }
 0x49f   :  { %v970_v47 = vadd.f32 1e-05, %v968_v35  ;;  %v9582_v35 = vld [vmem:[#allocation26_spill] sm:$0xff] }
 0x4a1   :  { %v4853_v41 = vpop.eup %4852  ;;  %4854 = vrsqrt.f32 %v970_v47  ;;  %vm977_vm8 = vweird.f32 %v970_v47 }
 0x4a2   :  { %v924_v39 = vmul.f32 %v4853_v41, %v922_v3  ;;  %vm930_vm13 = vweird.f32 %v4853_v41  ;;  %v9571_v3 = vld [vmem:[#allocation19_spill] sm:$0xff] }
 0x4a3   :  { %vm931_vm6 = vmor %vm929_vm2, %vm930_vm13 }
 0x4a4   :  { %v925_v1 = vmul.f32 %v4853_v41, %v924_v39  ;;  %v9587_v39 = vld [vmem:[#allocation29_spill] sm:$0xff] }
 0x4a6   :  { %v926_v56 = vmul.f32 0.5, %v925_v1  ;;  %v9589_v1 = vld [vmem:[#allocation35_spill] sm:$0xff] }
 0x4a7   :  { %v4855_v37 = vpop.eup %4854 }
 0x4a8   :  { %v927_v0 = vsub.f32 1.5, %v926_v56  ;;  %v972_v52 = vmul.f32 %v4855_v37, %v970_v47  ;;  %vm978_vm7 = vweird.f32 %v4855_v37  ;;  %v9585_v47 = vld [vmem:[#allocation31_spill] sm:$0xff]  ;;  %v9590_v56 = vld [vmem:[#allocation34_spill] sm:$0xff] }
 0x4a9   :  { %vm979_vm9 = vmor %vm977_vm8, %vm978_vm7 }
 0x4aa   :  { %v928_v7 = vmul.f32 %v4853_v41, %v927_v0  ;;  %v973_v61 = vmul.f32 %v4855_v37, %v972_v52  ;;  %v9593_v0 = vld [vmem:[#allocation39_spill] sm:$0xff]  ;;  %v9594_v52 = vld [vmem:[#allocation38_spill] sm:$0xff] }
 0x4ac   :  { %v974_v40 = vmul.f32 0.5, %v973_v61  ;;  %v932_v42 = vsel %vm931_vm6, %v4853_v41, %v928_v7  ;;  %v9586_v41 = vld [vmem:[#allocation30_spill] sm:$0xff]  ;;  %v9595_v7 = vld [vmem:[#allocation37_spill] sm:$0xff]  ;;  %v9596_v61 = vld [vmem:[#allocation44_spill] sm:$0xff] }
 0x4ad   :  { %v933_v28 = vmul.f32 %v932_v42, %v921_v6  ;;  %v9597_v6 = vld [vmem:[#allocation43_spill] sm:$0xff] }
 0x4ae   :  { %v975_v16 = vsub.f32 1.5, %v974_v40  ;;  %v9600_v40 = vld [vmem:[#allocation48_spill] sm:$0xff]  ;;  %v9601_v42 = vld [vmem:[#allocation47_spill] sm:$0xff] }
 0x4af   :  { %v935_v44 = vmul.f32 0.01, %v933_v28  ;;  %vm934_vm10 = vcmp.ge.f32.partialorder %v933_v28, 0.0 }
 0x4b0   :  { %v976_v43 = vmul.f32 %v4855_v37, %v975_v16  ;;  %v9603_v16 = vld [vmem:[#allocation45_spill] sm:$0xff] }
 0x4b1   :  { %v936_v63 = vsel %vm934_vm10, %v933_v28, %v935_v44  ;;  %v9602_v28 = vld [vmem:[#allocation46_spill] sm:$0xff] }
 0x4b2   :  { %v980_v10 = vsel %vm979_vm9, %v4855_v37, %v976_v43  ;;  %v985_v51 = vsel %vm578_vm1, %v886_v53, %v936_v63  ;;  %v9591_v37 = vld [vmem:[#allocation33_spill] sm:$0xff]  ;;  %v9605_v43 = vld [vmem:[#allocation51_spill] sm:$0xff]  ;;  %v9606_v44 = vld [vmem:[#allocation50_spill] sm:$0xff] }
 0x4b3   :  { %v981_v62 = vmul.f32 %v980_v10, %v969_v49  ;;  %v9607_v49 = vld [vmem:[#allocation49_spill] sm:$0xff]  ;;  %v9609_v10 = vld [vmem:[#allocation55_spill] sm:$0xff] }
 0x4b4   :  { %v9611_v63 = vld [vmem:[#allocation53_spill] sm:$0xff]  ;;  %v9613_v53 = vld [vmem:[#allocation59_spill] sm:$0xff] }
 0x4b5   :  { %vm982_vm12 = vcmp.ge.f32.partialorder %v981_v62, 0.0  ;;  %v983_v48 = vmul.f32 0.01, %v981_v62 }
 0x4b7   :  { %v984_v13 = vsel %vm982_vm12, %v981_v62, %v983_v48  ;;  %v9610_v62 = vld [vmem:[#allocation54_spill] sm:$0xff]  ;;  %v9612_v48 = vld [vmem:[#allocation60_spill] sm:$0xff] }
 0x4b8   :  { %v986_v14 = vsel %vm580_vm4, %v985_v51, %v984_v13  ;;  %v9614_v13 = vld [vmem:[#allocation58_spill] sm:$0xff]  ;;  %v9615_v51 = vld [vmem:[#allocation57_spill] sm:$0xff] }
 0x4b9   :  { %993 = vrot.lane.b32.xlu2 %v986_v14, %s5718_s29  ;;  %v9616_v14 = vld [vmem:[#allocation63_spill] sm:$0xff] }
 0x513   :  { %v994_v17 = vpop.permute.xlu2 %993 }
 0x514   :  { %v997_v18 = vsel %vm175_vm0, %v6730_v31, %v994_v17  ;;  %v9567_v31 = vld [vmem:[#allocation13_spill] sm:$0xff]  ;;  %v9617_v17 = vld [vmem:[#allocation62_spill] sm:$0xff] }
 0x515   :  { %4561 = vmatmul.msk.f32.vlgmr.msra.gmra.mxu1 %vm177_vm5, %v997_v18  ;;  %4562 = vmatmul.msk.f32.vlgmr.msra.gmra.mxu0 %vm177_vm5, %v997_v18 }
 0x516   :  { %4563 = vmatmul.msk.f32.vlgmr.msrb.gmra.mxu3 %vm177_vm5, %v997_v18  ;;  %4564 = vmatmul.msk.f32.vlgmr.msrb.gmra.mxu2 %vm177_vm5, %v997_v18  ;;  %v9618_v18 = vld [vmem:[#allocation61_spill] sm:$0xff] }
 0x517   :  { %1428 = vmatpush.msra.mxu1 %v6422_v54  ;;  %1468 = vmatpush.msra.mxu0 %v6425_v55  ;;  %v9572_v54 = vld [vmem:[#allocation16_spill] sm:$0xff] }
 0x518   :  { %1508 = vmatpush.msrb.mxu3 %v6428_v22  ;;  %1548 = vmatpush.msrb.mxu2 %v6431_v34  ;;  %v9573_v55 = vld [vmem:[#allocation20_spill] sm:$0xff]  ;;  %v9574_v22 = vld [vmem:[#allocation18_spill] sm:$0xff]  ;;  %v9575_v34 = vld [vmem:[#allocation17_spill] sm:$0xff] }
 0x519   :  { %1429 = vmatpush.msra.mxu1 %v6434_v24  ;;  %1469 = vmatpush.msra.mxu0 %v6437_v26  ;;  %v9576_v24 = vld [vmem:[#allocation24_spill] sm:$0xff]  ;;  %v9577_v26 = vld [vmem:[#allocation23_spill] sm:$0xff] }
 0x51a   :  { %1509 = vmatpush.msrb.mxu3 %v9567_v31  ;;  %1549 = vmatpush.msrb.mxu2 %v9568_v20  ;;  %v9619_v31 = vld [vmem:[#allocation65_spill] sm:$0xff]  ;;  %v9620_v20 = vld [vmem:[#allocation64_spill] sm:$0xff] }
 0x51b   :  { %1430 = vmatpush.msra.mxu1 %v9569_v21  ;;  %1470 = vmatpush.msra.mxu0 %v9570_v30  ;;  %v9621_v21 = vld [vmem:[#allocation66_spill] sm:$0xff]  ;;  %v9622_v30 = vld [vmem:[#allocation67_spill] sm:$0xff] }
 0x51c   :  { %1510 = vmatpush.msrb.mxu3 %v9571_v3  ;;  %1550 = vmatpush.msrb.mxu2 %v9572_v54  ;;  %v9623_v3 = vld [vmem:[#allocation68_spill] sm:$0xff]  ;;  %v9624_v54 = vld [vmem:[#allocation69_spill] sm:$0xff] }
 0x51d   :  { %1097 = vmatmul.f32.vlgmr.msrb.gmra.mxu1 %v6734_v50  ;;  %1137 = vmatmul.f32.vlgmr.msrb.gmra.mxu0 %v6734_v50  ;;  %v9583_v50 = vld [vmem:[#allocation25_spill] sm:$0xff] }
 0x51e   :  { %1431 = vmatpush.msra.mxu1 %v9573_v55  ;;  %1471 = vmatpush.msra.mxu0 %v9574_v22  ;;  %v9625_v55 = vld [vmem:[#allocation70_spill] sm:$0xff]  ;;  %v9626_v22 = vld [vmem:[#allocation71_spill] sm:$0xff] }
 0x51f   :  { %1511 = vmatpush.msrb.mxu3 %v9575_v34  ;;  %1551 = vmatpush.msrb.mxu2 %v9576_v24  ;;  %v9627_v34 = vld [vmem:[#allocation72_spill] sm:$0xff]  ;;  %v9628_v24 = vld [vmem:[#allocation73_spill] sm:$0xff] }
 0x520   :  { %1432 = vmatpush.msra.mxu1 %v9577_v26  ;;  %1472 = vmatpush.msra.mxu0 %v9578_v27  ;;  %v9629_v26 = vld [vmem:[#allocation74_spill] sm:$0xff]  ;;  %v9630_v27 = vld [vmem:[#allocation75_spill] sm:$0xff] }
 0x521   :  { %1512 = vmatpush.msrb.mxu3 %v9579_v32  ;;  %1552 = vmatpush.msrb.mxu2 %v9580_v29  ;;  %v9631_v32 = vld [vmem:[#allocation76_spill] sm:$0xff]  ;;  %v9632_v29 = vld [vmem:[#allocation77_spill] sm:$0xff] }
 0x522   :  { %1433 = vmatpush.msra.mxu1 %v9581_v38  ;;  %1473 = vmatpush.msra.mxu0 %v9582_v35  ;;  %v9633_v38 = vld [vmem:[#allocation78_spill] sm:$0xff]  ;;  %v9634_v35 = vld [vmem:[#allocation79_spill] sm:$0xff] }
 0x523   :  { %1513 = vmatpush.msrb.mxu3 %v9583_v50  ;;  %1553 = vmatpush.msrb.mxu2 %v9584_v9  ;;  %v9635_v50 = vld [vmem:[#allocation80_spill] sm:$0xff]  ;;  %v9636_v9 = vld [vmem:[#allocation81_spill] sm:$0xff] }
 0x524   :  { %1434 = vmatpush.msra.mxu1 %v9585_v47  ;;  %1474 = vmatpush.msra.mxu0 %v9586_v41  ;;  %v9637_v47 = vld [vmem:[#allocation82_spill] sm:$0xff]  ;;  %v9638_v41 = vld [vmem:[#allocation83_spill] sm:$0xff] }
 0x525   :  { %1514 = vmatpush.msrb.mxu3 %v9587_v39  ;;  %1554 = vmatpush.msrb.mxu2 %v9588_v25  ;;  %v9639_v39 = vld [vmem:[#allocation84_spill] sm:$0xff]  ;;  %v9640_v25 = vld [vmem:[#allocation85_spill] sm:$0xff] }
 0x526   :  { %1435 = vmatpush.msra.mxu1 %v9589_v1  ;;  %1475 = vmatpush.msra.mxu0 %v9590_v56  ;;  %v9641_v1 = vld [vmem:[#allocation86_spill] sm:$0xff]  ;;  %v9642_v56 = vld [vmem:[#allocation87_spill] sm:$0xff] }
 0x527   :  { %1515 = vmatpush.msrb.mxu3 %v9591_v37  ;;  %1555 = vmatpush.msrb.mxu2 %v9592_v33  ;;  %v9643_v37 = vld [vmem:[#allocation88_spill] sm:$0xff]  ;;  %v9644_v33 = vld [vmem:[#allocation89_spill] sm:$0xff] }
 0x528   :  { %1436 = vmatpush.msra.mxu1 %v9593_v0  ;;  %1476 = vmatpush.msra.mxu0 %v9594_v52  ;;  %v9645_v0 = vld [vmem:[#allocation90_spill] sm:$0xff]  ;;  %v9646_v52 = vld [vmem:[#allocation91_spill] sm:$0xff] }
 0x529   :  { %1516 = vmatpush.msrb.mxu3 %v9595_v7  ;;  %1556 = vmatpush.msrb.mxu2 %v9596_v61  ;;  %v9647_v7 = vld [vmem:[#allocation92_spill] sm:$0xff]  ;;  %v9648_v61 = vld [vmem:[#allocation93_spill] sm:$0xff] }
 0x52a   :  { %1437 = vmatpush.msra.mxu1 %v9597_v6  ;;  %1477 = vmatpush.msra.mxu0 %v9598_v15  ;;  %v1018_v6 = vpop.f32.mrf.mxu3  ;;  %v1058_v15 = vpop.f32.mrf.mxu2 }
 0x52b   :  { %1517 = vmatpush.msrb.mxu3 %v9599_v45  ;;  %1557 = vmatpush.msrb.mxu2 %v9600_v40  ;;  %v9649_v45 = vld [vmem:[#allocation8_spill] sm:$0xff] }
 0x52c   :  { %1438 = vmatpush.msra.mxu1 %v9601_v42  ;;  %1478 = vmatpush.msra.mxu0 %v9602_v28  ;;  %v1019_v40 = vadd.f32 %v1018_v6, %v9649_v45  ;;  %v9650_v42 = vld [vmem:[#allocation9_spill] sm:$0xff] }
 0x52d   :  { %1518 = vmatpush.msrb.mxu3 %v9603_v16  ;;  %1558 = vmatpush.msrb.mxu2 %v9604_v36  ;;  %v1059_v28 = vadd.f32 %v1058_v15, %v9650_v42 }
 0x52e   :  { %1439 = vmatpush.msra.mxu1 %v9605_v43  ;;  %1479 = vmatpush.msra.mxu0 %v9606_v44 }
 0x52f   :  { %1519 = vmatpush.msrb.mxu3 %v9607_v49  ;;  %1559 = vmatpush.msrb.mxu2 %v9608_v2 }
 0x530   :  { %1440 = vmatpush.msra.mxu1 %v9609_v10  ;;  %1480 = vmatpush.msra.mxu0 %v9610_v62 }
 0x531   :  { %1520 = vmatpush.msrb.mxu3 %v9611_v63  ;;  %1560 = vmatpush.msrb.mxu2 %v9612_v48  ;;  %v9651_v63 = vld [vmem:[#allocation11_spill] sm:$0xff] }
 0x532   :  { %1441 = vmatpush.msra.mxu1 %v9613_v53  ;;  %1481 = vmatpush.msra.mxu0 %v9614_v13  ;;  %v9652_v53 = vld [vmem:[#allocation10_spill] sm:$0xff] }
 0x533   :  { %1521 = vmatpush.msrb.mxu3 %v9617_v17  ;;  %1561 = vmatpush.msrb.mxu2 %v9618_v18 }
 0x534   :  { %1486 = vmatpush.msrb.mxu1 %v9615_v51  ;;  %1526 = vmatpush.msrb.mxu0 %v9616_v14 }
 0x536   :  { %1487 = vmatpush.msrb.mxu1 %v9619_v31  ;;  %1527 = vmatpush.msrb.mxu0 %v9620_v20 }
 0x538   :  { %1488 = vmatpush.msrb.mxu1 %v9621_v21  ;;  %1528 = vmatpush.msrb.mxu0 %v9622_v30 }
 0x53a   :  { %1489 = vmatpush.msrb.mxu1 %v9623_v3  ;;  %1529 = vmatpush.msrb.mxu0 %v9624_v54 }
 0x53c   :  { %1490 = vmatpush.msrb.mxu1 %v9625_v55  ;;  %1530 = vmatpush.msrb.mxu0 %v9626_v22 }
 0x53e   :  { %1491 = vmatpush.msrb.mxu1 %v9627_v34  ;;  %1531 = vmatpush.msrb.mxu0 %v9628_v24 }
 0x540   :  { %1492 = vmatpush.msrb.mxu1 %v9629_v26  ;;  %1532 = vmatpush.msrb.mxu0 %v9630_v27 }
 0x542   :  { %1493 = vmatpush.msrb.mxu1 %v9631_v32  ;;  %1533 = vmatpush.msrb.mxu0 %v9632_v29 }
 0x544   :  { %1494 = vmatpush.msrb.mxu1 %v9633_v38  ;;  %1534 = vmatpush.msrb.mxu0 %v9634_v35 }
 0x546   :  { %1495 = vmatpush.msrb.mxu1 %v9635_v50  ;;  %1535 = vmatpush.msrb.mxu0 %v9636_v9 }
 0x548   :  { %1496 = vmatpush.msrb.mxu1 %v9637_v47  ;;  %1536 = vmatpush.msrb.mxu0 %v9638_v41 }
 0x54a   :  { %1497 = vmatpush.msrb.mxu1 %v9639_v39  ;;  %1537 = vmatpush.msrb.mxu0 %v9640_v25 }
 0x54c   :  { %1498 = vmatpush.msrb.mxu1 %v9641_v1  ;;  %1538 = vmatpush.msrb.mxu0 %v9642_v56 }
 0x54e   :  { %1499 = vmatpush.msrb.mxu1 %v9643_v37  ;;  %1539 = vmatpush.msrb.mxu0 %v9644_v33 }
 0x550   :  { %1500 = vmatpush.msrb.mxu1 %v9645_v0  ;;  %1540 = vmatpush.msrb.mxu0 %v9646_v52 }
 0x552   :  { %1501 = vmatpush.msrb.mxu1 %v9647_v7  ;;  %1541 = vmatpush.msrb.mxu0 %v9648_v61 }
 0x592   :  { %v1038_v16 = vpop.f32.mrf.mxu1  ;;  %v1078_v36 = vpop.f32.mrf.mxu0 }
 0x593   :  { %v1039_v43 = vadd.f32 %v1038_v16, %v1019_v40  ;;  %v1079_v44 = vadd.f32 %v1078_v36, %v1059_v28 }
 0x595   :  { %v4565_v49 = vmul.f32 -1.442695, %v1039_v43  ;;  %v4566_v2 = vmul.f32 -1.442695, %v1079_v44 }
 0x597   :  { %4856 = vpow2.f32 %v4565_v49 }
 0x598   :  { %4858 = vpow2.f32 %v4566_v2 }
 0x599   :  { %v1118_v51 = vpop.f32.mrf.mxu3  ;;  %v1158_v14 = vpop.f32.mrf.mxu2 }
 0x59a   :  { %v1098_v10 = vpop.f32.mrf.mxu1  ;;  %v1138_v62 = vpop.f32.mrf.mxu0 }
 0x59b   :  { %v1099_v48 = vadd.f32 %v1098_v10, %v9651_v63  ;;  %v1139_v13 = vadd.f32 %v1138_v62, %v9652_v53 }
 0x59d   :  { %v4857_v17 = vpop.eup %4856  ;;  %v1119_v18 = vadd.f32 %v1118_v51, %v1099_v48  ;;  %v1159_v31 = vadd.f32 %v1158_v14, %v1139_v13 }
 0x59e   :  { %v4859_v20 = vpop.eup %4858  ;;  %v1173_v54 = vadd.f32 1.0, %v4857_v17 }
 0x59f   :  { %v1174_v21 = vadd.f32 1.0, %v4859_v20  ;;  %v4567_v30 = vmul.f32 -1.442695, %v1119_v18  ;;  %v4568_v3 = vmul.f32 -1.442695, %v1159_v31 }
 0x5a0   :  { %vm1182_vm8 = vweird.f32 %v1173_v54  ;;  %v1188_v40 = vand.u32 2147483648, %v1173_v54  ;;  %v1186_v16 = vand.u32 2147483647, %v1173_v54 }
 0x5a1   :  { %4860 = vrcp.f32 %v1174_v21  ;;  %vm1197_vm15 = vweird.f32 %v1174_v21  ;;  %v1201_v0 = vand.u32 2147483647, %v1174_v21  ;;  %v1203_v52 = vand.u32 2147483648, %v1174_v21 }
 0x5a2   :  { %4862 = vpow2.f32 %v4567_v30  ;;  %v1189_v48 = vor.u32 1.1754944e-38, %v1188_v40 }
 0x5a3   :  { %4864 = vpow2.f32 %v4568_v3  ;;  %v1204_v44 = vor.u32 1.1754944e-38, %v1203_v52  ;;  %vm1202_vm12 = vcmp.eq.f32.partialorder %v1201_v0, 8.507059e+37 }
 0x5a4   :  { %4866 = vrcp.f32 %v1173_v54 }
 0x5a7   :  { %v4861_v55 = vpop.eup %4860 }
 0x5a8   :  { %v4863_v22 = vpop.eup %4862  ;;  %v1193_v27 = vmul.f32 %v4861_v55, %v1174_v21  ;;  %vm1198_vm13 = vweird.f32 %v4861_v55 }
 0x5a9   :  { %v4865_v34 = vpop.eup %4864  ;;  %v1175_v32 = vadd.f32 1.0, %v4863_v22  ;;  %vm6903_vm6 = vmor %vm1197_vm15, %vm1198_vm13  ;;  %vm1187_vm13 = vcmp.eq.f32.partialorder %v1186_v16, 8.507059e+37 }
 0x5aa   :  { %v4867_v24 = vpop.eup %4866  ;;  %v1176_v26 = vadd.f32 1.0, %v4865_v34  ;;  %v1194_v38 = vsub.f32 1.0, %v1193_v27 }
 0x5ab   :  { %v1178_v29 = vmul.f32 %v4867_v24, %v1173_v54  ;;  %vm1183_vm2 = vweird.f32 %v4867_v24  ;;  %v1218_v30 = vand.u32 2147483648, %v1175_v32  ;;  %v1216_v54 = vand.u32 2147483647, %v1175_v32 }
 0x5ac   :  { %4868 = vrcp.f32 %v1176_v26  ;;  %v1195_v9 = vmul.f32 %v4861_v55, %v1194_v38  ;;  %v1233_v1 = vand.u32 2147483648, %v1176_v26  ;;  %v1231_v33 = vand.u32 2147483647, %v1176_v26  ;;  %vm1184_vm11 = vmor %vm1182_vm8, %vm1183_vm2 }
 0x5ad   :  { %4870 = vrcp.f32 %v1175_v32  ;;  %v1179_v35 = vsub.f32 1.0, %v1178_v29  ;;  %vm1227_vm7 = vweird.f32 %v1176_v26  ;;  %vm1212_vm2 = vweird.f32 %v1175_v32 }
 0x5ae   :  { %v1196_v56 = vadd.f32 %v4861_v55, %v1195_v9  ;;  %v1234_v28 = vor.u32 1.1754944e-38, %v1233_v1  ;;  %vm1232_vm10 = vcmp.eq.f32.partialorder %v1231_v33, 8.507059e+37  ;;  %v1219_v22 = vor.u32 1.1754944e-38, %v1218_v30 }
 0x5af   :  { %v1180_v39 = vmul.f32 %v4867_v24, %v1179_v35 }
 0x5b0   :  { %v1200_v36 = vsel %vm6903_vm6, %v4861_v55, %v1196_v56 }
 0x5b1   :  { %v1181_v61 = vadd.f32 %v4867_v24, %v1180_v39  ;;  %v1205_v13 = vsel %vm1202_vm12, %v1204_v44, %v1200_v36 }
 0x5b2   :  { %v4869_v50 = vpop.eup %4868  ;;  %v1239_v18 = vmul.f32 %v1205_v13, %v6703_v5 }
 0x5b3   :  { %v1223_v47 = vmul.f32 %v4869_v50, %v1176_v26  ;;  %v4871_v41 = vpop.eup %4870  ;;  %vm1228_vm14 = vweird.f32 %v4869_v50  ;;  %v1185_v10 = vsel %vm1184_vm11, %v4867_v24, %v1181_v61 }
 0x5b4   :  { %v1208_v7 = vmul.f32 %v4871_v41, %v1175_v32  ;;  %vm1229_vm9 = vmor %vm1227_vm7, %vm1228_vm14  ;;  %v1190_v14 = vsel %vm1187_vm13, %v1189_v48, %v1185_v10  ;;  %vm1244_vm14 = vcmp.lt.s32.totalorder %v6284_v19, 96  ;;  %vm1213_vm15 = vweird.f32 %v4871_v41 }
 0x5b5   :  { %v1224_v25 = vsub.f32 1.0, %v1223_v47  ;;  %vm1214_vm6 = vmor %vm1212_vm2, %vm1213_vm15  ;;  %vm1217_vm7 = vcmp.eq.f32.partialorder %v1216_v54, 8.507059e+37 }
 0x5b6   :  { %v1209_v49 = vsub.f32 1.0, %v1208_v7 }
 0x5b7   :  { %v1225_v37 = vmul.f32 %v4869_v50, %v1224_v25 }
 0x5b8   :  { %v1210_v17 = vmul.f32 %v4871_v41, %v1209_v49 }
 0x5b9   :  { %v1226_v15 = vadd.f32 %v4869_v50, %v1225_v37 }
 0x5ba   :  { %v1211_v21 = vadd.f32 %v4871_v41, %v1210_v17 }
 0x5bb   :  { %v1230_v43 = vsel %vm1229_vm9, %v4869_v50, %v1226_v15 }
 0x5bc   :  { %v1235_v2 = vsel %vm1232_vm10, %v1234_v28, %v1230_v43  ;;  %v1215_v55 = vsel %vm1214_vm6, %v4871_v41, %v1211_v21 }
 0x5bd   :  { %v1237_v62 = vmul.f32 2.0, %v1235_v2  ;;  %v1220_v24 = vsel %vm1217_vm7, %v1219_v22, %v1215_v55 }
 0x5bf   :  { %v4569_v51 = vadd.f32 -1.0, %v1237_v62 }
 0x5c1   :  { %v1240_v31 = vmul.f32 %v4569_v51, %v1190_v14 }
 0x5c3   :  { %v1241_v20 = vadd.f32 %v1240_v31, %v1239_v18 }
 0x5c5   :  { %4872 = vtanh.f32 %v1241_v20  ;;  %v6914_v3 = vsel %vm1244_vm14, %v1241_v20, %v6703_v5 }
 0x5cb   :  { %v4873_v34 = vpop.eup %4872 }
 0x5cc   :  { %v1243_v26 = vmul.f32 %v4873_v34, %v1220_v24 }
 0x5ce   :  { %v6919_v27 = vsel %vm1244_vm14, %v1243_v26, %v6708_v46 }
 0x5cf   :  { %1342 = vrot.lane.b32.xlu2 %v6919_v27, %s5716_s2  ;;  %1293 = vrot.lane.b32.xlu1 %v6919_v27, %s5717_s28  ;;  %v1261_v5 = vmul.f32 %v6919_v27, %v6919_v27  ;;  %v1249_v19 = vsel %vm429_vm3, %v6919_v27, 0.0 }
 0x5d1   :  { %1309 = vrot.lane.b32.xlu0 %v1261_v5, %s5717_s28  ;;  %v1262_v32 = vsel %vm429_vm3, %v1261_v5, 0.0 }
 0x5d9   :  { %1357 = vrot.lane.b32.xlu0 %v1261_v5, %s5716_s2 }
 0x5f8   :  { %1263 = vadd.xlane.f32.xlu2 %v1262_v32 }
 0x5f9   :  { %1250 = vadd.xlane.f32.xlu1 %v1249_v19 }
 0x629   :  { %v1343_v46 = vpop.permute.xlu2 %1342 }
 0x62a   :  { %v1345_v29 = vsel %vm429_vm3, %v1343_v46, 0.0 }
 0x62b   :  { %1346 = vadd.xlane.f32.xlu2 %v1345_v29  ;;  %v4570_v29 = vld [vmem:[%s8945_s0 + $0x6] sm:$0x3] }
 0x641   :  { %v1294_v38 = vpop.permute.xlu1 %1293 }
 0x642   :  { %v1296_v35 = vsel %vm429_vm3, %v1294_v38, 0.0 }
 0x643   :  { %1297 = vadd.xlane.f32.xlu0 %v1296_v35  ;;  %v1310_v50 = vpop.permute.xlu0 %1309 }
 0x644   :  { %v1312_v9 = vsel %vm429_vm3, %v1310_v50, 0.0  ;;  %v6949_v50 = vld [vmem:[#allocation2 + $0x1e0] sm:$0xff] }
 0x645   :  { %1313 = vadd.xlane.f32.xlu1 %v1312_v9  ;;  %v6952_v9 = vld [vmem:[#allocation2 + $0x1e8] sm:$0xff] }
 0x64b   :  { %v1358_v47 = vpop.permute.xlu0 %1357 }
 0x64c   :  { %v1360_v41 = vsel %vm429_vm3, %v1358_v47, 0.0  ;;  %v6955_v47 = vld [vmem:[#allocation2 + $0x1c0] sm:$0xff] }
 0x64d   :  { %1361 = vadd.xlane.f32.xlu0 %v1360_v41  ;;  %v6958_v41 = vld [vmem:[#allocation2 + $0x1c8] sm:$0xff] }
 0x65e   :  { %1394 = vrot.lane.b32.xlu1 %v6919_v27, %s5718_s29 }
 0x66b   :  { %v1264_v39 = vpop.xlane.xlu2 %1263 }
 0x66c   :  { %v1265_v25 = vrot.slane %v1264_v39, 4  ;;  %v1251_v1 = vpop.xlane.xlu1 %1250 }
 0x66d   :  { %v1252_v56 = vrot.slane %v1251_v1, 4 }
 0x66e   :  { %v1266_v37 = vadd.f32 %v1265_v25, %v1264_v39  ;;  %v6961_v39 = vld [vmem:[#allocation2 + $0x1a0] sm:$0xff]  ;;  %v6964_v25 = vld [vmem:[#allocation2 + $0x1a8] sm:$0xff] }
 0x66f   :  { %v1253_v33 = vadd.f32 %v1252_v56, %v1251_v1  ;;  %v6967_v1 = vld [vmem:[#allocation2 + $0x180] sm:$0xff]  ;;  %v6970_v56 = vld [vmem:[#allocation2 + $0x188] sm:$0xff] }
 0x670   :  { %v1267_v0 = vrot.slane %v1266_v37, 2 }
 0x671   :  { %v1254_v52 = vrot.slane %v1253_v33, 2 }
 0x672   :  { %v1268_v7 = vadd.f32 %v1267_v0, %v1266_v37  ;;  %v6973_v37 = vld [vmem:[#allocation2 + $0x160] sm:$0xff] }
 0x673   :  { %v1255_v61 = vadd.f32 %v1254_v52, %v1253_v33  ;;  %v6976_v33 = vld [vmem:[#allocation2 + $0x168] sm:$0xff]  ;;  %v6979_v0 = vld [vmem:[#allocation2 + $0x140] sm:$0xff] }
 0x674   :  { %v1269_v6 = vrot.slane %v1268_v7, 1  ;;  %v6982_v52 = vld [vmem:[#allocation2 + $0x148] sm:$0xff] }
 0x675   :  { %v1256_v15 = vrot.slane %v1255_v61, 1 }
 0x676   :  { %v1270_v40 = vadd.f32 %v1269_v6, %v1268_v7  ;;  %v6985_v7 = vld [vmem:[#allocation2 + $0x120] sm:$0xff] }
 0x677   :  { %v1257_v28 = vadd.f32 %v1256_v15, %v1255_v61  ;;  %v6988_v61 = vld [vmem:[#allocation2 + $0x128] sm:$0xff]  ;;  %v6991_v15 = vld [vmem:[#allocation2 + $0x100] sm:$0xff] }
 0x679   :  { %4696 = vpush %v1257_v28 }
 0x67a   :  { %4698 = vpush %v1270_v40  ;;  %v6994_v40 = vld [vmem:[#allocation2 + $0x108] sm:$0xff] }
 0x69e   :  { %v1347_v16 = vpop.xlane.xlu2 %1346 }
 0x69f   :  { %v1348_v36 = vrot.slane %v1347_v16, 4 }
 0x6a1   :  { %v1349_v43 = vadd.f32 %v1348_v36, %v1347_v16  ;;  %v7000_v16 = vld [vmem:[#allocation2 + $0xe0] sm:$0xff]  ;;  %v7003_v36 = vld [vmem:[#allocation2 + $0xe8] sm:$0xff] }
 0x6a3   :  { %v1350_v2 = vrot.slane %v1349_v43, 2 }
 0x6a5   :  { %v1351_v14 = vadd.f32 %v1350_v2, %v1349_v43  ;;  %v7006_v43 = vld [vmem:[#allocation2 + $0xc0] sm:$0xff] }
 0x6a7   :  { %v1352_v30 = vrot.slane %v1351_v14, 1 }
 0x6a9   :  { %v1353_v26 = vadd.f32 %v1352_v30, %v1351_v14 }
 0x6aa   :  { %s4697_s23 = spop %4696 }
 0x6ab   :  { %v1259_v6 = vstv %s4697_s23  ;;  %s4699_s1 = spop %4698 }
 0x6ac   :  { %v6998_v28 = vmul.f32 %v1259_v6, %v6394_v23 }
 0x6ae   :  { %v1274_v2 = vmul.f32 %v6998_v28, %v6998_v28 }
 0x6b6   :  { %v1298_v44 = vpop.xlane.xlu0 %1297 }
 0x6b7   :  { %v1299_v49 = vrot.slane %v1298_v44, 4 }
 0x6b8   :  { %v1314_v10 = vpop.xlane.xlu1 %1313 }
 0x6b9   :  { %v1300_v62 = vadd.f32 %v1299_v49, %v1298_v44  ;;  %v1315_v48 = vrot.slane %v1314_v10, 4  ;;  %v7009_v44 = vld [vmem:[#allocation2 + $0xc8] sm:$0xff]  ;;  %v1272_v49 = vstv %s4699_s1 }
 0x6bb   :  { %v1301_v13 = vrot.slane %v1300_v62, 2  ;;  %v1316_v51 = vadd.f32 %v1315_v48, %v1314_v10  ;;  %v7014_v10 = vld [vmem:[#allocation2 + $0xa0] sm:$0xff]  ;;  %v1273_v48 = vmul.f32 %v1272_v49, %v6394_v23 }
 0x6bd   :  { %v1317_v17 = vrot.slane %v1316_v51, 2  ;;  %v1302_v18 = vadd.f32 %v1301_v13, %v1300_v62  ;;  %v7017_v62 = vld [vmem:[#allocation2 + $0xa8] sm:$0xff]  ;;  %v7021_v13 = vld [vmem:[#allocation2 + $0x80] sm:$0xff]  ;;  %v1275_v14 = vsub.f32 %v1273_v48, %v1274_v2 }
 0x6bf   :  { %v1303_v31 = vrot.slane %v1302_v18, 1  ;;  %v1318_v20 = vadd.f32 %v1317_v17, %v1316_v51  ;;  %v7024_v51 = vld [vmem:[#allocation2 + $0x88] sm:$0xff]  ;;  %v1277_v17 = vadd.f32 1e-05, %v1275_v14 }
 0x6c0   :  { %v1362_v21 = vpop.xlane.xlu0 %1361 }
 0x6c1   :  { %v1363_v54 = vrot.slane %v1362_v21, 4  ;;  %v1304_v55 = vadd.f32 %v1303_v31, %v1302_v18  ;;  %v1319_v22 = vrot.slane %v1318_v20, 1  ;;  %4874 = vrsqrt.f32 %v1277_v17 }
 0x6c2   :  { %vm1284_vm11 = vweird.f32 %v1277_v17 }
 0x6c3   :  { %v1364_v34 = vadd.f32 %v1363_v54, %v1362_v21  ;;  %4700 = vpush %v1304_v55  ;;  %v1320_v24 = vadd.f32 %v1319_v22, %v1318_v20 }
 0x6c5   :  { %v1365_v5 = vrot.slane %v1364_v34, 2  ;;  %4702 = vpush %v1320_v24 }
 0x6c6   :  { %4704 = vpush %v1353_v26 }
 0x6c7   :  { %v1366_v32 = vadd.f32 %v1365_v5, %v1364_v34  ;;  %v4875_v31 = vpop.eup %4874 }
 0x6c8   :  { %v1279_v21 = vmul.f32 %v4875_v31, %v1277_v17  ;;  %vm1285_vm9 = vweird.f32 %v4875_v31 }
 0x6c9   :  { %v1367_v19 = vrot.slane %v1366_v32, 1  ;;  %vm1286_vm13 = vmor %vm1284_vm11, %vm1285_vm9 }
 0x6ca   :  { %v1280_v30 = vmul.f32 %v4875_v31, %v1279_v21 }
 0x6cb   :  { %v1368_v46 = vadd.f32 %v1367_v19, %v1366_v32 }
 0x6cc   :  { %v1281_v24 = vmul.f32 0.5, %v1280_v30 }
 0x6cd   :  { %4706 = vpush %v1368_v46 }
 0x6ce   :  { %v1282_v19 = vsub.f32 1.5, %v1281_v24 }
 0x6d0   :  { %v6941_v38 = vpop.permute.xlu1 %1394  ;;  %v1283_v49 = vmul.f32 %v4875_v31, %v1282_v19  ;;  %v7058_v19 = vld [vmem:[#allocation2 + $0x3b0] sm:$0xff] }
 0x6d1   :  { %v6945_v35 = vsel %vm175_vm0, %v4570_v29, %v6941_v38 }
 0x6d2   :  { %1422 = vmatmul.f32.vlgmr.msra.gmra.mxu3 %v6945_v35  ;;  %1462 = vmatmul.f32.vlgmr.msra.gmra.mxu2 %v6945_v35 }
 0x6d3   :  { %1806 = vmatpush.msra.mxu3 %v6949_v50  ;;  %1846 = vmatpush.msra.mxu2 %v6952_v9 }
 0x6d5   :  { %1807 = vmatpush.msra.mxu3 %v6955_v47  ;;  %1847 = vmatpush.msra.mxu2 %v6958_v41 }
 0x6d7   :  { %1808 = vmatpush.msra.mxu3 %v6961_v39  ;;  %1848 = vmatpush.msra.mxu2 %v6964_v25 }
 0x6d9   :  { %1809 = vmatpush.msra.mxu3 %v6967_v1  ;;  %1849 = vmatpush.msra.mxu2 %v6970_v56 }
 0x6db   :  { %1810 = vmatpush.msra.mxu3 %v6973_v37  ;;  %1850 = vmatpush.msra.mxu2 %v6976_v33 }
 0x6dd   :  { %1811 = vmatpush.msra.mxu3 %v6979_v0  ;;  %1851 = vmatpush.msra.mxu2 %v6982_v52 }
 0x6df   :  { %1812 = vmatpush.msra.mxu3 %v6985_v7  ;;  %1852 = vmatpush.msra.mxu2 %v6988_v61 }
 0x6e1   :  { %1813 = vmatpush.msra.mxu3 %v6991_v15  ;;  %1853 = vmatpush.msra.mxu2 %v6994_v40 }
 0x6e3   :  { %1814 = vmatpush.msra.mxu3 %v7000_v16  ;;  %1854 = vmatpush.msra.mxu2 %v7003_v36 }
 0x6e5   :  { %1815 = vmatpush.msra.mxu3 %v7006_v43  ;;  %1855 = vmatpush.msra.mxu2 %v7009_v44 }
 0x6e7   :  { %1816 = vmatpush.msra.mxu3 %v7014_v10  ;;  %1856 = vmatpush.msra.mxu2 %v7017_v62 }
 0x6e9   :  { %1817 = vmatpush.msra.mxu3 %v7021_v13  ;;  %1857 = vmatpush.msra.mxu2 %v7024_v51 }
 0x6eb   :  { %1818 = vmatpush.msra.mxu3 %v6766_v57  ;;  %1858 = vmatpush.msra.mxu2 %v6769_v60 }
 0x6ed   :  { %1819 = vmatpush.msra.mxu3 %v6774_v4  ;;  %1859 = vmatpush.msra.mxu2 %v6777_v8 }
 0x6ef   :  { %1820 = vmatpush.msra.mxu3 %v6780_v11  ;;  %1860 = vmatpush.msra.mxu2 %v6783_v12 }
 0x6f1   :  { %1821 = vmatpush.msra.mxu3 %v6786_v58  ;;  %1861 = vmatpush.msra.mxu2 %v6789_v59 }
 0x6f4   :  { %s4701_s25 = spop %4700 }
 0x6f5   :  { %v1306_v18 = vstv %s4701_s25 }
 0x6f6   :  { %v1307_v57 = vmul.f32 %v1306_v18, %v6394_v23  ;;  %s4703_s26 = spop %4702 }
 0x6f7   :  { %v1322_v60 = vstv %s4703_s26  ;;  %s4705_s27 = spop %4704 }
 0x6f8   :  { %v1324_v4 = vmul.f32 %v1307_v57, %v1307_v57  ;;  %v1323_v8 = vmul.f32 %v1322_v60, %v6394_v23  ;;  %v1355_v20 = vstv %s4705_s27  ;;  %v1326_v14 = vsub.f32 %v6919_v27, %v1307_v57 }
 0x6f9   :  { %v1356_v58 = vmul.f32 %v1355_v20, %v6394_v23 }
 0x6fa   :  { %v1325_v11 = vsub.f32 %v1323_v8, %v1324_v4  ;;  %v1287_v4 = vsel %vm1286_vm13, %v4875_v31, %v1283_v49  ;;  %v1276_v8 = vsub.f32 %v6919_v27, %v6998_v28  ;;  %v7073_v49 = vld [vmem:[#allocation2 + $0x398] sm:$0xff] }
 0x6fb   :  { %v1372_v54 = vmul.f32 %v1356_v58, %v1356_v58  ;;  %v1374_v17 = vsub.f32 %v6919_v27, %v1356_v58  ;;  %v7052_v58 = vld [vmem:[#allocation2 + $0x3a0] sm:$0xff] }
 0x6fc   :  { %v1327_v12 = vadd.f32 1e-05, %v1325_v11 }
 0x6fe   :  { %4876 = vrsqrt.f32 %v1327_v12  ;;  %s4707_s30 = spop %4706  ;;  %vm1334_vm10 = vweird.f32 %v1327_v12 }
 0x6ff   :  { %v1370_v59 = vstv %s4707_s30 }
 0x700   :  { %v1371_v55 = vmul.f32 %v1370_v59, %v6394_v23  ;;  %v1288_v59 = vmul.f32 %v1287_v4, %v1276_v8  ;;  %v7093_v4 = vld [vmem:[#allocation2 + $0x348] sm:$0xff]  ;;  %v7096_v8 = vld [vmem:[#allocation2 + $0x350] sm:$0xff] }
 0x701   :  { %9660 = vst [vmem:[#allocation16_spill] sm:$0xff] %v7093_v4 }
 0x702   :  { %v1373_v22 = vsub.f32 %v1371_v55, %v1372_v54  ;;  %v1290_v54 = vmul.f32 0.01, %v1288_v59  ;;  %vm1289_vm7 = vcmp.ge.f32.partialorder %v1288_v59, 0.0  ;;  %9661 = vst [vmem:[#allocation20_spill] sm:$0xff] %v7096_v8 }
 0x704   :  { %v4877_v34 = vpop.eup %4876  ;;  %v1375_v26 = vadd.f32 1e-05, %v1373_v22  ;;  %v1291_v28 = vsel %vm1289_vm7, %v1288_v59, %v1290_v54  ;;  %v7111_v59 = vld [vmem:[#allocation2 + $0x338] sm:$0xff] }
 0x705   :  { %v1329_v5 = vmul.f32 %v4877_v34, %v1327_v12  ;;  %vm1335_vm8 = vweird.f32 %v4877_v34  ;;  %9666 = vst [vmem:[#allocation22_spill] sm:$0xff] %v7111_v59  ;;  %v7123_v54 = vld [vmem:[#allocation2 + $0x318] sm:$0xff] }
 0x706   :  { %4878 = vrsqrt.f32 %v1375_v26  ;;  %vm1336_vm12 = vmor %vm1334_vm10, %vm1335_vm8  ;;  %vm1382_vm15 = vweird.f32 %v1375_v26  ;;  %9670 = vst [vmem:[#allocation26_spill] sm:$0xff] %v7123_v54 }
 0x707   :  { %v1330_v32 = vmul.f32 %v4877_v34, %v1329_v5 }
 0x709   :  { %v1331_v46 = vmul.f32 0.5, %v1330_v32  ;;  %v7055_v32 = vld [vmem:[#allocation2 + $0x3a8] sm:$0xff] }
 0x70b   :  { %v1332_v29 = vsub.f32 1.5, %v1331_v46  ;;  %v7064_v46 = vld [vmem:[#allocation2 + $0x380] sm:$0xff] }
 0x70c   :  { %v4879_v6 = vpop.eup %4878 }
 0x70d   :  { %v1333_v2 = vmul.f32 %v4877_v34, %v1332_v29  ;;  %v1377_v48 = vmul.f32 %v4879_v6, %v1375_v26  ;;  %vm1383_vm14 = vweird.f32 %v4879_v6  ;;  %v7067_v29 = vld [vmem:[#allocation2 + $0x388] sm:$0xff] }
 0x70e   :  { %vm1384_vm2 = vmor %vm1382_vm15, %vm1383_vm14 }
 0x70f   :  { %v1378_v18 = vmul.f32 %v4879_v6, %v1377_v48  ;;  %v1337_v60 = vsel %vm1336_vm12, %v4877_v34, %v1333_v2  ;;  %v7076_v2 = vld [vmem:[#allocation2 + $0x360] sm:$0xff]  ;;  %v7079_v48 = vld [vmem:[#allocation2 + $0x368] sm:$0xff] }
 0x710   :  { %v1338_v11 = vmul.f32 %v1337_v60, %v1326_v14  ;;  %9655 = vst [vmem:[#allocation13_spill] sm:$0xff] %v7076_v2  ;;  %v7082_v14 = vld [vmem:[#allocation2 + $0x370] sm:$0xff]  ;;  %v7090_v60 = vld [vmem:[#allocation2 + $0x340] sm:$0xff] }
 0x711   :  { %v1379_v20 = vmul.f32 0.5, %v1378_v18  ;;  %9656 = vst [vmem:[#allocation12_spill] sm:$0xff] %v7079_v48  ;;  %v7085_v18 = vld [vmem:[#allocation2 + $0x378] sm:$0xff] }
 0x712   :  { %v1340_v12 = vmul.f32 0.01, %v1338_v11  ;;  %vm1339_vm6 = vcmp.ge.f32.partialorder %v1338_v11, 0.0  ;;  %9657 = vst [vmem:[#allocation14_spill] sm:$0xff] %v7082_v14 }
 0x713   :  { %v1380_v21 = vsub.f32 1.5, %v1379_v20  ;;  %9658 = vst [vmem:[#allocation15_spill] sm:$0xff] %v7085_v18  ;;  %v7099_v20 = vld [vmem:[#allocation2 + $0x358] sm:$0xff] }
 0x714   :  { %v1341_v31 = vsel %vm1339_vm6, %v1338_v11, %v1340_v12  ;;  %9659 = vst [vmem:[#allocation19_spill] sm:$0xff] %v7090_v60  ;;  %v7102_v11 = vld [vmem:[#allocation2 + $0x320] sm:$0xff]  ;;  %v7117_v12 = vld [vmem:[#allocation2 + $0x308] sm:$0xff] }
 0x715   :  { %v1381_v30 = vmul.f32 %v4879_v6, %v1380_v21  ;;  %v1390_v24 = vsel %vm578_vm1, %v1291_v28, %v1341_v31  ;;  %9662 = vst [vmem:[#allocation18_spill] sm:$0xff] %v7099_v20  ;;  %v7108_v21 = vld [vmem:[#allocation2 + $0x330] sm:$0xff]  ;;  %v7138_v28 = vld [vmem:[#allocation2 + $0x2c0] sm:$0xff] }
 0x716   :  { %9663 = vst [vmem:[#allocation17_spill] sm:$0xff] %v7102_v11  ;;  %v7132_v31 = vld [vmem:[#allocation2 + $0x2f0] sm:$0xff] }
 0x717   :  { %v1385_v57 = vsel %vm1384_vm2, %v4879_v6, %v1381_v30  ;;  %v7070_v6 = vld [vmem:[#allocation2 + $0x390] sm:$0xff]  ;;  %9665 = vst [vmem:[#allocation23_spill] sm:$0xff] %v7108_v21  ;;  %v7114_v30 = vld [vmem:[#allocation2 + $0x300] sm:$0xff] }
 0x718   :  { %v1386_v55 = vmul.f32 %v1385_v57, %v1374_v17  ;;  %9667 = vst [vmem:[#allocation21_spill] sm:$0xff] %v7114_v30  ;;  %v7120_v17 = vld [vmem:[#allocation2 + $0x310] sm:$0xff]  ;;  %v7126_v57 = vld [vmem:[#allocation2 + $0x2e0] sm:$0xff] }
 0x719   :  { %9668 = vst [vmem:[#allocation28_spill] sm:$0xff] %v7117_v12 }
 0x71a   :  { %vm1387_vm8 = vcmp.ge.f32.partialorder %v1386_v55, 0.0  ;;  %v1388_v22 = vmul.f32 0.01, %v1386_v55  ;;  %9669 = vst [vmem:[#allocation27_spill] sm:$0xff] %v7120_v17 }
 0x71b   :  { %9671 = vst [vmem:[#allocation25_spill] sm:$0xff] %v7126_v57 }
 0x71c   :  { %v1389_v34 = vsel %vm1387_vm8, %v1386_v55, %v1388_v22  ;;  %v7129_v55 = vld [vmem:[#allocation2 + $0x2e8] sm:$0xff]  ;;  %9673 = vst [vmem:[#allocation31_spill] sm:$0xff] %v7132_v31  ;;  %v7135_v22 = vld [vmem:[#allocation2 + $0x2f8] sm:$0xff] }
 0x71d   :  { %v1391_v5 = vsel %vm580_vm4, %v1390_v24, %v1389_v34  ;;  %9672 = vst [vmem:[#allocation32_spill] sm:$0xff] %v7129_v55  ;;  %v7141_v34 = vld [vmem:[#allocation2 + $0x2c8] sm:$0xff]  ;;  %v7144_v24 = vld [vmem:[#allocation2 + $0x2d0] sm:$0xff] }
 0x71e   :  { %1398 = vrot.lane.b32.xlu2 %v1391_v5, %s5718_s29  ;;  %9674 = vst [vmem:[#allocation30_spill] sm:$0xff] %v7135_v22  ;;  %v7147_v5 = vld [vmem:[#allocation2 + $0x2d8] sm:$0xff] }
 0x71f   :  { %9675 = vst [vmem:[#allocation29_spill] sm:$0xff] %v7138_v28 }
 0x720   :  { %9676 = vst [vmem:[#allocation36_spill] sm:$0xff] %v7141_v34 }
 0x721   :  { %9677 = vst [vmem:[#allocation35_spill] sm:$0xff] %v7144_v24 }
 0x722   :  { %9678 = vst [vmem:[#allocation34_spill] sm:$0xff] %v7147_v5 }
 0x778   :  { %v1399_v26 = vpop.permute.xlu2 %1398 }
 0x779   :  { %v1402_v27 = vsel %vm175_vm0, %v6941_v38, %v1399_v26  ;;  %v7061_v38 = vld [vmem:[#allocation2 + $0x3b8] sm:$0xff]  ;;  %v7150_v26 = vld [vmem:[#allocation2 + $0x2a0] sm:$0xff] }
 0x77a   :  { %4571 = vmatmul.msk.f32.vlgmr.msra.gmra.mxu1 %vm177_vm5, %v1402_v27  ;;  %4572 = vmatmul.msk.f32.vlgmr.msra.gmra.mxu0 %vm177_vm5, %v1402_v27  ;;  %9679 = vst [vmem:[#allocation33_spill] sm:$0xff] %v7150_v26 }
 0x77b   :  { %4573 = vmatmul.msk.f32.vlgmr.msrb.gmra.mxu3 %vm177_vm5, %v1402_v27  ;;  %4574 = vmatmul.msk.f32.vlgmr.msrb.gmra.mxu2 %vm177_vm5, %v1402_v27  ;;  %v7153_v27 = vld [vmem:[#allocation2 + $0x2a8] sm:$0xff] }
 0x77c   :  { %1828 = vmatpush.msra.mxu1 %v7052_v58  ;;  %1868 = vmatpush.msra.mxu0 %v7055_v32  ;;  %9680 = vst [vmem:[#allocation40_spill] sm:$0xff] %v7153_v27 }
 0x77d   :  { %1908 = vmatpush.msrb.mxu3 %v7058_v19  ;;  %1948 = vmatpush.msrb.mxu2 %v7061_v38 }
 0x77e   :  { %1829 = vmatpush.msra.mxu1 %v7064_v46  ;;  %1869 = vmatpush.msra.mxu0 %v7067_v29 }
 0x77f   :  { %1909 = vmatpush.msrb.mxu3 %v7070_v6  ;;  %1949 = vmatpush.msrb.mxu2 %v7073_v49 }
 0x780   :  { %1830 = vmatpush.msra.mxu1 %v7076_v2  ;;  %1870 = vmatpush.msra.mxu0 %v7079_v48 }
 0x781   :  { %1910 = vmatpush.msrb.mxu3 %v7082_v14  ;;  %1950 = vmatpush.msrb.mxu2 %v7085_v18 }
 0x782   :  { %1502 = vmatmul.f32.vlgmr.msrb.gmra.mxu1 %v6945_v35  ;;  %1542 = vmatmul.f32.vlgmr.msrb.gmra.mxu0 %v6945_v35  ;;  %v7105_v35 = vld [vmem:[#allocation2 + $0x328] sm:$0xff] }
 0x783   :  { %1831 = vmatpush.msra.mxu1 %v7090_v60  ;;  %1871 = vmatpush.msra.mxu0 %v7093_v4  ;;  %9664 = vst [vmem:[#allocation24_spill] sm:$0xff] %v7105_v35 }
 0x784   :  { %1911 = vmatpush.msrb.mxu3 %v7096_v8  ;;  %1951 = vmatpush.msrb.mxu2 %v7099_v20 }
 0x785   :  { %1832 = vmatpush.msra.mxu1 %v7102_v11  ;;  %1872 = vmatpush.msra.mxu0 %v7105_v35 }
 0x786   :  { %1912 = vmatpush.msrb.mxu3 %v7108_v21  ;;  %1952 = vmatpush.msrb.mxu2 %v7111_v59 }
 0x787   :  { %1833 = vmatpush.msra.mxu1 %v7114_v30  ;;  %1873 = vmatpush.msra.mxu0 %v7117_v12 }
 0x788   :  { %1913 = vmatpush.msrb.mxu3 %v7120_v17  ;;  %1953 = vmatpush.msrb.mxu2 %v7123_v54 }
 0x789   :  { %1834 = vmatpush.msra.mxu1 %v7126_v57  ;;  %1874 = vmatpush.msra.mxu0 %v7129_v55 }
 0x78a   :  { %1914 = vmatpush.msrb.mxu3 %v7132_v31  ;;  %1954 = vmatpush.msrb.mxu2 %v7135_v22  ;;  %v1463_v22 = vpop.f32.mrf.mxu2 }
 0x78b   :  { %1835 = vmatpush.msra.mxu1 %v7138_v28  ;;  %1875 = vmatpush.msra.mxu0 %v7141_v34  ;;  %v7156_v28 = vld [vmem:[#allocation2 + $0x2b0] sm:$0xff]  ;;  %v7159_v34 = vld [vmem:[#allocation2 + $0x2b8] sm:$0xff]  ;;  %v1464_v31 = vadd.f32 %v1463_v22, %v9650_v42 }
 0x78c   :  { %1915 = vmatpush.msrb.mxu3 %v7144_v24  ;;  %1955 = vmatpush.msrb.mxu2 %v7147_v5  ;;  %9681 = vst [vmem:[#allocation39_spill] sm:$0xff] %v7156_v28  ;;  %v7162_v24 = vld [vmem:[#allocation2 + $0x280] sm:$0xff]  ;;  %v7165_v5 = vld [vmem:[#allocation2 + $0x288] sm:$0xff] }
 0x78d   :  { %1836 = vmatpush.msra.mxu1 %v7150_v26  ;;  %1876 = vmatpush.msra.mxu0 %v7153_v27  ;;  %9682 = vst [vmem:[#allocation38_spill] sm:$0xff] %v7159_v34  ;;  %v7168_v26 = vld [vmem:[#allocation2 + $0x290] sm:$0xff]  ;;  %v7171_v27 = vld [vmem:[#allocation2 + $0x298] sm:$0xff] }
 0x78e   :  { %1916 = vmatpush.msrb.mxu3 %v7156_v28  ;;  %1956 = vmatpush.msrb.mxu2 %v7159_v34  ;;  %9683 = vst [vmem:[#allocation37_spill] sm:$0xff] %v7162_v24  ;;  %v7174_v28 = vld [vmem:[#allocation2 + $0x260] sm:$0xff]  ;;  %v7177_v34 = vld [vmem:[#allocation2 + $0x268] sm:$0xff] }
 0x78f   :  { %1837 = vmatpush.msra.mxu1 %v7162_v24  ;;  %9684 = vst [vmem:[#allocation44_spill] sm:$0xff] %v7165_v5  ;;  %1877 = vmatpush.msra.mxu0 %v7165_v5  ;;  %v7180_v24 = vld [vmem:[#allocation2 + $0x270] sm:$0xff]  ;;  %v7183_v5 = vld [vmem:[#allocation2 + $0x278] sm:$0xff] }
 0x790   :  { %9685 = vst [vmem:[#allocation43_spill] sm:$0xff] %v7168_v26  ;;  %1917 = vmatpush.msrb.mxu3 %v7168_v26  ;;  %1957 = vmatpush.msrb.mxu2 %v7171_v27  ;;  %v7186_v26 = vld [vmem:[#allocation2 + $0x240] sm:$0xff] }
 0x791   :  { %9686 = vst [vmem:[#allocation42_spill] sm:$0xff] %v7171_v27  ;;  %1838 = vmatpush.msra.mxu1 %v7174_v28  ;;  %1878 = vmatpush.msra.mxu0 %v7177_v34  ;;  %v7189_v27 = vld [vmem:[#allocation2 + $0x248] sm:$0xff] }
 0x792   :  { %9687 = vst [vmem:[#allocation41_spill] sm:$0xff] %v7174_v28  ;;  %1918 = vmatpush.msrb.mxu3 %v7180_v24  ;;  %1958 = vmatpush.msrb.mxu2 %v7183_v5  ;;  %v7192_v28 = vld [vmem:[#allocation2 + $0x250] sm:$0xff] }
 0x793   :  { %9688 = vst [vmem:[#allocation48_spill] sm:$0xff] %v7177_v34  ;;  %1839 = vmatpush.msra.mxu1 %v7186_v26  ;;  %1879 = vmatpush.msra.mxu0 %v7189_v27  ;;  %v7195_v34 = vld [vmem:[#allocation2 + $0x258] sm:$0xff] }
 0x794   :  { %9689 = vst [vmem:[#allocation47_spill] sm:$0xff] %v7180_v24  ;;  %1919 = vmatpush.msrb.mxu3 %v7192_v28  ;;  %1959 = vmatpush.msrb.mxu2 %v7195_v34  ;;  %v7198_v24 = vld [vmem:[#allocation2 + $0x220] sm:$0xff] }
 0x795   :  { %9690 = vst [vmem:[#allocation46_spill] sm:$0xff] %v7183_v5  ;;  %1840 = vmatpush.msra.mxu1 %v7198_v24  ;;  %v7201_v5 = vld [vmem:[#allocation2 + $0x228] sm:$0xff] }
 0x796   :  { %9691 = vst [vmem:[#allocation45_spill] sm:$0xff] %v7186_v26  ;;  %1880 = vmatpush.msra.mxu0 %v7201_v5  ;;  %v7204_v26 = vld [vmem:[#allocation2 + $0x230] sm:$0xff] }
 0x797   :  { %9692 = vst [vmem:[#allocation52_spill] sm:$0xff] %v7189_v27  ;;  %1920 = vmatpush.msrb.mxu3 %v7204_v26  ;;  %v7207_v27 = vld [vmem:[#allocation2 + $0x238] sm:$0xff] }
 0x798   :  { %9693 = vst [vmem:[#allocation51_spill] sm:$0xff] %v7192_v28  ;;  %1960 = vmatpush.msrb.mxu2 %v7207_v27  ;;  %v7210_v28 = vld [vmem:[#allocation2 + $0x200] sm:$0xff] }
 0x799   :  { %9694 = vst [vmem:[#allocation50_spill] sm:$0xff] %v7195_v34  ;;  %1841 = vmatpush.msra.mxu1 %v7210_v28  ;;  %v7213_v34 = vld [vmem:[#allocation2 + $0x208] sm:$0xff] }
 0x79a   :  { %9695 = vst [vmem:[#allocation49_spill] sm:$0xff] %v7198_v24  ;;  %1881 = vmatpush.msra.mxu0 %v7213_v34  ;;  %v7216_v24 = vld [vmem:[#allocation2 + $0x1f0] sm:$0xff] }
 0x79b   :  { %9696 = vst [vmem:[#allocation56_spill] sm:$0xff] %v7201_v5  ;;  %1886 = vmatpush.msrb.mxu1 %v7216_v24  ;;  %v7219_v5 = vld [vmem:[#allocation2 + $0x1f8] sm:$0xff] }
 0x79c   :  { %9697 = vst [vmem:[#allocation55_spill] sm:$0xff] %v7204_v26  ;;  %1926 = vmatpush.msrb.mxu0 %v7219_v5  ;;  %v7222_v26 = vld [vmem:[#allocation2 + $0x210] sm:$0xff] }
 0x79d   :  { %9698 = vst [vmem:[#allocation54_spill] sm:$0xff] %v7207_v27  ;;  %1921 = vmatpush.msrb.mxu3 %v7222_v26  ;;  %v7225_v27 = vld [vmem:[#allocation2 + $0x218] sm:$0xff] }
 0x79e   :  { %9699 = vst [vmem:[#allocation53_spill] sm:$0xff] %v7210_v28  ;;  %1961 = vmatpush.msrb.mxu2 %v7225_v27  ;;  %v7228_v28 = vld [vmem:[#allocation2 + $0x1d0] sm:$0xff] }
 0x79f   :  { %9700 = vst [vmem:[#allocation60_spill] sm:$0xff] %v7213_v34  ;;  %1887 = vmatpush.msrb.mxu1 %v7228_v28  ;;  %v7231_v34 = vld [vmem:[#allocation2 + $0x1d8] sm:$0xff] }
 0x7a0   :  { %9701 = vst [vmem:[#allocation59_spill] sm:$0xff] %v7216_v24  ;;  %1927 = vmatpush.msrb.mxu0 %v7231_v34  ;;  %v7234_v24 = vld [vmem:[#allocation2 + $0x1b0] sm:$0xff] }
 0x7a1   :  { %9702 = vst [vmem:[#allocation58_spill] sm:$0xff] %v7219_v5  ;;  %1888 = vmatpush.msrb.mxu1 %v7234_v24  ;;  %v7237_v5 = vld [vmem:[#allocation2 + $0x1b8] sm:$0xff] }
 0x7a2   :  { %9703 = vst [vmem:[#allocation57_spill] sm:$0xff] %v7222_v26  ;;  %1928 = vmatpush.msrb.mxu0 %v7237_v5  ;;  %v7240_v26 = vld [vmem:[#allocation2 + $0x190] sm:$0xff] }
 0x7a3   :  { %9704 = vst [vmem:[#allocation63_spill] sm:$0xff] %v7225_v27  ;;  %1889 = vmatpush.msrb.mxu1 %v7240_v26  ;;  %v7243_v27 = vld [vmem:[#allocation2 + $0x198] sm:$0xff] }
 0x7a4   :  { %9705 = vst [vmem:[#allocation62_spill] sm:$0xff] %v7228_v28  ;;  %1929 = vmatpush.msrb.mxu0 %v7243_v27  ;;  %v7246_v28 = vld [vmem:[#allocation2 + $0x170] sm:$0xff] }
 0x7a5   :  { %9706 = vst [vmem:[#allocation61_spill] sm:$0xff] %v7231_v34  ;;  %1890 = vmatpush.msrb.mxu1 %v7246_v28  ;;  %v7249_v34 = vld [vmem:[#allocation2 + $0x178] sm:$0xff] }
 0x7a6   :  { %9707 = vst [vmem:[#allocation65_spill] sm:$0xff] %v7234_v24  ;;  %1930 = vmatpush.msrb.mxu0 %v7249_v34  ;;  %v7252_v24 = vld [vmem:[#allocation2 + $0x150] sm:$0xff] }
 0x7a7   :  { %9708 = vst [vmem:[#allocation64_spill] sm:$0xff] %v7237_v5  ;;  %1891 = vmatpush.msrb.mxu1 %v7252_v24  ;;  %v7255_v5 = vld [vmem:[#allocation2 + $0x158] sm:$0xff] }
 0x7a8   :  { %9709 = vst [vmem:[#allocation66_spill] sm:$0xff] %v7240_v26  ;;  %1931 = vmatpush.msrb.mxu0 %v7255_v5  ;;  %v7258_v26 = vld [vmem:[#allocation2 + $0x130] sm:$0xff] }
 0x7a9   :  { %9710 = vst [vmem:[#allocation67_spill] sm:$0xff] %v7243_v27  ;;  %1892 = vmatpush.msrb.mxu1 %v7258_v26  ;;  %v7261_v27 = vld [vmem:[#allocation2 + $0x138] sm:$0xff] }
 0x7aa   :  { %9711 = vst [vmem:[#allocation68_spill] sm:$0xff] %v7246_v28  ;;  %1932 = vmatpush.msrb.mxu0 %v7261_v27  ;;  %v7264_v28 = vld [vmem:[#allocation2 + $0x110] sm:$0xff] }
 0x7ab   :  { %9712 = vst [vmem:[#allocation69_spill] sm:$0xff] %v7249_v34  ;;  %1893 = vmatpush.msrb.mxu1 %v7264_v28  ;;  %v7267_v34 = vld [vmem:[#allocation2 + $0x118] sm:$0xff] }
 0x7ac   :  { %9713 = vst [vmem:[#allocation70_spill] sm:$0xff] %v7252_v24  ;;  %1933 = vmatpush.msrb.mxu0 %v7267_v34  ;;  %v7270_v24 = vld [vmem:[#allocation2 + $0xf0] sm:$0xff] }
 0x7ad   :  { %9714 = vst [vmem:[#allocation71_spill] sm:$0xff] %v7255_v5  ;;  %1894 = vmatpush.msrb.mxu1 %v7270_v24  ;;  %v7273_v5 = vld [vmem:[#allocation2 + $0xf8] sm:$0xff] }
 0x7ae   :  { %9715 = vst [vmem:[#allocation72_spill] sm:$0xff] %v7258_v26  ;;  %1934 = vmatpush.msrb.mxu0 %v7273_v5  ;;  %v7276_v26 = vld [vmem:[#allocation2 + $0xd0] sm:$0xff] }
 0x7af   :  { %9716 = vst [vmem:[#allocation73_spill] sm:$0xff] %v7261_v27  ;;  %1895 = vmatpush.msrb.mxu1 %v7276_v26  ;;  %v7279_v27 = vld [vmem:[#allocation2 + $0xd8] sm:$0xff] }
 0x7b0   :  { %9717 = vst [vmem:[#allocation74_spill] sm:$0xff] %v7264_v28  ;;  %1935 = vmatpush.msrb.mxu0 %v7279_v27  ;;  %v7282_v28 = vld [vmem:[#allocation2 + $0xb0] sm:$0xff] }
 0x7b1   :  { %9718 = vst [vmem:[#allocation75_spill] sm:$0xff] %v7267_v34  ;;  %1896 = vmatpush.msrb.mxu1 %v7282_v28  ;;  %v7285_v34 = vld [vmem:[#allocation2 + $0xb8] sm:$0xff] }
 0x7b2   :  { %9719 = vst [vmem:[#allocation76_spill] sm:$0xff] %v7270_v24  ;;  %1936 = vmatpush.msrb.mxu0 %v7285_v34  ;;  %v7288_v24 = vld [vmem:[#allocation2 + $0x90] sm:$0xff] }
 0x7b3   :  { %9720 = vst [vmem:[#allocation77_spill] sm:$0xff] %v7273_v5  ;;  %1897 = vmatpush.msrb.mxu1 %v7288_v24  ;;  %v7291_v5 = vld [vmem:[#allocation2 + $0x98] sm:$0xff] }
 0x7b4   :  { %9721 = vst [vmem:[#allocation78_spill] sm:$0xff] %v7276_v26  ;;  %1937 = vmatpush.msrb.mxu0 %v7291_v5  ;;  %v7294_v26 = vld [vmem:[#allocation2 + $0x70] sm:$0xff] }
 0x7b5   :  { %9722 = vst [vmem:[#allocation79_spill] sm:$0xff] %v7279_v27  ;;  %1898 = vmatpush.msrb.mxu1 %v7294_v26  ;;  %v7297_v27 = vld [vmem:[#allocation2 + $0x78] sm:$0xff] }
 0x7b6   :  { %9723 = vst [vmem:[#allocation80_spill] sm:$0xff] %v7282_v28  ;;  %1938 = vmatpush.msrb.mxu0 %v7297_v27  ;;  %v7300_v28 = vld [vmem:[#allocation2 + $0x50] sm:$0xff] }
 0x7b7   :  { %9724 = vst [vmem:[#allocation81_spill] sm:$0xff] %v7285_v34  ;;  %1899 = vmatpush.msrb.mxu1 %v7300_v28  ;;  %v7303_v34 = vld [vmem:[#allocation2 + $0x58] sm:$0xff] }
 0x7b8   :  { %9725 = vst [vmem:[#allocation82_spill] sm:$0xff] %v7288_v24  ;;  %1939 = vmatpush.msrb.mxu0 %v7303_v34  ;;  %v7306_v24 = vld [vmem:[#allocation2 + $0x30] sm:$0xff] }
 0x7b9   :  { %9726 = vst [vmem:[#allocation83_spill] sm:$0xff] %v7291_v5  ;;  %1900 = vmatpush.msrb.mxu1 %v7306_v24  ;;  %v7309_v5 = vld [vmem:[#allocation2 + $0x38] sm:$0xff] }
 0x7ba   :  { %9727 = vst [vmem:[#allocation84_spill] sm:$0xff] %v7294_v26  ;;  %1940 = vmatpush.msrb.mxu0 %v7309_v5  ;;  %v7312_v26 = vld [vmem:[#allocation2 + $0x10] sm:$0xff] }
 0x7bb   :  { %9728 = vst [vmem:[#allocation85_spill] sm:$0xff] %v7297_v27  ;;  %1901 = vmatpush.msrb.mxu1 %v7312_v26  ;;  %v7315_v27 = vld [vmem:[#allocation2 + $0x18] sm:$0xff] }
 0x7bc   :  { %9729 = vst [vmem:[#allocation86_spill] sm:$0xff] %v7300_v28  ;;  %1941 = vmatpush.msrb.mxu0 %v7315_v27  ;;  %v1423_v28 = vpop.f32.mrf.mxu3 }
 0x7bd   :  { %9730 = vst [vmem:[#allocation87_spill] sm:$0xff] %v7303_v34  ;;  %v1424_v34 = vadd.f32 %v1423_v28, %v9649_v45 }
 0x7be   :  { %9731 = vst [vmem:[#allocation88_spill] sm:$0xff] %v7306_v24 }
 0x7bf   :  { %9732 = vst [vmem:[#allocation89_spill] sm:$0xff] %v7309_v5 }
 0x7c0   :  { %9733 = vst [vmem:[#allocation90_spill] sm:$0xff] %v7312_v26 }
 0x7c1   :  { %9734 = vst [vmem:[#allocation91_spill] sm:$0xff] %v7315_v27 }
 0x7f7   :  { %v1443_v55 = vpop.f32.mrf.mxu1  ;;  %v1483_v24 = vpop.f32.mrf.mxu0 }
 0x7f8   :  { %v1444_v57 = vadd.f32 %v1443_v55, %v1424_v34  ;;  %v1484_v54 = vadd.f32 %v1483_v24, %v1464_v31 }
 0x7fa   :  { %v4575_v17 = vmul.f32 -1.442695, %v1444_v57  ;;  %v4576_v5 = vmul.f32 -1.442695, %v1484_v54 }
 0x7fc   :  { %4880 = vpow2.f32 %v4575_v17 }
 0x7fd   :  { %4882 = vpow2.f32 %v4576_v5 }
 0x7fe   :  { %v1523_v59 = vpop.f32.mrf.mxu3  ;;  %v1563_v21 = vpop.f32.mrf.mxu2 }
 0x7ff   :  { %v1503_v12 = vpop.f32.mrf.mxu1  ;;  %v1543_v26 = vpop.f32.mrf.mxu0 }
 0x800   :  { %v1504_v30 = vadd.f32 %v1503_v12, %v9651_v63  ;;  %v1544_v27 = vadd.f32 %v1543_v26, %v9652_v53 }
 0x802   :  { %v4881_v35 = vpop.eup %4880  ;;  %v1524_v28 = vadd.f32 %v1523_v59, %v1504_v30  ;;  %v1564_v45 = vadd.f32 %v1563_v21, %v1544_v27 }
 0x803   :  { %v4883_v22 = vpop.eup %4882  ;;  %v1578_v31 = vadd.f32 1.0, %v4881_v35 }
 0x804   :  { %v1579_v42 = vadd.f32 1.0, %v4883_v22  ;;  %v4577_v11 = vmul.f32 -1.442695, %v1524_v28  ;;  %v4578_v55 = vmul.f32 -1.442695, %v1564_v45 }
 0x805   :  { %vm1587_vm15 = vweird.f32 %v1578_v31 }
 0x806   :  { %4884 = vrcp.f32 %v1579_v42  ;;  %vm1602_vm11 = vweird.f32 %v1579_v42 }
 0x807   :  { %4886 = vpow2.f32 %v4577_v11 }
 0x808   :  { %4888 = vpow2.f32 %v4578_v55 }
 0x809   :  { %4890 = vrcp.f32 %v1578_v31 }
 0x80c   :  { %v4885_v17 = vpop.eup %4884 }
 0x80d   :  { %v4887_v54 = vpop.eup %4886  ;;  %v1598_v24 = vmul.f32 %v4885_v17, %v1579_v42  ;;  %vm1603_vm9 = vweird.f32 %v4885_v17 }
 0x80e   :  { %v4889_v57 = vpop.eup %4888  ;;  %v1580_v5 = vadd.f32 1.0, %v4887_v54  ;;  %v1608_v54 = vand.u32 2147483648, %v1579_v42  ;;  %vm7322_vm13 = vmor %vm1602_vm11, %vm1603_vm9 }
 0x80f   :  { %v4891_v12 = vpop.eup %4890  ;;  %v1581_v34 = vadd.f32 1.0, %v4889_v57  ;;  %v1599_v59 = vsub.f32 1.0, %v1598_v24  ;;  %v1606_v57 = vand.u32 2147483647, %v1579_v42 }
 0x810   :  { %v1583_v26 = vmul.f32 %v4891_v12, %v1578_v31  ;;  %vm1588_vm12 = vweird.f32 %v4891_v12  ;;  %v1609_v42 = vor.u32 1.1754944e-38, %v1608_v54  ;;  %vm1617_vm11 = vweird.f32 %v1580_v5 }
 0x811   :  { %4892 = vrcp.f32 %v1581_v34  ;;  %v1600_v27 = vmul.f32 %v4885_v17, %v1599_v59  ;;  %v1638_v22 = vand.u32 2147483648, %v1581_v34  ;;  %v1636_v63 = vand.u32 2147483647, %v1581_v34  ;;  %vm1589_vm7 = vmor %vm1587_vm15, %vm1588_vm12 }
 0x812   :  { %4894 = vrcp.f32 %v1580_v5  ;;  %v1584_v21 = vsub.f32 1.0, %v1583_v26  ;;  %vm1632_vm14 = vweird.f32 %v1581_v34  ;;  %v1593_v59 = vand.u32 2147483648, %v1578_v31 }
 0x813   :  { %v1601_v55 = vadd.f32 %v4885_v17, %v1600_v27  ;;  %v1591_v27 = vand.u32 2147483647, %v1578_v31  ;;  %vm1637_vm6 = vcmp.eq.f32.partialorder %v1636_v63, 8.507059e+37  ;;  %vm1607_vm8 = vcmp.eq.f32.partialorder %v1606_v57, 8.507059e+37 }
 0x814   :  { %v1585_v28 = vmul.f32 %v4891_v12, %v1584_v21  ;;  %v1639_v21 = vor.u32 1.1754944e-38, %v1638_v22  ;;  %v1594_v14 = vor.u32 1.1754944e-38, %v1593_v59  ;;  %v1623_v63 = vand.u32 2147483648, %v1580_v5 }
 0x815   :  { %vm1592_vm9 = vcmp.eq.f32.partialorder %v1591_v27, 8.507059e+37 }
 0x816   :  { %v1586_v8 = vadd.f32 %v4891_v12, %v1585_v28 }
 0x817   :  { %v4893_v30 = vpop.eup %4892 }
 0x818   :  { %v1628_v45 = vmul.f32 %v4893_v30, %v1581_v34  ;;  %v4895_v35 = vpop.eup %4894  ;;  %vm1633_vm10 = vweird.f32 %v4893_v30  ;;  %v1590_v60 = vsel %vm1589_vm7, %v4891_v12, %v1586_v8  ;;  %v1621_v8 = vand.u32 2147483647, %v1580_v5 }
 0x819   :  { %v1613_v20 = vmul.f32 %v4895_v35, %v1580_v5  ;;  %vm1634_vm2 = vmor %vm1632_vm14, %vm1633_vm10  ;;  %v1595_v48 = vsel %vm1592_vm9, %v1594_v14, %v1590_v60  ;;  %vm1618_vm10 = vweird.f32 %v4895_v35 }
 0x81a   :  { %v1629_v11 = vsub.f32 1.0, %v1628_v45  ;;  %v1605_v45 = vsel %vm7322_vm13, %v4885_v17, %v1601_v55  ;;  %vm1619_vm12 = vmor %vm1617_vm11, %vm1618_vm10  ;;  %vm1622_vm13 = vcmp.eq.f32.partialorder %v1621_v8, 8.507059e+37 }
 0x81b   :  { %v1614_v28 = vsub.f32 1.0, %v1613_v20  ;;  %v1624_v20 = vor.u32 1.1754944e-38, %v1623_v63 }
 0x81c   :  { %v1630_v53 = vmul.f32 %v4893_v30, %v1629_v11 }
 0x81d   :  { %v1615_v2 = vmul.f32 %v4895_v35, %v1614_v28 }
 0x81e   :  { %v1631_v26 = vadd.f32 %v4893_v30, %v1630_v53  ;;  %v1610_v53 = vsel %vm1607_vm8, %v1609_v42, %v1605_v45 }
 0x81f   :  { %v1644_v31 = vmul.f32 %v1610_v53, %v6914_v3  ;;  %v1616_v17 = vadd.f32 %v4895_v35, %v1615_v2 }
 0x820   :  { %v1635_v11 = vsel %vm1634_vm2, %v4893_v30, %v1631_v26 }
 0x821   :  { %v1640_v4 = vsel %vm1637_vm6, %v1639_v21, %v1635_v11 }
 0x822   :  { %v1642_v18 = vmul.f32 2.0, %v1640_v4  ;;  %v1620_v4 = vsel %vm1619_vm12, %v4895_v35, %v1616_v17 }
 0x824   :  { %v4579_v34 = vadd.f32 -1.0, %v1642_v18  ;;  %v1625_v18 = vsel %vm1622_vm13, %v1624_v20, %v1620_v4 }
 0x826   :  { %v1645_v22 = vmul.f32 %v4579_v34, %v1595_v48 }
 0x828   :  { %v7329_v24 = vadd.f32 %v1645_v22, %v1644_v31 }
 0x82a   :  { %4896 = vtanh.f32 %v7329_v24 }
 0x830   :  { %v4897_v12 = vpop.eup %4896 }
 0x831   :  { %v7332_v14 = vmul.f32 %v4897_v12, %v1625_v18 }
 0x833   :  { %1693 = vrot.lane.b32.xlu0 %v7332_v14, %s5717_s28  ;;  %v1661_v3 = vmul.f32 %v7332_v14, %v7332_v14  ;;  %v1649_v2 = vsel %vm429_vm3, %v7332_v14, 0.0 }
 0x835   :  { %1757 = vrot.lane.b32.xlu2 %v1661_v3, %s5716_s2  ;;  %1709 = vrot.lane.b32.xlu1 %v1661_v3, %s5717_s28  ;;  %v1662_v48 = vsel %vm429_vm3, %v1661_v3, 0.0 }
 0x83b   :  { %1742 = vrot.lane.b32.xlu0 %v7332_v14, %s5716_s2 }
 0x85f   :  { %1650 = vadd.xlane.f32.xlu1 %v1649_v2 }
 0x865   :  { %1663 = vadd.xlane.f32.xlu0 %v1662_v48 }
 0x88f   :  { %v1758_v60 = vpop.permute.xlu2 %1757 }
 0x890   :  { %v1760_v5 = vsel %vm429_vm3, %v1758_v60, 0.0 }
 0x891   :  { %1761 = vadd.xlane.f32.xlu0 %v1760_v5 }
 0x8a5   :  { %v1694_v30 = vpop.permute.xlu0 %1693 }
 0x8a6   :  { %v1696_v35 = vsel %vm429_vm3, %v1694_v30, 0.0 }
 0x8a7   :  { %1697 = vadd.xlane.f32.xlu2 %v1696_v35  ;;  %v1710_v55 = vpop.permute.xlu1 %1709 }
 0x8a8   :  { %v1712_v57 = vsel %vm429_vm3, %v1710_v55, 0.0 }
 0x8a9   :  { %1713 = vadd.xlane.f32.xlu1 %v1712_v57 }
 0x8ad   :  { %v1743_v54 = vpop.permute.xlu0 %1742 }
 0x8ae   :  { %v1745_v26 = vsel %vm429_vm3, %v1743_v54, 0.0 }
 0x8af   :  { %1746 = vadd.xlane.f32.xlu2 %v1745_v26 }
 0x8c2   :  { %1794 = vrot.lane.b32.xlu1 %v7332_v14, %s5718_s29 }
 0x8d2   :  { %v1651_v59 = vpop.xlane.xlu1 %1650 }
 0x8d3   :  { %v1652_v21 = vrot.slane %v1651_v59, 4 }
 0x8d5   :  { %v1653_v27 = vadd.f32 %v1652_v21, %v1651_v59 }
 0x8d7   :  { %v1654_v45 = vrot.slane %v1653_v27, 2 }
 0x8d8   :  { %v1664_v11 = vpop.xlane.xlu0 %1663 }
 0x8d9   :  { %v1665_v42 = vrot.slane %v1664_v11, 4  ;;  %v1655_v28 = vadd.f32 %v1654_v45, %v1653_v27 }
 0x8db   :  { %v1666_v53 = vadd.f32 %v1665_v42, %v1664_v11  ;;  %v1656_v34 = vrot.slane %v1655_v28, 1 }
 0x8dd   :  { %v1667_v31 = vrot.slane %v1666_v53, 2  ;;  %v1657_v22 = vadd.f32 %v1656_v34, %v1655_v28 }
 0x8df   :  { %4708 = vpush %v1657_v22  ;;  %v1668_v17 = vadd.f32 %v1667_v31, %v1666_v53 }
 0x8e1   :  { %v1669_v63 = vrot.slane %v1668_v17, 1 }
 0x8e3   :  { %v1670_v8 = vadd.f32 %v1669_v63, %v1668_v17 }
 0x8e5   :  { %4710 = vpush %v1670_v8  ;;  %v4580_v8 = vld [vmem:[%s8945_s0 + $0x8] sm:$0x3] }
 0x904   :  { %v1762_v4 = vpop.xlane.xlu0 %1761 }
 0x905   :  { %v1763_v20 = vrot.slane %v1762_v4, 4 }
 0x907   :  { %v1764_v60 = vadd.f32 %v1763_v20, %v1762_v4 }
 0x909   :  { %v1765_v57 = vrot.slane %v1764_v60, 2 }
 0x90b   :  { %v1766_v42 = vadd.f32 %v1765_v57, %v1764_v60 }
 0x90d   :  { %v1767_v31 = vrot.slane %v1766_v42, 1 }
 0x90f   :  { %v1768_v63 = vadd.f32 %v1767_v31, %v1766_v42 }
 0x910   :  { %s4709_s8 = spop %4708 }
 0x916   :  { %s4711_s9 = spop %4710 }
 0x91a   :  { %v1698_v12 = vpop.xlane.xlu2 %1697 }
 0x91b   :  { %v1699_v18 = vrot.slane %v1698_v12, 4 }
 0x91c   :  { %v1714_v3 = vpop.xlane.xlu1 %1713 }
 0x91d   :  { %v1700_v2 = vadd.f32 %v1699_v18, %v1698_v12  ;;  %v1715_v48 = vrot.slane %v1714_v3, 4 }
 0x91f   :  { %v1701_v5 = vrot.slane %v1700_v2, 2  ;;  %v1716_v30 = vadd.f32 %v1715_v48, %v1714_v3 }
 0x921   :  { %v1717_v35 = vrot.slane %v1716_v30, 2  ;;  %v1702_v55 = vadd.f32 %v1701_v5, %v1700_v2 }
 0x922   :  { %v1747_v54 = vpop.xlane.xlu2 %1746 }
 0x923   :  { %v1748_v26 = vrot.slane %v1747_v54, 4  ;;  %v1703_v59 = vrot.slane %v1702_v55, 1  ;;  %v1718_v21 = vadd.f32 %v1717_v35, %v1716_v30 }
 0x925   :  { %v1749_v27 = vadd.f32 %v1748_v26, %v1747_v54  ;;  %v1704_v45 = vadd.f32 %v1703_v59, %v1702_v55  ;;  %v1719_v11 = vrot.slane %v1718_v21, 1 }
 0x927   :  { %v1750_v28 = vrot.slane %v1749_v27, 2  ;;  %4712 = vpush %v1704_v45  ;;  %v1720_v53 = vadd.f32 %v1719_v11, %v1718_v21 }
 0x929   :  { %v1751_v34 = vadd.f32 %v1750_v28, %v1749_v27  ;;  %4714 = vpush %v1720_v53 }
 0x92b   :  { %v1752_v22 = vrot.slane %v1751_v34, 1 }
 0x92d   :  { %v1753_v17 = vadd.f32 %v1752_v22, %v1751_v34 }
 0x92f   :  { %4716 = vpush %v1753_v17 }
 0x930   :  { %4718 = vpush %v1768_v63 }
 0x934   :  { %v7354_v4 = vpop.permute.xlu1 %1794 }
 0x935   :  { %v7358_v20 = vsel %vm175_vm0, %v4580_v8, %v7354_v4 }
 0x936   :  { %1822 = vmatmul.f32.vlgmr.msra.gmra.mxu3 %v7358_v20  ;;  %1862 = vmatmul.f32.vlgmr.msra.gmra.mxu2 %v7358_v20 }
 0x937   :  { %2206 = vmatpush.msra.mxu3 %v6949_v50  ;;  %2246 = vmatpush.msra.mxu2 %v6952_v9  ;;  %v1659_v50 = vstv %s4709_s8  ;;  %v1672_v9 = vstv %s4711_s9 }
 0x939   :  { %2207 = vmatpush.msra.mxu3 %v6955_v47  ;;  %2247 = vmatpush.msra.mxu2 %v6958_v41  ;;  %v7381_v47 = vmul.f32 %v1659_v50, %v6394_v23  ;;  %v1673_v41 = vmul.f32 %v1672_v9, %v6394_v23 }
 0x93b   :  { %2208 = vmatpush.msra.mxu3 %v6961_v39  ;;  %2248 = vmatpush.msra.mxu2 %v6964_v25  ;;  %v1674_v39 = vmul.f32 %v7381_v47, %v7381_v47  ;;  %v1676_v22 = vsub.f32 %v7332_v14, %v7381_v47 }
 0x93d   :  { %2209 = vmatpush.msra.mxu3 %v6967_v1  ;;  %2249 = vmatpush.msra.mxu2 %v6970_v56  ;;  %v1675_v25 = vsub.f32 %v1673_v41, %v1674_v39  ;;  %v7392_v1 = vld [vmem:[#allocation2 + $0x60] sm:$0xff]  ;;  %v7395_v56 = vld [vmem:[#allocation2 + $0x68] sm:$0xff] }
 0x93f   :  { %2210 = vmatpush.msra.mxu3 %v6973_v37  ;;  %2250 = vmatpush.msra.mxu2 %v6976_v33  ;;  %v7398_v37 = vld [vmem:[#allocation2 + $0x40] sm:$0xff]  ;;  %v7401_v33 = vld [vmem:[#allocation2 + $0x48] sm:$0xff] }
 0x941   :  { %2211 = vmatpush.msra.mxu3 %v6979_v0  ;;  %2251 = vmatpush.msra.mxu2 %v6982_v52  ;;  %v1677_v0 = vadd.f32 1e-05, %v1675_v25  ;;  %v7404_v52 = vld [vmem:[#allocation2 + $0x20] sm:$0xff] }
 0x943   :  { %2212 = vmatpush.msra.mxu3 %v6985_v7  ;;  %2252 = vmatpush.msra.mxu2 %v6988_v61  ;;  %v7407_v7 = vld [vmem:[#allocation2 + $0x28] sm:$0xff]  ;;  %v7410_v61 = vld [vmem:[#allocation2] sm:$0xff]  ;;  %4898 = vrsqrt.f32 %v1677_v0  ;;  %vm1684_vm2 = vweird.f32 %v1677_v0 }
 0x945   :  { %2213 = vmatpush.msra.mxu3 %v6991_v15  ;;  %2253 = vmatpush.msra.mxu2 %v6994_v40  ;;  %v7413_v15 = vld [vmem:[#allocation2 + $0x8] sm:$0xff] }
 0x947   :  { %2214 = vmatpush.msra.mxu3 %v7000_v16  ;;  %2254 = vmatpush.msra.mxu2 %v7003_v36 }
 0x949   :  { %2215 = vmatpush.msra.mxu3 %v7006_v43  ;;  %2255 = vmatpush.msra.mxu2 %v7009_v44  ;;  %v4899_v44 = vpop.eup %4898 }
 0x94a   :  { %vm1685_vm14 = vweird.f32 %v4899_v44 }
 0x94b   :  { %2216 = vmatpush.msra.mxu3 %v7014_v10  ;;  %2256 = vmatpush.msra.mxu2 %v7017_v62  ;;  %vm1686_vm6 = vmor %vm1684_vm2, %vm1685_vm14 }
 0x94d   :  { %2217 = vmatpush.msra.mxu3 %v7021_v13  ;;  %2257 = vmatpush.msra.mxu2 %v7024_v51  ;;  %v1679_v13 = vmul.f32 %v4899_v44, %v1677_v0 }
 0x94f   :  { %2218 = vmatpush.msra.mxu3 %v7392_v1  ;;  %2258 = vmatpush.msra.mxu2 %v7395_v56  ;;  %v1680_v2 = vmul.f32 %v4899_v44, %v1679_v13  ;;  %v9738_v13 = vld [vmem:[#allocation12_spill] sm:$0xff] }
 0x951   :  { %2219 = vmatpush.msra.mxu3 %v7398_v37  ;;  %2259 = vmatpush.msra.mxu2 %v7401_v33  ;;  %v1681_v30 = vmul.f32 0.5, %v1680_v2  ;;  %v9752_v2 = vld [vmem:[#allocation26_spill] sm:$0xff] }
 0x953   :  { %2220 = vmatpush.msra.mxu3 %v7404_v52  ;;  %2260 = vmatpush.msra.mxu2 %v7407_v7  ;;  %v1682_v54 = vsub.f32 1.5, %v1681_v30  ;;  %v9756_v30 = vld [vmem:[#allocation30_spill] sm:$0xff] }
 0x955   :  { %2221 = vmatpush.msra.mxu3 %v7410_v61  ;;  %2261 = vmatpush.msra.mxu2 %v7413_v15  ;;  %v1683_v27 = vmul.f32 %v4899_v44, %v1682_v54  ;;  %v9760_v54 = vld [vmem:[#allocation34_spill] sm:$0xff] }
 0x957   :  { %v1687_v34 = vsel %vm1686_vm6, %v4899_v44, %v1683_v27  ;;  %v9764_v27 = vld [vmem:[#allocation38_spill] sm:$0xff] }
 0x958   :  { %s4713_s10 = spop %4712  ;;  %v1688_v50 = vmul.f32 %v1687_v34, %v1676_v22  ;;  %v9770_v34 = vld [vmem:[#allocation48_spill] sm:$0xff]  ;;  %v9772_v22 = vld [vmem:[#allocation46_spill] sm:$0xff] }
 0x959   :  { %v1706_v40 = vstv %s4713_s10 }
 0x95a   :  { %v1707_v16 = vmul.f32 %v1706_v40, %v6394_v23  ;;  %s4715_s11 = spop %4714  ;;  %v1690_v25 = vmul.f32 0.01, %v1688_v50  ;;  %vm1689_vm13 = vcmp.ge.f32.partialorder %v1688_v50, 0.0 }
 0x95b   :  { %v1722_v43 = vstv %s4715_s11 }
 0x95c   :  { %v1724_v36 = vmul.f32 %v1707_v16, %v1707_v16  ;;  %v1723_v10 = vmul.f32 %v1722_v43, %v6394_v23  ;;  %v1726_v28 = vsub.f32 %v7332_v14, %v1707_v16  ;;  %v1691_v47 = vsel %vm1689_vm13, %v1688_v50, %v1690_v25  ;;  %v9776_v50 = vld [vmem:[#allocation50_spill] sm:$0xff] }
 0x95d   :  { %v9780_v25 = vld [vmem:[#allocation54_spill] sm:$0xff] }
 0x95e   :  { %v1725_v62 = vsub.f32 %v1723_v10, %v1724_v36 }
 0x960   :  { %s4717_s12 = spop %4716  ;;  %v1727_v51 = vadd.f32 1e-05, %v1725_v62 }
 0x961   :  { %v1755_v12 = vstv %s4717_s12  ;;  %s4719_s13 = spop %4718 }
 0x962   :  { %v1756_v18 = vmul.f32 %v1755_v12, %v6394_v23  ;;  %v1770_v3 = vstv %s4719_s13  ;;  %4900 = vrsqrt.f32 %v1727_v51  ;;  %vm1734_vm7 = vweird.f32 %v1727_v51  ;;  %v9748_v12 = vld [vmem:[#allocation22_spill] sm:$0xff] }
 0x963   :  { %v1771_v60 = vmul.f32 %v1770_v3, %v6394_v23  ;;  %v9750_v3 = vld [vmem:[#allocation28_spill] sm:$0xff] }
 0x964   :  { %v1772_v48 = vmul.f32 %v1756_v18, %v1756_v18  ;;  %v1774_v39 = vsub.f32 %v7332_v14, %v1756_v18  ;;  %v9749_v18 = vld [vmem:[#allocation21_spill] sm:$0xff] }
 0x966   :  { %v1773_v5 = vsub.f32 %v1771_v60, %v1772_v48  ;;  %v9753_v48 = vld [vmem:[#allocation25_spill] sm:$0xff]  ;;  %v9754_v60 = vld [vmem:[#allocation32_spill] sm:$0xff] }
 0x968   :  { %v1775_v35 = vadd.f32 1e-05, %v1773_v5  ;;  %v4901_v55 = vpop.eup %4900  ;;  %v9755_v5 = vld [vmem:[#allocation31_spill] sm:$0xff] }
 0x969   :  { %v1729_v57 = vmul.f32 %v4901_v55, %v1727_v51  ;;  %vm1735_vm15 = vweird.f32 %v4901_v55  ;;  %v9739_v51 = vld [vmem:[#allocation14_spill] sm:$0xff] }
 0x96a   :  { %4902 = vrsqrt.f32 %v1775_v35  ;;  %vm1736_vm8 = vmor %vm1734_vm7, %vm1735_vm15  ;;  %vm1782_vm10 = vweird.f32 %v1775_v35 }
 0x96b   :  { %v1730_v26 = vmul.f32 %v4901_v55, %v1729_v57  ;;  %v9759_v57 = vld [vmem:[#allocation35_spill] sm:$0xff] }
 0x96d   :  { %v1731_v59 = vmul.f32 0.5, %v1730_v26  ;;  %v9761_v26 = vld [vmem:[#allocation33_spill] sm:$0xff] }
 0x96f   :  { %v1732_v45 = vsub.f32 1.5, %v1731_v59  ;;  %v9762_v59 = vld [vmem:[#allocation40_spill] sm:$0xff] }
 0x970   :  { %v4903_v21 = vpop.eup %4902 }
 0x971   :  { %v1777_v11 = vmul.f32 %v4903_v21, %v1775_v35  ;;  %v1733_v42 = vmul.f32 %v4901_v55, %v1732_v45  ;;  %vm1783_vm9 = vweird.f32 %v4903_v21  ;;  %v9757_v35 = vld [vmem:[#allocation29_spill] sm:$0xff] }
 0x972   :  { %vm1784_vm11 = vmor %vm1782_vm10, %vm1783_vm9  ;;  %v9765_v45 = vld [vmem:[#allocation37_spill] sm:$0xff] }
 0x973   :  { %v1778_v53 = vmul.f32 %v4903_v21, %v1777_v11  ;;  %v1737_v31 = vsel %vm1736_vm8, %v4901_v55, %v1733_v42  ;;  %v9758_v55 = vld [vmem:[#allocation36_spill] sm:$0xff]  ;;  %v9767_v42 = vld [vmem:[#allocation43_spill] sm:$0xff] }
 0x974   :  { %v1738_v63 = vmul.f32 %v1737_v31, %v1726_v28  ;;  %v9766_v11 = vld [vmem:[#allocation44_spill] sm:$0xff]  ;;  %v9768_v28 = vld [vmem:[#allocation42_spill] sm:$0xff]  ;;  %v9771_v31 = vld [vmem:[#allocation47_spill] sm:$0xff] }
 0x975   :  { %v1779_v17 = vmul.f32 0.5, %v1778_v53  ;;  %v9769_v53 = vld [vmem:[#allocation41_spill] sm:$0xff] }
 0x976   :  { %v1740_v41 = vmul.f32 0.01, %v1738_v63  ;;  %vm1739_vm12 = vcmp.ge.f32.partialorder %v1738_v63, 0.0 }
 0x977   :  { %v1780_v8 = vsub.f32 1.5, %v1779_v17  ;;  %v9773_v17 = vld [vmem:[#allocation45_spill] sm:$0xff] }
 0x978   :  { %v1741_v16 = vsel %vm1739_vm12, %v1738_v63, %v1740_v41  ;;  %v9774_v63 = vld [vmem:[#allocation52_spill] sm:$0xff] }
 0x979   :  { %v1781_v9 = vmul.f32 %v4903_v21, %v1780_v8  ;;  %v1790_v44 = vsel %vm578_vm1, %v1691_v47, %v1741_v16  ;;  %v9775_v8 = vld [vmem:[#allocation51_spill] sm:$0xff]  ;;  %v9778_v41 = vld [vmem:[#allocation56_spill] sm:$0xff]  ;;  %v9785_v47 = vld [vmem:[#allocation57_spill] sm:$0xff] }
 0x97a   :  { %v9783_v16 = vld [vmem:[#allocation59_spill] sm:$0xff] }
 0x97b   :  { %v1785_v0 = vsel %vm1784_vm11, %v4903_v21, %v1781_v9  ;;  %v9763_v21 = vld [vmem:[#allocation39_spill] sm:$0xff]  ;;  %v9777_v9 = vld [vmem:[#allocation49_spill] sm:$0xff] }
 0x97c   :  { %v1786_v40 = vmul.f32 %v1785_v0, %v1774_v39  ;;  %v9779_v39 = vld [vmem:[#allocation55_spill] sm:$0xff]  ;;  %v9781_v0 = vld [vmem:[#allocation53_spill] sm:$0xff] }
 0x97e   :  { %vm1787_vm14 = vcmp.ge.f32.partialorder %v1786_v40, 0.0  ;;  %v1788_v36 = vmul.f32 0.01, %v1786_v40 }
 0x980   :  { %v1789_v43 = vsel %vm1787_vm14, %v1786_v40, %v1788_v36  ;;  %v9782_v40 = vld [vmem:[#allocation60_spill] sm:$0xff]  ;;  %v9784_v36 = vld [vmem:[#allocation58_spill] sm:$0xff] }
 0x981   :  { %v1791_v10 = vsel %vm580_vm4, %v1790_v44, %v1789_v43  ;;  %v9786_v43 = vld [vmem:[#allocation63_spill] sm:$0xff]  ;;  %v9787_v44 = vld [vmem:[#allocation62_spill] sm:$0xff] }
 0x982   :  { %1798 = vrot.lane.b32.xlu2 %v1791_v10, %s5718_s29  ;;  %v9788_v10 = vld [vmem:[#allocation61_spill] sm:$0xff] }
 0x9dc   :  { %v1799_v62 = vpop.permute.xlu2 %1798 }
 0x9dd   :  { %v1802_v14 = vsel %vm175_vm0, %v7354_v4, %v1799_v62  ;;  %v9737_v4 = vld [vmem:[#allocation13_spill] sm:$0xff] }
 0x9de   :  { %4581 = vmatmul.msk.f32.vlgmr.msra.gmra.mxu1 %vm177_vm5, %v1802_v14  ;;  %4582 = vmatmul.msk.f32.vlgmr.msra.gmra.mxu0 %vm177_vm5, %v1802_v14  ;;  %v9789_v62 = vld [vmem:[#allocation65_spill] sm:$0xff] }
 0x9df   :  { %4583 = vmatmul.msk.f32.vlgmr.msrb.gmra.mxu3 %vm177_vm5, %v1802_v14  ;;  %4584 = vmatmul.msk.f32.vlgmr.msrb.gmra.mxu2 %vm177_vm5, %v1802_v14  ;;  %v9790_v14 = vld [vmem:[#allocation64_spill] sm:$0xff] }
 0x9e0   :  { %2228 = vmatpush.msra.mxu1 %v7052_v58  ;;  %2268 = vmatpush.msra.mxu0 %v7055_v32  ;;  %v9740_v58 = vld [vmem:[#allocation15_spill] sm:$0xff] }
 0x9e1   :  { %2308 = vmatpush.msrb.mxu3 %v7058_v19  ;;  %2348 = vmatpush.msrb.mxu2 %v7061_v38  ;;  %v9741_v32 = vld [vmem:[#allocation19_spill] sm:$0xff]  ;;  %v9742_v19 = vld [vmem:[#allocation16_spill] sm:$0xff] }
 0x9e2   :  { %2229 = vmatpush.msra.mxu1 %v7064_v46  ;;  %2269 = vmatpush.msra.mxu0 %v7067_v29  ;;  %v9743_v38 = vld [vmem:[#allocation20_spill] sm:$0xff]  ;;  %v9744_v46 = vld [vmem:[#allocation18_spill] sm:$0xff]  ;;  %v9745_v29 = vld [vmem:[#allocation17_spill] sm:$0xff] }
 0x9e3   :  { %2309 = vmatpush.msrb.mxu3 %v7070_v6  ;;  %2349 = vmatpush.msrb.mxu2 %v7073_v49  ;;  %v9746_v6 = vld [vmem:[#allocation24_spill] sm:$0xff]  ;;  %v9747_v49 = vld [vmem:[#allocation23_spill] sm:$0xff] }
 0x9e4   :  { %2230 = vmatpush.msra.mxu1 %v9737_v4  ;;  %2270 = vmatpush.msra.mxu0 %v9738_v13  ;;  %v9791_v4 = vld [vmem:[#allocation66_spill] sm:$0xff]  ;;  %v9792_v13 = vld [vmem:[#allocation67_spill] sm:$0xff] }
 0x9e5   :  { %2310 = vmatpush.msrb.mxu3 %v9739_v51  ;;  %2350 = vmatpush.msrb.mxu2 %v9740_v58  ;;  %v9793_v51 = vld [vmem:[#allocation68_spill] sm:$0xff]  ;;  %v9794_v58 = vld [vmem:[#allocation69_spill] sm:$0xff] }
 0x9e6   :  { %1902 = vmatmul.f32.vlgmr.msrb.gmra.mxu1 %v7358_v20  ;;  %1942 = vmatmul.f32.vlgmr.msrb.gmra.mxu0 %v7358_v20  ;;  %v9751_v20 = vld [vmem:[#allocation27_spill] sm:$0xff] }
 0x9e7   :  { %2231 = vmatpush.msra.mxu1 %v9741_v32  ;;  %2271 = vmatpush.msra.mxu0 %v9742_v19  ;;  %v9795_v32 = vld [vmem:[#allocation70_spill] sm:$0xff]  ;;  %v9796_v19 = vld [vmem:[#allocation71_spill] sm:$0xff] }
 0x9e8   :  { %2311 = vmatpush.msrb.mxu3 %v9743_v38  ;;  %2351 = vmatpush.msrb.mxu2 %v9744_v46  ;;  %v9797_v38 = vld [vmem:[#allocation72_spill] sm:$0xff]  ;;  %v9798_v46 = vld [vmem:[#allocation73_spill] sm:$0xff] }
 0x9e9   :  { %2232 = vmatpush.msra.mxu1 %v9745_v29  ;;  %2272 = vmatpush.msra.mxu0 %v9746_v6  ;;  %v9799_v29 = vld [vmem:[#allocation74_spill] sm:$0xff]  ;;  %v9800_v6 = vld [vmem:[#allocation75_spill] sm:$0xff] }
 0x9ea   :  { %2312 = vmatpush.msrb.mxu3 %v9747_v49  ;;  %2352 = vmatpush.msrb.mxu2 %v9748_v12  ;;  %v9801_v49 = vld [vmem:[#allocation76_spill] sm:$0xff]  ;;  %v9802_v12 = vld [vmem:[#allocation77_spill] sm:$0xff] }
 0x9eb   :  { %2233 = vmatpush.msra.mxu1 %v9749_v18  ;;  %2273 = vmatpush.msra.mxu0 %v9750_v3  ;;  %v9803_v18 = vld [vmem:[#allocation78_spill] sm:$0xff]  ;;  %v9804_v3 = vld [vmem:[#allocation79_spill] sm:$0xff] }
 0x9ec   :  { %2313 = vmatpush.msrb.mxu3 %v9751_v20  ;;  %2353 = vmatpush.msrb.mxu2 %v9752_v2  ;;  %v9805_v20 = vld [vmem:[#allocation80_spill] sm:$0xff]  ;;  %v9806_v2 = vld [vmem:[#allocation81_spill] sm:$0xff] }
 0x9ed   :  { %2234 = vmatpush.msra.mxu1 %v9753_v48  ;;  %2274 = vmatpush.msra.mxu0 %v9754_v60  ;;  %v9807_v48 = vld [vmem:[#allocation82_spill] sm:$0xff]  ;;  %v9808_v60 = vld [vmem:[#allocation83_spill] sm:$0xff] }
 0x9ee   :  { %2314 = vmatpush.msrb.mxu3 %v9755_v5  ;;  %2354 = vmatpush.msrb.mxu2 %v9756_v30  ;;  %v9809_v5 = vld [vmem:[#allocation84_spill] sm:$0xff]  ;;  %v9810_v30 = vld [vmem:[#allocation85_spill] sm:$0xff] }
 0x9ef   :  { %2235 = vmatpush.msra.mxu1 %v9757_v35  ;;  %2275 = vmatpush.msra.mxu0 %v9758_v55  ;;  %v9811_v35 = vld [vmem:[#allocation86_spill] sm:$0xff]  ;;  %v9812_v55 = vld [vmem:[#allocation87_spill] sm:$0xff] }
 0x9f0   :  { %2315 = vmatpush.msrb.mxu3 %v9759_v57  ;;  %2355 = vmatpush.msrb.mxu2 %v9760_v54  ;;  %v9813_v57 = vld [vmem:[#allocation88_spill] sm:$0xff]  ;;  %v9814_v54 = vld [vmem:[#allocation89_spill] sm:$0xff] }
 0x9f1   :  { %2236 = vmatpush.msra.mxu1 %v9761_v26  ;;  %2276 = vmatpush.msra.mxu0 %v9762_v59  ;;  %v9815_v26 = vld [vmem:[#allocation90_spill] sm:$0xff]  ;;  %v9816_v59 = vld [vmem:[#allocation91_spill] sm:$0xff] }
 0x9f2   :  { %2316 = vmatpush.msrb.mxu3 %v9763_v21  ;;  %2356 = vmatpush.msrb.mxu2 %v9764_v27  ;;  %v1823_v21 = vpop.f32.mrf.mxu3  ;;  %v1863_v27 = vpop.f32.mrf.mxu2 }
 0x9f3   :  { %2237 = vmatpush.msra.mxu1 %v9765_v45  ;;  %2277 = vmatpush.msra.mxu0 %v9766_v11  ;;  %v9817_v45 = vld [vmem:[#allocation8_spill] sm:$0xff] }
 0x9f4   :  { %2317 = vmatpush.msrb.mxu3 %v9767_v42  ;;  %2357 = vmatpush.msrb.mxu2 %v9768_v28  ;;  %v1824_v11 = vadd.f32 %v1823_v21, %v9817_v45  ;;  %v9818_v42 = vld [vmem:[#allocation9_spill] sm:$0xff] }
 0x9f5   :  { %2238 = vmatpush.msra.mxu1 %v9769_v53  ;;  %2278 = vmatpush.msra.mxu0 %v9770_v34  ;;  %v1864_v28 = vadd.f32 %v1863_v27, %v9818_v42 }
 0x9f6   :  { %2318 = vmatpush.msrb.mxu3 %v9771_v31  ;;  %2358 = vmatpush.msrb.mxu2 %v9772_v22 }
 0x9f7   :  { %2239 = vmatpush.msra.mxu1 %v9773_v17  ;;  %2279 = vmatpush.msra.mxu0 %v9774_v63 }
 0x9f8   :  { %2319 = vmatpush.msrb.mxu3 %v9775_v8  ;;  %2359 = vmatpush.msrb.mxu2 %v9776_v50 }
 0x9f9   :  { %2240 = vmatpush.msra.mxu1 %v9777_v9  ;;  %2280 = vmatpush.msra.mxu0 %v9778_v41  ;;  %v9819_v9 = vld [vmem:[#allocation11_spill] sm:$0xff] }
 0x9fa   :  { %2320 = vmatpush.msrb.mxu3 %v9779_v39  ;;  %2360 = vmatpush.msrb.mxu2 %v9780_v25  ;;  %v9820_v39 = vld [vmem:[#allocation10_spill] sm:$0xff] }
 0x9fb   :  { %2241 = vmatpush.msra.mxu1 %v9781_v0  ;;  %2281 = vmatpush.msra.mxu0 %v9782_v40 }
 0x9fc   :  { %2321 = vmatpush.msrb.mxu3 %v9785_v47  ;;  %2361 = vmatpush.msrb.mxu2 %v9786_v43 }
 0x9fd   :  { %2286 = vmatpush.msrb.mxu1 %v9783_v16  ;;  %2326 = vmatpush.msrb.mxu0 %v9784_v36 }
 0x9ff   :  { %2287 = vmatpush.msrb.mxu1 %v9787_v44  ;;  %2327 = vmatpush.msrb.mxu0 %v9788_v10 }
 0xa01   :  { %2288 = vmatpush.msrb.mxu1 %v9789_v62  ;;  %2328 = vmatpush.msrb.mxu0 %v9790_v14 }
 0xa03   :  { %2289 = vmatpush.msrb.mxu1 %v9791_v4  ;;  %2329 = vmatpush.msrb.mxu0 %v9792_v13 }
 0xa05   :  { %2290 = vmatpush.msrb.mxu1 %v9793_v51  ;;  %2330 = vmatpush.msrb.mxu0 %v9794_v58 }
 0xa07   :  { %2291 = vmatpush.msrb.mxu1 %v9795_v32  ;;  %2331 = vmatpush.msrb.mxu0 %v9796_v19 }
 0xa09   :  { %2292 = vmatpush.msrb.mxu1 %v9797_v38  ;;  %2332 = vmatpush.msrb.mxu0 %v9798_v46 }
 0xa0b   :  { %2293 = vmatpush.msrb.mxu1 %v9799_v29  ;;  %2333 = vmatpush.msrb.mxu0 %v9800_v6 }
 0xa0d   :  { %2294 = vmatpush.msrb.mxu1 %v9801_v49  ;;  %2334 = vmatpush.msrb.mxu0 %v9802_v12 }
 0xa0f   :  { %2295 = vmatpush.msrb.mxu1 %v9803_v18  ;;  %2335 = vmatpush.msrb.mxu0 %v9804_v3 }
 0xa11   :  { %2296 = vmatpush.msrb.mxu1 %v9805_v20  ;;  %2336 = vmatpush.msrb.mxu0 %v9806_v2 }
 0xa13   :  { %2297 = vmatpush.msrb.mxu1 %v9807_v48  ;;  %2337 = vmatpush.msrb.mxu0 %v9808_v60 }
 0xa15   :  { %2298 = vmatpush.msrb.mxu1 %v9809_v5  ;;  %2338 = vmatpush.msrb.mxu0 %v9810_v30 }
 0xa17   :  { %2299 = vmatpush.msrb.mxu1 %v9811_v35  ;;  %2339 = vmatpush.msrb.mxu0 %v9812_v55 }
 0xa19   :  { %2300 = vmatpush.msrb.mxu1 %v9813_v57  ;;  %2340 = vmatpush.msrb.mxu0 %v9814_v54 }
 0xa1b   :  { %2301 = vmatpush.msrb.mxu1 %v9815_v26  ;;  %2341 = vmatpush.msrb.mxu0 %v9816_v59 }
 0xa5b   :  { %v1843_v53 = vpop.f32.mrf.mxu1  ;;  %v1883_v34 = vpop.f32.mrf.mxu0 }
 0xa5c   :  { %v1844_v31 = vadd.f32 %v1843_v53, %v1824_v11  ;;  %v1884_v22 = vadd.f32 %v1883_v34, %v1864_v28 }
 0xa5e   :  { %v4585_v17 = vmul.f32 -1.442695, %v1844_v31  ;;  %v4586_v63 = vmul.f32 -1.442695, %v1884_v22 }
 0xa60   :  { %4904 = vpow2.f32 %v4585_v17 }
 0xa61   :  { %4906 = vpow2.f32 %v4586_v63 }
 0xa62   :  { %v1923_v0 = vpop.f32.mrf.mxu3  ;;  %v1963_v40 = vpop.f32.mrf.mxu2 }
 0xa63   :  { %v1903_v8 = vpop.f32.mrf.mxu1  ;;  %v1943_v50 = vpop.f32.mrf.mxu0 }
 0xa64   :  { %v1904_v41 = vadd.f32 %v1903_v8, %v9819_v9  ;;  %v1944_v25 = vadd.f32 %v1943_v50, %v9820_v39 }
 0xa66   :  { %v4905_v16 = vpop.eup %4904  ;;  %v1924_v36 = vadd.f32 %v1923_v0, %v1904_v41  ;;  %v1964_v47 = vadd.f32 %v1963_v40, %v1944_v25 }
 0xa67   :  { %v4907_v43 = vpop.eup %4906  ;;  %v1978_v14 = vadd.f32 1.0, %v4905_v16 }
 0xa68   :  { %v1979_v44 = vadd.f32 1.0, %v4907_v43  ;;  %v4587_v10 = vmul.f32 -1.442695, %v1924_v36  ;;  %v4588_v62 = vmul.f32 -1.442695, %v1964_v47 }
 0xa69   :  { %vm1987_vm10 = vweird.f32 %v1978_v14  ;;  %v1993_v21 = vand.u32 2147483648, %v1978_v14  ;;  %v1991_v11 = vand.u32 2147483647, %v1978_v14 }
 0xa6a   :  { %4908 = vrcp.f32 %v1979_v44  ;;  %vm2002_vm6 = vweird.f32 %v1979_v44  ;;  %v2006_v35 = vand.u32 2147483647, %v1979_v44  ;;  %v2008_v55 = vand.u32 2147483648, %v1979_v44 }
 0xa6b   :  { %4910 = vpow2.f32 %v4587_v10  ;;  %v1994_v8 = vor.u32 1.1754944e-38, %v1993_v21 }
 0xa6c   :  { %4912 = vpow2.f32 %v4588_v62  ;;  %v2009_v34 = vor.u32 1.1754944e-38, %v2008_v55  ;;  %vm2007_vm14 = vcmp.eq.f32.partialorder %v2006_v35, 8.507059e+37 }
 0xa6d   :  { %4914 = vrcp.f32 %v1978_v14 }
 0xa70   :  { %v4909_v4 = vpop.eup %4908 }
 0xa71   :  { %v4911_v13 = vpop.eup %4910  ;;  %v1998_v19 = vmul.f32 %v4909_v4, %v1979_v44  ;;  %vm2003_vm15 = vweird.f32 %v4909_v4 }
 0xa72   :  { %v4913_v51 = vpop.eup %4912  ;;  %v1980_v38 = vadd.f32 1.0, %v4911_v13  ;;  %vm7527_vm8 = vmor %vm2002_vm6, %vm2003_vm15  ;;  %vm1992_vm15 = vcmp.eq.f32.partialorder %v1991_v11, 8.507059e+37 }
 0xa73   :  { %v4915_v58 = vpop.eup %4914  ;;  %v1981_v32 = vadd.f32 1.0, %v4913_v51  ;;  %v1999_v29 = vsub.f32 1.0, %v1998_v19 }
 0xa74   :  { %v1983_v46 = vmul.f32 %v4915_v58, %v1978_v14  ;;  %vm1988_vm7 = vweird.f32 %v4915_v58  ;;  %v2023_v43 = vand.u32 2147483648, %v1980_v38  ;;  %vm2017_vm6 = vweird.f32 %v1980_v38 }
 0xa75   :  { %4916 = vrcp.f32 %v1981_v32  ;;  %v2000_v12 = vmul.f32 %v4909_v4, %v1999_v29  ;;  %v2038_v48 = vand.u32 2147483648, %v1981_v32  ;;  %v2036_v30 = vand.u32 2147483647, %v1981_v32  ;;  %vm1989_vm13 = vmor %vm1987_vm10, %vm1988_vm7 }
 0xa76   :  { %4918 = vrcp.f32 %v1980_v38  ;;  %v1984_v6 = vsub.f32 1.0, %v1983_v46  ;;  %vm2032_vm9 = vweird.f32 %v1981_v32  ;;  %v2021_v44 = vand.u32 2147483647, %v1980_v38 }
 0xa77   :  { %v2001_v60 = vadd.f32 %v4909_v4, %v2000_v12  ;;  %v2039_v27 = vor.u32 1.1754944e-38, %v2038_v48  ;;  %vm2037_vm12 = vcmp.eq.f32.partialorder %v2036_v30, 8.507059e+37  ;;  %v2024_v62 = vor.u32 1.1754944e-38, %v2023_v43 }
 0xa78   :  { %v1985_v20 = vmul.f32 %v4915_v58, %v1984_v6 }
 0xa79   :  { %v2005_v28 = vsel %vm7527_vm8, %v4909_v4, %v2001_v60  ;;  %vm2022_vm8 = vcmp.eq.f32.partialorder %v2021_v44, 8.507059e+37 }
 0xa7a   :  { %v1986_v54 = vadd.f32 %v4915_v58, %v1985_v20  ;;  %v2010_v50 = vsel %vm2007_vm14, %v2009_v34, %v2005_v28 }
 0xa7b   :  { %v4917_v49 = vpop.eup %4916  ;;  %v2044_v40 = vmul.f32 %v2010_v50, %v7329_v24 }
 0xa7c   :  { %v2028_v18 = vmul.f32 %v4917_v49, %v1981_v32  ;;  %v4919_v3 = vpop.eup %4918  ;;  %vm2033_vm2 = vweird.f32 %v4917_v49  ;;  %v1990_v17 = vsel %vm1989_vm13, %v4915_v58, %v1986_v54 }
 0xa7d   :  { %v2013_v57 = vmul.f32 %v4919_v3, %v1980_v38  ;;  %vm2034_vm11 = vmor %vm2032_vm9, %vm2033_vm2  ;;  %v1995_v25 = vsel %vm1992_vm15, %v1994_v8, %v1990_v17  ;;  %vm2018_vm2 = vweird.f32 %v4919_v3 }
 0xa7e   :  { %v2029_v2 = vsub.f32 1.0, %v2028_v18  ;;  %vm2019_vm7 = vmor %vm2017_vm6, %vm2018_vm2 }
 0xa7f   :  { %v2014_v31 = vsub.f32 1.0, %v2013_v57 }
 0xa80   :  { %v2030_v5 = vmul.f32 %v4917_v49, %v2029_v2 }
 0xa81   :  { %v2015_v0 = vmul.f32 %v4919_v3, %v2014_v31 }
 0xa82   :  { %v2031_v59 = vadd.f32 %v4917_v49, %v2030_v5 }
 0xa83   :  { %v2016_v47 = vadd.f32 %v4919_v3, %v2015_v0 }
 0xa84   :  { %v2035_v53 = vsel %vm2034_vm11, %v4917_v49, %v2031_v59 }
 0xa85   :  { %v2040_v22 = vsel %vm2037_vm12, %v2039_v27, %v2035_v53  ;;  %v2020_v10 = vsel %vm2019_vm7, %v4919_v3, %v2016_v47 }
 0xa86   :  { %v2042_v63 = vmul.f32 2.0, %v2040_v22  ;;  %v2025_v4 = vsel %vm2022_vm8, %v2024_v62, %v2020_v10 }
 0xa88   :  { %v4589_v41 = vadd.f32 -1.0, %v2042_v63 }
 0xa8a   :  { %v2045_v16 = vmul.f32 %v4589_v41, %v1995_v25 }
 0xa8c   :  { %v7534_v36 = vadd.f32 %v2045_v16, %v2044_v40 }
 0xa8e   :  { %4920 = vtanh.f32 %v7534_v36 }
 0xa94   :  { %v4921_v14 = vpop.eup %4920 }
 0xa95   :  { %v7537_v13 = vmul.f32 %v4921_v14, %v2025_v4 }
 0xa97   :  { %2142 = vrot.lane.b32.xlu2 %v7537_v13, %s5716_s2  ;;  %2093 = vrot.lane.b32.xlu0 %v7537_v13, %s5717_s28  ;;  %v2061_v24 = vmul.f32 %v7537_v13, %v7537_v13  ;;  %v2049_v58 = vsel %vm429_vm3, %v7537_v13, 0.0 }
 0xa99   :  { %2157 = vrot.lane.b32.xlu1 %v2061_v24, %s5716_s2  ;;  %v2062_v51 = vsel %vm429_vm3, %v2061_v24, 0.0 }
 0xa9f   :  { %2109 = vrot.lane.b32.xlu0 %v2061_v24, %s5717_s28 }
 0xac0   :  { %2063 = vadd.xlane.f32.xlu2 %v2062_v51 }
 0xac9   :  { %2050 = vadd.xlane.f32.xlu0 %v2049_v58 }
 0xaf1   :  { %v2143_v32 = vpop.permute.xlu2 %2142 }
 0xaf2   :  { %v2145_v19 = vsel %vm429_vm3, %v2143_v32, 0.0 }
 0xaf3   :  { %2146 = vadd.xlane.f32.xlu2 %v2145_v19  ;;  %v4590_v19 = vld [vmem:[%s8945_s0 + $0xa] sm:$0x3] }
 0xb09   :  { %v2094_v38 = vpop.permute.xlu0 %2093 }
 0xb0a   :  { %v2096_v46 = vsel %vm429_vm3, %v2094_v38, 0.0 }
 0xb0b   :  { %2097 = vadd.xlane.f32.xlu1 %v2096_v46  ;;  %v2158_v29 = vpop.permute.xlu1 %2157 }
 0xb0c   :  { %v2160_v49 = vsel %vm429_vm3, %v2158_v29, 0.0  ;;  %v7567_v29 = vld [vmem:[#allocation2 + $0x1e0] sm:$0xff] }
 0xb11   :  { %v2110_v6 = vpop.permute.xlu0 %2109 }
 0xb12   :  { %v2112_v12 = vsel %vm429_vm3, %v2110_v6, 0.0  ;;  %v7570_v6 = vld [vmem:[#allocation2 + $0x1e8] sm:$0xff] }
 0xb13   :  { %2161 = vadd.xlane.f32.xlu1 %v2160_v49  ;;  %2113 = vadd.xlane.f32.xlu0 %v2112_v12  ;;  %v7573_v49 = vld [vmem:[#allocation2 + $0x1c0] sm:$0xff]  ;;  %v7576_v12 = vld [vmem:[#allocation2 + $0x1c8] sm:$0xff] }
 0xb27   :  { %2194 = vrot.lane.b32.xlu0 %v7537_v13, %s5718_s29 }
 0xb33   :  { %v2064_v18 = vpop.xlane.xlu2 %2063 }
 0xb34   :  { %v2065_v3 = vrot.slane %v2064_v18, 4 }
 0xb36   :  { %v2066_v20 = vadd.f32 %v2065_v3, %v2064_v18  ;;  %v7579_v18 = vld [vmem:[#allocation2 + $0x1a0] sm:$0xff]  ;;  %v7582_v3 = vld [vmem:[#allocation2 + $0x1a8] sm:$0xff] }
 0xb38   :  { %v2067_v2 = vrot.slane %v2066_v20, 2 }
 0xb3a   :  { %v2068_v30 = vadd.f32 %v2067_v2, %v2066_v20  ;;  %v7585_v20 = vld [vmem:[#allocation2 + $0x180] sm:$0xff]  ;;  %v7588_v2 = vld [vmem:[#allocation2 + $0x188] sm:$0xff] }
 0xb3c   :  { %v2051_v48 = vpop.xlane.xlu0 %2050  ;;  %v2069_v57 = vrot.slane %v2068_v30, 1 }
 0xb3d   :  { %v2052_v60 = vrot.slane %v2051_v48, 4 }
 0xb3e   :  { %v2070_v59 = vadd.f32 %v2069_v57, %v2068_v30  ;;  %v7600_v30 = vld [vmem:[#allocation2 + $0x148] sm:$0xff] }
 0xb3f   :  { %v2053_v5 = vadd.f32 %v2052_v60, %v2051_v48  ;;  %v7591_v48 = vld [vmem:[#allocation2 + $0x160] sm:$0xff]  ;;  %v7594_v60 = vld [vmem:[#allocation2 + $0x168] sm:$0xff] }
 0xb40   :  { %v7606_v57 = vld [vmem:[#allocation2 + $0x128] sm:$0xff] }
 0xb41   :  { %v2054_v35 = vrot.slane %v2053_v5, 2 }
 0xb43   :  { %v2055_v55 = vadd.f32 %v2054_v35, %v2053_v5  ;;  %v7597_v5 = vld [vmem:[#allocation2 + $0x140] sm:$0xff] }
 0xb45   :  { %v2056_v54 = vrot.slane %v2055_v55, 1 }
 0xb47   :  { %v2057_v26 = vadd.f32 %v2056_v54, %v2055_v55  ;;  %v7603_v55 = vld [vmem:[#allocation2 + $0x120] sm:$0xff] }
 0xb49   :  { %4720 = vpush %v2057_v26  ;;  %v7612_v26 = vld [vmem:[#allocation2 + $0x100] sm:$0xff] }
 0xb4a   :  { %4722 = vpush %v2070_v59  ;;  %v7615_v59 = vld [vmem:[#allocation2 + $0x108] sm:$0xff] }
 0xb66   :  { %v2147_v21 = vpop.xlane.xlu2 %2146 }
 0xb67   :  { %v2148_v27 = vrot.slane %v2147_v21, 4 }
 0xb69   :  { %v2149_v34 = vadd.f32 %v2148_v27, %v2147_v21  ;;  %v7618_v21 = vld [vmem:[#allocation2 + $0xe0] sm:$0xff]  ;;  %v7621_v27 = vld [vmem:[#allocation2 + $0xe8] sm:$0xff] }
 0xb6b   :  { %v2150_v17 = vrot.slane %v2149_v34, 2 }
 0xb6d   :  { %v2151_v47 = vadd.f32 %v2150_v17, %v2149_v34  ;;  %v7629_v34 = vld [vmem:[#allocation2 + $0xc8] sm:$0xff] }
 0xb6e   :  { %v7636_v17 = vld [vmem:[#allocation2 + $0xa8] sm:$0xff] }
 0xb6f   :  { %v2152_v14 = vrot.slane %v2151_v47, 1 }
 0xb71   :  { %v2153_v32 = vadd.f32 %v2152_v14, %v2151_v47 }
 0xb7a   :  { %s4721_s16 = spop %4720 }
 0xb7b   :  { %v2059_v35 = vstv %s4721_s16  ;;  %s4723_s17 = spop %4722 }
 0xb7c   :  { %v7610_v54 = vmul.f32 %v2059_v35, %v6394_v23 }
 0xb7e   :  { %v2098_v11 = vpop.xlane.xlu1 %2097 }
 0xb7f   :  { %v2099_v28 = vrot.slane %v2098_v11, 4 }
 0xb81   :  { %v2100_v53 = vadd.f32 %v2099_v28, %v2098_v11  ;;  %v2072_v11 = vstv %s4723_s17  ;;  %v2074_v28 = vmul.f32 %v7610_v54, %v7610_v54 }
 0xb83   :  { %v2101_v31 = vrot.slane %v2100_v53, 2 }
 0xb85   :  { %v2102_v22 = vadd.f32 %v2101_v31, %v2100_v53  ;;  %v7626_v53 = vld [vmem:[#allocation2 + $0xc0] sm:$0xff]  ;;  %v2073_v31 = vmul.f32 %v2072_v11, %v6394_v23 }
 0xb86   :  { %v2162_v63 = vpop.xlane.xlu1 %2161  ;;  %v2114_v8 = vpop.xlane.xlu0 %2113 }
 0xb87   :  { %v2163_v50 = vrot.slane %v2162_v63, 4  ;;  %v2115_v41 = vrot.slane %v2114_v8, 4  ;;  %v2103_v25 = vrot.slane %v2102_v22, 1 }
 0xb89   :  { %v2164_v0 = vadd.f32 %v2163_v50, %v2162_v63  ;;  %v2116_v40 = vadd.f32 %v2115_v41, %v2114_v8  ;;  %v2104_v16 = vadd.f32 %v2103_v25, %v2102_v22  ;;  %v7633_v22 = vld [vmem:[#allocation2 + $0xa0] sm:$0xff]  ;;  %v2075_v63 = vsub.f32 %v2073_v31, %v2074_v28  ;;  %v7642_v50 = vld [vmem:[#allocation2 + $0x88] sm:$0xff] }
 0xb8a   :  { %v7639_v8 = vld [vmem:[#allocation2 + $0x80] sm:$0xff]  ;;  %v2076_v31 = vsub.f32 %v7537_v13, %v7610_v54 }
 0xb8b   :  { %v2165_v43 = vrot.slane %v2164_v0, 2  ;;  %v2117_v44 = vrot.slane %v2116_v40, 2  ;;  %4724 = vpush %v2104_v16  ;;  %v2077_v41 = vadd.f32 1e-05, %v2075_v63 }
 0xb8d   :  { %v2118_v10 = vadd.f32 %v2117_v44, %v2116_v40  ;;  %v2166_v62 = vadd.f32 %v2165_v43, %v2164_v0  ;;  %4922 = vrsqrt.f32 %v2077_v41  ;;  %vm2084_vm10 = vweird.f32 %v2077_v41 }
 0xb8f   :  { %v2119_v4 = vrot.slane %v2118_v10, 1  ;;  %v2167_v24 = vrot.slane %v2166_v62, 1 }
 0xb91   :  { %v2120_v51 = vadd.f32 %v2119_v4, %v2118_v10  ;;  %v2168_v58 = vadd.f32 %v2167_v24, %v2166_v62 }
 0xb93   :  { %4726 = vpush %v2120_v51  ;;  %v4923_v0 = vpop.eup %4922 }
 0xb94   :  { %4728 = vpush %v2153_v32  ;;  %vm2085_vm9 = vweird.f32 %v4923_v0 }
 0xb95   :  { %4730 = vpush %v2168_v58  ;;  %vm2086_vm11 = vmor %vm2084_vm10, %vm2085_vm9 }
 0xb99   :  { %v7559_v38 = vpop.permute.xlu0 %2194 }
 0xb9a   :  { %v7563_v46 = vsel %vm175_vm0, %v4590_v19, %v7559_v38 }
 0xb9b   :  { %2222 = vmatmul.f32.vlgmr.msra.gmra.mxu3 %v7563_v46  ;;  %2262 = vmatmul.f32.vlgmr.msra.gmra.mxu2 %v7563_v46 }
 0xb9c   :  { %2606 = vmatpush.msra.mxu3 %v7567_v29  ;;  %2646 = vmatpush.msra.mxu2 %v7570_v6 }
 0xb9e   :  { %2607 = vmatpush.msra.mxu3 %v7573_v49  ;;  %2647 = vmatpush.msra.mxu2 %v7576_v12 }
 0xba0   :  { %2608 = vmatpush.msra.mxu3 %v7579_v18  ;;  %2648 = vmatpush.msra.mxu2 %v7582_v3 }
 0xba2   :  { %2609 = vmatpush.msra.mxu3 %v7585_v20  ;;  %2649 = vmatpush.msra.mxu2 %v7588_v2 }
 0xba4   :  { %2610 = vmatpush.msra.mxu3 %v7591_v48  ;;  %2650 = vmatpush.msra.mxu2 %v7594_v60 }
 0xba6   :  { %2611 = vmatpush.msra.mxu3 %v7597_v5  ;;  %2651 = vmatpush.msra.mxu2 %v7600_v30 }
 0xba8   :  { %2612 = vmatpush.msra.mxu3 %v7603_v55  ;;  %2652 = vmatpush.msra.mxu2 %v7606_v57 }
 0xbaa   :  { %2613 = vmatpush.msra.mxu3 %v7612_v26  ;;  %2653 = vmatpush.msra.mxu2 %v7615_v59 }
 0xbac   :  { %2614 = vmatpush.msra.mxu3 %v7618_v21  ;;  %2654 = vmatpush.msra.mxu2 %v7621_v27 }
 0xbae   :  { %2615 = vmatpush.msra.mxu3 %v7626_v53  ;;  %2655 = vmatpush.msra.mxu2 %v7629_v34 }
 0xbb0   :  { %2616 = vmatpush.msra.mxu3 %v7633_v22  ;;  %2656 = vmatpush.msra.mxu2 %v7636_v17 }
 0xbb2   :  { %2617 = vmatpush.msra.mxu3 %v7639_v8  ;;  %2657 = vmatpush.msra.mxu2 %v7642_v50 }
 0xbb4   :  { %2618 = vmatpush.msra.mxu3 %v7392_v1  ;;  %2658 = vmatpush.msra.mxu2 %v7395_v56  ;;  %v2079_v56 = vmul.f32 %v4923_v0, %v2077_v41 }
 0xbb6   :  { %2619 = vmatpush.msra.mxu3 %v7398_v37  ;;  %2659 = vmatpush.msra.mxu2 %v7401_v33 }
 0xbb8   :  { %2620 = vmatpush.msra.mxu3 %v7404_v52  ;;  %2660 = vmatpush.msra.mxu2 %v7407_v7  ;;  %v2080_v7 = vmul.f32 %v4923_v0, %v2079_v56 }
 0xbba   :  { %2621 = vmatpush.msra.mxu3 %v7410_v61  ;;  %2661 = vmatpush.msra.mxu2 %v7413_v15  ;;  %v2081_v10 = vmul.f32 0.5, %v2080_v7 }
 0xbbc   :  { %s4725_s18 = spop %4724  ;;  %v2082_v4 = vsub.f32 1.5, %v2081_v10 }
 0xbbd   :  { %v2106_v25 = vstv %s4725_s18 }
 0xbbe   :  { %v2107_v1 = vmul.f32 %v2106_v25, %v6394_v23  ;;  %v2083_v51 = vmul.f32 %v4923_v0, %v2082_v4 }
 0xbc0   :  { %v2124_v37 = vmul.f32 %v2107_v1, %v2107_v1  ;;  %v2087_v28 = vsel %vm2086_vm11, %v4923_v0, %v2083_v51  ;;  %v7673_v51 = vld [vmem:[#allocation2 + $0x3a8] sm:$0xff] }
 0xbc4   :  { %s4727_s19 = spop %4726 }
 0xbc5   :  { %v2122_v40 = vstv %s4727_s19  ;;  %s4729_s20 = spop %4728 }
 0xbc6   :  { %v2123_v33 = vmul.f32 %v2122_v40, %v6394_v23  ;;  %v2155_v52 = vstv %s4729_s20  ;;  %s4731_s21 = spop %4730  ;;  %v2088_v40 = vmul.f32 %v2087_v28, %v2076_v31  ;;  %v7694_v28 = vld [vmem:[#allocation2 + $0x360] sm:$0xff]  ;;  %v7697_v31 = vld [vmem:[#allocation2 + $0x368] sm:$0xff] }
 0xbc7   :  { %v2156_v16 = vmul.f32 %v2155_v52, %v6394_v23  ;;  %v2170_v61 = vstv %s4731_s21  ;;  %9823 = vst [vmem:[#allocation92_spill] sm:$0xff] %v7694_v28 }
 0xbc8   :  { %v2125_v47 = vsub.f32 %v2123_v33, %v2124_v37  ;;  %v2171_v43 = vmul.f32 %v2170_v61, %v6394_v23  ;;  %v2126_v33 = vsub.f32 %v7537_v13, %v2107_v1  ;;  %v2090_v61 = vmul.f32 0.01, %v2088_v40  ;;  %9824 = vst [vmem:[#allocation93_spill] sm:$0xff] %v7697_v31 }
 0xbc9   :  { %v2172_v15 = vmul.f32 %v2156_v16, %v2156_v16  ;;  %vm2089_vm7 = vcmp.ge.f32.partialorder %v2088_v40, 0.0 }
 0xbca   :  { %v2127_v44 = vadd.f32 1e-05, %v2125_v47  ;;  %v2174_v47 = vsub.f32 %v7537_v13, %v2156_v16  ;;  %v2091_v10 = vsel %vm2089_vm7, %v2088_v40, %v2090_v61  ;;  %v7670_v16 = vld [vmem:[#allocation2 + $0x3a0] sm:$0xff]  ;;  %v7711_v40 = vld [vmem:[#allocation2 + $0x348] sm:$0xff] }
 0xbcb   :  { %v2173_v62 = vsub.f32 %v2171_v43, %v2172_v15  ;;  %9828 = vst [vmem:[#allocation15_spill] sm:$0xff] %v7711_v40  ;;  %v7732_v61 = vld [vmem:[#allocation2 + $0x300] sm:$0xff] }
 0xbcc   :  { %4924 = vrsqrt.f32 %v2127_v44  ;;  %vm2134_vm13 = vweird.f32 %v2127_v44  ;;  %9835 = vst [vmem:[#allocation23_spill] sm:$0xff] %v7732_v61 }
 0xbcd   :  { %v2175_v14 = vadd.f32 1e-05, %v2173_v62 }
 0xbcf   :  { %4926 = vrsqrt.f32 %v2175_v14  ;;  %vm2182_vm2 = vweird.f32 %v2175_v14 }
 0xbd2   :  { %v4925_v24 = vpop.eup %4924 }
 0xbd3   :  { %v2129_v58 = vmul.f32 %v4925_v24, %v2127_v44  ;;  %vm2135_vm12 = vweird.f32 %v4925_v24 }
 0xbd4   :  { %vm2136_vm14 = vmor %vm2134_vm13, %vm2135_vm12 }
 0xbd5   :  { %v4927_v32 = vpop.eup %4926  ;;  %v2130_v19 = vmul.f32 %v4925_v24, %v2129_v58  ;;  %v7676_v58 = vld [vmem:[#allocation2 + $0x3b0] sm:$0xff] }
 0xbd6   :  { %v2177_v35 = vmul.f32 %v4927_v32, %v2175_v14  ;;  %vm2183_vm15 = vweird.f32 %v4927_v32 }
 0xbd7   :  { %v2131_v11 = vmul.f32 0.5, %v2130_v19  ;;  %vm2184_vm6 = vmor %vm2182_vm2, %vm2183_vm15  ;;  %v7685_v19 = vld [vmem:[#allocation2 + $0x388] sm:$0xff] }
 0xbd8   :  { %v2178_v63 = vmul.f32 %v4927_v32, %v2177_v35  ;;  %v7688_v35 = vld [vmem:[#allocation2 + $0x390] sm:$0xff] }
 0xbd9   :  { %v2132_v25 = vsub.f32 1.5, %v2131_v11  ;;  %v7691_v11 = vld [vmem:[#allocation2 + $0x398] sm:$0xff] }
 0xbda   :  { %v2179_v56 = vmul.f32 0.5, %v2178_v63  ;;  %v7700_v63 = vld [vmem:[#allocation2 + $0x370] sm:$0xff] }
 0xbdb   :  { %v2133_v37 = vmul.f32 %v4925_v24, %v2132_v25  ;;  %9825 = vst [vmem:[#allocation13_spill] sm:$0xff] %v7700_v63  ;;  %v7703_v25 = vld [vmem:[#allocation2 + $0x378] sm:$0xff] }
 0xbdc   :  { %v2180_v52 = vsub.f32 1.5, %v2179_v56  ;;  %9826 = vst [vmem:[#allocation12_spill] sm:$0xff] %v7703_v25  ;;  %v7708_v56 = vld [vmem:[#allocation2 + $0x340] sm:$0xff] }
 0xbdd   :  { %v2137_v41 = vsel %vm2136_vm14, %v4925_v24, %v2133_v37  ;;  %9827 = vst [vmem:[#allocation14_spill] sm:$0xff] %v7708_v56  ;;  %v7714_v37 = vld [vmem:[#allocation2 + $0x350] sm:$0xff] }
 0xbde   :  { %v2181_v7 = vmul.f32 %v4927_v32, %v2180_v52  ;;  %v2138_v0 = vmul.f32 %v2137_v41, %v2126_v33  ;;  %9829 = vst [vmem:[#allocation19_spill] sm:$0xff] %v7714_v37  ;;  %v7717_v33 = vld [vmem:[#allocation2 + $0x358] sm:$0xff]  ;;  %v7720_v52 = vld [vmem:[#allocation2 + $0x320] sm:$0xff]  ;;  %v7726_v41 = vld [vmem:[#allocation2 + $0x330] sm:$0xff] }
 0xbdf   :  { %9830 = vst [vmem:[#allocation16_spill] sm:$0xff] %v7717_v33 }
 0xbe0   :  { %vm2139_vm8 = vcmp.ge.f32.partialorder %v2138_v0, 0.0  ;;  %v2140_v54 = vmul.f32 0.01, %v2138_v0  ;;  %v2185_v15 = vsel %vm2184_vm6, %v4927_v32, %v2181_v7  ;;  %v7682_v32 = vld [vmem:[#allocation2 + $0x380] sm:$0xff]  ;;  %9831 = vst [vmem:[#allocation20_spill] sm:$0xff] %v7720_v52  ;;  %v7729_v7 = vld [vmem:[#allocation2 + $0x338] sm:$0xff] }
 0xbe1   :  { %v2186_v43 = vmul.f32 %v2185_v15, %v2174_v47  ;;  %9833 = vst [vmem:[#allocation17_spill] sm:$0xff] %v7726_v41  ;;  %v7738_v47 = vld [vmem:[#allocation2 + $0x310] sm:$0xff]  ;;  %v7744_v15 = vld [vmem:[#allocation2 + $0x2e0] sm:$0xff] }
 0xbe2   :  { %v2141_v44 = vsel %vm2139_vm8, %v2138_v0, %v2140_v54  ;;  %9834 = vst [vmem:[#allocation24_spill] sm:$0xff] %v7729_v7  ;;  %v7735_v0 = vld [vmem:[#allocation2 + $0x308] sm:$0xff]  ;;  %v7741_v54 = vld [vmem:[#allocation2 + $0x318] sm:$0xff] }
 0xbe3   :  { %vm2187_vm9 = vcmp.ge.f32.partialorder %v2186_v43, 0.0  ;;  %v2188_v1 = vmul.f32 0.01, %v2186_v43  ;;  %v2190_v62 = vsel %vm578_vm1, %v2091_v10, %v2141_v44  ;;  %9836 = vst [vmem:[#allocation22_spill] sm:$0xff] %v7735_v0  ;;  %v7750_v10 = vld [vmem:[#allocation2 + $0x2f0] sm:$0xff]  ;;  %v7753_v44 = vld [vmem:[#allocation2 + $0x2f8] sm:$0xff] }
 0xbe4   :  { %9837 = vst [vmem:[#allocation21_spill] sm:$0xff] %v7738_v47 }
 0xbe5   :  { %v2189_v4 = vsel %vm2187_vm9, %v2186_v43, %v2188_v1  ;;  %9838 = vst [vmem:[#allocation28_spill] sm:$0xff] %v7741_v54  ;;  %v7747_v43 = vld [vmem:[#allocation2 + $0x2e8] sm:$0xff]  ;;  %v7756_v1 = vld [vmem:[#allocation2 + $0x2c0] sm:$0xff] }
 0xbe6   :  { %v2191_v24 = vsel %vm580_vm4, %v2190_v62, %v2189_v4  ;;  %9839 = vst [vmem:[#allocation27_spill] sm:$0xff] %v7744_v15  ;;  %v7759_v62 = vld [vmem:[#allocation2 + $0x2c8] sm:$0xff]  ;;  %v7762_v4 = vld [vmem:[#allocation2 + $0x2d0] sm:$0xff] }
 0xbe7   :  { %2198 = vrot.lane.b32.xlu2 %v2191_v24, %s5718_s29  ;;  %9840 = vst [vmem:[#allocation26_spill] sm:$0xff] %v7747_v43  ;;  %v7765_v24 = vld [vmem:[#allocation2 + $0x2d8] sm:$0xff] }
 0xbe8   :  { %9841 = vst [vmem:[#allocation25_spill] sm:$0xff] %v7750_v10 }
 0xbe9   :  { %9842 = vst [vmem:[#allocation32_spill] sm:$0xff] %v7753_v44 }
 0xbea   :  { %9843 = vst [vmem:[#allocation31_spill] sm:$0xff] %v7756_v1 }
 0xbeb   :  { %9844 = vst [vmem:[#allocation30_spill] sm:$0xff] %v7759_v62 }
 0xbec   :  { %9845 = vst [vmem:[#allocation29_spill] sm:$0xff] %v7762_v4 }
 0xbed   :  { %9846 = vst [vmem:[#allocation36_spill] sm:$0xff] %v7765_v24 }
 0xc41   :  { %v2199_v14 = vpop.permute.xlu2 %2198 }
 0xc42   :  { %v2202_v13 = vsel %vm175_vm0, %v7559_v38, %v2199_v14  ;;  %v7679_v38 = vld [vmem:[#allocation2 + $0x3b8] sm:$0xff]  ;;  %v7768_v14 = vld [vmem:[#allocation2 + $0x2a0] sm:$0xff] }
 0xc43   :  { %4591 = vmatmul.msk.f32.vlgmr.msra.gmra.mxu1 %vm177_vm5, %v2202_v13  ;;  %4592 = vmatmul.msk.f32.vlgmr.msra.gmra.mxu0 %vm177_vm5, %v2202_v13  ;;  %9847 = vst [vmem:[#allocation35_spill] sm:$0xff] %v7768_v14 }
 0xc44   :  { %4593 = vmatmul.msk.f32.vlgmr.msrb.gmra.mxu3 %vm177_vm5, %v2202_v13  ;;  %4594 = vmatmul.msk.f32.vlgmr.msrb.gmra.mxu2 %vm177_vm5, %v2202_v13  ;;  %v7771_v13 = vld [vmem:[#allocation2 + $0x2a8] sm:$0xff] }
 0xc45   :  { %2628 = vmatpush.msra.mxu1 %v7670_v16  ;;  %2668 = vmatpush.msra.mxu0 %v7673_v51  ;;  %9848 = vst [vmem:[#allocation34_spill] sm:$0xff] %v7771_v13 }
 0xc46   :  { %2708 = vmatpush.msrb.mxu3 %v7676_v58  ;;  %2748 = vmatpush.msrb.mxu2 %v7679_v38 }
 0xc47   :  { %2629 = vmatpush.msra.mxu1 %v7682_v32  ;;  %2669 = vmatpush.msra.mxu0 %v7685_v19 }
 0xc48   :  { %2709 = vmatpush.msrb.mxu3 %v7688_v35  ;;  %2749 = vmatpush.msrb.mxu2 %v7691_v11 }
 0xc49   :  { %2630 = vmatpush.msra.mxu1 %v7694_v28  ;;  %2670 = vmatpush.msra.mxu0 %v7697_v31 }
 0xc4a   :  { %2710 = vmatpush.msrb.mxu3 %v7700_v63  ;;  %2750 = vmatpush.msrb.mxu2 %v7703_v25 }
 0xc4b   :  { %2302 = vmatmul.f32.vlgmr.msrb.gmra.mxu1 %v7563_v46  ;;  %2342 = vmatmul.f32.vlgmr.msrb.gmra.mxu0 %v7563_v46  ;;  %v7723_v46 = vld [vmem:[#allocation2 + $0x328] sm:$0xff] }
 0xc4c   :  { %2631 = vmatpush.msra.mxu1 %v7708_v56  ;;  %2671 = vmatpush.msra.mxu0 %v7711_v40  ;;  %9832 = vst [vmem:[#allocation18_spill] sm:$0xff] %v7723_v46 }
 0xc4d   :  { %2711 = vmatpush.msrb.mxu3 %v7714_v37  ;;  %2751 = vmatpush.msrb.mxu2 %v7717_v33 }
 0xc4e   :  { %2632 = vmatpush.msra.mxu1 %v7720_v52  ;;  %2672 = vmatpush.msra.mxu0 %v7723_v46 }
 0xc4f   :  { %2712 = vmatpush.msrb.mxu3 %v7726_v41  ;;  %2752 = vmatpush.msrb.mxu2 %v7729_v7 }
 0xc50   :  { %2633 = vmatpush.msra.mxu1 %v7732_v61  ;;  %2673 = vmatpush.msra.mxu0 %v7735_v0 }
 0xc51   :  { %2713 = vmatpush.msrb.mxu3 %v7738_v47  ;;  %2753 = vmatpush.msrb.mxu2 %v7741_v54 }
 0xc52   :  { %2634 = vmatpush.msra.mxu1 %v7744_v15  ;;  %2674 = vmatpush.msra.mxu0 %v7747_v43 }
 0xc53   :  { %2714 = vmatpush.msrb.mxu3 %v7750_v10  ;;  %2754 = vmatpush.msrb.mxu2 %v7753_v44  ;;  %v2263_v44 = vpop.f32.mrf.mxu2 }
 0xc54   :  { %2635 = vmatpush.msra.mxu1 %v7756_v1  ;;  %2675 = vmatpush.msra.mxu0 %v7759_v62  ;;  %v7774_v1 = vld [vmem:[#allocation2 + $0x2b0] sm:$0xff]  ;;  %v7777_v62 = vld [vmem:[#allocation2 + $0x2b8] sm:$0xff]  ;;  %v2264_v10 = vadd.f32 %v2263_v44, %v9818_v42 }
 0xc55   :  { %2715 = vmatpush.msrb.mxu3 %v7762_v4  ;;  %2755 = vmatpush.msrb.mxu2 %v7765_v24  ;;  %9849 = vst [vmem:[#allocation33_spill] sm:$0xff] %v7774_v1  ;;  %v7780_v4 = vld [vmem:[#allocation2 + $0x280] sm:$0xff]  ;;  %v7783_v24 = vld [vmem:[#allocation2 + $0x288] sm:$0xff] }
 0xc56   :  { %2636 = vmatpush.msra.mxu1 %v7768_v14  ;;  %2676 = vmatpush.msra.mxu0 %v7771_v13  ;;  %9850 = vst [vmem:[#allocation40_spill] sm:$0xff] %v7777_v62  ;;  %v7786_v14 = vld [vmem:[#allocation2 + $0x290] sm:$0xff]  ;;  %v7789_v13 = vld [vmem:[#allocation2 + $0x298] sm:$0xff] }
 0xc57   :  { %2716 = vmatpush.msrb.mxu3 %v7774_v1  ;;  %2756 = vmatpush.msrb.mxu2 %v7777_v62  ;;  %9851 = vst [vmem:[#allocation39_spill] sm:$0xff] %v7780_v4  ;;  %v7792_v1 = vld [vmem:[#allocation2 + $0x260] sm:$0xff]  ;;  %v7795_v62 = vld [vmem:[#allocation2 + $0x268] sm:$0xff] }
 0xc58   :  { %2637 = vmatpush.msra.mxu1 %v7780_v4  ;;  %9852 = vst [vmem:[#allocation38_spill] sm:$0xff] %v7783_v24  ;;  %2677 = vmatpush.msra.mxu0 %v7783_v24  ;;  %v7798_v4 = vld [vmem:[#allocation2 + $0x270] sm:$0xff]  ;;  %v7801_v24 = vld [vmem:[#allocation2 + $0x278] sm:$0xff] }
 0xc59   :  { %9853 = vst [vmem:[#allocation37_spill] sm:$0xff] %v7786_v14  ;;  %2717 = vmatpush.msrb.mxu3 %v7786_v14  ;;  %2757 = vmatpush.msrb.mxu2 %v7789_v13  ;;  %v7804_v14 = vld [vmem:[#allocation2 + $0x240] sm:$0xff] }
 0xc5a   :  { %9854 = vst [vmem:[#allocation44_spill] sm:$0xff] %v7789_v13  ;;  %2638 = vmatpush.msra.mxu1 %v7792_v1  ;;  %2678 = vmatpush.msra.mxu0 %v7795_v62  ;;  %v7807_v13 = vld [vmem:[#allocation2 + $0x248] sm:$0xff] }
 0xc5b   :  { %9855 = vst [vmem:[#allocation43_spill] sm:$0xff] %v7792_v1  ;;  %2718 = vmatpush.msrb.mxu3 %v7798_v4  ;;  %2758 = vmatpush.msrb.mxu2 %v7801_v24  ;;  %v7810_v1 = vld [vmem:[#allocation2 + $0x250] sm:$0xff] }
 0xc5c   :  { %9856 = vst [vmem:[#allocation42_spill] sm:$0xff] %v7795_v62  ;;  %2639 = vmatpush.msra.mxu1 %v7804_v14  ;;  %2679 = vmatpush.msra.mxu0 %v7807_v13  ;;  %v7813_v62 = vld [vmem:[#allocation2 + $0x258] sm:$0xff] }
 0xc5d   :  { %9857 = vst [vmem:[#allocation41_spill] sm:$0xff] %v7798_v4  ;;  %2719 = vmatpush.msrb.mxu3 %v7810_v1  ;;  %2759 = vmatpush.msrb.mxu2 %v7813_v62  ;;  %v7816_v4 = vld [vmem:[#allocation2 + $0x220] sm:$0xff] }
 0xc5e   :  { %9858 = vst [vmem:[#allocation48_spill] sm:$0xff] %v7801_v24  ;;  %2640 = vmatpush.msra.mxu1 %v7816_v4  ;;  %v7819_v24 = vld [vmem:[#allocation2 + $0x228] sm:$0xff] }
 0xc5f   :  { %9859 = vst [vmem:[#allocation47_spill] sm:$0xff] %v7804_v14  ;;  %2680 = vmatpush.msra.mxu0 %v7819_v24  ;;  %v7822_v14 = vld [vmem:[#allocation2 + $0x230] sm:$0xff] }
 0xc60   :  { %9860 = vst [vmem:[#allocation46_spill] sm:$0xff] %v7807_v13  ;;  %2720 = vmatpush.msrb.mxu3 %v7822_v14  ;;  %v7825_v13 = vld [vmem:[#allocation2 + $0x238] sm:$0xff] }
 0xc61   :  { %9861 = vst [vmem:[#allocation45_spill] sm:$0xff] %v7810_v1  ;;  %2760 = vmatpush.msrb.mxu2 %v7825_v13  ;;  %v7828_v1 = vld [vmem:[#allocation2 + $0x200] sm:$0xff] }
 0xc62   :  { %9862 = vst [vmem:[#allocation52_spill] sm:$0xff] %v7813_v62  ;;  %2641 = vmatpush.msra.mxu1 %v7828_v1  ;;  %v7831_v62 = vld [vmem:[#allocation2 + $0x208] sm:$0xff] }
 0xc63   :  { %9863 = vst [vmem:[#allocation51_spill] sm:$0xff] %v7816_v4  ;;  %2681 = vmatpush.msra.mxu0 %v7831_v62  ;;  %v7834_v4 = vld [vmem:[#allocation2 + $0x1f0] sm:$0xff] }
 0xc64   :  { %9864 = vst [vmem:[#allocation50_spill] sm:$0xff] %v7819_v24  ;;  %2686 = vmatpush.msrb.mxu1 %v7834_v4  ;;  %v7837_v24 = vld [vmem:[#allocation2 + $0x1f8] sm:$0xff] }
 0xc65   :  { %9865 = vst [vmem:[#allocation49_spill] sm:$0xff] %v7822_v14  ;;  %2726 = vmatpush.msrb.mxu0 %v7837_v24  ;;  %v7840_v14 = vld [vmem:[#allocation2 + $0x210] sm:$0xff] }
 0xc66   :  { %9866 = vst [vmem:[#allocation56_spill] sm:$0xff] %v7825_v13  ;;  %2721 = vmatpush.msrb.mxu3 %v7840_v14  ;;  %v7843_v13 = vld [vmem:[#allocation2 + $0x218] sm:$0xff] }
 0xc67   :  { %9867 = vst [vmem:[#allocation55_spill] sm:$0xff] %v7828_v1  ;;  %2761 = vmatpush.msrb.mxu2 %v7843_v13  ;;  %v7846_v1 = vld [vmem:[#allocation2 + $0x1d0] sm:$0xff] }
 0xc68   :  { %9868 = vst [vmem:[#allocation54_spill] sm:$0xff] %v7831_v62  ;;  %2687 = vmatpush.msrb.mxu1 %v7846_v1  ;;  %v7849_v62 = vld [vmem:[#allocation2 + $0x1d8] sm:$0xff] }
 0xc69   :  { %9869 = vst [vmem:[#allocation53_spill] sm:$0xff] %v7834_v4  ;;  %2727 = vmatpush.msrb.mxu0 %v7849_v62  ;;  %v7852_v4 = vld [vmem:[#allocation2 + $0x1b0] sm:$0xff] }
 0xc6a   :  { %9870 = vst [vmem:[#allocation60_spill] sm:$0xff] %v7837_v24  ;;  %2688 = vmatpush.msrb.mxu1 %v7852_v4  ;;  %v7855_v24 = vld [vmem:[#allocation2 + $0x1b8] sm:$0xff] }
 0xc6b   :  { %9871 = vst [vmem:[#allocation59_spill] sm:$0xff] %v7840_v14  ;;  %2728 = vmatpush.msrb.mxu0 %v7855_v24  ;;  %v7858_v14 = vld [vmem:[#allocation2 + $0x190] sm:$0xff] }
 0xc6c   :  { %9872 = vst [vmem:[#allocation58_spill] sm:$0xff] %v7843_v13  ;;  %2689 = vmatpush.msrb.mxu1 %v7858_v14  ;;  %v7861_v13 = vld [vmem:[#allocation2 + $0x198] sm:$0xff] }
 0xc6d   :  { %9873 = vst [vmem:[#allocation57_spill] sm:$0xff] %v7846_v1  ;;  %2729 = vmatpush.msrb.mxu0 %v7861_v13  ;;  %v7864_v1 = vld [vmem:[#allocation2 + $0x170] sm:$0xff] }
 0xc6e   :  { %9874 = vst [vmem:[#allocation63_spill] sm:$0xff] %v7849_v62  ;;  %2690 = vmatpush.msrb.mxu1 %v7864_v1  ;;  %v7867_v62 = vld [vmem:[#allocation2 + $0x178] sm:$0xff] }
 0xc6f   :  { %9875 = vst [vmem:[#allocation62_spill] sm:$0xff] %v7852_v4  ;;  %2730 = vmatpush.msrb.mxu0 %v7867_v62  ;;  %v7870_v4 = vld [vmem:[#allocation2 + $0x150] sm:$0xff] }
 0xc70   :  { %9876 = vst [vmem:[#allocation61_spill] sm:$0xff] %v7855_v24  ;;  %2691 = vmatpush.msrb.mxu1 %v7870_v4  ;;  %v7873_v24 = vld [vmem:[#allocation2 + $0x158] sm:$0xff] }
 0xc71   :  { %9877 = vst [vmem:[#allocation65_spill] sm:$0xff] %v7858_v14  ;;  %2731 = vmatpush.msrb.mxu0 %v7873_v24  ;;  %v7876_v14 = vld [vmem:[#allocation2 + $0x130] sm:$0xff] }
 0xc72   :  { %9878 = vst [vmem:[#allocation64_spill] sm:$0xff] %v7861_v13  ;;  %2692 = vmatpush.msrb.mxu1 %v7876_v14  ;;  %v7879_v13 = vld [vmem:[#allocation2 + $0x138] sm:$0xff] }
 0xc73   :  { %9879 = vst [vmem:[#allocation66_spill] sm:$0xff] %v7864_v1  ;;  %2732 = vmatpush.msrb.mxu0 %v7879_v13  ;;  %v7882_v1 = vld [vmem:[#allocation2 + $0x110] sm:$0xff] }
 0xc74   :  { %9880 = vst [vmem:[#allocation67_spill] sm:$0xff] %v7867_v62  ;;  %2693 = vmatpush.msrb.mxu1 %v7882_v1  ;;  %v7885_v62 = vld [vmem:[#allocation2 + $0x118] sm:$0xff] }
 0xc75   :  { %9881 = vst [vmem:[#allocation68_spill] sm:$0xff] %v7870_v4  ;;  %2733 = vmatpush.msrb.mxu0 %v7885_v62  ;;  %v7888_v4 = vld [vmem:[#allocation2 + $0xf0] sm:$0xff] }
 0xc76   :  { %9882 = vst [vmem:[#allocation69_spill] sm:$0xff] %v7873_v24  ;;  %2694 = vmatpush.msrb.mxu1 %v7888_v4  ;;  %v7891_v24 = vld [vmem:[#allocation2 + $0xf8] sm:$0xff] }
 0xc77   :  { %9883 = vst [vmem:[#allocation70_spill] sm:$0xff] %v7876_v14  ;;  %2734 = vmatpush.msrb.mxu0 %v7891_v24  ;;  %v7894_v14 = vld [vmem:[#allocation2 + $0xd0] sm:$0xff] }
 0xc78   :  { %9884 = vst [vmem:[#allocation71_spill] sm:$0xff] %v7879_v13  ;;  %2695 = vmatpush.msrb.mxu1 %v7894_v14  ;;  %v7897_v13 = vld [vmem:[#allocation2 + $0xd8] sm:$0xff] }
 0xc79   :  { %9885 = vst [vmem:[#allocation72_spill] sm:$0xff] %v7882_v1  ;;  %2735 = vmatpush.msrb.mxu0 %v7897_v13  ;;  %v7900_v1 = vld [vmem:[#allocation2 + $0xb0] sm:$0xff] }
 0xc7a   :  { %9886 = vst [vmem:[#allocation73_spill] sm:$0xff] %v7885_v62  ;;  %2696 = vmatpush.msrb.mxu1 %v7900_v1  ;;  %v7903_v62 = vld [vmem:[#allocation2 + $0xb8] sm:$0xff] }
 0xc7b   :  { %9887 = vst [vmem:[#allocation74_spill] sm:$0xff] %v7888_v4  ;;  %2736 = vmatpush.msrb.mxu0 %v7903_v62  ;;  %v7906_v4 = vld [vmem:[#allocation2 + $0x90] sm:$0xff] }
 0xc7c   :  { %9888 = vst [vmem:[#allocation75_spill] sm:$0xff] %v7891_v24  ;;  %2697 = vmatpush.msrb.mxu1 %v7906_v4  ;;  %v7909_v24 = vld [vmem:[#allocation2 + $0x98] sm:$0xff] }
 0xc7d   :  { %9889 = vst [vmem:[#allocation76_spill] sm:$0xff] %v7894_v14  ;;  %2737 = vmatpush.msrb.mxu0 %v7909_v24  ;;  %v7912_v14 = vld [vmem:[#allocation2 + $0x70] sm:$0xff] }
 0xc7e   :  { %9890 = vst [vmem:[#allocation77_spill] sm:$0xff] %v7897_v13  ;;  %2698 = vmatpush.msrb.mxu1 %v7912_v14  ;;  %v7915_v13 = vld [vmem:[#allocation2 + $0x78] sm:$0xff] }
 0xc7f   :  { %9891 = vst [vmem:[#allocation78_spill] sm:$0xff] %v7900_v1  ;;  %2738 = vmatpush.msrb.mxu0 %v7915_v13  ;;  %v7918_v1 = vld [vmem:[#allocation2 + $0x50] sm:$0xff] }
 0xc80   :  { %9892 = vst [vmem:[#allocation79_spill] sm:$0xff] %v7903_v62  ;;  %2699 = vmatpush.msrb.mxu1 %v7918_v1  ;;  %v7921_v62 = vld [vmem:[#allocation2 + $0x58] sm:$0xff] }
 0xc81   :  { %9893 = vst [vmem:[#allocation80_spill] sm:$0xff] %v7906_v4  ;;  %2739 = vmatpush.msrb.mxu0 %v7921_v62  ;;  %v7924_v4 = vld [vmem:[#allocation2 + $0x30] sm:$0xff] }
 0xc82   :  { %9894 = vst [vmem:[#allocation81_spill] sm:$0xff] %v7909_v24  ;;  %2700 = vmatpush.msrb.mxu1 %v7924_v4  ;;  %v7927_v24 = vld [vmem:[#allocation2 + $0x38] sm:$0xff] }
 0xc83   :  { %9895 = vst [vmem:[#allocation82_spill] sm:$0xff] %v7912_v14  ;;  %2740 = vmatpush.msrb.mxu0 %v7927_v24  ;;  %v7930_v14 = vld [vmem:[#allocation2 + $0x10] sm:$0xff] }
 0xc84   :  { %9896 = vst [vmem:[#allocation83_spill] sm:$0xff] %v7915_v13  ;;  %2701 = vmatpush.msrb.mxu1 %v7930_v14  ;;  %v7933_v13 = vld [vmem:[#allocation2 + $0x18] sm:$0xff] }
 0xc85   :  { %9897 = vst [vmem:[#allocation84_spill] sm:$0xff] %v7918_v1  ;;  %2741 = vmatpush.msrb.mxu0 %v7933_v13  ;;  %v2223_v1 = vpop.f32.mrf.mxu3 }
 0xc86   :  { %9898 = vst [vmem:[#allocation85_spill] sm:$0xff] %v7921_v62  ;;  %v2224_v62 = vadd.f32 %v2223_v1, %v9817_v45 }
 0xc87   :  { %9899 = vst [vmem:[#allocation86_spill] sm:$0xff] %v7924_v4 }
 0xc88   :  { %9900 = vst [vmem:[#allocation87_spill] sm:$0xff] %v7927_v24 }
 0xc89   :  { %9901 = vst [vmem:[#allocation88_spill] sm:$0xff] %v7930_v14 }
 0xc8a   :  { %9902 = vst [vmem:[#allocation89_spill] sm:$0xff] %v7933_v13 }
 0xcc0   :  { %v2243_v43 = vpop.f32.mrf.mxu1  ;;  %v2283_v4 = vpop.f32.mrf.mxu0 }
 0xcc1   :  { %v2244_v15 = vadd.f32 %v2243_v43, %v2224_v62  ;;  %v2284_v54 = vadd.f32 %v2283_v4, %v2264_v10 }
 0xcc3   :  { %v4595_v47 = vmul.f32 -1.442695, %v2244_v15  ;;  %v4596_v24 = vmul.f32 -1.442695, %v2284_v54 }
 0xcc5   :  { %4928 = vpow2.f32 %v4595_v47 }
 0xcc6   :  { %4930 = vpow2.f32 %v4596_v24 }
 0xcc7   :  { %v2323_v7 = vpop.f32.mrf.mxu3  ;;  %v2363_v41 = vpop.f32.mrf.mxu2 }
 0xcc8   :  { %v2303_v0 = vpop.f32.mrf.mxu1  ;;  %v2343_v14 = vpop.f32.mrf.mxu0 }
 0xcc9   :  { %v2304_v61 = vadd.f32 %v2303_v0, %v9819_v9  ;;  %v2344_v13 = vadd.f32 %v2343_v14, %v9820_v39 }
 0xccb   :  { %v4929_v46 = vpop.eup %4928  ;;  %v2324_v1 = vadd.f32 %v2323_v7, %v2304_v61  ;;  %v2364_v45 = vadd.f32 %v2363_v41, %v2344_v13 }
 0xccc   :  { %v4931_v44 = vpop.eup %4930  ;;  %v2378_v10 = vadd.f32 1.0, %v4929_v46 }
 0xccd   :  { %v2379_v42 = vadd.f32 1.0, %v4931_v44  ;;  %v4597_v52 = vmul.f32 -1.442695, %v2324_v1  ;;  %v4598_v43 = vmul.f32 -1.442695, %v2364_v45 }
 0xcce   :  { %vm2387_vm2 = vweird.f32 %v2378_v10 }
 0xccf   :  { %4932 = vrcp.f32 %v2379_v42  ;;  %vm2402_vm12 = vweird.f32 %v2379_v42 }
 0xcd0   :  { %4934 = vpow2.f32 %v4597_v52 }
 0xcd1   :  { %4936 = vpow2.f32 %v4598_v43 }
 0xcd2   :  { %4938 = vrcp.f32 %v2378_v10 }
 0xcd5   :  { %v4933_v47 = vpop.eup %4932 }
 0xcd6   :  { %v4935_v54 = vpop.eup %4934  ;;  %v2398_v4 = vmul.f32 %v4933_v47, %v2379_v42  ;;  %vm2403_vm10 = vweird.f32 %v4933_v47 }
 0xcd7   :  { %v4937_v15 = vpop.eup %4936  ;;  %v2380_v24 = vadd.f32 1.0, %v4935_v54  ;;  %v2408_v54 = vand.u32 2147483648, %v2379_v42  ;;  %vm7940_vm14 = vmor %vm2402_vm12, %vm2403_vm10 }
 0xcd8   :  { %v4939_v0 = vpop.eup %4938  ;;  %v2381_v62 = vadd.f32 1.0, %v4937_v15  ;;  %v2399_v7 = vsub.f32 1.0, %v2398_v4  ;;  %v2406_v15 = vand.u32 2147483647, %v2379_v42 }
 0xcd9   :  { %v2383_v14 = vmul.f32 %v4939_v0, %v2378_v10  ;;  %vm2388_vm13 = vweird.f32 %v4939_v0  ;;  %v2409_v42 = vor.u32 1.1754944e-38, %v2408_v54  ;;  %vm2417_vm12 = vweird.f32 %v2380_v24 }
 0xcda   :  { %4940 = vrcp.f32 %v2381_v62  ;;  %v2400_v13 = vmul.f32 %v4933_v47, %v2399_v7  ;;  %v2438_v44 = vand.u32 2147483648, %v2381_v62  ;;  %v2436_v9 = vand.u32 2147483647, %v2381_v62  ;;  %vm2389_vm8 = vmor %vm2387_vm2, %vm2388_vm13 }
 0xcdb   :  { %4942 = vrcp.f32 %v2380_v24  ;;  %v2384_v41 = vsub.f32 1.0, %v2383_v14  ;;  %vm2432_vm15 = vweird.f32 %v2381_v62  ;;  %v2393_v7 = vand.u32 2147483648, %v2378_v10 }
 0xcdc   :  { %v2401_v43 = vadd.f32 %v4933_v47, %v2400_v13  ;;  %v2391_v13 = vand.u32 2147483647, %v2378_v10  ;;  %vm2437_vm7 = vcmp.eq.f32.partialorder %v2436_v9, 8.507059e+37  ;;  %vm2407_vm9 = vcmp.eq.f32.partialorder %v2406_v15, 8.507059e+37 }
 0xcdd   :  { %v2385_v1 = vmul.f32 %v4939_v0, %v2384_v41  ;;  %v2439_v41 = vor.u32 1.1754944e-38, %v2438_v44  ;;  %v2394_v63 = vor.u32 1.1754944e-38, %v2393_v7  ;;  %v2423_v9 = vand.u32 2147483648, %v2380_v24 }
 0xcde   :  { %vm2392_vm10 = vcmp.eq.f32.partialorder %v2391_v13, 8.507059e+37 }
 0xcdf   :  { %v2386_v37 = vadd.f32 %v4939_v0, %v2385_v1 }
 0xce0   :  { %v4941_v61 = vpop.eup %4940 }
 0xce1   :  { %v2428_v45 = vmul.f32 %v4941_v61, %v2381_v62  ;;  %v4943_v46 = vpop.eup %4942  ;;  %vm2433_vm11 = vweird.f32 %v4941_v61  ;;  %v2390_v56 = vsel %vm2389_vm8, %v4939_v0, %v2386_v37  ;;  %v2421_v37 = vand.u32 2147483647, %v2380_v24 }
 0xce2   :  { %v2413_v33 = vmul.f32 %v4943_v46, %v2380_v24  ;;  %vm2434_vm6 = vmor %vm2432_vm15, %vm2433_vm11  ;;  %v2395_v31 = vsel %vm2392_vm10, %v2394_v63, %v2390_v56  ;;  %vm2418_vm11 = vweird.f32 %v4943_v46 }
 0xce3   :  { %v2429_v52 = vsub.f32 1.0, %v2428_v45  ;;  %v2405_v45 = vsel %vm7940_vm14, %v4933_v47, %v2401_v43  ;;  %vm2419_vm13 = vmor %vm2417_vm12, %vm2418_vm11  ;;  %vm2422_vm14 = vcmp.eq.f32.partialorder %v2421_v37, 8.507059e+37 }
 0xce4   :  { %v2414_v1 = vsub.f32 1.0, %v2413_v33  ;;  %v2424_v33 = vor.u32 1.1754944e-38, %v2423_v9 }
 0xce5   :  { %v2430_v39 = vmul.f32 %v4941_v61, %v2429_v52 }
 0xce6   :  { %v2415_v28 = vmul.f32 %v4943_v46, %v2414_v1 }
 0xce7   :  { %v2431_v14 = vadd.f32 %v4941_v61, %v2430_v39  ;;  %v2410_v39 = vsel %vm2407_vm9, %v2409_v42, %v2405_v45 }
 0xce8   :  { %v2444_v10 = vmul.f32 %v2410_v39, %v7534_v36  ;;  %v2416_v47 = vadd.f32 %v4943_v46, %v2415_v28 }
 0xce9   :  { %v2435_v52 = vsel %vm2434_vm6, %v4941_v61, %v2431_v14 }
 0xcea   :  { %v2440_v40 = vsel %vm2437_vm7, %v2439_v41, %v2435_v52 }
 0xceb   :  { %v2442_v25 = vmul.f32 2.0, %v2440_v40  ;;  %v2420_v40 = vsel %vm2419_vm13, %v4943_v46, %v2416_v47 }
 0xced   :  { %v4599_v62 = vadd.f32 -1.0, %v2442_v25  ;;  %v2425_v25 = vsel %vm2422_vm14, %v2424_v33, %v2420_v40 }
 0xcef   :  { %v2445_v44 = vmul.f32 %v4599_v62, %v2395_v31 }
 0xcf1   :  { %v7947_v4 = vadd.f32 %v2445_v44, %v2444_v10 }
 0xcf3   :  { %4944 = vtanh.f32 %v7947_v4 }
 0xcf9   :  { %v4945_v0 = vpop.eup %4944 }
 0xcfa   :  { %v7950_v63 = vmul.f32 %v4945_v0, %v2425_v25 }
 0xcfc   :  { %2542 = vrot.lane.b32.xlu2 %v7950_v63, %s5716_s2  ;;  %2493 = vrot.lane.b32.xlu1 %v7950_v63, %s5717_s28  ;;  %v2461_v36 = vmul.f32 %v7950_v63, %v7950_v63  ;;  %v2449_v31 = vsel %vm429_vm3, %v7950_v63, 0.0 }
 0xcfe   :  { %2509 = vrot.lane.b32.xlu0 %v2461_v36, %s5717_s28  ;;  %v2462_v28 = vsel %vm429_vm3, %v2461_v36, 0.0 }
 0xd06   :  { %2557 = vrot.lane.b32.xlu0 %v2461_v36, %s5716_s2 }
 0xd25   :  { %2463 = vadd.xlane.f32.xlu2 %v2462_v28 }
 0xd26   :  { %2450 = vadd.xlane.f32.xlu1 %v2449_v31 }
 0xd56   :  { %v2543_v56 = vpop.permute.xlu2 %2542 }
 0xd57   :  { %v2545_v24 = vsel %vm429_vm3, %v2543_v56, 0.0 }
 0xd58   :  { %2546 = vadd.xlane.f32.xlu2 %v2545_v24 }
 0xd6e   :  { %v2494_v61 = vpop.permute.xlu1 %2493 }
 0xd6f   :  { %v2496_v46 = vsel %vm429_vm3, %v2494_v61, 0.0 }
 0xd70   :  { %2497 = vadd.xlane.f32.xlu0 %v2496_v46  ;;  %v2510_v43 = vpop.permute.xlu0 %2509 }
 0xd71   :  { %v2512_v15 = vsel %vm429_vm3, %v2510_v43, 0.0 }
 0xd72   :  { %2513 = vadd.xlane.f32.xlu1 %v2512_v15 }
 0xd78   :  { %v2558_v54 = vpop.permute.xlu0 %2557 }
 0xd79   :  { %v2560_v14 = vsel %vm429_vm3, %v2558_v54, 0.0 }
 0xd7a   :  { %2561 = vadd.xlane.f32.xlu0 %v2560_v14 }
 0xd8b   :  { %2594 = vrot.lane.b32.xlu1 %v7950_v63, %s5718_s29 }
 0xd98   :  { %v2464_v7 = vpop.xlane.xlu2 %2463 }
 0xd99   :  { %v2465_v41 = vrot.slane %v2464_v7, 4  ;;  %v2451_v13 = vpop.xlane.xlu1 %2450 }
 0xd9a   :  { %v2452_v45 = vrot.slane %v2451_v13, 4 }
 0xd9b   :  { %v2466_v52 = vadd.f32 %v2465_v41, %v2464_v7 }
 0xd9c   :  { %v2453_v42 = vadd.f32 %v2452_v45, %v2451_v13 }
 0xd9d   :  { %v2467_v1 = vrot.slane %v2466_v52, 2 }
 0xd9e   :  { %v2454_v39 = vrot.slane %v2453_v42, 2 }
 0xd9f   :  { %v2468_v62 = vadd.f32 %v2467_v1, %v2466_v52 }
 0xda0   :  { %v2455_v10 = vadd.f32 %v2454_v39, %v2453_v42 }
 0xda1   :  { %v2469_v44 = vrot.slane %v2468_v62, 1 }
 0xda2   :  { %v2456_v47 = vrot.slane %v2455_v10, 1 }
 0xda3   :  { %v2470_v9 = vadd.f32 %v2469_v44, %v2468_v62 }
 0xda4   :  { %v2457_v37 = vadd.f32 %v2456_v47, %v2455_v10 }
 0xda6   :  { %4732 = vpush %v2457_v37  ;;  %v4600_v37 = vld [vmem:[%s8945_s0 + $0xc] sm:$0x3] }
 0xda7   :  { %4734 = vpush %v2470_v9 }
 0xdcb   :  { %v2547_v40 = vpop.xlane.xlu2 %2546 }
 0xdcc   :  { %v2548_v33 = vrot.slane %v2547_v40, 4 }
 0xdce   :  { %v2549_v0 = vadd.f32 %v2548_v33, %v2547_v40 }
 0xdd0   :  { %v2550_v28 = vrot.slane %v2549_v0, 2 }
 0xdd2   :  { %v2551_v43 = vadd.f32 %v2550_v28, %v2549_v0 }
 0xdd4   :  { %v2552_v13 = vrot.slane %v2551_v43, 1 }
 0xdd6   :  { %v2553_v62 = vadd.f32 %v2552_v13, %v2551_v43 }
 0xdd7   :  { %s4733_s1 = spop %4732 }
 0xdd8   :  { %s4735_s25 = spop %4734 }
 0xde3   :  { %v2498_v25 = vpop.xlane.xlu0 %2497 }
 0xde4   :  { %v2499_v36 = vrot.slane %v2498_v25, 4 }
 0xde5   :  { %v2514_v31 = vpop.xlane.xlu1 %2513 }
 0xde6   :  { %v2500_v56 = vadd.f32 %v2499_v36, %v2498_v25  ;;  %v2515_v24 = vrot.slane %v2514_v31, 4 }
 0xde8   :  { %v2501_v61 = vrot.slane %v2500_v56, 2  ;;  %v2516_v46 = vadd.f32 %v2515_v24, %v2514_v31 }
 0xdea   :  { %v2517_v15 = vrot.slane %v2516_v46, 2  ;;  %v2502_v54 = vadd.f32 %v2501_v61, %v2500_v56 }
 0xdec   :  { %v2503_v14 = vrot.slane %v2502_v54, 1  ;;  %v2518_v7 = vadd.f32 %v2517_v15, %v2516_v46 }
 0xded   :  { %v2562_v41 = vpop.xlane.xlu0 %2561 }
 0xdee   :  { %v2563_v45 = vrot.slane %v2562_v41, 4  ;;  %v2504_v52 = vadd.f32 %v2503_v14, %v2502_v54  ;;  %v2519_v42 = vrot.slane %v2518_v7, 1 }
 0xdf0   :  { %v2564_v1 = vadd.f32 %v2563_v45, %v2562_v41  ;;  %4736 = vpush %v2504_v52  ;;  %v2520_v39 = vadd.f32 %v2519_v42, %v2518_v7 }
 0xdf2   :  { %v2565_v10 = vrot.slane %v2564_v1, 2  ;;  %4738 = vpush %v2520_v39 }
 0xdf3   :  { %4740 = vpush %v2553_v62 }
 0xdf4   :  { %v2566_v44 = vadd.f32 %v2565_v10, %v2564_v1 }
 0xdf6   :  { %v2567_v47 = vrot.slane %v2566_v44, 1 }
 0xdf8   :  { %v2568_v9 = vadd.f32 %v2567_v47, %v2566_v44 }
 0xdfa   :  { %4742 = vpush %v2568_v9 }
 0xdfd   :  { %v7972_v40 = vpop.permute.xlu1 %2594 }
 0xdfe   :  { %v7976_v33 = vsel %vm175_vm0, %v4600_v37, %v7972_v40 }
 0xdff   :  { %2622 = vmatmul.f32.vlgmr.msra.gmra.mxu3 %v7976_v33  ;;  %2662 = vmatmul.f32.vlgmr.msra.gmra.mxu2 %v7976_v33 }
 0xe00   :  { %3006 = vmatpush.msra.mxu3 %v7567_v29  ;;  %3046 = vmatpush.msra.mxu2 %v7570_v6  ;;  %v2459_v29 = vstv %s4733_s1 }
 0xe01   :  { %v7997_v6 = vmul.f32 %v2459_v29, %v6394_v23 }
 0xe02   :  { %3007 = vmatpush.msra.mxu3 %v7573_v49  ;;  %3047 = vmatpush.msra.mxu2 %v7576_v12  ;;  %v2472_v49 = vstv %s4735_s25 }
 0xe03   :  { %v2474_v12 = vmul.f32 %v7997_v6, %v7997_v6  ;;  %v2476_v44 = vsub.f32 %v7950_v63, %v7997_v6 }
 0xe04   :  { %3008 = vmatpush.msra.mxu3 %v7579_v18  ;;  %3048 = vmatpush.msra.mxu2 %v7582_v3  ;;  %v2473_v18 = vmul.f32 %v2472_v49, %v6394_v23 }
 0xe06   :  { %3009 = vmatpush.msra.mxu3 %v7585_v20  ;;  %3049 = vmatpush.msra.mxu2 %v7588_v2  ;;  %v2475_v3 = vsub.f32 %v2473_v18, %v2474_v12  ;;  %v8010_v20 = vld [vmem:[#allocation2 + $0x60] sm:$0xff]  ;;  %v8013_v2 = vld [vmem:[#allocation2 + $0x68] sm:$0xff] }
 0xe08   :  { %3010 = vmatpush.msra.mxu3 %v7591_v48  ;;  %3050 = vmatpush.msra.mxu2 %v7594_v60  ;;  %v8016_v48 = vld [vmem:[#allocation2 + $0x40] sm:$0xff]  ;;  %v8019_v60 = vld [vmem:[#allocation2 + $0x48] sm:$0xff] }
 0xe0a   :  { %3011 = vmatpush.msra.mxu3 %v7597_v5  ;;  %3051 = vmatpush.msra.mxu2 %v7600_v30  ;;  %v2477_v5 = vadd.f32 1e-05, %v2475_v3  ;;  %v8022_v30 = vld [vmem:[#allocation2 + $0x20] sm:$0xff] }
 0xe0c   :  { %3012 = vmatpush.msra.mxu3 %v7603_v55  ;;  %3052 = vmatpush.msra.mxu2 %v7606_v57  ;;  %v8025_v55 = vld [vmem:[#allocation2 + $0x28] sm:$0xff]  ;;  %v8028_v57 = vld [vmem:[#allocation2] sm:$0xff]  ;;  %4946 = vrsqrt.f32 %v2477_v5  ;;  %vm2484_vm7 = vweird.f32 %v2477_v5 }
 0xe0e   :  { %3013 = vmatpush.msra.mxu3 %v7612_v26  ;;  %3053 = vmatpush.msra.mxu2 %v7615_v59  ;;  %v8031_v26 = vld [vmem:[#allocation2 + $0x8] sm:$0xff] }
 0xe10   :  { %3014 = vmatpush.msra.mxu3 %v7618_v21  ;;  %3054 = vmatpush.msra.mxu2 %v7621_v27 }
 0xe12   :  { %3015 = vmatpush.msra.mxu3 %v7626_v53  ;;  %3055 = vmatpush.msra.mxu2 %v7629_v34 }
 0xe14   :  { %3016 = vmatpush.msra.mxu3 %v7633_v22  ;;  %3056 = vmatpush.msra.mxu2 %v7636_v17  ;;  %v4947_v22 = vpop.eup %4946 }
 0xe15   :  { %vm2485_vm2 = vweird.f32 %v4947_v22 }
 0xe16   :  { %3017 = vmatpush.msra.mxu3 %v7639_v8  ;;  %3057 = vmatpush.msra.mxu2 %v7642_v50  ;;  %v2479_v50 = vmul.f32 %v4947_v22, %v2477_v5  ;;  %vm2486_vm9 = vmor %vm2484_vm7, %vm2485_vm2 }
 0xe18   :  { %3018 = vmatpush.msra.mxu3 %v8010_v20  ;;  %3058 = vmatpush.msra.mxu2 %v8013_v2  ;;  %v2480_v28 = vmul.f32 %v4947_v22, %v2479_v50  ;;  %v9907_v50 = vld [vmem:[#allocation13_spill] sm:$0xff] }
 0xe1a   :  { %3019 = vmatpush.msra.mxu3 %v8016_v48  ;;  %3059 = vmatpush.msra.mxu2 %v8019_v60  ;;  %v2481_v46 = vmul.f32 0.5, %v2480_v28  ;;  %v9920_v28 = vld [vmem:[#allocation28_spill] sm:$0xff] }
 0xe1c   :  { %3020 = vmatpush.msra.mxu3 %v8022_v30  ;;  %3060 = vmatpush.msra.mxu2 %v8025_v55  ;;  %v2482_v14 = vsub.f32 1.5, %v2481_v46  ;;  %v9925_v46 = vld [vmem:[#allocation31_spill] sm:$0xff] }
 0xe1e   :  { %3021 = vmatpush.msra.mxu3 %v8028_v57  ;;  %3061 = vmatpush.msra.mxu2 %v8031_v26  ;;  %v2483_v45 = vmul.f32 %v4947_v22, %v2482_v14  ;;  %v9929_v14 = vld [vmem:[#allocation35_spill] sm:$0xff] }
 0xe20   :  { %v2487_v10 = vsel %vm2486_vm9, %v4947_v22, %v2483_v45  ;;  %v9933_v45 = vld [vmem:[#allocation39_spill] sm:$0xff] }
 0xe21   :  { %s4737_s26 = spop %4736  ;;  %v2488_v29 = vmul.f32 %v2487_v10, %v2476_v44  ;;  %v9939_v10 = vld [vmem:[#allocation41_spill] sm:$0xff]  ;;  %v9940_v44 = vld [vmem:[#allocation48_spill] sm:$0xff] }
 0xe22   :  { %v2506_v59 = vstv %s4737_s26 }
 0xe23   :  { %v2507_v21 = vmul.f32 %v2506_v59, %v6394_v23  ;;  %s4739_s27 = spop %4738  ;;  %v2490_v3 = vmul.f32 0.01, %v2488_v29  ;;  %vm2489_vm14 = vcmp.ge.f32.partialorder %v2488_v29, 0.0 }
 0xe24   :  { %v2522_v27 = vstv %s4739_s27  ;;  %s4741_s30 = spop %4740 }
 0xe25   :  { %v2524_v53 = vmul.f32 %v2507_v21, %v2507_v21  ;;  %v2523_v34 = vmul.f32 %v2522_v27, %v6394_v23  ;;  %v2555_v17 = vstv %s4741_s30  ;;  %v2526_v1 = vsub.f32 %v7950_v63, %v2507_v21 }
 0xe26   :  { %v2556_v25 = vmul.f32 %v2555_v17, %v6394_v23  ;;  %v2491_v6 = vsel %vm2489_vm14, %v2488_v29, %v2490_v3  ;;  %v9944_v29 = vld [vmem:[#allocation52_spill] sm:$0xff] }
 0xe27   :  { %v2525_v8 = vsub.f32 %v2523_v34, %v2524_v53  ;;  %v9948_v3 = vld [vmem:[#allocation56_spill] sm:$0xff] }
 0xe28   :  { %v2572_v31 = vmul.f32 %v2556_v25, %v2556_v25  ;;  %v2574_v18 = vsub.f32 %v7950_v63, %v2556_v25  ;;  %v9917_v25 = vld [vmem:[#allocation23_spill] sm:$0xff] }
 0xe29   :  { %v2527_v0 = vadd.f32 1e-05, %v2525_v8  ;;  %v9906_v8 = vld [vmem:[#allocation93_spill] sm:$0xff] }
 0xe2b   :  { %4948 = vrsqrt.f32 %v2527_v0  ;;  %s4743_s6 = spop %4742  ;;  %vm2534_vm6 = vweird.f32 %v2527_v0 }
 0xe2c   :  { %v2570_v36 = vstv %s4743_s6 }
 0xe2d   :  { %v2571_v56 = vmul.f32 %v2570_v36, %v6394_v23  ;;  %v9918_v36 = vld [vmem:[#allocation22_spill] sm:$0xff] }
 0xe2f   :  { %v2573_v24 = vsub.f32 %v2571_v56, %v2572_v31  ;;  %v9921_v31 = vld [vmem:[#allocation27_spill] sm:$0xff]  ;;  %v9922_v56 = vld [vmem:[#allocation26_spill] sm:$0xff] }
 0xe31   :  { %v4949_v61 = vpop.eup %4948  ;;  %v2575_v43 = vadd.f32 1e-05, %v2573_v24  ;;  %v9923_v24 = vld [vmem:[#allocation25_spill] sm:$0xff] }
 0xe32   :  { %v2529_v15 = vmul.f32 %v4949_v61, %v2527_v0  ;;  %vm2535_vm15 = vweird.f32 %v4949_v61  ;;  %v9916_v0 = vld [vmem:[#allocation24_spill] sm:$0xff] }
 0xe33   :  { %4950 = vrsqrt.f32 %v2575_v43  ;;  %vm2536_vm8 = vmor %vm2534_vm6, %vm2535_vm15  ;;  %vm2582_vm11 = vweird.f32 %v2575_v43 }
 0xe34   :  { %v2530_v54 = vmul.f32 %v4949_v61, %v2529_v15  ;;  %v9927_v15 = vld [vmem:[#allocation29_spill] sm:$0xff] }
 0xe36   :  { %v2531_v7 = vmul.f32 0.5, %v2530_v54  ;;  %v9928_v54 = vld [vmem:[#allocation36_spill] sm:$0xff] }
 0xe38   :  { %v2532_v41 = vsub.f32 1.5, %v2531_v7  ;;  %v9930_v7 = vld [vmem:[#allocation34_spill] sm:$0xff] }
 0xe39   :  { %v4951_v13 = vpop.eup %4950 }
 0xe3a   :  { %v2533_v52 = vmul.f32 %v4949_v61, %v2532_v41  ;;  %v2577_v42 = vmul.f32 %v4951_v13, %v2575_v43  ;;  %vm2583_vm10 = vweird.f32 %v4951_v13  ;;  %v9926_v43 = vld [vmem:[#allocation30_spill] sm:$0xff]  ;;  %v9931_v41 = vld [vmem:[#allocation33_spill] sm:$0xff] }
 0xe3b   :  { %vm2584_vm12 = vmor %vm2582_vm11, %vm2583_vm10 }
 0xe3c   :  { %v2578_v39 = vmul.f32 %v4951_v13, %v2577_v42  ;;  %v2537_v62 = vsel %vm2536_vm8, %v4949_v61, %v2533_v52  ;;  %v9924_v61 = vld [vmem:[#allocation32_spill] sm:$0xff]  ;;  %v9934_v52 = vld [vmem:[#allocation38_spill] sm:$0xff]  ;;  %v9935_v42 = vld [vmem:[#allocation37_spill] sm:$0xff] }
 0xe3d   :  { %v2538_v9 = vmul.f32 %v2537_v62, %v2526_v1  ;;  %v9936_v1 = vld [vmem:[#allocation44_spill] sm:$0xff]  ;;  %v9938_v62 = vld [vmem:[#allocation42_spill] sm:$0xff] }
 0xe3e   :  { %v2579_v47 = vmul.f32 0.5, %v2578_v39  ;;  %v9937_v39 = vld [vmem:[#allocation43_spill] sm:$0xff] }
 0xe3f   :  { %v2540_v12 = vmul.f32 0.01, %v2538_v9  ;;  %vm2539_vm13 = vcmp.ge.f32.partialorder %v2538_v9, 0.0 }
 0xe40   :  { %v2580_v37 = vsub.f32 1.5, %v2579_v47  ;;  %v9941_v47 = vld [vmem:[#allocation47_spill] sm:$0xff] }
 0xe41   :  { %v2541_v21 = vsel %vm2539_vm13, %v2538_v9, %v2540_v12  ;;  %v9942_v9 = vld [vmem:[#allocation46_spill] sm:$0xff] }
 0xe42   :  { %v2581_v49 = vmul.f32 %v4951_v13, %v2580_v37  ;;  %v2590_v34 = vsel %vm578_vm1, %v2491_v6, %v2541_v21  ;;  %v9943_v37 = vld [vmem:[#allocation45_spill] sm:$0xff]  ;;  %v9946_v12 = vld [vmem:[#allocation50_spill] sm:$0xff]  ;;  %v9953_v6 = vld [vmem:[#allocation59_spill] sm:$0xff] }
 0xe43   :  { %v9951_v21 = vld [vmem:[#allocation53_spill] sm:$0xff] }
 0xe44   :  { %v2585_v5 = vsel %vm2584_vm12, %v4951_v13, %v2581_v49  ;;  %v9932_v13 = vld [vmem:[#allocation40_spill] sm:$0xff]  ;;  %v9945_v49 = vld [vmem:[#allocation51_spill] sm:$0xff] }
 0xe45   :  { %v2586_v59 = vmul.f32 %v2585_v5, %v2574_v18  ;;  %v9947_v18 = vld [vmem:[#allocation49_spill] sm:$0xff]  ;;  %v9949_v5 = vld [vmem:[#allocation55_spill] sm:$0xff] }
 0xe47   :  { %vm2587_vm15 = vcmp.ge.f32.partialorder %v2586_v59, 0.0  ;;  %v2588_v27 = vmul.f32 0.01, %v2586_v59 }
 0xe49   :  { %v2589_v53 = vsel %vm2587_vm15, %v2586_v59, %v2588_v27  ;;  %v9950_v59 = vld [vmem:[#allocation54_spill] sm:$0xff]  ;;  %v9952_v27 = vld [vmem:[#allocation60_spill] sm:$0xff] }
 0xe4a   :  { %v2591_v22 = vsel %vm580_vm4, %v2590_v34, %v2589_v53  ;;  %v9954_v53 = vld [vmem:[#allocation58_spill] sm:$0xff]  ;;  %v9955_v34 = vld [vmem:[#allocation57_spill] sm:$0xff] }
 0xe4b   :  { %2598 = vrot.lane.b32.xlu2 %v2591_v22, %s5718_s29  ;;  %v9956_v22 = vld [vmem:[#allocation63_spill] sm:$0xff] }
 0xea5   :  { %v2599_v17 = vpop.permute.xlu2 %2598 }
 0xea6   :  { %v2602_v63 = vsel %vm175_vm0, %v7972_v40, %v2599_v17  ;;  %v9905_v40 = vld [vmem:[#allocation92_spill] sm:$0xff]  ;;  %v9957_v17 = vld [vmem:[#allocation62_spill] sm:$0xff] }
 0xea7   :  { %4601 = vmatmul.msk.f32.vlgmr.msra.gmra.mxu1 %vm177_vm5, %v2602_v63  ;;  %4602 = vmatmul.msk.f32.vlgmr.msra.gmra.mxu0 %vm177_vm5, %v2602_v63 }
 0xea8   :  { %4603 = vmatmul.msk.f32.vlgmr.msrb.gmra.mxu3 %vm177_vm5, %v2602_v63  ;;  %4604 = vmatmul.msk.f32.vlgmr.msrb.gmra.mxu2 %vm177_vm5, %v2602_v63  ;;  %v9958_v63 = vld [vmem:[#allocation61_spill] sm:$0xff] }
 0xea9   :  { %3028 = vmatpush.msra.mxu1 %v7670_v16  ;;  %3068 = vmatpush.msra.mxu0 %v7673_v51  ;;  %v9908_v16 = vld [vmem:[#allocation12_spill] sm:$0xff]  ;;  %v9909_v51 = vld [vmem:[#allocation14_spill] sm:$0xff] }
 0xeaa   :  { %3108 = vmatpush.msrb.mxu3 %v7676_v58  ;;  %3148 = vmatpush.msrb.mxu2 %v7679_v38  ;;  %v9910_v58 = vld [vmem:[#allocation15_spill] sm:$0xff] }
 0xeab   :  { %3029 = vmatpush.msra.mxu1 %v7682_v32  ;;  %3069 = vmatpush.msra.mxu0 %v7685_v19  ;;  %v9911_v38 = vld [vmem:[#allocation19_spill] sm:$0xff]  ;;  %v9912_v32 = vld [vmem:[#allocation16_spill] sm:$0xff] }
 0xeac   :  { %3109 = vmatpush.msrb.mxu3 %v7688_v35  ;;  %3149 = vmatpush.msrb.mxu2 %v7691_v11  ;;  %v9913_v19 = vld [vmem:[#allocation20_spill] sm:$0xff]  ;;  %v9914_v35 = vld [vmem:[#allocation18_spill] sm:$0xff]  ;;  %v9915_v11 = vld [vmem:[#allocation17_spill] sm:$0xff] }
 0xead   :  { %3030 = vmatpush.msra.mxu1 %v9905_v40  ;;  %3070 = vmatpush.msra.mxu0 %v9906_v8  ;;  %v9959_v40 = vld [vmem:[#allocation65_spill] sm:$0xff]  ;;  %v9960_v8 = vld [vmem:[#allocation64_spill] sm:$0xff] }
 0xeae   :  { %3110 = vmatpush.msrb.mxu3 %v9907_v50  ;;  %3150 = vmatpush.msrb.mxu2 %v9908_v16  ;;  %v9961_v50 = vld [vmem:[#allocation66_spill] sm:$0xff]  ;;  %v9962_v16 = vld [vmem:[#allocation67_spill] sm:$0xff] }
 0xeaf   :  { %2702 = vmatmul.f32.vlgmr.msrb.gmra.mxu1 %v7976_v33  ;;  %2742 = vmatmul.f32.vlgmr.msrb.gmra.mxu0 %v7976_v33  ;;  %v9919_v33 = vld [vmem:[#allocation21_spill] sm:$0xff] }
 0xeb0   :  { %3031 = vmatpush.msra.mxu1 %v9909_v51  ;;  %3071 = vmatpush.msra.mxu0 %v9910_v58  ;;  %v9963_v51 = vld [vmem:[#allocation68_spill] sm:$0xff]  ;;  %v9964_v58 = vld [vmem:[#allocation69_spill] sm:$0xff] }
 0xeb1   :  { %3111 = vmatpush.msrb.mxu3 %v9911_v38  ;;  %3151 = vmatpush.msrb.mxu2 %v9912_v32  ;;  %v9965_v38 = vld [vmem:[#allocation70_spill] sm:$0xff]  ;;  %v9966_v32 = vld [vmem:[#allocation71_spill] sm:$0xff] }
 0xeb2   :  { %3032 = vmatpush.msra.mxu1 %v9913_v19  ;;  %3072 = vmatpush.msra.mxu0 %v9914_v35  ;;  %v9967_v19 = vld [vmem:[#allocation72_spill] sm:$0xff]  ;;  %v9968_v35 = vld [vmem:[#allocation73_spill] sm:$0xff] }
 0xeb3   :  { %3112 = vmatpush.msrb.mxu3 %v9915_v11  ;;  %3152 = vmatpush.msrb.mxu2 %v9916_v0  ;;  %v9969_v11 = vld [vmem:[#allocation74_spill] sm:$0xff]  ;;  %v9970_v0 = vld [vmem:[#allocation75_spill] sm:$0xff] }
 0xeb4   :  { %3033 = vmatpush.msra.mxu1 %v9917_v25  ;;  %3073 = vmatpush.msra.mxu0 %v9918_v36  ;;  %v9971_v25 = vld [vmem:[#allocation76_spill] sm:$0xff]  ;;  %v9972_v36 = vld [vmem:[#allocation77_spill] sm:$0xff] }
 0xeb5   :  { %3113 = vmatpush.msrb.mxu3 %v9919_v33  ;;  %3153 = vmatpush.msrb.mxu2 %v9920_v28  ;;  %v9973_v33 = vld [vmem:[#allocation78_spill] sm:$0xff]  ;;  %v9974_v28 = vld [vmem:[#allocation79_spill] sm:$0xff] }
 0xeb6   :  { %3034 = vmatpush.msra.mxu1 %v9921_v31  ;;  %3074 = vmatpush.msra.mxu0 %v9922_v56  ;;  %v9975_v31 = vld [vmem:[#allocation80_spill] sm:$0xff]  ;;  %v9976_v56 = vld [vmem:[#allocation81_spill] sm:$0xff] }
 0xeb7   :  { %3114 = vmatpush.msrb.mxu3 %v9923_v24  ;;  %3154 = vmatpush.msrb.mxu2 %v9924_v61  ;;  %v9977_v24 = vld [vmem:[#allocation82_spill] sm:$0xff]  ;;  %v9978_v61 = vld [vmem:[#allocation83_spill] sm:$0xff] }
 0xeb8   :  { %3035 = vmatpush.msra.mxu1 %v9925_v46  ;;  %3075 = vmatpush.msra.mxu0 %v9926_v43  ;;  %v9979_v46 = vld [vmem:[#allocation84_spill] sm:$0xff]  ;;  %v9980_v43 = vld [vmem:[#allocation85_spill] sm:$0xff] }
 0xeb9   :  { %3115 = vmatpush.msrb.mxu3 %v9927_v15  ;;  %3155 = vmatpush.msrb.mxu2 %v9928_v54  ;;  %v9981_v15 = vld [vmem:[#allocation86_spill] sm:$0xff]  ;;  %v9982_v54 = vld [vmem:[#allocation87_spill] sm:$0xff] }
 0xeba   :  { %3036 = vmatpush.msra.mxu1 %v9929_v14  ;;  %3076 = vmatpush.msra.mxu0 %v9930_v7  ;;  %v9983_v14 = vld [vmem:[#allocation88_spill] sm:$0xff]  ;;  %v9984_v7 = vld [vmem:[#allocation89_spill] sm:$0xff] }
 0xebb   :  { %3116 = vmatpush.msrb.mxu3 %v9931_v41  ;;  %3156 = vmatpush.msrb.mxu2 %v9932_v13  ;;  %v2623_v41 = vpop.f32.mrf.mxu3  ;;  %v2663_v13 = vpop.f32.mrf.mxu2 }
 0xebc   :  { %3037 = vmatpush.msra.mxu1 %v9933_v45  ;;  %3077 = vmatpush.msra.mxu0 %v9934_v52  ;;  %v9985_v45 = vld [vmem:[#allocation8_spill] sm:$0xff] }
 0xebd   :  { %3117 = vmatpush.msrb.mxu3 %v9935_v42  ;;  %3157 = vmatpush.msrb.mxu2 %v9936_v1  ;;  %v2624_v52 = vadd.f32 %v2623_v41, %v9985_v45  ;;  %v9986_v42 = vld [vmem:[#allocation9_spill] sm:$0xff] }
 0xebe   :  { %3038 = vmatpush.msra.mxu1 %v9937_v39  ;;  %3078 = vmatpush.msra.mxu0 %v9938_v62  ;;  %v2664_v1 = vadd.f32 %v2663_v13, %v9986_v42 }
 0xebf   :  { %3118 = vmatpush.msrb.mxu3 %v9939_v10  ;;  %3158 = vmatpush.msrb.mxu2 %v9940_v44 }
 0xec0   :  { %3039 = vmatpush.msra.mxu1 %v9941_v47  ;;  %3079 = vmatpush.msra.mxu0 %v9942_v9 }
 0xec1   :  { %3119 = vmatpush.msrb.mxu3 %v9943_v37  ;;  %3159 = vmatpush.msrb.mxu2 %v9944_v29 }
 0xec2   :  { %3040 = vmatpush.msra.mxu1 %v9945_v49  ;;  %3080 = vmatpush.msra.mxu0 %v9946_v12  ;;  %v9987_v49 = vld [vmem:[#allocation11_spill] sm:$0xff] }
 0xec3   :  { %3120 = vmatpush.msrb.mxu3 %v9947_v18  ;;  %3160 = vmatpush.msrb.mxu2 %v9948_v3  ;;  %v9988_v18 = vld [vmem:[#allocation10_spill] sm:$0xff] }
 0xec4   :  { %3041 = vmatpush.msra.mxu1 %v9949_v5  ;;  %3081 = vmatpush.msra.mxu0 %v9950_v59 }
 0xec5   :  { %3121 = vmatpush.msrb.mxu3 %v9953_v6  ;;  %3161 = vmatpush.msrb.mxu2 %v9954_v53 }
 0xec6   :  { %3086 = vmatpush.msrb.mxu1 %v9951_v21  ;;  %3126 = vmatpush.msrb.mxu0 %v9952_v27 }
 0xec8   :  { %3087 = vmatpush.msrb.mxu1 %v9955_v34  ;;  %3127 = vmatpush.msrb.mxu0 %v9956_v22 }
 0xeca   :  { %3088 = vmatpush.msrb.mxu1 %v9957_v17  ;;  %3128 = vmatpush.msrb.mxu0 %v9958_v63 }
 0xecc   :  { %3089 = vmatpush.msrb.mxu1 %v9959_v40  ;;  %3129 = vmatpush.msrb.mxu0 %v9960_v8 }
 0xece   :  { %3090 = vmatpush.msrb.mxu1 %v9961_v50  ;;  %3130 = vmatpush.msrb.mxu0 %v9962_v16 }
 0xed0   :  { %3091 = vmatpush.msrb.mxu1 %v9963_v51  ;;  %3131 = vmatpush.msrb.mxu0 %v9964_v58 }
 0xed2   :  { %3092 = vmatpush.msrb.mxu1 %v9965_v38  ;;  %3132 = vmatpush.msrb.mxu0 %v9966_v32 }
 0xed4   :  { %3093 = vmatpush.msrb.mxu1 %v9967_v19  ;;  %3133 = vmatpush.msrb.mxu0 %v9968_v35 }
 0xed6   :  { %3094 = vmatpush.msrb.mxu1 %v9969_v11  ;;  %3134 = vmatpush.msrb.mxu0 %v9970_v0 }
 0xed8   :  { %3095 = vmatpush.msrb.mxu1 %v9971_v25  ;;  %3135 = vmatpush.msrb.mxu0 %v9972_v36 }
 0xeda   :  { %3096 = vmatpush.msrb.mxu1 %v9973_v33  ;;  %3136 = vmatpush.msrb.mxu0 %v9974_v28 }
 0xedc   :  { %3097 = vmatpush.msrb.mxu1 %v9975_v31  ;;  %3137 = vmatpush.msrb.mxu0 %v9976_v56 }
 0xede   :  { %3098 = vmatpush.msrb.mxu1 %v9977_v24  ;;  %3138 = vmatpush.msrb.mxu0 %v9978_v61 }
 0xee0   :  { %3099 = vmatpush.msrb.mxu1 %v9979_v46  ;;  %3139 = vmatpush.msrb.mxu0 %v9980_v43 }
 0xee2   :  { %3100 = vmatpush.msrb.mxu1 %v9981_v15  ;;  %3140 = vmatpush.msrb.mxu0 %v9982_v54 }
 0xee4   :  { %3101 = vmatpush.msrb.mxu1 %v9983_v14  ;;  %3141 = vmatpush.msrb.mxu0 %v9984_v7 }
 0xf24   :  { %v2643_v39 = vpop.f32.mrf.mxu1  ;;  %v2683_v62 = vpop.f32.mrf.mxu0 }
 0xf25   :  { %v2644_v10 = vadd.f32 %v2643_v39, %v2624_v52  ;;  %v2684_v44 = vadd.f32 %v2683_v62, %v2664_v1 }
 0xf27   :  { %v4605_v47 = vmul.f32 -1.442695, %v2644_v10  ;;  %v4606_v9 = vmul.f32 -1.442695, %v2684_v44 }
 0xf29   :  { %4952 = vpow2.f32 %v4605_v47 }
 0xf2a   :  { %4954 = vpow2.f32 %v4606_v9 }
 0xf2b   :  { %v2723_v5 = vpop.f32.mrf.mxu3  ;;  %v2763_v59 = vpop.f32.mrf.mxu2 }
 0xf2c   :  { %v2703_v37 = vpop.f32.mrf.mxu1  ;;  %v2743_v29 = vpop.f32.mrf.mxu0 }
 0xf2d   :  { %v2704_v12 = vadd.f32 %v2703_v37, %v9987_v49  ;;  %v2744_v3 = vadd.f32 %v2743_v29, %v9988_v18 }
 0xf2f   :  { %v4953_v21 = vpop.eup %4952  ;;  %v2724_v27 = vadd.f32 %v2723_v5, %v2704_v12  ;;  %v2764_v6 = vadd.f32 %v2763_v59, %v2744_v3 }
 0xf30   :  { %v4955_v53 = vpop.eup %4954  ;;  %v2778_v63 = vadd.f32 1.0, %v4953_v21 }
 0xf31   :  { %v2779_v34 = vadd.f32 1.0, %v4955_v53  ;;  %v4607_v22 = vmul.f32 -1.442695, %v2724_v27  ;;  %v4608_v17 = vmul.f32 -1.442695, %v2764_v6 }
 0xf32   :  { %vm2787_vm11 = vweird.f32 %v2778_v63  ;;  %v2793_v41 = vand.u32 2147483648, %v2778_v63  ;;  %v2791_v52 = vand.u32 2147483647, %v2778_v63 }
 0xf33   :  { %4956 = vrcp.f32 %v2779_v34  ;;  %vm2802_vm7 = vweird.f32 %v2779_v34  ;;  %v2806_v46 = vand.u32 2147483647, %v2779_v34  ;;  %v2808_v43 = vand.u32 2147483648, %v2779_v34 }
 0xf34   :  { %4958 = vpow2.f32 %v4607_v22  ;;  %v2794_v37 = vor.u32 1.1754944e-38, %v2793_v41 }
 0xf35   :  { %4960 = vpow2.f32 %v4608_v17  ;;  %v2809_v62 = vor.u32 1.1754944e-38, %v2808_v43  ;;  %vm2807_vm15 = vcmp.eq.f32.partialorder %v2806_v46, 8.507059e+37 }
 0xf36   :  { %4962 = vrcp.f32 %v2778_v63 }
 0xf39   :  { %v4957_v40 = vpop.eup %4956 }
 0xf3a   :  { %v4959_v8 = vpop.eup %4958  ;;  %v2798_v58 = vmul.f32 %v4957_v40, %v2779_v34  ;;  %vm2803_vm2 = vweird.f32 %v4957_v40 }
 0xf3b   :  { %v4961_v50 = vpop.eup %4960  ;;  %v2780_v38 = vadd.f32 1.0, %v4959_v8  ;;  %vm8145_vm9 = vmor %vm2802_vm7, %vm2803_vm2  ;;  %vm2792_vm2 = vcmp.eq.f32.partialorder %v2791_v52, 8.507059e+37 }
 0xf3c   :  { %v4963_v16 = vpop.eup %4962  ;;  %v2781_v51 = vadd.f32 1.0, %v4961_v50  ;;  %v2799_v19 = vsub.f32 1.0, %v2798_v58 }
 0xf3d   :  { %v2783_v32 = vmul.f32 %v4963_v16, %v2778_v63  ;;  %vm2788_vm8 = vweird.f32 %v4963_v16  ;;  %v2823_v53 = vand.u32 2147483648, %v2780_v38  ;;  %vm2817_vm7 = vweird.f32 %v2780_v38 }
 0xf3e   :  { %4964 = vrcp.f32 %v2781_v51  ;;  %v2800_v0 = vmul.f32 %v4957_v40, %v2799_v19  ;;  %v2838_v31 = vand.u32 2147483648, %v2781_v51  ;;  %v2836_v61 = vand.u32 2147483647, %v2781_v51  ;;  %vm2789_vm14 = vmor %vm2787_vm11, %vm2788_vm8 }
 0xf3f   :  { %4966 = vrcp.f32 %v2780_v38  ;;  %v2784_v35 = vsub.f32 1.0, %v2783_v32  ;;  %vm2832_vm10 = vweird.f32 %v2781_v51  ;;  %v2821_v34 = vand.u32 2147483647, %v2780_v38 }
 0xf40   :  { %v2801_v56 = vadd.f32 %v4957_v40, %v2800_v0  ;;  %v2839_v13 = vor.u32 1.1754944e-38, %v2838_v31  ;;  %vm2837_vm13 = vcmp.eq.f32.partialorder %v2836_v61, 8.507059e+37  ;;  %v2824_v17 = vor.u32 1.1754944e-38, %v2823_v53 }
 0xf41   :  { %v2785_v33 = vmul.f32 %v4963_v16, %v2784_v35 }
 0xf42   :  { %v2805_v1 = vsel %vm8145_vm9, %v4957_v40, %v2801_v56  ;;  %vm2822_vm9 = vcmp.eq.f32.partialorder %v2821_v34, 8.507059e+37 }
 0xf43   :  { %v2786_v54 = vadd.f32 %v4963_v16, %v2785_v33  ;;  %v2810_v29 = vsel %vm2807_vm15, %v2809_v62, %v2805_v1 }
 0xf44   :  { %v4965_v11 = vpop.eup %4964  ;;  %v2844_v59 = vmul.f32 %v2810_v29, %v7947_v4 }
 0xf45   :  { %v2828_v25 = vmul.f32 %v4965_v11, %v2781_v51  ;;  %v4967_v36 = vpop.eup %4966  ;;  %vm2833_vm6 = vweird.f32 %v4965_v11  ;;  %v2790_v47 = vsel %vm2789_vm14, %v4963_v16, %v2786_v54 }
 0xf46   :  { %v2813_v15 = vmul.f32 %v4967_v36, %v2780_v38  ;;  %vm2834_vm12 = vmor %vm2832_vm10, %vm2833_vm6  ;;  %v2795_v3 = vsel %vm2792_vm2, %v2794_v37, %v2790_v47  ;;  %vm2818_vm6 = vweird.f32 %v4967_v36 }
 0xf47   :  { %v2829_v28 = vsub.f32 1.0, %v2828_v25  ;;  %vm2819_vm8 = vmor %vm2817_vm7, %vm2818_vm6 }
 0xf48   :  { %v2814_v10 = vsub.f32 1.0, %v2813_v15 }
 0xf49   :  { %v2830_v24 = vmul.f32 %v4965_v11, %v2829_v28 }
 0xf4a   :  { %v2815_v5 = vmul.f32 %v4967_v36, %v2814_v10 }
 0xf4b   :  { %v2831_v7 = vadd.f32 %v4965_v11, %v2830_v24 }
 0xf4c   :  { %v2816_v6 = vadd.f32 %v4967_v36, %v2815_v5 }
 0xf4d   :  { %v2835_v39 = vsel %vm2834_vm12, %v4965_v11, %v2831_v7 }
 0xf4e   :  { %v2840_v44 = vsel %vm2837_vm13, %v2839_v13, %v2835_v39  ;;  %v2820_v22 = vsel %vm2819_vm8, %v4967_v36, %v2816_v6 }
 0xf4f   :  { %v2842_v9 = vmul.f32 2.0, %v2840_v44  ;;  %v2825_v40 = vsel %vm2822_vm9, %v2824_v17, %v2820_v22 }
 0xf51   :  { %v4609_v12 = vadd.f32 -1.0, %v2842_v9 }
 0xf53   :  { %v2845_v21 = vmul.f32 %v4609_v12, %v2795_v3 }
 0xf55   :  { %v8152_v27 = vadd.f32 %v2845_v21, %v2844_v59 }
 0xf57   :  { %4968 = vtanh.f32 %v8152_v27 }
 0xf5d   :  { %v4969_v63 = vpop.eup %4968 }
 0xf5e   :  { %v8155_v8 = vmul.f32 %v4969_v63, %v2825_v40 }
 0xf60   :  { %2893 = vrot.lane.b32.xlu0 %v8155_v8, %s5717_s28  ;;  %v2861_v4 = vmul.f32 %v8155_v8, %v8155_v8  ;;  %v2849_v50 = vsel %vm429_vm3, %v8155_v8, 0.0 }
 0xf62   :  { %2957 = vrot.lane.b32.xlu2 %v2861_v4, %s5716_s2  ;;  %2909 = vrot.lane.b32.xlu1 %v2861_v4, %s5717_s28  ;;  %v2862_v16 = vsel %vm429_vm3, %v2861_v4, 0.0 }
 0xf68   :  { %2942 = vrot.lane.b32.xlu0 %v8155_v8, %s5716_s2 }
 0xf8c   :  { %2850 = vadd.xlane.f32.xlu1 %v2849_v50 }
 0xf92   :  { %2863 = vadd.xlane.f32.xlu0 %v2862_v16 }
 0xfbc   :  { %v2958_v19 = vpop.permute.xlu2 %2957 }
 0xfbd   :  { %v2960_v11 = vsel %vm429_vm3, %v2958_v19, 0.0  ;;  %v8185_v19 = vld [vmem:[#allocation2 + $0x1e0] sm:$0xff] }
 0xfd2   :  { %v2894_v51 = vpop.permute.xlu0 %2893 }
 0xfd3   :  { %v2896_v58 = vsel %vm429_vm3, %v2894_v51, 0.0 }
 0xfd4   :  { %2897 = vadd.xlane.f32.xlu2 %v2896_v58  ;;  %v2910_v38 = vpop.permute.xlu1 %2909  ;;  %v4610_v58 = vld [vmem:[%s8945_s0 + $0xe] sm:$0x3] }
 0xfd5   :  { %v2912_v32 = vsel %vm429_vm3, %v2910_v38, 0.0 }
 0xfd6   :  { %2913 = vadd.xlane.f32.xlu1 %v2912_v32 }
 0xfda   :  { %v2943_v35 = vpop.permute.xlu0 %2942 }
 0xfdb   :  { %v2945_v0 = vsel %vm429_vm3, %v2943_v35, 0.0  ;;  %v8188_v35 = vld [vmem:[#allocation2 + $0x1e8] sm:$0xff] }
 0xfdc   :  { %2961 = vadd.xlane.f32.xlu2 %v2960_v11  ;;  %2946 = vadd.xlane.f32.xlu0 %v2945_v0  ;;  %v8191_v11 = vld [vmem:[#allocation2 + $0x1c0] sm:$0xff]  ;;  %v8194_v0 = vld [vmem:[#allocation2 + $0x1c8] sm:$0xff] }
 0xfef   :  { %2994 = vrot.lane.b32.xlu1 %v8155_v8, %s5718_s29 }
 0xfff   :  { %v2851_v25 = vpop.xlane.xlu1 %2850 }
0x1000   :  { %v2852_v36 = vrot.slane %v2851_v25, 4 }
0x1002   :  { %v2853_v33 = vadd.f32 %v2852_v36, %v2851_v25  ;;  %v8197_v25 = vld [vmem:[#allocation2 + $0x1a0] sm:$0xff]  ;;  %v8200_v36 = vld [vmem:[#allocation2 + $0x1a8] sm:$0xff] }
0x1004   :  { %v2854_v28 = vrot.slane %v2853_v33, 2 }
0x1005   :  { %v2864_v31 = vpop.xlane.xlu0 %2863 }
0x1006   :  { %v2865_v56 = vrot.slane %v2864_v31, 4  ;;  %v2855_v24 = vadd.f32 %v2854_v28, %v2853_v33  ;;  %v8203_v33 = vld [vmem:[#allocation2 + $0x180] sm:$0xff]  ;;  %v8206_v28 = vld [vmem:[#allocation2 + $0x188] sm:$0xff] }
0x1008   :  { %v2866_v61 = vadd.f32 %v2865_v56, %v2864_v31  ;;  %v2856_v46 = vrot.slane %v2855_v24, 1  ;;  %v8209_v31 = vld [vmem:[#allocation2 + $0x160] sm:$0xff]  ;;  %v8212_v56 = vld [vmem:[#allocation2 + $0x168] sm:$0xff] }
0x100a   :  { %v2867_v43 = vrot.slane %v2866_v61, 2  ;;  %v2857_v15 = vadd.f32 %v2856_v46, %v2855_v24  ;;  %v8215_v24 = vld [vmem:[#allocation2 + $0x140] sm:$0xff] }
0x100b   :  { %v8221_v46 = vld [vmem:[#allocation2 + $0x120] sm:$0xff] }
0x100c   :  { %4744 = vpush %v2857_v15  ;;  %v2868_v54 = vadd.f32 %v2867_v43, %v2866_v61  ;;  %v8218_v61 = vld [vmem:[#allocation2 + $0x148] sm:$0xff]  ;;  %v8227_v15 = vld [vmem:[#allocation2 + $0x100] sm:$0xff] }
0x100d   :  { %v8224_v43 = vld [vmem:[#allocation2 + $0x128] sm:$0xff] }
0x100e   :  { %v2869_v14 = vrot.slane %v2868_v54, 1 }
0x1010   :  { %v2870_v7 = vadd.f32 %v2869_v14, %v2868_v54  ;;  %v8230_v54 = vld [vmem:[#allocation2 + $0x108] sm:$0xff] }
0x1012   :  { %4746 = vpush %v2870_v7  ;;  %v8233_v7 = vld [vmem:[#allocation2 + $0xe0] sm:$0xff] }
0x103d   :  { %s4745_s0 = spop %4744 }
0x103e   :  { %v2859_v14 = vstv %s4745_s0 }
0x1043   :  { %s4747_s9 = spop %4746 }
0x1047   :  { %v2898_v41 = vpop.xlane.xlu2 %2897 }
0x1048   :  { %v2899_v13 = vrot.slane %v2898_v41, 4 }
0x1049   :  { %v2914_v52 = vpop.xlane.xlu1 %2913 }
0x104a   :  { %v2900_v1 = vadd.f32 %v2899_v13, %v2898_v41  ;;  %v2915_v39 = vrot.slane %v2914_v52, 4  ;;  %v8236_v41 = vld [vmem:[#allocation2 + $0xe8] sm:$0xff]  ;;  %v2872_v13 = vstv %s4747_s9 }
0x104c   :  { %v2901_v62 = vrot.slane %v2900_v1, 2  ;;  %v2916_v10 = vadd.f32 %v2915_v39, %v2914_v52  ;;  %v8240_v52 = vmul.f32 %v2859_v14, %v6394_v23  ;;  %v8245_v39 = vld [vmem:[#allocation2 + $0xc8] sm:$0xff] }
0x104e   :  { %v2917_v44 = vrot.slane %v2916_v10, 2  ;;  %v2902_v47 = vadd.f32 %v2901_v62, %v2900_v1  ;;  %v8242_v1 = vld [vmem:[#allocation2 + $0xc0] sm:$0xff]  ;;  %v2873_v62 = vmul.f32 %v2872_v13, %v6394_v23 }
0x104f   :  { %v2962_v9 = vpop.xlane.xlu2 %2961  ;;  %v2947_v37 = vpop.xlane.xlu0 %2946 }
0x1050   :  { %v2963_v29 = vrot.slane %v2962_v9, 4  ;;  %v2948_v12 = vrot.slane %v2947_v37, 4  ;;  %v2903_v3 = vrot.slane %v2902_v47, 1  ;;  %v2918_v5 = vadd.f32 %v2917_v44, %v2916_v10  ;;  %v8249_v10 = vld [vmem:[#allocation2 + $0xa0] sm:$0xff]  ;;  %v8252_v44 = vld [vmem:[#allocation2 + $0xa8] sm:$0xff] }
0x1052   :  { %v2964_v59 = vadd.f32 %v2963_v29, %v2962_v9  ;;  %v2949_v21 = vadd.f32 %v2948_v12, %v2947_v37  ;;  %v2904_v6 = vadd.f32 %v2903_v3, %v2902_v47  ;;  %v2919_v53 = vrot.slane %v2918_v5, 1  ;;  %v8257_v9 = vld [vmem:[#allocation2 + $0x80] sm:$0xff]  ;;  %v8260_v37 = vld [vmem:[#allocation2 + $0x88] sm:$0xff] }
0x1053   :  { %v2874_v47 = vmul.f32 %v8240_v52, %v8240_v52 }
0x1054   :  { %v2965_v34 = vrot.slane %v2964_v59, 2  ;;  %v2950_v22 = vrot.slane %v2949_v21, 2  ;;  %4748 = vpush %v2904_v6  ;;  %v2920_v17 = vadd.f32 %v2919_v53, %v2918_v5 }
0x1055   :  { %v2875_v29 = vsub.f32 %v2873_v62, %v2874_v47 }
0x1056   :  { %v2951_v63 = vadd.f32 %v2950_v22, %v2949_v21  ;;  %v2966_v40 = vadd.f32 %v2965_v34, %v2964_v59  ;;  %4750 = vpush %v2920_v17 }
0x1057   :  { %v2877_v12 = vadd.f32 1e-05, %v2875_v29 }
0x1058   :  { %v2952_v4 = vrot.slane %v2951_v63, 1  ;;  %v2967_v50 = vrot.slane %v2966_v40, 1 }
0x1059   :  { %4970 = vrsqrt.f32 %v2877_v12  ;;  %vm2884_vm12 = vweird.f32 %v2877_v12 }
0x105a   :  { %v2953_v16 = vadd.f32 %v2952_v4, %v2951_v63  ;;  %v2968_v51 = vadd.f32 %v2967_v50, %v2966_v40 }
0x105c   :  { %4752 = vpush %v2953_v16 }
0x105d   :  { %4754 = vpush %v2968_v51 }
0x105f   :  { %v4971_v5 = vpop.eup %4970 }
0x1060   :  { %v2879_v21 = vmul.f32 %v4971_v5, %v2877_v12  ;;  %vm2885_vm10 = vweird.f32 %v4971_v5 }
0x1061   :  { %v8177_v38 = vpop.permute.xlu1 %2994  ;;  %vm2886_vm13 = vmor %vm2884_vm12, %vm2885_vm10 }
0x1062   :  { %v8181_v32 = vsel %vm175_vm0, %v4610_v58, %v8177_v38  ;;  %v2880_v6 = vmul.f32 %v4971_v5, %v2879_v21 }
0x1063   :  { %3022 = vmatmul.f32.vlgmr.msra.gmra.mxu3 %v8181_v32  ;;  %3062 = vmatmul.f32.vlgmr.msra.gmra.mxu2 %v8181_v32 }
0x1064   :  { %3404 = vmatpush.msra.mxu3 %v8185_v19  ;;  %3444 = vmatpush.msra.mxu2 %v8188_v35  ;;  %v2881_v17 = vmul.f32 0.5, %v2880_v6 }
0x1066   :  { %3405 = vmatpush.msra.mxu3 %v8191_v11  ;;  %3445 = vmatpush.msra.mxu2 %v8194_v0  ;;  %v2882_v50 = vsub.f32 1.5, %v2881_v17 }
0x1068   :  { %3406 = vmatpush.msra.mxu3 %v8197_v25  ;;  %3446 = vmatpush.msra.mxu2 %v8200_v36  ;;  %v2883_v14 = vmul.f32 %v4971_v5, %v2882_v50  ;;  %v8291_v50 = vld [vmem:[#allocation2 + $0x3a8] sm:$0xff] }
0x106a   :  { %3407 = vmatpush.msra.mxu3 %v8203_v33  ;;  %3447 = vmatpush.msra.mxu2 %v8206_v28 }
0x106c   :  { %3408 = vmatpush.msra.mxu3 %v8209_v31  ;;  %3448 = vmatpush.msra.mxu2 %v8212_v56 }
0x106e   :  { %3409 = vmatpush.msra.mxu3 %v8215_v24  ;;  %3449 = vmatpush.msra.mxu2 %v8218_v61 }
0x1070   :  { %3410 = vmatpush.msra.mxu3 %v8221_v46  ;;  %3450 = vmatpush.msra.mxu2 %v8224_v43 }
0x1072   :  { %3411 = vmatpush.msra.mxu3 %v8227_v15  ;;  %3451 = vmatpush.msra.mxu2 %v8230_v54 }
0x1074   :  { %3412 = vmatpush.msra.mxu3 %v8233_v7  ;;  %3452 = vmatpush.msra.mxu2 %v8236_v41 }
0x1076   :  { %3413 = vmatpush.msra.mxu3 %v8242_v1  ;;  %3453 = vmatpush.msra.mxu2 %v8245_v39 }
0x1078   :  { %3414 = vmatpush.msra.mxu3 %v8249_v10  ;;  %3454 = vmatpush.msra.mxu2 %v8252_v44 }
0x107a   :  { %3415 = vmatpush.msra.mxu3 %v8257_v9  ;;  %3455 = vmatpush.msra.mxu2 %v8260_v37 }
0x107c   :  { %3416 = vmatpush.msra.mxu3 %v8010_v20  ;;  %3456 = vmatpush.msra.mxu2 %v8013_v2 }
0x107e   :  { %3417 = vmatpush.msra.mxu3 %v8016_v48  ;;  %3457 = vmatpush.msra.mxu2 %v8019_v60 }
0x1080   :  { %3418 = vmatpush.msra.mxu3 %v8022_v30  ;;  %3458 = vmatpush.msra.mxu2 %v8025_v55 }
0x1082   :  { %3419 = vmatpush.msra.mxu3 %v8028_v57  ;;  %3459 = vmatpush.msra.mxu2 %v8031_v26 }
0x1085   :  { %s4749_s10 = spop %4748 }
0x1086   :  { %v2906_v3 = vstv %s4749_s10 }
0x1087   :  { %v2907_v20 = vmul.f32 %v2906_v3, %v6394_v23  ;;  %s4751_s11 = spop %4750 }
0x1088   :  { %v2922_v2 = vstv %s4751_s11 }
0x1089   :  { %v2924_v48 = vmul.f32 %v2907_v20, %v2907_v20  ;;  %v2923_v60 = vmul.f32 %v2922_v2, %v6394_v23  ;;  %v2926_v29 = vsub.f32 %v8155_v8, %v2907_v20  ;;  %v2887_v2 = vsel %vm2886_vm13, %v4971_v5, %v2883_v14  ;;  %v8306_v14 = vld [vmem:[#allocation2 + $0x390] sm:$0xff] }
0x108b   :  { %v2925_v59 = vsub.f32 %v2923_v60, %v2924_v48  ;;  %v2876_v60 = vsub.f32 %v8155_v8, %v8240_v52 }
0x108d   :  { %s4753_s12 = spop %4752  ;;  %v2927_v30 = vadd.f32 1e-05, %v2925_v59 }
0x108e   :  { %v2955_v55 = vstv %s4753_s12  ;;  %s4755_s13 = spop %4754 }
0x108f   :  { %v2956_v57 = vmul.f32 %v2955_v55, %v6394_v23  ;;  %v2970_v26 = vstv %s4755_s13  ;;  %4972 = vrsqrt.f32 %v2927_v30  ;;  %vm2934_vm14 = vweird.f32 %v2927_v30 }
0x1090   :  { %v2971_v34 = vmul.f32 %v2970_v26, %v6394_v23  ;;  %v2888_v26 = vmul.f32 %v2887_v2, %v2876_v60  ;;  %v8326_v2 = vld [vmem:[#allocation2 + $0x340] sm:$0xff]  ;;  %v8332_v60 = vld [vmem:[#allocation2 + $0x350] sm:$0xff] }
0x1091   :  { %v2972_v53 = vmul.f32 %v2956_v57, %v2956_v57  ;;  %9995 = vst [vmem:[#allocation13_spill] sm:$0xff] %v8326_v2 }
0x1092   :  { %v2890_v20 = vmul.f32 0.01, %v2888_v26  ;;  %vm2889_vm9 = vcmp.ge.f32.partialorder %v2888_v26, 0.0  ;;  %9997 = vst [vmem:[#allocation14_spill] sm:$0xff] %v8332_v60 }
0x1093   :  { %v2973_v22 = vsub.f32 %v2971_v34, %v2972_v53  ;;  %v2974_v53 = vsub.f32 %v8155_v8, %v2956_v57  ;;  %v8288_v57 = vld [vmem:[#allocation2 + $0x3a0] sm:$0xff] }
0x1094   :  { %v2891_v52 = vsel %vm2889_vm9, %v2888_v26, %v2890_v20  ;;  %v8347_v26 = vld [vmem:[#allocation2 + $0x338] sm:$0xff] }
0x1095   :  { %v2975_v63 = vadd.f32 1e-05, %v2973_v22  ;;  %v4973_v40 = vpop.eup %4972  ;;  %10002 = vst [vmem:[#allocation18_spill] sm:$0xff] %v8347_v26  ;;  %v8359_v20 = vld [vmem:[#allocation2 + $0x318] sm:$0xff] }
0x1096   :  { %v2929_v4 = vmul.f32 %v4973_v40, %v2927_v30  ;;  %vm2935_vm11 = vweird.f32 %v4973_v40  ;;  %10006 = vst [vmem:[#allocation22_spill] sm:$0xff] %v8359_v20 }
0x1097   :  { %4974 = vrsqrt.f32 %v2975_v63  ;;  %vm2936_vm15 = vmor %vm2934_vm14, %vm2935_vm11  ;;  %vm2982_vm6 = vweird.f32 %v2975_v63 }
0x1098   :  { %v2930_v16 = vmul.f32 %v4973_v40, %v2929_v4 }
0x109a   :  { %v2931_v51 = vmul.f32 0.5, %v2930_v16  ;;  %v8294_v16 = vld [vmem:[#allocation2 + $0x3b0] sm:$0xff] }
0x109c   :  { %v2932_v13 = vsub.f32 1.5, %v2931_v51  ;;  %v8300_v51 = vld [vmem:[#allocation2 + $0x380] sm:$0xff] }
0x109d   :  { %v4975_v58 = vpop.eup %4974 }
0x109e   :  { %v2977_v62 = vmul.f32 %v4975_v58, %v2975_v63  ;;  %v2933_v47 = vmul.f32 %v4973_v40, %v2932_v13  ;;  %vm2983_vm2 = vweird.f32 %v4975_v58  ;;  %v8309_v13 = vld [vmem:[#allocation2 + $0x398] sm:$0xff] }
0x109f   :  { %vm2984_vm7 = vmor %vm2982_vm6, %vm2983_vm2 }
0x10a0   :  { %v2978_v3 = vmul.f32 %v4975_v58, %v2977_v62  ;;  %v2937_v48 = vsel %vm2936_vm15, %v4973_v40, %v2933_v47  ;;  %v8312_v62 = vld [vmem:[#allocation2 + $0x360] sm:$0xff]  ;;  %v8315_v47 = vld [vmem:[#allocation2 + $0x368] sm:$0xff] }
0x10a1   :  { %v2938_v21 = vmul.f32 %v2937_v48, %v2926_v29  ;;  %9991 = vst [vmem:[#allocation90_spill] sm:$0xff] %v8312_v62  ;;  %v8318_v29 = vld [vmem:[#allocation2 + $0x370] sm:$0xff]  ;;  %v8329_v48 = vld [vmem:[#allocation2 + $0x348] sm:$0xff] }
0x10a2   :  { %v2979_v59 = vmul.f32 0.5, %v2978_v3  ;;  %9992 = vst [vmem:[#allocation91_spill] sm:$0xff] %v8315_v47  ;;  %v8321_v3 = vld [vmem:[#allocation2 + $0x378] sm:$0xff] }
0x10a3   :  { %v2940_v12 = vmul.f32 0.01, %v2938_v21  ;;  %vm2939_vm8 = vcmp.ge.f32.partialorder %v2938_v21, 0.0  ;;  %9993 = vst [vmem:[#allocation92_spill] sm:$0xff] %v8318_v29 }
0x10a4   :  { %v2980_v55 = vsub.f32 1.5, %v2979_v59  ;;  %9994 = vst [vmem:[#allocation93_spill] sm:$0xff] %v8321_v3  ;;  %v8335_v59 = vld [vmem:[#allocation2 + $0x358] sm:$0xff] }
0x10a5   :  { %v2941_v34 = vsel %vm2939_vm8, %v2938_v21, %v2940_v12  ;;  %9996 = vst [vmem:[#allocation12_spill] sm:$0xff] %v8329_v48  ;;  %v8338_v21 = vld [vmem:[#allocation2 + $0x320] sm:$0xff]  ;;  %v8353_v12 = vld [vmem:[#allocation2 + $0x308] sm:$0xff] }
0x10a6   :  { %v2981_v6 = vmul.f32 %v4975_v58, %v2980_v55  ;;  %v2990_v40 = vsel %vm578_vm1, %v2891_v52, %v2941_v34  ;;  %9998 = vst [vmem:[#allocation15_spill] sm:$0xff] %v8335_v59  ;;  %v8344_v55 = vld [vmem:[#allocation2 + $0x330] sm:$0xff]  ;;  %v8374_v52 = vld [vmem:[#allocation2 + $0x2c0] sm:$0xff] }
0x10a7   :  { %9999 = vst [vmem:[#allocation19_spill] sm:$0xff] %v8338_v21  ;;  %v8368_v34 = vld [vmem:[#allocation2 + $0x2f0] sm:$0xff] }
0x10a8   :  { %v2985_v30 = vsel %vm2984_vm7, %v4975_v58, %v2981_v6  ;;  %v8303_v58 = vld [vmem:[#allocation2 + $0x388] sm:$0xff]  ;;  %10001 = vst [vmem:[#allocation20_spill] sm:$0xff] %v8344_v55  ;;  %v8350_v6 = vld [vmem:[#allocation2 + $0x300] sm:$0xff] }
0x10a9   :  { %v2986_v5 = vmul.f32 %v2985_v30, %v2974_v53  ;;  %10003 = vst [vmem:[#allocation17_spill] sm:$0xff] %v8350_v6  ;;  %v8356_v53 = vld [vmem:[#allocation2 + $0x310] sm:$0xff]  ;;  %v8362_v30 = vld [vmem:[#allocation2 + $0x2e0] sm:$0xff] }
0x10aa   :  { %10004 = vst [vmem:[#allocation24_spill] sm:$0xff] %v8353_v12 }
0x10ab   :  { %vm2987_vm10 = vcmp.ge.f32.partialorder %v2986_v5, 0.0  ;;  %v2988_v22 = vmul.f32 0.01, %v2986_v5  ;;  %10005 = vst [vmem:[#allocation23_spill] sm:$0xff] %v8356_v53 }
0x10ac   :  { %10007 = vst [vmem:[#allocation21_spill] sm:$0xff] %v8362_v30 }
0x10ad   :  { %v2989_v17 = vsel %vm2987_vm10, %v2986_v5, %v2988_v22  ;;  %v8365_v5 = vld [vmem:[#allocation2 + $0x2e8] sm:$0xff]  ;;  %10009 = vst [vmem:[#allocation27_spill] sm:$0xff] %v8368_v34  ;;  %v8371_v22 = vld [vmem:[#allocation2 + $0x2f8] sm:$0xff] }
0x10ae   :  { %v2991_v4 = vsel %vm580_vm4, %v2990_v40, %v2989_v17  ;;  %10008 = vst [vmem:[#allocation28_spill] sm:$0xff] %v8365_v5  ;;  %v8377_v17 = vld [vmem:[#allocation2 + $0x2c8] sm:$0xff]  ;;  %v8380_v40 = vld [vmem:[#allocation2 + $0x2d0] sm:$0xff] }
0x10af   :  { %2998 = vrot.lane.b32.xlu0 %v2991_v4, %s5718_s29  ;;  %10010 = vst [vmem:[#allocation26_spill] sm:$0xff] %v8371_v22  ;;  %v8383_v4 = vld [vmem:[#allocation2 + $0x2d8] sm:$0xff] }
0x10b0   :  { %10011 = vst [vmem:[#allocation25_spill] sm:$0xff] %v8374_v52 }
0x10b1   :  { %10012 = vst [vmem:[#allocation32_spill] sm:$0xff] %v8377_v17 }
0x10b2   :  { %10013 = vst [vmem:[#allocation31_spill] sm:$0xff] %v8380_v40 }
0x10b3   :  { %10014 = vst [vmem:[#allocation30_spill] sm:$0xff] %v8383_v4 }
0x1121   :  { %v2999_v63 = vpop.permute.xlu0 %2998 }
0x1122   :  { %v3002_v8 = vsel %vm175_vm0, %v8177_v38, %v2999_v63  ;;  %v8297_v38 = vld [vmem:[#allocation2 + $0x3b8] sm:$0xff]  ;;  %v8386_v63 = vld [vmem:[#allocation2 + $0x2a0] sm:$0xff] }
0x1123   :  { %4611 = vmatmul.msk.f32.vlgmr.msra.gmra.mxu1 %vm177_vm5, %v3002_v8  ;;  %4612 = vmatmul.msk.f32.vlgmr.msra.gmra.mxu0 %vm177_vm5, %v3002_v8  ;;  %10015 = vst [vmem:[#allocation29_spill] sm:$0xff] %v8386_v63 }
0x1124   :  { %4613 = vmatmul.msk.f32.vlgmr.msrb.gmra.mxu3 %vm177_vm5, %v3002_v8  ;;  %4614 = vmatmul.msk.f32.vlgmr.msrb.gmra.mxu2 %vm177_vm5, %v3002_v8  ;;  %v8389_v8 = vld [vmem:[#allocation2 + $0x2a8] sm:$0xff] }
0x1125   :  { %3426 = vmatpush.msra.mxu1 %v8288_v57  ;;  %3466 = vmatpush.msra.mxu0 %v8291_v50  ;;  %10016 = vst [vmem:[#allocation36_spill] sm:$0xff] %v8389_v8 }
0x1126   :  { %3506 = vmatpush.msrb.mxu3 %v8294_v16  ;;  %3546 = vmatpush.msrb.mxu2 %v8297_v38 }
0x1127   :  { %3427 = vmatpush.msra.mxu1 %v8300_v51  ;;  %3467 = vmatpush.msra.mxu0 %v8303_v58 }
0x1128   :  { %3507 = vmatpush.msrb.mxu3 %v8306_v14  ;;  %3547 = vmatpush.msrb.mxu2 %v8309_v13 }
0x1129   :  { %3428 = vmatpush.msra.mxu1 %v8312_v62  ;;  %3468 = vmatpush.msra.mxu0 %v8315_v47 }
0x112a   :  { %3508 = vmatpush.msrb.mxu3 %v8318_v29  ;;  %3548 = vmatpush.msrb.mxu2 %v8321_v3 }
0x112b   :  { %3102 = vmatmul.f32.vlgmr.msrb.gmra.mxu1 %v8181_v32  ;;  %3142 = vmatmul.f32.vlgmr.msrb.gmra.mxu0 %v8181_v32  ;;  %v8341_v32 = vld [vmem:[#allocation2 + $0x328] sm:$0xff] }
0x112c   :  { %3429 = vmatpush.msra.mxu1 %v8326_v2  ;;  %3469 = vmatpush.msra.mxu0 %v8329_v48  ;;  %10000 = vst [vmem:[#allocation16_spill] sm:$0xff] %v8341_v32 }
0x112d   :  { %3509 = vmatpush.msrb.mxu3 %v8332_v60  ;;  %3549 = vmatpush.msrb.mxu2 %v8335_v59 }
0x112e   :  { %3430 = vmatpush.msra.mxu1 %v8338_v21  ;;  %3470 = vmatpush.msra.mxu0 %v8341_v32 }
0x112f   :  { %3510 = vmatpush.msrb.mxu3 %v8344_v55  ;;  %3550 = vmatpush.msrb.mxu2 %v8347_v26 }
0x1130   :  { %3431 = vmatpush.msra.mxu1 %v8350_v6  ;;  %3471 = vmatpush.msra.mxu0 %v8353_v12 }
0x1131   :  { %3511 = vmatpush.msrb.mxu3 %v8356_v53  ;;  %3551 = vmatpush.msrb.mxu2 %v8359_v20 }
0x1132   :  { %3432 = vmatpush.msra.mxu1 %v8362_v30  ;;  %3472 = vmatpush.msra.mxu0 %v8365_v5 }
0x1133   :  { %3512 = vmatpush.msrb.mxu3 %v8368_v34  ;;  %3552 = vmatpush.msrb.mxu2 %v8371_v22  ;;  %v3063_v22 = vpop.f32.mrf.mxu2 }
0x1134   :  { %3433 = vmatpush.msra.mxu1 %v8374_v52  ;;  %3473 = vmatpush.msra.mxu0 %v8377_v17  ;;  %v8392_v52 = vld [vmem:[#allocation2 + $0x2b0] sm:$0xff]  ;;  %v8395_v17 = vld [vmem:[#allocation2 + $0x2b8] sm:$0xff]  ;;  %v3064_v34 = vadd.f32 %v3063_v22, %v9986_v42 }
0x1135   :  { %3513 = vmatpush.msrb.mxu3 %v8380_v40  ;;  %3553 = vmatpush.msrb.mxu2 %v8383_v4  ;;  %10017 = vst [vmem:[#allocation35_spill] sm:$0xff] %v8392_v52  ;;  %v8398_v40 = vld [vmem:[#allocation2 + $0x280] sm:$0xff]  ;;  %v8401_v4 = vld [vmem:[#allocation2 + $0x288] sm:$0xff] }
0x1136   :  { %3434 = vmatpush.msra.mxu1 %v8386_v63  ;;  %3474 = vmatpush.msra.mxu0 %v8389_v8  ;;  %10018 = vst [vmem:[#allocation34_spill] sm:$0xff] %v8395_v17  ;;  %v8404_v63 = vld [vmem:[#allocation2 + $0x290] sm:$0xff]  ;;  %v8407_v8 = vld [vmem:[#allocation2 + $0x298] sm:$0xff] }
0x1137   :  { %3514 = vmatpush.msrb.mxu3 %v8392_v52  ;;  %3554 = vmatpush.msrb.mxu2 %v8395_v17  ;;  %10019 = vst [vmem:[#allocation33_spill] sm:$0xff] %v8398_v40  ;;  %v8410_v52 = vld [vmem:[#allocation2 + $0x260] sm:$0xff]  ;;  %v8413_v17 = vld [vmem:[#allocation2 + $0x268] sm:$0xff] }
0x1138   :  { %3435 = vmatpush.msra.mxu1 %v8398_v40  ;;  %10020 = vst [vmem:[#allocation40_spill] sm:$0xff] %v8401_v4  ;;  %3475 = vmatpush.msra.mxu0 %v8401_v4  ;;  %v8416_v40 = vld [vmem:[#allocation2 + $0x270] sm:$0xff]  ;;  %v8419_v4 = vld [vmem:[#allocation2 + $0x278] sm:$0xff] }
0x1139   :  { %10021 = vst [vmem:[#allocation39_spill] sm:$0xff] %v8404_v63  ;;  %3515 = vmatpush.msrb.mxu3 %v8404_v63  ;;  %3555 = vmatpush.msrb.mxu2 %v8407_v8  ;;  %v8422_v63 = vld [vmem:[#allocation2 + $0x240] sm:$0xff] }
0x113a   :  { %10022 = vst [vmem:[#allocation38_spill] sm:$0xff] %v8407_v8  ;;  %3436 = vmatpush.msra.mxu1 %v8410_v52  ;;  %3476 = vmatpush.msra.mxu0 %v8413_v17  ;;  %v8425_v8 = vld [vmem:[#allocation2 + $0x248] sm:$0xff] }
0x113b   :  { %10023 = vst [vmem:[#allocation37_spill] sm:$0xff] %v8410_v52  ;;  %3516 = vmatpush.msrb.mxu3 %v8416_v40  ;;  %3556 = vmatpush.msrb.mxu2 %v8419_v4  ;;  %v8428_v52 = vld [vmem:[#allocation2 + $0x250] sm:$0xff] }
0x113c   :  { %10024 = vst [vmem:[#allocation44_spill] sm:$0xff] %v8413_v17  ;;  %3437 = vmatpush.msra.mxu1 %v8422_v63  ;;  %3477 = vmatpush.msra.mxu0 %v8425_v8  ;;  %v8431_v17 = vld [vmem:[#allocation2 + $0x258] sm:$0xff] }
0x113d   :  { %10025 = vst [vmem:[#allocation43_spill] sm:$0xff] %v8416_v40  ;;  %3517 = vmatpush.msrb.mxu3 %v8428_v52  ;;  %3557 = vmatpush.msrb.mxu2 %v8431_v17  ;;  %v8434_v40 = vld [vmem:[#allocation2 + $0x220] sm:$0xff] }
0x113e   :  { %10026 = vst [vmem:[#allocation42_spill] sm:$0xff] %v8419_v4  ;;  %3438 = vmatpush.msra.mxu1 %v8434_v40  ;;  %v8437_v4 = vld [vmem:[#allocation2 + $0x228] sm:$0xff] }
0x113f   :  { %10027 = vst [vmem:[#allocation41_spill] sm:$0xff] %v8422_v63  ;;  %3478 = vmatpush.msra.mxu0 %v8437_v4  ;;  %v8440_v63 = vld [vmem:[#allocation2 + $0x230] sm:$0xff] }
0x1140   :  { %10028 = vst [vmem:[#allocation48_spill] sm:$0xff] %v8425_v8  ;;  %3518 = vmatpush.msrb.mxu3 %v8440_v63  ;;  %v8443_v8 = vld [vmem:[#allocation2 + $0x238] sm:$0xff] }
0x1141   :  { %10029 = vst [vmem:[#allocation47_spill] sm:$0xff] %v8428_v52  ;;  %3558 = vmatpush.msrb.mxu2 %v8443_v8  ;;  %v8446_v52 = vld [vmem:[#allocation2 + $0x200] sm:$0xff] }
0x1142   :  { %10030 = vst [vmem:[#allocation46_spill] sm:$0xff] %v8431_v17  ;;  %3439 = vmatpush.msra.mxu1 %v8446_v52  ;;  %v8449_v17 = vld [vmem:[#allocation2 + $0x208] sm:$0xff] }
0x1143   :  { %10031 = vst [vmem:[#allocation45_spill] sm:$0xff] %v8434_v40  ;;  %3479 = vmatpush.msra.mxu0 %v8449_v17  ;;  %v8452_v40 = vld [vmem:[#allocation2 + $0x1f0] sm:$0xff] }
0x1144   :  { %10032 = vst [vmem:[#allocation52_spill] sm:$0xff] %v8437_v4  ;;  %3484 = vmatpush.msrb.mxu1 %v8452_v40  ;;  %v8455_v4 = vld [vmem:[#allocation2 + $0x1f8] sm:$0xff] }
0x1145   :  { %10033 = vst [vmem:[#allocation51_spill] sm:$0xff] %v8440_v63  ;;  %3524 = vmatpush.msrb.mxu0 %v8455_v4  ;;  %v8458_v63 = vld [vmem:[#allocation2 + $0x210] sm:$0xff] }
0x1146   :  { %10034 = vst [vmem:[#allocation50_spill] sm:$0xff] %v8443_v8  ;;  %3519 = vmatpush.msrb.mxu3 %v8458_v63  ;;  %v8461_v8 = vld [vmem:[#allocation2 + $0x218] sm:$0xff] }
0x1147   :  { %10035 = vst [vmem:[#allocation49_spill] sm:$0xff] %v8446_v52  ;;  %3559 = vmatpush.msrb.mxu2 %v8461_v8  ;;  %v8464_v52 = vld [vmem:[#allocation2 + $0x1d0] sm:$0xff] }
0x1148   :  { %10036 = vst [vmem:[#allocation56_spill] sm:$0xff] %v8449_v17  ;;  %3485 = vmatpush.msrb.mxu1 %v8464_v52  ;;  %v8467_v17 = vld [vmem:[#allocation2 + $0x1d8] sm:$0xff] }
0x1149   :  { %10037 = vst [vmem:[#allocation55_spill] sm:$0xff] %v8452_v40  ;;  %3525 = vmatpush.msrb.mxu0 %v8467_v17  ;;  %v8470_v40 = vld [vmem:[#allocation2 + $0x1b0] sm:$0xff] }
0x114a   :  { %10038 = vst [vmem:[#allocation54_spill] sm:$0xff] %v8455_v4  ;;  %3486 = vmatpush.msrb.mxu1 %v8470_v40  ;;  %v8473_v4 = vld [vmem:[#allocation2 + $0x1b8] sm:$0xff] }
0x114b   :  { %10039 = vst [vmem:[#allocation53_spill] sm:$0xff] %v8458_v63  ;;  %3526 = vmatpush.msrb.mxu0 %v8473_v4  ;;  %v8476_v63 = vld [vmem:[#allocation2 + $0x190] sm:$0xff] }
0x114c   :  { %10040 = vst [vmem:[#allocation60_spill] sm:$0xff] %v8461_v8  ;;  %3487 = vmatpush.msrb.mxu1 %v8476_v63  ;;  %v8479_v8 = vld [vmem:[#allocation2 + $0x198] sm:$0xff] }
0x114d   :  { %10041 = vst [vmem:[#allocation59_spill] sm:$0xff] %v8464_v52  ;;  %3527 = vmatpush.msrb.mxu0 %v8479_v8  ;;  %v8482_v52 = vld [vmem:[#allocation2 + $0x170] sm:$0xff] }
0x114e   :  { %10042 = vst [vmem:[#allocation58_spill] sm:$0xff] %v8467_v17  ;;  %3488 = vmatpush.msrb.mxu1 %v8482_v52  ;;  %v8485_v17 = vld [vmem:[#allocation2 + $0x178] sm:$0xff] }
0x114f   :  { %10043 = vst [vmem:[#allocation57_spill] sm:$0xff] %v8470_v40  ;;  %3528 = vmatpush.msrb.mxu0 %v8485_v17  ;;  %v8488_v40 = vld [vmem:[#allocation2 + $0x150] sm:$0xff] }
0x1150   :  { %10044 = vst [vmem:[#allocation63_spill] sm:$0xff] %v8473_v4  ;;  %3489 = vmatpush.msrb.mxu1 %v8488_v40  ;;  %v8491_v4 = vld [vmem:[#allocation2 + $0x158] sm:$0xff] }
0x1151   :  { %10045 = vst [vmem:[#allocation62_spill] sm:$0xff] %v8476_v63  ;;  %3529 = vmatpush.msrb.mxu0 %v8491_v4  ;;  %v8494_v63 = vld [vmem:[#allocation2 + $0x130] sm:$0xff] }
0x1152   :  { %10046 = vst [vmem:[#allocation61_spill] sm:$0xff] %v8479_v8  ;;  %3490 = vmatpush.msrb.mxu1 %v8494_v63  ;;  %v8497_v8 = vld [vmem:[#allocation2 + $0x138] sm:$0xff] }
0x1153   :  { %10047 = vst [vmem:[#allocation65_spill] sm:$0xff] %v8482_v52  ;;  %3530 = vmatpush.msrb.mxu0 %v8497_v8  ;;  %v8500_v52 = vld [vmem:[#allocation2 + $0x110] sm:$0xff] }
0x1154   :  { %10048 = vst [vmem:[#allocation64_spill] sm:$0xff] %v8485_v17  ;;  %3491 = vmatpush.msrb.mxu1 %v8500_v52  ;;  %v8503_v17 = vld [vmem:[#allocation2 + $0x118] sm:$0xff] }
0x1155   :  { %10049 = vst [vmem:[#allocation66_spill] sm:$0xff] %v8488_v40  ;;  %3531 = vmatpush.msrb.mxu0 %v8503_v17  ;;  %v8506_v40 = vld [vmem:[#allocation2 + $0xf0] sm:$0xff] }
0x1156   :  { %10050 = vst [vmem:[#allocation67_spill] sm:$0xff] %v8491_v4  ;;  %3492 = vmatpush.msrb.mxu1 %v8506_v40  ;;  %v8509_v4 = vld [vmem:[#allocation2 + $0xf8] sm:$0xff] }
0x1157   :  { %10051 = vst [vmem:[#allocation68_spill] sm:$0xff] %v8494_v63  ;;  %3532 = vmatpush.msrb.mxu0 %v8509_v4  ;;  %v8512_v63 = vld [vmem:[#allocation2 + $0xd0] sm:$0xff] }
0x1158   :  { %10052 = vst [vmem:[#allocation69_spill] sm:$0xff] %v8497_v8  ;;  %3493 = vmatpush.msrb.mxu1 %v8512_v63  ;;  %v8515_v8 = vld [vmem:[#allocation2 + $0xd8] sm:$0xff] }
0x1159   :  { %10053 = vst [vmem:[#allocation70_spill] sm:$0xff] %v8500_v52  ;;  %3533 = vmatpush.msrb.mxu0 %v8515_v8  ;;  %v8518_v52 = vld [vmem:[#allocation2 + $0xb0] sm:$0xff] }
0x115a   :  { %10054 = vst [vmem:[#allocation71_spill] sm:$0xff] %v8503_v17  ;;  %3494 = vmatpush.msrb.mxu1 %v8518_v52  ;;  %v8521_v17 = vld [vmem:[#allocation2 + $0xb8] sm:$0xff] }
0x115b   :  { %10055 = vst [vmem:[#allocation72_spill] sm:$0xff] %v8506_v40  ;;  %3534 = vmatpush.msrb.mxu0 %v8521_v17  ;;  %v8524_v40 = vld [vmem:[#allocation2 + $0x90] sm:$0xff] }
0x115c   :  { %10056 = vst [vmem:[#allocation73_spill] sm:$0xff] %v8509_v4  ;;  %3495 = vmatpush.msrb.mxu1 %v8524_v40  ;;  %v8527_v4 = vld [vmem:[#allocation2 + $0x98] sm:$0xff] }
0x115d   :  { %10057 = vst [vmem:[#allocation74_spill] sm:$0xff] %v8512_v63  ;;  %3535 = vmatpush.msrb.mxu0 %v8527_v4  ;;  %v8530_v63 = vld [vmem:[#allocation2 + $0x70] sm:$0xff] }
0x115e   :  { %10058 = vst [vmem:[#allocation75_spill] sm:$0xff] %v8515_v8  ;;  %3496 = vmatpush.msrb.mxu1 %v8530_v63  ;;  %v8533_v8 = vld [vmem:[#allocation2 + $0x78] sm:$0xff] }
0x115f   :  { %10059 = vst [vmem:[#allocation76_spill] sm:$0xff] %v8518_v52  ;;  %3536 = vmatpush.msrb.mxu0 %v8533_v8  ;;  %v8536_v52 = vld [vmem:[#allocation2 + $0x50] sm:$0xff] }
0x1160   :  { %10060 = vst [vmem:[#allocation77_spill] sm:$0xff] %v8521_v17  ;;  %3497 = vmatpush.msrb.mxu1 %v8536_v52  ;;  %v8539_v17 = vld [vmem:[#allocation2 + $0x58] sm:$0xff] }
0x1161   :  { %10061 = vst [vmem:[#allocation78_spill] sm:$0xff] %v8524_v40  ;;  %3537 = vmatpush.msrb.mxu0 %v8539_v17  ;;  %v8542_v40 = vld [vmem:[#allocation2 + $0x30] sm:$0xff] }
0x1162   :  { %10062 = vst [vmem:[#allocation79_spill] sm:$0xff] %v8527_v4  ;;  %3498 = vmatpush.msrb.mxu1 %v8542_v40  ;;  %v8545_v4 = vld [vmem:[#allocation2 + $0x38] sm:$0xff] }
0x1163   :  { %10063 = vst [vmem:[#allocation80_spill] sm:$0xff] %v8530_v63  ;;  %3538 = vmatpush.msrb.mxu0 %v8545_v4  ;;  %v8548_v63 = vld [vmem:[#allocation2 + $0x10] sm:$0xff] }
0x1164   :  { %10064 = vst [vmem:[#allocation81_spill] sm:$0xff] %v8533_v8  ;;  %3499 = vmatpush.msrb.mxu1 %v8548_v63  ;;  %v8551_v8 = vld [vmem:[#allocation2 + $0x18] sm:$0xff] }
0x1165   :  { %10065 = vst [vmem:[#allocation82_spill] sm:$0xff] %v8536_v52  ;;  %3539 = vmatpush.msrb.mxu0 %v8551_v8  ;;  %v3023_v52 = vpop.f32.mrf.mxu3 }
0x1166   :  { %10066 = vst [vmem:[#allocation83_spill] sm:$0xff] %v8539_v17  ;;  %v3024_v17 = vadd.f32 %v3023_v52, %v9985_v45 }
0x1167   :  { %10067 = vst [vmem:[#allocation84_spill] sm:$0xff] %v8542_v40 }
0x1168   :  { %10068 = vst [vmem:[#allocation85_spill] sm:$0xff] %v8545_v4 }
0x1169   :  { %10069 = vst [vmem:[#allocation86_spill] sm:$0xff] %v8548_v63 }
0x116a   :  { %10070 = vst [vmem:[#allocation87_spill] sm:$0xff] %v8551_v8 }
0x11a0   :  { %v3043_v5 = vpop.f32.mrf.mxu1  ;;  %v3083_v40 = vpop.f32.mrf.mxu0 }
0x11a1   :  { %v3044_v30 = vadd.f32 %v3043_v5, %v3024_v17  ;;  %v3084_v20 = vadd.f32 %v3083_v40, %v3064_v34 }
0x11a3   :  { %v4615_v53 = vmul.f32 -1.442695, %v3044_v30  ;;  %v4616_v4 = vmul.f32 -1.442695, %v3084_v20 }
0x11a5   :  { %4976 = vpow2.f32 %v4615_v53 }
0x11a6   :  { %4978 = vpow2.f32 %v4616_v4 }
0x11a7   :  { %v3123_v26 = vpop.f32.mrf.mxu3  ;;  %v3163_v55 = vpop.f32.mrf.mxu2 }
0x11a8   :  { %v3103_v12 = vpop.f32.mrf.mxu1  ;;  %v3143_v63 = vpop.f32.mrf.mxu0 }
0x11a9   :  { %v3104_v6 = vadd.f32 %v3103_v12, %v9987_v49  ;;  %v3144_v8 = vadd.f32 %v3143_v63, %v9988_v18 }
0x11ab   :  { %v4977_v32 = vpop.eup %4976  ;;  %v3124_v52 = vadd.f32 %v3123_v26, %v3104_v6  ;;  %v3164_v45 = vadd.f32 %v3163_v55, %v3144_v8 }
0x11ac   :  { %v4979_v22 = vpop.eup %4978  ;;  %v3178_v34 = vadd.f32 1.0, %v4977_v32 }
0x11ad   :  { %v3179_v42 = vadd.f32 1.0, %v4979_v22  ;;  %v4617_v21 = vmul.f32 -1.442695, %v3124_v52  ;;  %v4618_v5 = vmul.f32 -1.442695, %v3164_v45 }
0x11ae   :  { %vm3187_vm6 = vweird.f32 %v3178_v34 }
0x11af   :  { %4980 = vrcp.f32 %v3179_v42  ;;  %vm3202_vm13 = vweird.f32 %v3179_v42 }
0x11b0   :  { %4982 = vpow2.f32 %v4617_v21 }
0x11b1   :  { %4984 = vpow2.f32 %v4618_v5 }
0x11b2   :  { %4986 = vrcp.f32 %v3178_v34 }
0x11b5   :  { %v4981_v53 = vpop.eup %4980 }
0x11b6   :  { %v4983_v20 = vpop.eup %4982  ;;  %v3198_v40 = vmul.f32 %v4981_v53, %v3179_v42  ;;  %vm3203_vm11 = vweird.f32 %v4981_v53 }
0x11b7   :  { %v4985_v30 = vpop.eup %4984  ;;  %v3180_v4 = vadd.f32 1.0, %v4983_v20  ;;  %v3208_v20 = vand.u32 2147483648, %v3179_v42  ;;  %vm8558_vm15 = vmor %vm3202_vm13, %vm3203_vm11 }
0x11b8   :  { %v4987_v12 = vpop.eup %4986  ;;  %v3181_v17 = vadd.f32 1.0, %v4985_v30  ;;  %v3199_v26 = vsub.f32 1.0, %v3198_v40  ;;  %v3206_v30 = vand.u32 2147483647, %v3179_v42 }
0x11b9   :  { %v3183_v63 = vmul.f32 %v4987_v12, %v3178_v34  ;;  %vm3188_vm14 = vweird.f32 %v4987_v12  ;;  %v3209_v42 = vor.u32 1.1754944e-38, %v3208_v20  ;;  %vm3217_vm13 = vweird.f32 %v3180_v4 }
0x11ba   :  { %4988 = vrcp.f32 %v3181_v17  ;;  %v3200_v8 = vmul.f32 %v4981_v53, %v3199_v26  ;;  %v3238_v22 = vand.u32 2147483648, %v3181_v17  ;;  %v3236_v49 = vand.u32 2147483647, %v3181_v17  ;;  %vm3189_vm9 = vmor %vm3187_vm6, %vm3188_vm14 }
0x11bb   :  { %4990 = vrcp.f32 %v3180_v4  ;;  %v3184_v55 = vsub.f32 1.0, %v3183_v63  ;;  %vm3232_vm2 = vweird.f32 %v3181_v17  ;;  %v3193_v26 = vand.u32 2147483648, %v3178_v34 }
0x11bc   :  { %v3201_v5 = vadd.f32 %v4981_v53, %v3200_v8  ;;  %v3191_v8 = vand.u32 2147483647, %v3178_v34  ;;  %vm3237_vm8 = vcmp.eq.f32.partialorder %v3236_v49, 8.507059e+37  ;;  %vm3207_vm10 = vcmp.eq.f32.partialorder %v3206_v30, 8.507059e+37 }
0x11bd   :  { %v3185_v52 = vmul.f32 %v4987_v12, %v3184_v55  ;;  %v3239_v55 = vor.u32 1.1754944e-38, %v3238_v22  ;;  %v3194_v29 = vor.u32 1.1754944e-38, %v3193_v26  ;;  %v3223_v49 = vand.u32 2147483648, %v3180_v4 }
0x11be   :  { %vm3192_vm11 = vcmp.eq.f32.partialorder %v3191_v8, 8.507059e+37 }
0x11bf   :  { %v3186_v60 = vadd.f32 %v4987_v12, %v3185_v52 }
0x11c0   :  { %v4989_v6 = vpop.eup %4988 }
0x11c1   :  { %v3228_v45 = vmul.f32 %v4989_v6, %v3181_v17  ;;  %v4991_v32 = vpop.eup %4990  ;;  %vm3233_vm12 = vweird.f32 %v4989_v6  ;;  %v3190_v2 = vsel %vm3189_vm9, %v4987_v12, %v3186_v60  ;;  %v3221_v60 = vand.u32 2147483647, %v3180_v4 }
0x11c2   :  { %v3213_v59 = vmul.f32 %v4991_v32, %v3180_v4  ;;  %vm3234_vm7 = vmor %vm3232_vm2, %vm3233_vm12  ;;  %v3195_v47 = vsel %vm3192_vm11, %v3194_v29, %v3190_v2  ;;  %vm3218_vm12 = vweird.f32 %v4991_v32 }
0x11c3   :  { %v3229_v21 = vsub.f32 1.0, %v3228_v45  ;;  %v3205_v45 = vsel %vm8558_vm15, %v4981_v53, %v3201_v5  ;;  %vm3219_vm14 = vmor %vm3217_vm13, %vm3218_vm12  ;;  %vm3222_vm15 = vcmp.eq.f32.partialorder %v3221_v60, 8.507059e+37 }
0x11c4   :  { %v3214_v52 = vsub.f32 1.0, %v3213_v59  ;;  %v3224_v59 = vor.u32 1.1754944e-38, %v3223_v49  ;;  %vm8588_vm2 = vmneg %vm175_vm0 }
0x11c5   :  { %v3230_v18 = vmul.f32 %v4989_v6, %v3229_v21 }
0x11c6   :  { %v3215_v62 = vmul.f32 %v4991_v32, %v3214_v52 }
0x11c7   :  { %v3231_v63 = vadd.f32 %v4989_v6, %v3230_v18  ;;  %v3210_v18 = vsel %vm3207_vm10, %v3209_v42, %v3205_v45 }
0x11c8   :  { %v3244_v34 = vmul.f32 %v3210_v18, %v8152_v27  ;;  %v3216_v53 = vadd.f32 %v4991_v32, %v3215_v62 }
0x11c9   :  { %v3235_v21 = vsel %vm3234_vm7, %v4989_v6, %v3231_v63 }
0x11ca   :  { %v3240_v48 = vsel %vm3237_vm8, %v3239_v55, %v3235_v21 }
0x11cb   :  { %v3242_v3 = vmul.f32 2.0, %v3240_v48  ;;  %v3220_v48 = vsel %vm3219_vm14, %v4991_v32, %v3216_v53 }
0x11cd   :  { %v4619_v17 = vadd.f32 -1.0, %v3242_v3  ;;  %v3225_v3 = vsel %vm3222_vm15, %v3224_v59, %v3220_v48 }
0x11cf   :  { %v3245_v22 = vmul.f32 %v4619_v17, %v3195_v47 }
0x11d1   :  { %v8565_v40 = vadd.f32 %v3245_v22, %v3244_v34 }
0x11d3   :  { %4992 = vtanh.f32 %v8565_v40 }
0x11d9   :  { %v4993_v12 = vpop.eup %4992 }
0x11da   :  { %v8568_v29 = vmul.f32 %v4993_v12, %v3225_v3 }
0x11dc   :  { %3342 = vrot.lane.b32.xlu1 %v8568_v29, %s5716_s2  ;;  %3293 = vrot.lane.b32.xlu2 %v8568_v29, %s5717_s28  ;;  %v3261_v27 = vmul.f32 %v8568_v29, %v8568_v29  ;;  %v3249_v47 = vsel %vm429_vm3, %v8568_v29, 0.0 }
0x11de   :  { %3309 = vrot.lane.b32.xlu0 %v3261_v27, %s5717_s28  ;;  %v3262_v62 = vsel %vm429_vm3, %v3261_v27, 0.0 }
0x11e4   :  { %3357 = vrot.lane.b32.xlu2 %v3261_v27, %s5716_s2 }
0x1206   :  { %3263 = vadd.xlane.f32.xlu1 %v3262_v62 }
0x1208   :  { %3250 = vadd.xlane.f32.xlu0 %v3249_v47 }
0x1236   :  { %v3294_v2 = vpop.permute.xlu2 %3293 }
0x1237   :  { %v3296_v4 = vsel %vm429_vm3, %v3294_v2, 0.0 }
0x1238   :  { %3297 = vadd.xlane.f32.xlu2 %v3296_v4 }
0x123e   :  { %v3358_v6 = vpop.permute.xlu2 %3357 }
0x123f   :  { %v3360_v32 = vsel %vm429_vm3, %v3358_v6, 0.0 }
0x1240   :  { %3361 = vadd.xlane.f32.xlu2 %v3360_v32 }
0x124e   :  { %v3343_v5 = vpop.permute.xlu1 %3342 }
0x124f   :  { %v3345_v30 = vsel %vm429_vm3, %v3343_v5, 0.0 }
0x1250   :  { %v3310_v20 = vpop.permute.xlu0 %3309  ;;  %3346 = vadd.xlane.f32.xlu1 %v3345_v30 }
0x1251   :  { %v3312_v63 = vsel %vm429_vm3, %v3310_v20, 0.0 }
0x1252   :  { %3313 = vadd.xlane.f32.xlu0 %v3312_v63 }
0x1266   :  { %3392 = vrot.lane.b32.xlu0 %v8568_v29, %s5718_s29 }
0x1279   :  { %v3264_v26 = vpop.xlane.xlu1 %3263 }
0x127a   :  { %v3265_v55 = vrot.slane %v3264_v26, 4 }
0x127b   :  { %v3251_v8 = vpop.xlane.xlu0 %3250 }
0x127c   :  { %v3266_v45 = vadd.f32 %v3265_v55, %v3264_v26  ;;  %v3252_v21 = vrot.slane %v3251_v8, 4 }
0x127e   :  { %v3267_v42 = vrot.slane %v3266_v45, 2  ;;  %v3253_v52 = vadd.f32 %v3252_v21, %v3251_v8 }
0x1280   :  { %v3254_v18 = vrot.slane %v3253_v52, 2  ;;  %v3268_v17 = vadd.f32 %v3267_v42, %v3266_v45 }
0x1282   :  { %v3255_v34 = vadd.f32 %v3254_v18, %v3253_v52  ;;  %v3269_v22 = vrot.slane %v3268_v17, 1 }
0x1284   :  { %v3256_v53 = vrot.slane %v3255_v34, 1  ;;  %v3270_v60 = vadd.f32 %v3269_v22, %v3268_v17 }
0x1286   :  { %v3257_v49 = vadd.f32 %v3256_v53, %v3255_v34 }
0x1288   :  { %4756 = vpush %v3257_v49 }
0x1289   :  { %4758 = vpush %v3270_v60 }
0x12ab   :  { %v3298_v48 = vpop.xlane.xlu2 %3297 }
0x12ac   :  { %v3299_v59 = vrot.slane %v3298_v48, 4 }
0x12ae   :  { %v3300_v12 = vadd.f32 %v3299_v59, %v3298_v48 }
0x12b0   :  { %v3301_v3 = vrot.slane %v3300_v12, 2 }
0x12b2   :  { %v3302_v27 = vadd.f32 %v3301_v3, %v3300_v12 }
0x12b3   :  { %v3362_v2 = vpop.xlane.xlu2 %3361 }
0x12b4   :  { %v3303_v62 = vrot.slane %v3302_v27, 1  ;;  %v3363_v4 = vrot.slane %v3362_v2, 4 }
0x12b6   :  { %v3304_v47 = vadd.f32 %v3303_v62, %v3302_v27  ;;  %v3364_v6 = vadd.f32 %v3363_v4, %v3362_v2 }
0x12b8   :  { %4760 = vpush %v3304_v47  ;;  %v3365_v20 = vrot.slane %v3364_v6, 2 }
0x12b9   :  { %s4757_s14 = spop %4756 }
0x12ba   :  { %v3366_v42 = vadd.f32 %v3365_v20, %v3364_v6  ;;  %s4759_s15 = spop %4758 }
0x12bc   :  { %v3367_v34 = vrot.slane %v3366_v42, 1 }
0x12be   :  { %v3368_v49 = vadd.f32 %v3367_v34, %v3366_v42 }
0x12c3   :  { %v3347_v32 = vpop.xlane.xlu1 %3346 }
0x12c4   :  { %v3348_v5 = vrot.slane %v3347_v32, 4 }
0x12c5   :  { %v3314_v30 = vpop.xlane.xlu0 %3313 }
0x12c6   :  { %v3349_v63 = vadd.f32 %v3348_v5, %v3347_v32  ;;  %v3315_v26 = vrot.slane %v3314_v30, 4 }
0x12c8   :  { %v3350_v55 = vrot.slane %v3349_v63, 2  ;;  %v3316_v8 = vadd.f32 %v3315_v26, %v3314_v30 }
0x12ca   :  { %v3317_v45 = vrot.slane %v3316_v8, 2  ;;  %v3351_v21 = vadd.f32 %v3350_v55, %v3349_v63 }
0x12cc   :  { %v3318_v52 = vadd.f32 %v3317_v45, %v3316_v8  ;;  %v3352_v18 = vrot.slane %v3351_v21, 1 }
0x12ce   :  { %v3319_v17 = vrot.slane %v3318_v52, 1  ;;  %v3353_v53 = vadd.f32 %v3352_v18, %v3351_v21 }
0x12d0   :  { %v3320_v22 = vadd.f32 %v3319_v17, %v3318_v52 }
0x12d2   :  { %4762 = vpush %v3320_v22 }
0x12d3   :  { %4764 = vpush %v3353_v53 }
0x12d4   :  { %4766 = vpush %v3368_v49 }
0x12d8   :  { %v8592_v48 = vpop.permute.xlu0 %3392 }
0x12d9   :  { %4621 = vmatmul.msk.f32.vlgmr.msra.gmra.mxu3 %vm8588_vm2, %v8592_v48  ;;  %4624 = vmatmul.msk.f32.vlgmr.msra.gmra.mxu2 %vm8588_vm2, %v8592_v48 }
0x12da   :  { %3802 = vmatpush.msra.mxu3 %v8185_v19  ;;  %3842 = vmatpush.msra.mxu2 %v8188_v35  ;;  %v3259_v19 = vstv %s4757_s14 }
0x12db   :  { %v8617_v35 = vmul.f32 %v3259_v19, %v6394_v23 }
0x12dc   :  { %3803 = vmatpush.msra.mxu3 %v8191_v11  ;;  %3843 = vmatpush.msra.mxu2 %v8194_v0  ;;  %v3272_v11 = vstv %s4759_s15 }
0x12dd   :  { %v3274_v0 = vmul.f32 %v8617_v35, %v8617_v35  ;;  %v3276_v21 = vsub.f32 %v8568_v29, %v8617_v35 }
0x12de   :  { %3804 = vmatpush.msra.mxu3 %v8197_v25  ;;  %3844 = vmatpush.msra.mxu2 %v8200_v36  ;;  %v3273_v25 = vmul.f32 %v3272_v11, %v6394_v23 }
0x12e0   :  { %3805 = vmatpush.msra.mxu3 %v8203_v33  ;;  %3845 = vmatpush.msra.mxu2 %v8206_v28  ;;  %v3275_v36 = vsub.f32 %v3273_v25, %v3274_v0  ;;  %v8630_v33 = vld [vmem:[#allocation2 + $0x60] sm:$0xff]  ;;  %v8633_v28 = vld [vmem:[#allocation2 + $0x68] sm:$0xff] }
0x12e2   :  { %3806 = vmatpush.msra.mxu3 %v8209_v31  ;;  %3846 = vmatpush.msra.mxu2 %v8212_v56  ;;  %v8636_v31 = vld [vmem:[#allocation2 + $0x40] sm:$0xff]  ;;  %v8639_v56 = vld [vmem:[#allocation2 + $0x48] sm:$0xff] }
0x12e4   :  { %3807 = vmatpush.msra.mxu3 %v8215_v24  ;;  %3847 = vmatpush.msra.mxu2 %v8218_v61  ;;  %v3277_v24 = vadd.f32 1e-05, %v3275_v36  ;;  %v8642_v61 = vld [vmem:[#allocation2 + $0x20] sm:$0xff] }
0x12e6   :  { %3808 = vmatpush.msra.mxu3 %v8221_v46  ;;  %3848 = vmatpush.msra.mxu2 %v8224_v43  ;;  %v8645_v46 = vld [vmem:[#allocation2 + $0x28] sm:$0xff]  ;;  %v8648_v43 = vld [vmem:[#allocation2] sm:$0xff]  ;;  %4994 = vrsqrt.f32 %v3277_v24  ;;  %vm3284_vm7 = vweird.f32 %v3277_v24 }
0x12e8   :  { %3809 = vmatpush.msra.mxu3 %v8227_v15  ;;  %3849 = vmatpush.msra.mxu2 %v8230_v54  ;;  %v8651_v15 = vld [vmem:[#allocation2 + $0x8] sm:$0xff] }
0x12e9   :  { %s4761_s16 = spop %4760 }
0x12ea   :  { %3810 = vmatpush.msra.mxu3 %v8233_v7  ;;  %3850 = vmatpush.msra.mxu2 %v8236_v41  ;;  %v3306_v54 = vstv %s4761_s16  ;;  %s5720_s16 = smov [#allocation5]  }
0x12eb   :  { %v3307_v41 = vmul.f32 %v3306_v54, %v6394_v23 }
0x12ec   :  { %3811 = vmatpush.msra.mxu3 %v8242_v1  ;;  %3851 = vmatpush.msra.mxu2 %v8245_v39  ;;  %v4995_v7 = vpop.eup %4994 }
0x12ed   :  { %v3279_v1 = vmul.f32 %v4995_v7, %v3277_v24  ;;  %vm3285_vm6 = vweird.f32 %v4995_v7  ;;  %v3326_v22 = vsub.f32 %v8568_v29, %v3307_v41 }
0x12ee   :  { %3812 = vmatpush.msra.mxu3 %v8249_v10  ;;  %3852 = vmatpush.msra.mxu2 %v8252_v44  ;;  %v3324_v10 = vmul.f32 %v3307_v41, %v3307_v41  ;;  %vm3286_vm8 = vmor %vm3284_vm7, %vm3285_vm6 }
0x12f0   :  { %3813 = vmatpush.msra.mxu3 %v8257_v9  ;;  %3853 = vmatpush.msra.mxu2 %v8260_v37  ;;  %v3280_v37 = vmul.f32 %v4995_v7, %v3279_v1 }
0x12f2   :  { %3814 = vmatpush.msra.mxu3 %v8630_v33  ;;  %3854 = vmatpush.msra.mxu2 %v8633_v28  ;;  %v3281_v2 = vmul.f32 0.5, %v3280_v37  ;;  %v10076_v37 = vld [vmem:[#allocation91_spill] sm:$0xff] }
0x12f4   :  { %3815 = vmatpush.msra.mxu3 %v8636_v31  ;;  %3855 = vmatpush.msra.mxu2 %v8639_v56  ;;  %v3282_v32 = vsub.f32 1.5, %v3281_v2  ;;  %v10092_v2 = vld [vmem:[#allocation28_spill] sm:$0xff] }
0x12f6   :  { %3816 = vmatpush.msra.mxu3 %v8642_v61  ;;  %3856 = vmatpush.msra.mxu2 %v8645_v46  ;;  %v3283_v30 = vmul.f32 %v4995_v7, %v3282_v32  ;;  %v10095_v32 = vld [vmem:[#allocation25_spill] sm:$0xff] }
0x12f8   :  { %3817 = vmatpush.msra.mxu3 %v8648_v43  ;;  %3857 = vmatpush.msra.mxu2 %v8651_v15  ;;  %v3287_v45 = vsel %vm3286_vm8, %v4995_v7, %v3283_v30  ;;  %v10097_v30 = vld [vmem:[#allocation31_spill] sm:$0xff] }
0x12f9   :  { %v3288_v17 = vmul.f32 %v3287_v45, %v3276_v21  ;;  %v10103_v45 = vld [vmem:[#allocation33_spill] sm:$0xff]  ;;  %v10104_v21 = vld [vmem:[#allocation40_spill] sm:$0xff] }
0x12fb   :  { %v3290_v11 = vmul.f32 0.01, %v3288_v17  ;;  %vm3289_vm15 = vcmp.ge.f32.partialorder %v3288_v17, 0.0 }
0x12fd   :  { %v3291_v54 = vsel %vm3289_vm15, %v3288_v17, %v3290_v11  ;;  %v10108_v17 = vld [vmem:[#allocation44_spill] sm:$0xff]  ;;  %v10114_v11 = vld [vmem:[#allocation46_spill] sm:$0xff] }
0x1303   :  { %s4763_s17 = spop %4762 }
0x1304   :  { %v3322_v39 = vstv %s4763_s17  ;;  %s4765_s18 = spop %4764  ;;  %s4529_s17 = sshll.u32 %s5720_s16, 4  ;;  %s4530_s17 = int_to_ptr.vmem [resolvable:$true] %s4529_s17 }
0x1305   :  { %v3323_v44 = vmul.f32 %v3322_v39, %v6394_v23  ;;  %v3355_v9 = vstv %s4765_s18  ;;  %s4767_s19 = spop %4766 }
0x1306   :  { %v3356_v59 = vmul.f32 %v3355_v9, %v6394_v23  ;;  %v3370_v12 = vstv %s4767_s19  ;;  %v10075_v9 = vld [vmem:[#allocation90_spill] sm:$0xff] }
0x1307   :  { %v3325_v3 = vsub.f32 %v3323_v44, %v3324_v10  ;;  %v3371_v62 = vmul.f32 %v3370_v12, %v6394_v23  ;;  %v10086_v12 = vld [vmem:[#allocation18_spill] sm:$0xff] }
0x1308   :  { %v3372_v27 = vmul.f32 %v3356_v59, %v3356_v59  ;;  %v3374_v25 = vsub.f32 %v8568_v29, %v3356_v59  ;;  %v10077_v59 = vld [vmem:[#allocation92_spill] sm:$0xff] }
0x1309   :  { %v3327_v47 = vadd.f32 1e-05, %v3325_v3  ;;  %v10087_v3 = vld [vmem:[#allocation17_spill] sm:$0xff] }
0x130a   :  { %v3373_v4 = vsub.f32 %v3371_v62, %v3372_v27  ;;  %v10088_v27 = vld [vmem:[#allocation24_spill] sm:$0xff]  ;;  %v10090_v62 = vld [vmem:[#allocation22_spill] sm:$0xff] }
0x130b   :  { %4996 = vrsqrt.f32 %v3327_v47  ;;  %vm3334_vm10 = vweird.f32 %v3327_v47 }
0x130c   :  { %v3375_v6 = vadd.f32 1e-05, %v3373_v4  ;;  %v10093_v4 = vld [vmem:[#allocation27_spill] sm:$0xff] }
0x130e   :  { %4998 = vrsqrt.f32 %v3375_v6  ;;  %vm3382_vm13 = vweird.f32 %v3375_v6 }
0x1311   :  { %v4997_v5 = vpop.eup %4996 }
0x1312   :  { %v3329_v20 = vmul.f32 %v4997_v5, %v3327_v47  ;;  %vm3335_vm9 = vweird.f32 %v4997_v5  ;;  %v10091_v47 = vld [vmem:[#allocation21_spill] sm:$0xff] }
0x1313   :  { %vm3336_vm11 = vmor %vm3334_vm10, %vm3335_vm9 }
0x1314   :  { %v4999_v63 = vpop.eup %4998  ;;  %v3330_v26 = vmul.f32 %v4997_v5, %v3329_v20  ;;  %v10098_v20 = vld [vmem:[#allocation30_spill] sm:$0xff] }
0x1315   :  { %v3377_v55 = vmul.f32 %v4999_v63, %v3375_v6  ;;  %vm3383_vm12 = vweird.f32 %v4999_v63  ;;  %v10094_v6 = vld [vmem:[#allocation26_spill] sm:$0xff] }
0x1316   :  { %v3331_v8 = vmul.f32 0.5, %v3330_v26  ;;  %vm3384_vm14 = vmor %vm3382_vm13, %vm3383_vm12  ;;  %v10100_v26 = vld [vmem:[#allocation36_spill] sm:$0xff] }
0x1317   :  { %v3378_v42 = vmul.f32 %v4999_v63, %v3377_v55  ;;  %v10101_v55 = vld [vmem:[#allocation35_spill] sm:$0xff] }
0x1318   :  { %v3332_v52 = vsub.f32 1.5, %v3331_v8  ;;  %v10102_v8 = vld [vmem:[#allocation34_spill] sm:$0xff] }
0x1319   :  { %v3379_v18 = vmul.f32 0.5, %v3378_v42  ;;  %v10105_v42 = vld [vmem:[#allocation39_spill] sm:$0xff] }
0x131a   :  { %v3333_v34 = vmul.f32 %v4997_v5, %v3332_v52  ;;  %v10106_v52 = vld [vmem:[#allocation38_spill] sm:$0xff] }
0x131b   :  { %v3380_v53 = vsub.f32 1.5, %v3379_v18  ;;  %v10107_v18 = vld [vmem:[#allocation37_spill] sm:$0xff] }
0x131c   :  { %v3337_v49 = vsel %vm3336_vm11, %v4997_v5, %v3333_v34  ;;  %v10096_v5 = vld [vmem:[#allocation32_spill] sm:$0xff]  ;;  %v10109_v34 = vld [vmem:[#allocation43_spill] sm:$0xff] }
0x131d   :  { %v3381_v19 = vmul.f32 %v4999_v63, %v3380_v53  ;;  %v3338_v0 = vmul.f32 %v3337_v49, %v3326_v22  ;;  %v10110_v22 = vld [vmem:[#allocation42_spill] sm:$0xff]  ;;  %v10111_v53 = vld [vmem:[#allocation41_spill] sm:$0xff]  ;;  %v10112_v49 = vld [vmem:[#allocation48_spill] sm:$0xff] }
0x131f   :  { %vm3339_vm6 = vcmp.ge.f32.partialorder %v3338_v0, 0.0  ;;  %v3340_v35 = vmul.f32 0.01, %v3338_v0  ;;  %v3385_v36 = vsel %vm3384_vm14, %v4999_v63, %v3381_v19  ;;  %v10099_v63 = vld [vmem:[#allocation29_spill] sm:$0xff]  ;;  %v10113_v19 = vld [vmem:[#allocation47_spill] sm:$0xff] }
0x1320   :  { %v3386_v24 = vmul.f32 %v3385_v36, %v3374_v25  ;;  %v10116_v25 = vld [vmem:[#allocation52_spill] sm:$0xff]  ;;  %v10118_v36 = vld [vmem:[#allocation50_spill] sm:$0xff] }
0x1321   :  { %v3341_v7 = vsel %vm3339_vm6, %v3338_v0, %v3340_v35  ;;  %v10115_v0 = vld [vmem:[#allocation45_spill] sm:$0xff]  ;;  %v10117_v35 = vld [vmem:[#allocation51_spill] sm:$0xff] }
0x1322   :  { %vm3387_vm7 = vcmp.ge.f32.partialorder %v3386_v24, 0.0  ;;  %v3388_v41 = vmul.f32 0.01, %v3386_v24  ;;  %v3390_v1 = vsel %vm578_vm1, %v3291_v54, %v3341_v7  ;;  %v10120_v54 = vld [vmem:[#allocation56_spill] sm:$0xff]  ;;  %v10121_v7 = vld [vmem:[#allocation55_spill] sm:$0xff] }
0x1324   :  { %v3389_v39 = vsel %vm3387_vm7, %v3386_v24, %v3388_v41  ;;  %v10119_v24 = vld [vmem:[#allocation49_spill] sm:$0xff]  ;;  %v10122_v41 = vld [vmem:[#allocation54_spill] sm:$0xff] }
0x1325   :  { %v3391_v10 = vsel %vm580_vm4, %v3390_v1, %v3389_v39  ;;  %v10123_v1 = vld [vmem:[#allocation53_spill] sm:$0xff]  ;;  %v10124_v39 = vld [vmem:[#allocation60_spill] sm:$0xff] }
0x1326   :  { %3396 = vrot.lane.b32.xlu1 %v3391_v10, %s5718_s29  ;;  %v10125_v10 = vld [vmem:[#allocation59_spill] sm:$0xff] }
0x1398   :  { %v3397_v44 = vpop.permute.xlu1 %3396 }
0x1399   :  { %v3400_v29 = vsel %vm175_vm0, %v8592_v48, %v3397_v44  ;;  %v10126_v44 = vld [vmem:[#allocation58_spill] sm:$0xff] }
0x139a   :  { %4622 = vmatmul.msk.f32.vlgmr.msra.gmra.mxu1 %vm177_vm5, %v3400_v29  ;;  %4625 = vmatmul.msk.f32.vlgmr.msra.gmra.mxu0 %vm177_vm5, %v3400_v29 }
0x139b   :  { %4628 = vmatmul.msk.f32.vlgmr.msrb.gmra.mxu3 %vm177_vm5, %v3400_v29  ;;  %4631 = vmatmul.msk.f32.vlgmr.msrb.gmra.mxu2 %vm177_vm5, %v3400_v29  ;;  %v10127_v29 = vld [vmem:[#allocation57_spill] sm:$0xff] }
0x139c   :  { %3824 = vmatpush.msra.mxu1 %v8288_v57  ;;  %3864 = vmatpush.msra.mxu0 %v8291_v50  ;;  %v10078_v57 = vld [vmem:[#allocation93_spill] sm:$0xff] }
0x139d   :  { %3904 = vmatpush.msrb.mxu3 %v8294_v16  ;;  %3944 = vmatpush.msrb.mxu2 %v8297_v38  ;;  %v10079_v50 = vld [vmem:[#allocation13_spill] sm:$0xff]  ;;  %v10080_v16 = vld [vmem:[#allocation12_spill] sm:$0xff]  ;;  %v10081_v38 = vld [vmem:[#allocation14_spill] sm:$0xff] }
0x139e   :  { %3825 = vmatpush.msra.mxu1 %v8300_v51  ;;  %3865 = vmatpush.msra.mxu0 %v8303_v58  ;;  %v10082_v51 = vld [vmem:[#allocation15_spill] sm:$0xff] }
0x139f   :  { %3905 = vmatpush.msrb.mxu3 %v8306_v14  ;;  %3945 = vmatpush.msrb.mxu2 %v8309_v13  ;;  %v10083_v58 = vld [vmem:[#allocation19_spill] sm:$0xff]  ;;  %v10084_v14 = vld [vmem:[#allocation16_spill] sm:$0xff] }
0x13a0   :  { %3826 = vmatpush.msra.mxu1 %v10075_v9  ;;  %3866 = vmatpush.msra.mxu0 %v10076_v37  ;;  %v10085_v13 = vld [vmem:[#allocation20_spill] sm:$0xff]  ;;  %v10128_v9 = vld [vmem:[#allocation63_spill] sm:$0xff]  ;;  %v10129_v37 = vld [vmem:[#allocation62_spill] sm:$0xff] }
0x13a1   :  { %3906 = vmatpush.msrb.mxu3 %v10077_v59  ;;  %3946 = vmatpush.msrb.mxu2 %v10078_v57  ;;  %v10130_v59 = vld [vmem:[#allocation61_spill] sm:$0xff] }
0x13a2   :  { %4627 = vmatmul.msk.f32.vlgmr.msrb.gmra.mxu1 %vm8588_vm2, %v8592_v48  ;;  %4630 = vmatmul.msk.f32.vlgmr.msrb.gmra.mxu0 %vm8588_vm2, %v8592_v48  ;;  %v10089_v48 = vld [vmem:[#allocation23_spill] sm:$0xff]  ;;  %v10131_v57 = vld [vmem:[#allocation65_spill] sm:$0xff] }
0x13a3   :  { %3827 = vmatpush.msra.mxu1 %v10079_v50  ;;  %3867 = vmatpush.msra.mxu0 %v10080_v16  ;;  %v10132_v50 = vld [vmem:[#allocation64_spill] sm:$0xff]  ;;  %v10133_v16 = vld [vmem:[#allocation66_spill] sm:$0xff] }
0x13a4   :  { %3907 = vmatpush.msrb.mxu3 %v10081_v38  ;;  %3947 = vmatpush.msrb.mxu2 %v10082_v51  ;;  %v10134_v38 = vld [vmem:[#allocation67_spill] sm:$0xff]  ;;  %v10135_v51 = vld [vmem:[#allocation68_spill] sm:$0xff] }
0x13a5   :  { %3828 = vmatpush.msra.mxu1 %v10083_v58  ;;  %3868 = vmatpush.msra.mxu0 %v10084_v14  ;;  %v10136_v58 = vld [vmem:[#allocation69_spill] sm:$0xff]  ;;  %v10137_v14 = vld [vmem:[#allocation70_spill] sm:$0xff] }
0x13a6   :  { %3908 = vmatpush.msrb.mxu3 %v10085_v13  ;;  %3948 = vmatpush.msrb.mxu2 %v10086_v12  ;;  %v10138_v13 = vld [vmem:[#allocation71_spill] sm:$0xff]  ;;  %v10139_v12 = vld [vmem:[#allocation72_spill] sm:$0xff] }
0x13a7   :  { %3829 = vmatpush.msra.mxu1 %v10087_v3  ;;  %3869 = vmatpush.msra.mxu0 %v10088_v27  ;;  %v10140_v3 = vld [vmem:[#allocation73_spill] sm:$0xff]  ;;  %v10141_v27 = vld [vmem:[#allocation74_spill] sm:$0xff] }
0x13a8   :  { %3909 = vmatpush.msrb.mxu3 %v10089_v48  ;;  %3949 = vmatpush.msrb.mxu2 %v10090_v62  ;;  %v10142_v48 = vld [vmem:[#allocation75_spill] sm:$0xff]  ;;  %v10143_v62 = vld [vmem:[#allocation76_spill] sm:$0xff] }
0x13a9   :  { %3830 = vmatpush.msra.mxu1 %v10091_v47  ;;  %3870 = vmatpush.msra.mxu0 %v10092_v2  ;;  %v10144_v47 = vld [vmem:[#allocation77_spill] sm:$0xff]  ;;  %v10145_v2 = vld [vmem:[#allocation78_spill] sm:$0xff] }
0x13aa   :  { %3910 = vmatpush.msrb.mxu3 %v10093_v4  ;;  %3950 = vmatpush.msrb.mxu2 %v10094_v6  ;;  %v10146_v4 = vld [vmem:[#allocation79_spill] sm:$0xff]  ;;  %v10147_v6 = vld [vmem:[#allocation80_spill] sm:$0xff] }
0x13ab   :  { %3831 = vmatpush.msra.mxu1 %v10095_v32  ;;  %3871 = vmatpush.msra.mxu0 %v10096_v5  ;;  %v10148_v32 = vld [vmem:[#allocation81_spill] sm:$0xff]  ;;  %v10149_v5 = vld [vmem:[#allocation82_spill] sm:$0xff] }
0x13ac   :  { %3911 = vmatpush.msrb.mxu3 %v10097_v30  ;;  %3951 = vmatpush.msrb.mxu2 %v10098_v20  ;;  %v10150_v30 = vld [vmem:[#allocation83_spill] sm:$0xff]  ;;  %v10151_v20 = vld [vmem:[#allocation84_spill] sm:$0xff] }
0x13ad   :  { %3832 = vmatpush.msra.mxu1 %v10099_v63  ;;  %3872 = vmatpush.msra.mxu0 %v10100_v26  ;;  %v10152_v63 = vld [vmem:[#allocation85_spill] sm:$0xff]  ;;  %v10153_v26 = vld [vmem:[#allocation86_spill] sm:$0xff] }
0x13ae   :  { %3912 = vmatpush.msrb.mxu3 %v10101_v55  ;;  %3952 = vmatpush.msrb.mxu2 %v10102_v8  ;;  %v10154_v55 = vld [vmem:[#allocation87_spill] sm:$0xff]  ;;  %v3421_v8 = vpop.f32.mrf.mxu3 }
0x13af   :  { %3833 = vmatpush.msra.mxu1 %v10103_v45  ;;  %3873 = vmatpush.msra.mxu0 %v10104_v21  ;;  %v3461_v45 = vpop.f32.mrf.mxu2  ;;  %v10155_v21 = vld [vmem:[#allocation8_spill] sm:$0xff] }
0x13b0   :  { %3913 = vmatpush.msrb.mxu3 %v10105_v42  ;;  %3953 = vmatpush.msrb.mxu2 %v10106_v52  ;;  %v3422_v42 = vadd.f32 %v3421_v8, %v10155_v21  ;;  %v10156_v52 = vld [vmem:[#allocation9_spill] sm:$0xff] }
0x13b1   :  { %3834 = vmatpush.msra.mxu1 %v10107_v18  ;;  %3874 = vmatpush.msra.mxu0 %v10108_v17  ;;  %v3462_v18 = vadd.f32 %v3461_v45, %v10156_v52 }
0x13b2   :  { %3914 = vmatpush.msrb.mxu3 %v10109_v34  ;;  %3954 = vmatpush.msrb.mxu2 %v10110_v22 }
0x13b3   :  { %3835 = vmatpush.msra.mxu1 %v10111_v53  ;;  %3875 = vmatpush.msra.mxu0 %v10112_v49 }
0x13b4   :  { %3915 = vmatpush.msrb.mxu3 %v10113_v19  ;;  %3955 = vmatpush.msrb.mxu2 %v10114_v11 }
0x13b5   :  { %3836 = vmatpush.msra.mxu1 %v10115_v0  ;;  %3876 = vmatpush.msra.mxu0 %v10116_v25  ;;  %v10157_v25 = vld [vmem:[#allocation11_spill] sm:$0xff] }
0x13b6   :  { %3916 = vmatpush.msrb.mxu3 %v10117_v35  ;;  %3956 = vmatpush.msrb.mxu2 %v10118_v36  ;;  %v10158_v36 = vld [vmem:[#allocation10_spill] sm:$0xff] }
0x13b7   :  { %3837 = vmatpush.msra.mxu1 %v10119_v24  ;;  %3877 = vmatpush.msra.mxu0 %v10120_v54 }
0x13b8   :  { %3917 = vmatpush.msrb.mxu3 %v10123_v1  ;;  %3957 = vmatpush.msrb.mxu2 %v10124_v39 }
0x13b9   :  { %3882 = vmatpush.msrb.mxu1 %v10121_v7  ;;  %3922 = vmatpush.msrb.mxu0 %v10122_v41 }
0x13bb   :  { %3883 = vmatpush.msrb.mxu1 %v10125_v10  ;;  %3923 = vmatpush.msrb.mxu0 %v10126_v44 }
0x13bd   :  { %3884 = vmatpush.msrb.mxu1 %v10127_v29  ;;  %3924 = vmatpush.msrb.mxu0 %v10128_v9 }
0x13bf   :  { %3885 = vmatpush.msrb.mxu1 %v10129_v37  ;;  %3925 = vmatpush.msrb.mxu0 %v10130_v59 }
0x13c1   :  { %3886 = vmatpush.msrb.mxu1 %v10131_v57  ;;  %3926 = vmatpush.msrb.mxu0 %v10132_v50 }
0x13c3   :  { %3887 = vmatpush.msrb.mxu1 %v10133_v16  ;;  %3927 = vmatpush.msrb.mxu0 %v10134_v38 }
0x13c5   :  { %3888 = vmatpush.msrb.mxu1 %v10135_v51  ;;  %3928 = vmatpush.msrb.mxu0 %v10136_v58 }
0x13c7   :  { %3889 = vmatpush.msrb.mxu1 %v10137_v14  ;;  %3929 = vmatpush.msrb.mxu0 %v10138_v13 }
0x13c9   :  { %3890 = vmatpush.msrb.mxu1 %v10139_v12  ;;  %3930 = vmatpush.msrb.mxu0 %v10140_v3 }
0x13cb   :  { %3891 = vmatpush.msrb.mxu1 %v10141_v27  ;;  %3931 = vmatpush.msrb.mxu0 %v10142_v48 }
0x13cd   :  { %3892 = vmatpush.msrb.mxu1 %v10143_v62  ;;  %3932 = vmatpush.msrb.mxu0 %v10144_v47 }
0x13cf   :  { %3893 = vmatpush.msrb.mxu1 %v10145_v2  ;;  %3933 = vmatpush.msrb.mxu0 %v10146_v4 }
0x13d1   :  { %3894 = vmatpush.msrb.mxu1 %v10147_v6  ;;  %3934 = vmatpush.msrb.mxu0 %v10148_v32 }
0x13d3   :  { %3895 = vmatpush.msrb.mxu1 %v10149_v5  ;;  %3935 = vmatpush.msrb.mxu0 %v10150_v30 }
0x13d5   :  { %3896 = vmatpush.msrb.mxu1 %v10151_v20  ;;  %3936 = vmatpush.msrb.mxu0 %v10152_v63 }
0x13d7   :  { %3897 = vmatpush.msrb.mxu1 %v10153_v26  ;;  %3937 = vmatpush.msrb.mxu0 %v10154_v55 }
0x1417   :  { %v3441_v17 = vpop.f32.mrf.mxu1  ;;  %v3481_v34 = vpop.f32.mrf.mxu0 }
0x1418   :  { %v3442_v22 = vadd.f32 %v3441_v17, %v3422_v42  ;;  %v3482_v53 = vadd.f32 %v3481_v34, %v3462_v18 }
0x141a   :  { %v4632_v49 = vmul.f32 -1.442695, %v3442_v22  ;;  %v4633_v19 = vmul.f32 -1.442695, %v3482_v53 }
0x141c   :  { %5000 = vpow2.f32 %v4632_v49 }
0x141d   :  { %5002 = vpow2.f32 %v4633_v19 }
0x141e   :  { %v3521_v54 = vpop.f32.mrf.mxu3  ;;  %v3561_v7 = vpop.f32.mrf.mxu2 }
0x141f   :  { %v3501_v11 = vpop.f32.mrf.mxu1  ;;  %v3541_v0 = vpop.f32.mrf.mxu0 }
0x1420   :  { %v3502_v35 = vadd.f32 %v3501_v11, %v10157_v25  ;;  %v3542_v24 = vadd.f32 %v3541_v0, %v10158_v36 }
0x1422   :  { %v5001_v41 = vpop.eup %5000  ;;  %v3522_v1 = vadd.f32 %v3521_v54, %v3502_v35  ;;  %v3562_v39 = vadd.f32 %v3561_v7, %v3542_v24 }
0x1423   :  { %v5003_v10 = vpop.eup %5002  ;;  %v3576_v37 = vadd.f32 1.0, %v5001_v41 }
0x1424   :  { %v3577_v44 = vadd.f32 1.0, %v5003_v10  ;;  %v4634_v29 = vmul.f32 -1.442695, %v3522_v1  ;;  %v4635_v9 = vmul.f32 -1.442695, %v3562_v39 }
0x1425   :  { %vm3585_vm14 = vweird.f32 %v3576_v37  ;;  %v3591_v45 = vand.u32 2147483648, %v3576_v37  ;;  %v3589_v18 = vand.u32 2147483647, %v3576_v37 }
0x1426   :  { %5004 = vrcp.f32 %v3577_v44  ;;  %vm3600_vm10 = vweird.f32 %v3577_v44  ;;  %v3604_v30 = vand.u32 2147483647, %v3577_v44  ;;  %v3606_v20 = vand.u32 2147483648, %v3577_v44 }
0x1427   :  { %5006 = vpow2.f32 %v4634_v29  ;;  %v3592_v0 = vor.u32 1.1754944e-38, %v3591_v45 }
0x1428   :  { %5008 = vpow2.f32 %v4635_v9  ;;  %v3607_v22 = vor.u32 1.1754944e-38, %v3606_v20 }
0x1429   :  { %5010 = vrcp.f32 %v3576_v37 }
0x142c   :  { %v5005_v59 = vpop.eup %5004 }
0x142d   :  { %v5007_v57 = vpop.eup %5006  ;;  %v3596_v51 = vmul.f32 %v5005_v59, %v3577_v44  ;;  %vm3601_vm8 = vweird.f32 %v5005_v59 }
0x142e   :  { %v5009_v50 = vpop.eup %5008  ;;  %v3578_v58 = vadd.f32 1.0, %v5007_v57  ;;  %vm8769_vm12 = vmor %vm3600_vm10, %vm3601_vm8  ;;  %vm3605_vm8 = vcmp.eq.f32.partialorder %v3604_v30, 8.507059e+37  ;;  %vm3590_vm10 = vcmp.eq.f32.partialorder %v3589_v18, 8.507059e+37 }
0x142f   :  { %v5011_v16 = vpop.eup %5010  ;;  %v3579_v38 = vadd.f32 1.0, %v5009_v50  ;;  %v3597_v13 = vsub.f32 1.0, %v3596_v51 }
0x1430   :  { %v3581_v14 = vmul.f32 %v5011_v16, %v3576_v37  ;;  %vm3586_vm11 = vweird.f32 %v5011_v16  ;;  %v3621_v44 = vand.u32 2147483648, %v3578_v58  ;;  %v3619_v29 = vand.u32 2147483647, %v3578_v58 }
0x1431   :  { %5012 = vrcp.f32 %v3579_v38  ;;  %v3598_v27 = vmul.f32 %v5005_v59, %v3597_v13  ;;  %v3636_v4 = vand.u32 2147483648, %v3579_v38  ;;  %v3634_v5 = vand.u32 2147483647, %v3579_v38  ;;  %vm3587_vm7 = vmor %vm3585_vm14, %vm3586_vm11 }
0x1432   :  { %5014 = vrcp.f32 %v3578_v58  ;;  %v3582_v12 = vsub.f32 1.0, %v3581_v14  ;;  %vm3630_vm13 = vweird.f32 %v3579_v38  ;;  %vm3615_vm11 = vweird.f32 %v3578_v58 }
0x1433   :  { %v3599_v6 = vadd.f32 %v5005_v59, %v3598_v27  ;;  %v3637_v42 = vor.u32 1.1754944e-38, %v3636_v4  ;;  %vm3635_vm6 = vcmp.eq.f32.partialorder %v3634_v5, 8.507059e+37  ;;  %v3622_v37 = vor.u32 1.1754944e-38, %v3621_v44 }
0x1434   :  { %v3583_v47 = vmul.f32 %v5011_v16, %v3582_v12 }
0x1435   :  { %v3603_v17 = vsel %vm8769_vm12, %v5005_v59, %v3599_v6 }
0x1436   :  { %v3584_v26 = vadd.f32 %v5011_v16, %v3583_v47  ;;  %v3608_v35 = vsel %vm3605_vm8, %v3607_v22, %v3603_v17 }
0x1437   :  { %v5013_v3 = vpop.eup %5012  ;;  %v3642_v41 = vmul.f32 %v3608_v35, %v8565_v40 }
0x1438   :  { %v3626_v48 = vmul.f32 %v5013_v3, %v3579_v38  ;;  %v5015_v62 = vpop.eup %5014  ;;  %vm3631_vm9 = vweird.f32 %v5013_v3  ;;  %v3588_v19 = vsel %vm3587_vm7, %v5011_v16, %v3584_v26 }
0x1439   :  { %v3611_v63 = vmul.f32 %v5015_v62, %v3578_v58  ;;  %vm3632_vm15 = vmor %vm3630_vm13, %vm3631_vm9  ;;  %v3593_v54 = vsel %vm3590_vm10, %v3592_v0, %v3588_v19  ;;  %vm3616_vm9 = vweird.f32 %v5015_v62  ;;  %vm3620_vm13 = vcmp.eq.f32.partialorder %v3619_v29, 8.507059e+37 }
0x143a   :  { %v3627_v2 = vsub.f32 1.0, %v3626_v48  ;;  %vm3617_vm12 = vmor %vm3615_vm11, %vm3616_vm9 }
0x143b   :  { %v3612_v53 = vsub.f32 1.0, %v3611_v63 }
0x143c   :  { %v3628_v32 = vmul.f32 %v5013_v3, %v3627_v2 }
0x143d   :  { %v3613_v7 = vmul.f32 %v5015_v62, %v3612_v53 }
0x143e   :  { %v3629_v8 = vadd.f32 %v5013_v3, %v3628_v32 }
0x143f   :  { %v3614_v10 = vadd.f32 %v5015_v62, %v3613_v7 }
0x1440   :  { %v3633_v34 = vsel %vm3632_vm15, %v5013_v3, %v3629_v8 }
0x1441   :  { %v3638_v49 = vsel %vm3635_vm6, %v3637_v42, %v3633_v34  ;;  %v3618_v9 = vsel %vm3617_vm12, %v5015_v62, %v3614_v10 }
0x1442   :  { %v3640_v11 = vmul.f32 2.0, %v3638_v49  ;;  %v3623_v57 = vsel %vm3620_vm13, %v3622_v37, %v3618_v9 }
0x1444   :  { %v4636_v24 = vadd.f32 -1.0, %v3640_v11 }
0x1446   :  { %v3643_v1 = vmul.f32 %v4636_v24, %v3593_v54 }
0x1448   :  { %v8776_v39 = vadd.f32 %v3643_v1, %v3642_v41 }
0x144a   :  { %5016 = vtanh.f32 %v8776_v39 }
0x1450   :  { %v5017_v59 = vpop.eup %5016 }
0x1451   :  { %v8779_v50 = vmul.f32 %v5017_v59, %v3623_v57 }
0x1453   :  { %3691 = vrot.lane.b32.xlu2 %v8779_v50, %s5717_s28  ;;  %v3647_v40 = vsel %vm429_vm3, %v8779_v50, 0.0  ;;  %v3659_v16 = vmul.f32 %v8779_v50, %v8779_v50 }
0x1454   :  { %3648 = vadd.xlane.f32.xlu1 %v3647_v40 }
0x1455   :  { %3707 = vrot.lane.b32.xlu0 %v3659_v16, %s5717_s28  ;;  %v3660_v38 = vsel %vm429_vm3, %v3659_v16, 0.0 }
0x145b   :  { %3740 = vrot.lane.b32.xlu2 %v8779_v50, %s5716_s2 }
0x145d   :  { %3755 = vrot.lane.b32.xlu0 %v3659_v16, %s5716_s2 }
0x1484   :  { %3661 = vadd.xlane.f32.xlu2 %v3660_v38 }
0x14ad   :  { %v3692_v51 = vpop.permute.xlu2 %3691 }
0x14ae   :  { %v3694_v58 = vsel %vm429_vm3, %v3692_v51, 0.0 }
0x14af   :  { %3695 = vadd.xlane.f32.xlu0 %v3694_v58 }
0x14b5   :  { %v3741_v14 = vpop.permute.xlu2 %3740 }
0x14b6   :  { %v3743_v13 = vsel %vm429_vm3, %v3741_v14, 0.0 }
0x14b7   :  { %3744 = vadd.xlane.f32.xlu2 %v3743_v13  ;;  %v5548_v13 = vld [vmem:[#allocation2 + $0x1e0] sm:$0xff] }
0x14c7   :  { %v3708_v12 = vpop.permute.xlu0 %3707  ;;  %v3649_v3 = vpop.xlane.xlu1 %3648 }
0x14c8   :  { %v3650_v27 = vrot.slane %v3649_v3, 4  ;;  %v3710_v48 = vsel %vm429_vm3, %v3708_v12, 0.0  ;;  %v5549_v12 = vld [vmem:[#allocation2 + $0x1e8] sm:$0xff] }
0x14c9   :  { %3711 = vadd.xlane.f32.xlu1 %v3710_v48  ;;  %v5552_v48 = vld [vmem:[#allocation2 + $0x1a0] sm:$0xff] }
0x14ca   :  { %v3651_v62 = vadd.f32 %v3650_v27, %v3649_v3  ;;  %v5550_v3 = vld [vmem:[#allocation2 + $0x1c0] sm:$0xff]  ;;  %v5551_v27 = vld [vmem:[#allocation2 + $0x1c8] sm:$0xff] }
0x14cc   :  { %v3652_v47 = vrot.slane %v3651_v62, 2 }
0x14ce   :  { %v3653_v2 = vadd.f32 %v3652_v47, %v3651_v62  ;;  %v5553_v62 = vld [vmem:[#allocation2 + $0x1a8] sm:$0xff]  ;;  %v5554_v47 = vld [vmem:[#allocation2 + $0x180] sm:$0xff] }
0x14cf   :  { %v3756_v4 = vpop.permute.xlu0 %3755 }
0x14d0   :  { %v3758_v6 = vsel %vm429_vm3, %v3756_v4, 0.0  ;;  %v3654_v32 = vrot.slane %v3653_v2, 1  ;;  %v5556_v4 = vld [vmem:[#allocation2 + $0x160] sm:$0xff] }
0x14d1   :  { %3759 = vadd.xlane.f32.xlu0 %v3758_v6  ;;  %v5557_v6 = vld [vmem:[#allocation2 + $0x168] sm:$0xff] }
0x14d2   :  { %v3655_v5 = vadd.f32 %v3654_v32, %v3653_v2  ;;  %v5555_v2 = vld [vmem:[#allocation2 + $0x188] sm:$0xff]  ;;  %v5558_v32 = vld [vmem:[#allocation2 + $0x140] sm:$0xff] }
0x14d4   :  { %4768 = vpush %v3655_v5  ;;  %v5559_v5 = vld [vmem:[#allocation2 + $0x148] sm:$0xff] }
0x14e2   :  { %3790 = vrot.lane.b32.xlu1 %v8779_v50, %s5718_s29 }
0x14f7   :  { %v3662_v30 = vpop.xlane.xlu2 %3661 }
0x14f8   :  { %v3663_v20 = vrot.slane %v3662_v30, 4 }
0x14fa   :  { %v3664_v63 = vadd.f32 %v3663_v20, %v3662_v30  ;;  %v5560_v30 = vld [vmem:[#allocation2 + $0x120] sm:$0xff]  ;;  %v5561_v20 = vld [vmem:[#allocation2 + $0x128] sm:$0xff] }
0x14fc   :  { %v3665_v26 = vrot.slane %v3664_v63, 2 }
0x14fe   :  { %v3666_v55 = vadd.f32 %v3665_v26, %v3664_v63  ;;  %v5562_v63 = vld [vmem:[#allocation2 + $0x100] sm:$0xff]  ;;  %v5563_v26 = vld [vmem:[#allocation2 + $0x108] sm:$0xff] }
0x1500   :  { %v3667_v8 = vrot.slane %v3666_v55, 1 }
0x1502   :  { %v3668_v45 = vadd.f32 %v3667_v8, %v3666_v55  ;;  %v5564_v8 = vld [vmem:[#allocation2 + $0xe0] sm:$0xff] }
0x1504   :  { %4770 = vpush %v3668_v45  ;;  %v5565_v45 = vld [vmem:[#allocation2 + $0xe8] sm:$0xff] }
0x1505   :  { %s4769_s20 = spop %4768 }
0x1506   :  { %v3657_v55 = vstv %s4769_s20  ;;  %s4531_s20 = sshll.u32 %s8950_s5, 4  ;;  %s4532_s20 = int_to_ptr.hbm [resolvable:$true] %s4531_s20 }
0x1522   :  { %v3696_v42 = vpop.xlane.xlu0 %3695 }
0x1523   :  { %v3697_v18 = vrot.slane %v3696_v42, 4 }
0x1525   :  { %v3698_v17 = vadd.f32 %v3697_v18, %v3696_v42  ;;  %v5566_v18 = vld [vmem:[#allocation2 + $0xc0] sm:$0xff] }
0x1527   :  { %v3699_v34 = vrot.slane %v3698_v17, 2 }
0x1529   :  { %v3700_v22 = vadd.f32 %v3699_v34, %v3698_v17  ;;  %v5567_v17 = vld [vmem:[#allocation2 + $0xc8] sm:$0xff]  ;;  %v8807_v34 = vmul.f32 %v3657_v55, %v6394_v23 }
0x152a   :  { %v3745_v19 = vpop.xlane.xlu2 %3744 }
0x152b   :  { %v3701_v53 = vrot.slane %v3700_v22, 1  ;;  %v3746_v11 = vrot.slane %v3745_v19, 4 }
0x152d   :  { %v3702_v49 = vadd.f32 %v3701_v53, %v3700_v22  ;;  %v3747_v0 = vadd.f32 %v3746_v11, %v3745_v19  ;;  %v5568_v22 = vld [vmem:[#allocation2 + $0xa0] sm:$0xff]  ;;  %v5569_v53 = vld [vmem:[#allocation2 + $0xa8] sm:$0xff] }
0x152e   :  { %v5570_v19 = vld [vmem:[#allocation2 + $0x80] sm:$0xff]  ;;  %v5571_v11 = vld [vmem:[#allocation2 + $0x88] sm:$0xff] }
0x152f   :  { %4772 = vpush %v3702_v49  ;;  %v3748_v35 = vrot.slane %v3747_v0, 2 }
0x1531   :  { %v3749_v41 = vadd.f32 %v3748_v35, %v3747_v0  ;;  %v3672_v0 = vmul.f32 %v8807_v34, %v8807_v34 }
0x1533   :  { %v3750_v29 = vrot.slane %v3749_v41, 1 }
0x1535   :  { %v3751_v40 = vadd.f32 %v3750_v29, %v3749_v41  ;;  %s4771_s21 = spop %4770 }
0x1536   :  { %v3670_v42 = vstv %s4771_s21 }
0x1537   :  { %v3671_v49 = vmul.f32 %v3670_v42, %v6394_v23 }
0x1539   :  { %v3673_v35 = vsub.f32 %v3671_v49, %v3672_v0  ;;  %v5574_v0 = vld [vmem:[#allocation2 + $0x3b0] sm:$0xff] }
0x153c   :  { %v3712_v24 = vpop.xlane.xlu1 %3711 }
0x153d   :  { %v3713_v54 = vrot.slane %v3712_v24, 4 }
0x153f   :  { %v3714_v7 = vadd.f32 %v3713_v54, %v3712_v24  ;;  %v3675_v24 = vadd.f32 1e-05, %v3673_v35  ;;  %v5575_v35 = vld [vmem:[#allocation2 + $0x3b8] sm:$0xff] }
0x1541   :  { %v3715_v1 = vrot.slane %v3714_v7, 2  ;;  %5018 = vrsqrt.f32 %v3675_v24  ;;  %vm3682_vm7 = vweird.f32 %v3675_v24 }
0x1543   :  { %v3716_v10 = vadd.f32 %v3715_v1, %v3714_v7 }
0x1544   :  { %v3760_v44 = vpop.xlane.xlu0 %3759 }
0x1545   :  { %v3761_v9 = vrot.slane %v3760_v44, 4  ;;  %v3717_v37 = vrot.slane %v3716_v10, 1 }
0x1547   :  { %v3762_v59 = vadd.f32 %v3761_v9, %v3760_v44  ;;  %v3718_v57 = vadd.f32 %v3717_v37, %v3716_v10  ;;  %v5019_v7 = vpop.eup %5018 }
0x1548   :  { %v3677_v1 = vmul.f32 %v5019_v7, %v3675_v24  ;;  %vm3683_vm15 = vweird.f32 %v5019_v7  ;;  %v5576_v24 = vld [vmem:[#allocation2 + $0x380] sm:$0xff] }
0x1549   :  { %v3763_v16 = vrot.slane %v3762_v59, 2  ;;  %4774 = vpush %v3718_v57  ;;  %vm3684_vm10 = vmor %vm3682_vm7, %vm3683_vm15 }
0x154a   :  { %4776 = vpush %v3751_v40 }
0x154b   :  { %v3764_v38 = vadd.f32 %v3763_v16, %v3762_v59 }
0x154d   :  { %v3765_v51 = vrot.slane %v3764_v38, 1 }
0x154f   :  { %v3766_v58 = vadd.f32 %v3765_v51, %v3764_v38 }
0x1551   :  { %4778 = vpush %v3766_v58 }
0x1554   :  { %v8798_v14 = vpop.permute.xlu1 %3790 }
0x1555   :  { %4638 = vmatmul.msk.f32.vlgmr.msra.gmra.mxu3 %vm8588_vm2, %v8798_v14  ;;  %4641 = vmatmul.msk.f32.vlgmr.msra.gmra.mxu2 %vm8588_vm2, %v8798_v14 }
0x1556   :  { %4200 = vmatpush.msra.mxu3 %v5548_v13  ;;  %4240 = vmatpush.msra.mxu2 %v5549_v12 }
0x1558   :  { %4201 = vmatpush.msra.mxu3 %v5550_v3  ;;  %4241 = vmatpush.msra.mxu2 %v5551_v27 }
0x155a   :  { %4202 = vmatpush.msra.mxu3 %v5552_v48  ;;  %4242 = vmatpush.msra.mxu2 %v5553_v62 }
0x155c   :  { %4203 = vmatpush.msra.mxu3 %v5554_v47  ;;  %4243 = vmatpush.msra.mxu2 %v5555_v2 }
0x155e   :  { %4204 = vmatpush.msra.mxu3 %v5556_v4  ;;  %4244 = vmatpush.msra.mxu2 %v5557_v6  ;;  %v3674_v4 = vsub.f32 %v8779_v50, %v8807_v34 }
0x1560   :  { %4205 = vmatpush.msra.mxu3 %v5558_v32  ;;  %4245 = vmatpush.msra.mxu2 %v5559_v5  ;;  %s4773_s22 = spop %4772 }
0x1561   :  { %v3704_v54 = vstv %s4773_s22 }
0x1562   :  { %4206 = vmatpush.msra.mxu3 %v5560_v30  ;;  %4246 = vmatpush.msra.mxu2 %v5561_v20 }
0x1564   :  { %4207 = vmatpush.msra.mxu3 %v5562_v63  ;;  %4247 = vmatpush.msra.mxu2 %v5563_v26 }
0x1566   :  { %4208 = vmatpush.msra.mxu3 %v5564_v8  ;;  %4248 = vmatpush.msra.mxu2 %v5565_v45 }
0x1568   :  { %4209 = vmatpush.msra.mxu3 %v5566_v18  ;;  %4249 = vmatpush.msra.mxu2 %v5567_v17 }
0x156a   :  { %4210 = vmatpush.msra.mxu3 %v5568_v22  ;;  %4250 = vmatpush.msra.mxu2 %v5569_v53 }
0x156c   :  { %4211 = vmatpush.msra.mxu3 %v5570_v19  ;;  %4251 = vmatpush.msra.mxu2 %v5571_v11  ;;  %v5572_v19 = vld [vmem:[#allocation2 + $0x3a0] sm:$0xff]  ;;  %v5573_v11 = vld [vmem:[#allocation2 + $0x3a8] sm:$0xff] }
0x156e   :  { %4212 = vmatpush.msra.mxu3 %v8630_v33  ;;  %4252 = vmatpush.msra.mxu2 %v8633_v28  ;;  %v3705_v33 = vmul.f32 %v3704_v54, %v6394_v23  ;;  %v5577_v54 = vld [vmem:[#allocation2 + $0x388] sm:$0xff] }
0x1570   :  { %4213 = vmatpush.msra.mxu3 %v8636_v31  ;;  %4253 = vmatpush.msra.mxu2 %v8639_v56  ;;  %v3722_v31 = vmul.f32 %v3705_v33, %v3705_v33  ;;  %v3724_v48 = vsub.f32 %v8779_v50, %v3705_v33  ;;  %v5578_v33 = vld [vmem:[#allocation2 + $0x390] sm:$0xff] }
0x1572   :  { %4214 = vmatpush.msra.mxu3 %v8642_v61  ;;  %4254 = vmatpush.msra.mxu2 %v8645_v46 }
0x1574   :  { %4215 = vmatpush.msra.mxu3 %v8648_v43  ;;  %4255 = vmatpush.msra.mxu2 %v8651_v15  ;;  %v3678_v15 = vmul.f32 %v5019_v7, %v3677_v1  ;;  %v5585_v1 = vld [vmem:[#allocation2 + $0x348] sm:$0xff] }
0x1576   :  { %v3679_v59 = vmul.f32 0.5, %v3678_v15  ;;  %v5589_v15 = vld [vmem:[#allocation2 + $0x328] sm:$0xff] }
0x1578   :  { %v3680_v38 = vsub.f32 1.5, %v3679_v59  ;;  %v5595_v59 = vld [vmem:[#allocation2 + $0x318] sm:$0xff] }
0x157a   :  { %s4775_s23 = spop %4774  ;;  %v3681_v12 = vmul.f32 %v5019_v7, %v3680_v38  ;;  %v5599_v38 = vld [vmem:[#allocation2 + $0x2f8] sm:$0xff] }
0x157b   :  { %v3720_v28 = vstv %s4775_s23  ;;  %s4777_s1 = spop %4776 }
0x157c   :  { %v3721_v56 = vmul.f32 %v3720_v28, %v6394_v23  ;;  %v3753_v41 = vstv %s4777_s1  ;;  %v3685_v2 = vsel %vm3684_vm10, %v5019_v7, %v3681_v12  ;;  %v5579_v28 = vld [vmem:[#allocation2 + $0x398] sm:$0xff]  ;;  %v5582_v7 = vld [vmem:[#allocation2 + $0x370] sm:$0xff] }
0x157d   :  { %v3754_v10 = vmul.f32 %v3753_v41, %v6394_v23  ;;  %v3686_v30 = vmul.f32 %v3685_v2, %v3674_v4  ;;  %v5583_v41 = vld [vmem:[#allocation2 + $0x378] sm:$0xff]  ;;  %v5609_v2 = vld [vmem:[#allocation2 + $0x288] sm:$0xff]  ;;  %v5610_v4 = vld [vmem:[#allocation2 + $0x290] sm:$0xff] }
0x157e   :  { %v3723_v61 = vsub.f32 %v3721_v56, %v3722_v31  ;;  %v5580_v31 = vld [vmem:[#allocation2 + $0x360] sm:$0xff]  ;;  %v5581_v56 = vld [vmem:[#allocation2 + $0x368] sm:$0xff]  ;;  %v5603_v12 = vld [vmem:[#allocation2 + $0x2d8] sm:$0xff] }
0x157f   :  { %v3770_v44 = vmul.f32 %v3754_v10, %v3754_v10  ;;  %v3772_v26 = vsub.f32 %v8779_v50, %v3754_v10  ;;  %v3688_v55 = vmul.f32 0.01, %v3686_v30  ;;  %v5587_v10 = vld [vmem:[#allocation2 + $0x358] sm:$0xff] }
0x1580   :  { %v3725_v46 = vadd.f32 1e-05, %v3723_v61  ;;  %v5584_v61 = vld [vmem:[#allocation2 + $0x340] sm:$0xff] }
0x1582   :  { %5020 = vrsqrt.f32 %v3725_v46  ;;  %s4779_s25 = spop %4778  ;;  %vm3732_vm6 = vweird.f32 %v3725_v46 }
0x1583   :  { %v3768_v43 = vstv %s4779_s25 }
0x1584   :  { %v3769_v29 = vmul.f32 %v3768_v43, %v6394_v23  ;;  %v5588_v43 = vld [vmem:[#allocation2 + $0x320] sm:$0xff] }
0x1586   :  { %v3771_v9 = vsub.f32 %v3769_v29, %v3770_v44  ;;  %v5590_v44 = vld [vmem:[#allocation2 + $0x330] sm:$0xff]  ;;  %v5591_v29 = vld [vmem:[#allocation2 + $0x338] sm:$0xff] }
0x1588   :  { %v5021_v37 = vpop.eup %5020  ;;  %v3773_v57 = vadd.f32 1e-05, %v3771_v9  ;;  %v5592_v9 = vld [vmem:[#allocation2 + $0x300] sm:$0xff] }
0x1589   :  { %v3727_v40 = vmul.f32 %v5021_v37, %v3725_v46  ;;  %vm3733_vm14 = vweird.f32 %v5021_v37  ;;  %v5586_v46 = vld [vmem:[#allocation2 + $0x350] sm:$0xff] }
0x158a   :  { %5022 = vrsqrt.f32 %v3773_v57  ;;  %vm3734_vm8 = vmor %vm3732_vm6, %vm3733_vm14  ;;  %vm3780_vm11 = vweird.f32 %v3773_v57  ;;  %vm3687_vm14 = vcmp.ge.f32.partialorder %v3686_v30, 0.0 }
0x158b   :  { %v3728_v16 = vmul.f32 %v5021_v37, %v3727_v40  ;;  %v3689_v17 = vsel %vm3687_vm14, %v3686_v30, %v3688_v55  ;;  %v5597_v40 = vld [vmem:[#allocation2 + $0x2e8] sm:$0xff]  ;;  %v5614_v30 = vld [vmem:[#allocation2 + $0x270] sm:$0xff] }
0x158c   :  { %v5618_v55 = vld [vmem:[#allocation2 + $0x250] sm:$0xff] }
0x158d   :  { %v3729_v51 = vmul.f32 0.5, %v3728_v16  ;;  %v5598_v16 = vld [vmem:[#allocation2 + $0x2f0] sm:$0xff] }
0x158f   :  { %v3730_v58 = vsub.f32 1.5, %v3729_v51  ;;  %v5600_v51 = vld [vmem:[#allocation2 + $0x2c0] sm:$0xff] }
0x1590   :  { %v5023_v13 = vpop.eup %5022 }
0x1591   :  { %v3731_v3 = vmul.f32 %v5021_v37, %v3730_v58  ;;  %v3775_v27 = vmul.f32 %v5023_v13, %v3773_v57  ;;  %vm3781_vm9 = vweird.f32 %v5023_v13  ;;  %v5596_v57 = vld [vmem:[#allocation2 + $0x2e0] sm:$0xff]  ;;  %v5601_v58 = vld [vmem:[#allocation2 + $0x2c8] sm:$0xff] }
0x1592   :  { %vm3782_vm12 = vmor %vm3780_vm11, %vm3781_vm9 }
0x1593   :  { %v3776_v62 = vmul.f32 %v5023_v13, %v3775_v27  ;;  %v3735_v47 = vsel %vm3734_vm8, %v5021_v37, %v3731_v3  ;;  %v5593_v37 = vld [vmem:[#allocation2 + $0x308] sm:$0xff]  ;;  %v5604_v3 = vld [vmem:[#allocation2 + $0x2a0] sm:$0xff] }
0x1594   :  { %v3736_v32 = vmul.f32 %v3735_v47, %v3724_v48  ;;  %v5605_v27 = vld [vmem:[#allocation2 + $0x2a8] sm:$0xff]  ;;  %v5606_v48 = vld [vmem:[#allocation2 + $0x2b0] sm:$0xff]  ;;  %v5608_v47 = vld [vmem:[#allocation2 + $0x280] sm:$0xff] }
0x1595   :  { %v3777_v6 = vmul.f32 0.5, %v3776_v62  ;;  %v5607_v62 = vld [vmem:[#allocation2 + $0x2b8] sm:$0xff] }
0x1596   :  { %v3738_v63 = vmul.f32 0.01, %v3736_v32  ;;  %vm3737_vm13 = vcmp.ge.f32.partialorder %v3736_v32, 0.0 }
0x1597   :  { %v3778_v5 = vsub.f32 1.5, %v3777_v6  ;;  %v5611_v6 = vld [vmem:[#allocation2 + $0x298] sm:$0xff] }
0x1598   :  { %v3739_v42 = vsel %vm3737_vm13, %v3736_v32, %v3738_v63  ;;  %v5612_v32 = vld [vmem:[#allocation2 + $0x260] sm:$0xff] }
0x1599   :  { %v3779_v20 = vmul.f32 %v5023_v13, %v3778_v5  ;;  %v3788_v22 = vsel %vm578_vm1, %v3689_v17, %v3739_v42  ;;  %v5613_v5 = vld [vmem:[#allocation2 + $0x268] sm:$0xff]  ;;  %v5616_v63 = vld [vmem:[#allocation2 + $0x240] sm:$0xff]  ;;  %v5623_v17 = vld [vmem:[#allocation2 + $0x238] sm:$0xff] }
0x159a   :  { %v5621_v42 = vld [vmem:[#allocation2 + $0x228] sm:$0xff] }
0x159b   :  { %v3783_v8 = vsel %vm3782_vm12, %v5023_v13, %v3779_v20  ;;  %v5602_v13 = vld [vmem:[#allocation2 + $0x2d0] sm:$0xff]  ;;  %v5615_v20 = vld [vmem:[#allocation2 + $0x278] sm:$0xff] }
0x159c   :  { %v3784_v45 = vmul.f32 %v3783_v8, %v3772_v26  ;;  %v5617_v26 = vld [vmem:[#allocation2 + $0x248] sm:$0xff]  ;;  %v5619_v8 = vld [vmem:[#allocation2 + $0x258] sm:$0xff] }
0x159e   :  { %vm3785_vm15 = vcmp.ge.f32.partialorder %v3784_v45, 0.0  ;;  %v3786_v18 = vmul.f32 0.01, %v3784_v45 }
0x15a0   :  { %v3787_v34 = vsel %vm3785_vm15, %v3784_v45, %v3786_v18  ;;  %v5620_v45 = vld [vmem:[#allocation2 + $0x220] sm:$0xff]  ;;  %v5622_v18 = vld [vmem:[#allocation2 + $0x230] sm:$0xff] }
0x15a1   :  { %v3789_v53 = vsel %vm580_vm4, %v3788_v22, %v3787_v34  ;;  %v5624_v34 = vld [vmem:[#allocation2 + $0x200] sm:$0xff]  ;;  %v5625_v22 = vld [vmem:[#allocation2 + $0x208] sm:$0xff] }
0x15a2   :  { %3794 = vrot.lane.b32.xlu2 %v3789_v53, %s5718_s29  ;;  %v5626_v53 = vld [vmem:[#allocation2 + $0x1f0] sm:$0xff] }
0x15fc   :  { %v3795_v49 = vpop.permute.xlu2 %3794 }
0x15fd   :  { %v3798_v50 = vsel %vm175_vm0, %v8798_v14, %v3795_v49  ;;  %v5627_v49 = vld [vmem:[#allocation2 + $0x1f8] sm:$0xff] }
0x15fe   :  { %4639 = vmatmul.msk.f32.vlgmr.msra.gmra.mxu1 %vm177_vm5, %v3798_v50  ;;  %4642 = vmatmul.msk.f32.vlgmr.msra.gmra.mxu0 %vm177_vm5, %v3798_v50 }
0x15ff   :  { %4645 = vmatmul.msk.f32.vlgmr.msrb.gmra.mxu3 %vm177_vm5, %v3798_v50  ;;  %4648 = vmatmul.msk.f32.vlgmr.msrb.gmra.mxu2 %vm177_vm5, %v3798_v50  ;;  %v5628_v50 = vld [vmem:[#allocation2 + $0x210] sm:$0xff] }
0x1600   :  { %4222 = vmatpush.msra.mxu1 %v5572_v19  ;;  %4262 = vmatpush.msra.mxu0 %v5573_v11  ;;  %v5629_v19 = vld [vmem:[#allocation2 + $0x218] sm:$0xff]  ;;  %v5630_v11 = vld [vmem:[#allocation2 + $0x1d0] sm:$0xff] }
0x1601   :  { %4302 = vmatpush.msrb.mxu3 %v5574_v0  ;;  %4342 = vmatpush.msrb.mxu2 %v5575_v35  ;;  %v5631_v0 = vld [vmem:[#allocation2 + $0x1d8] sm:$0xff]  ;;  %v5632_v35 = vld [vmem:[#allocation2 + $0x1b0] sm:$0xff] }
0x1602   :  { %4223 = vmatpush.msra.mxu1 %v5576_v24  ;;  %4263 = vmatpush.msra.mxu0 %v5577_v54  ;;  %v5633_v24 = vld [vmem:[#allocation2 + $0x1b8] sm:$0xff]  ;;  %v5634_v54 = vld [vmem:[#allocation2 + $0x190] sm:$0xff] }
0x1603   :  { %4303 = vmatpush.msrb.mxu3 %v5578_v33  ;;  %4343 = vmatpush.msrb.mxu2 %v5579_v28  ;;  %v5635_v33 = vld [vmem:[#allocation2 + $0x198] sm:$0xff]  ;;  %v5636_v28 = vld [vmem:[#allocation2 + $0x170] sm:$0xff] }
0x1604   :  { %4224 = vmatpush.msra.mxu1 %v5580_v31  ;;  %4264 = vmatpush.msra.mxu0 %v5581_v56  ;;  %v5637_v31 = vld [vmem:[#allocation2 + $0x178] sm:$0xff]  ;;  %v5638_v56 = vld [vmem:[#allocation2 + $0x150] sm:$0xff] }
0x1605   :  { %4304 = vmatpush.msrb.mxu3 %v5582_v7  ;;  %4344 = vmatpush.msrb.mxu2 %v5583_v41  ;;  %v5639_v7 = vld [vmem:[#allocation2 + $0x158] sm:$0xff]  ;;  %v5640_v41 = vld [vmem:[#allocation2 + $0x130] sm:$0xff] }
0x1606   :  { %4644 = vmatmul.msk.f32.vlgmr.msrb.gmra.mxu1 %vm8588_vm2, %v8798_v14  ;;  %4647 = vmatmul.msk.f32.vlgmr.msrb.gmra.mxu0 %vm8588_vm2, %v8798_v14  ;;  %v5594_v14 = vld [vmem:[#allocation2 + $0x310] sm:$0xff] }
0x1607   :  { %4225 = vmatpush.msra.mxu1 %v5584_v61  ;;  %4265 = vmatpush.msra.mxu0 %v5585_v1  ;;  %v5641_v61 = vld [vmem:[#allocation2 + $0x138] sm:$0xff]  ;;  %v5642_v1 = vld [vmem:[#allocation2 + $0x110] sm:$0xff] }
0x1608   :  { %4305 = vmatpush.msrb.mxu3 %v5586_v46  ;;  %4345 = vmatpush.msrb.mxu2 %v5587_v10  ;;  %v5643_v46 = vld [vmem:[#allocation2 + $0x118] sm:$0xff]  ;;  %v5644_v10 = vld [vmem:[#allocation2 + $0xf0] sm:$0xff] }
0x1609   :  { %4226 = vmatpush.msra.mxu1 %v5588_v43  ;;  %4266 = vmatpush.msra.mxu0 %v5589_v15  ;;  %v5645_v43 = vld [vmem:[#allocation2 + $0xf8] sm:$0xff]  ;;  %v5646_v15 = vld [vmem:[#allocation2 + $0xd0] sm:$0xff] }
0x160a   :  { %4306 = vmatpush.msrb.mxu3 %v5590_v44  ;;  %4346 = vmatpush.msrb.mxu2 %v5591_v29  ;;  %v5647_v44 = vld [vmem:[#allocation2 + $0xd8] sm:$0xff]  ;;  %v5648_v29 = vld [vmem:[#allocation2 + $0xb0] sm:$0xff] }
0x160b   :  { %4227 = vmatpush.msra.mxu1 %v5592_v9  ;;  %4267 = vmatpush.msra.mxu0 %v5593_v37  ;;  %v5649_v9 = vld [vmem:[#allocation2 + $0xb8] sm:$0xff]  ;;  %v5650_v37 = vld [vmem:[#allocation2 + $0x90] sm:$0xff] }
0x160c   :  { %4307 = vmatpush.msrb.mxu3 %v5594_v14  ;;  %4347 = vmatpush.msrb.mxu2 %v5595_v59  ;;  %v5651_v14 = vld [vmem:[#allocation2 + $0x98] sm:$0xff]  ;;  %v5652_v59 = vld [vmem:[#allocation2 + $0x70] sm:$0xff] }
0x160d   :  { %4228 = vmatpush.msra.mxu1 %v5596_v57  ;;  %4268 = vmatpush.msra.mxu0 %v5597_v40  ;;  %v5653_v57 = vld [vmem:[#allocation2 + $0x78] sm:$0xff]  ;;  %v5654_v40 = vld [vmem:[#allocation2 + $0x50] sm:$0xff] }
0x160e   :  { %4308 = vmatpush.msrb.mxu3 %v5598_v16  ;;  %4348 = vmatpush.msrb.mxu2 %v5599_v38  ;;  %v5655_v16 = vld [vmem:[#allocation2 + $0x58] sm:$0xff]  ;;  %v5656_v38 = vld [vmem:[#allocation2 + $0x30] sm:$0xff] }
0x160f   :  { %4229 = vmatpush.msra.mxu1 %v5600_v51  ;;  %4269 = vmatpush.msra.mxu0 %v5601_v58  ;;  %v5657_v51 = vld [vmem:[#allocation2 + $0x38] sm:$0xff]  ;;  %v5658_v58 = vld [vmem:[#allocation2 + $0x10] sm:$0xff] }
0x1610   :  { %4309 = vmatpush.msrb.mxu3 %v5602_v13  ;;  %4349 = vmatpush.msrb.mxu2 %v5603_v12  ;;  %v5659_v13 = vld [vmem:[#allocation2 + $0x18] sm:$0xff]  ;;  %v3819_v12 = vpop.f32.mrf.mxu3 }
0x1611   :  { %4230 = vmatpush.msra.mxu1 %v5604_v3  ;;  %4270 = vmatpush.msra.mxu0 %v5605_v27  ;;  %v3859_v3 = vpop.f32.mrf.mxu2  ;;  %v3820_v27 = vadd.f32 %v3819_v12, %v10155_v21 }
0x1612   :  { %4310 = vmatpush.msrb.mxu3 %v5606_v48  ;;  %4350 = vmatpush.msrb.mxu2 %v5607_v62  ;;  %v3860_v48 = vadd.f32 %v3859_v3, %v10156_v52 }
0x1613   :  { %4231 = vmatpush.msra.mxu1 %v5608_v47  ;;  %4271 = vmatpush.msra.mxu0 %v5609_v2 }
0x1614   :  { %4311 = vmatpush.msrb.mxu3 %v5610_v4  ;;  %4351 = vmatpush.msrb.mxu2 %v5611_v6 }
0x1615   :  { %4232 = vmatpush.msra.mxu1 %v5612_v32  ;;  %4272 = vmatpush.msra.mxu0 %v5613_v5 }
0x1616   :  { %4312 = vmatpush.msrb.mxu3 %v5614_v30  ;;  %4352 = vmatpush.msrb.mxu2 %v5615_v20 }
0x1617   :  { %4233 = vmatpush.msra.mxu1 %v5616_v63  ;;  %4273 = vmatpush.msra.mxu0 %v5617_v26 }
0x1618   :  { %4313 = vmatpush.msrb.mxu3 %v5618_v55  ;;  %4353 = vmatpush.msrb.mxu2 %v5619_v8 }
0x1619   :  { %4234 = vmatpush.msra.mxu1 %v5620_v45  ;;  %4274 = vmatpush.msra.mxu0 %v5621_v42 }
0x161a   :  { %4314 = vmatpush.msrb.mxu3 %v5622_v18  ;;  %4354 = vmatpush.msrb.mxu2 %v5623_v17 }
0x161b   :  { %4235 = vmatpush.msra.mxu1 %v5624_v34  ;;  %4275 = vmatpush.msra.mxu0 %v5625_v22 }
0x161c   :  { %4315 = vmatpush.msrb.mxu3 %v5628_v50  ;;  %4355 = vmatpush.msrb.mxu2 %v5629_v19 }
0x161d   :  { %4280 = vmatpush.msrb.mxu1 %v5626_v53  ;;  %4320 = vmatpush.msrb.mxu0 %v5627_v49 }
0x161f   :  { %4281 = vmatpush.msrb.mxu1 %v5630_v11  ;;  %4321 = vmatpush.msrb.mxu0 %v5631_v0 }
0x1621   :  { %4282 = vmatpush.msrb.mxu1 %v5632_v35  ;;  %4322 = vmatpush.msrb.mxu0 %v5633_v24 }
0x1623   :  { %4283 = vmatpush.msrb.mxu1 %v5634_v54  ;;  %4323 = vmatpush.msrb.mxu0 %v5635_v33 }
0x1625   :  { %4284 = vmatpush.msrb.mxu1 %v5636_v28  ;;  %4324 = vmatpush.msrb.mxu0 %v5637_v31 }
0x1627   :  { %4285 = vmatpush.msrb.mxu1 %v5638_v56  ;;  %4325 = vmatpush.msrb.mxu0 %v5639_v7 }
0x1629   :  { %4286 = vmatpush.msrb.mxu1 %v5640_v41  ;;  %4326 = vmatpush.msrb.mxu0 %v5641_v61 }
0x162b   :  { %4287 = vmatpush.msrb.mxu1 %v5642_v1  ;;  %4327 = vmatpush.msrb.mxu0 %v5643_v46 }
0x162d   :  { %4288 = vmatpush.msrb.mxu1 %v5644_v10  ;;  %4328 = vmatpush.msrb.mxu0 %v5645_v43 }
0x162f   :  { %4289 = vmatpush.msrb.mxu1 %v5646_v15  ;;  %4329 = vmatpush.msrb.mxu0 %v5647_v44 }
0x1631   :  { %4290 = vmatpush.msrb.mxu1 %v5648_v29  ;;  %4330 = vmatpush.msrb.mxu0 %v5649_v9 }
0x1633   :  { %4291 = vmatpush.msrb.mxu1 %v5650_v37  ;;  %4331 = vmatpush.msrb.mxu0 %v5651_v14 }
0x1635   :  { %4292 = vmatpush.msrb.mxu1 %v5652_v59  ;;  %4332 = vmatpush.msrb.mxu0 %v5653_v57 }
0x1637   :  { %4293 = vmatpush.msrb.mxu1 %v5654_v40  ;;  %4333 = vmatpush.msrb.mxu0 %v5655_v16 }
0x1639   :  { %4294 = vmatpush.msrb.mxu1 %v5656_v38  ;;  %4334 = vmatpush.msrb.mxu0 %v5657_v51 }
0x163b   :  { %4295 = vmatpush.msrb.mxu1 %v5658_v58  ;;  %4335 = vmatpush.msrb.mxu0 %v5659_v13 }
0x167b   :  { %v3839_v62 = vpop.f32.mrf.mxu1  ;;  %v3879_v47 = vpop.f32.mrf.mxu0 }
0x167c   :  { %v3840_v2 = vadd.f32 %v3839_v62, %v3820_v27  ;;  %v3880_v4 = vadd.f32 %v3879_v47, %v3860_v48 }
0x167e   :  { %v4649_v6 = vmul.f32 -1.442695, %v3840_v2  ;;  %v4650_v32 = vmul.f32 -1.442695, %v3880_v4 }
0x1680   :  { %5024 = vpow2.f32 %v4649_v6 }
0x1681   :  { %5026 = vpow2.f32 %v4650_v32 }
0x1682   :  { %v3919_v26 = vpop.f32.mrf.mxu3  ;;  %v3959_v55 = vpop.f32.mrf.mxu2 }
0x1683   :  { %v3899_v5 = vpop.f32.mrf.mxu1  ;;  %v3939_v30 = vpop.f32.mrf.mxu0 }
0x1684   :  { %v3900_v20 = vadd.f32 %v3899_v5, %v10157_v25  ;;  %v3940_v63 = vadd.f32 %v3939_v30, %v10158_v36 }
0x1686   :  { %v5025_v8 = vpop.eup %5024  ;;  %v3920_v45 = vadd.f32 %v3919_v26, %v3900_v20  ;;  %v3960_v42 = vadd.f32 %v3959_v55, %v3940_v63 }
0x1687   :  { %v5027_v18 = vpop.eup %5026  ;;  %v3974_v53 = vadd.f32 1.0, %v5025_v8 }
0x1688   :  { %v3975_v17 = vadd.f32 1.0, %v5027_v18  ;;  %v4651_v34 = vmul.f32 -1.442695, %v3920_v45  ;;  %v4652_v22 = vmul.f32 -1.442695, %v3960_v42 }
0x1689   :  { %vm3983_vm12 = vweird.f32 %v3974_v53  ;;  %v3989_v57 = vand.u32 2147483648, %v3974_v53  ;;  %v3987_v16 = vand.u32 2147483647, %v3974_v53 }
0x168a   :  { %5028 = vrcp.f32 %v3975_v17  ;;  %vm3998_vm8 = vweird.f32 %v3975_v17  ;;  %v4002_v44 = vand.u32 2147483647, %v3975_v17  ;;  %v4004_v29 = vand.u32 2147483648, %v3975_v17 }
0x168b   :  { %5030 = vpow2.f32 %v4651_v34  ;;  %v3990_v48 = vor.u32 1.1754944e-38, %v3989_v57 }
0x168c   :  { %5032 = vpow2.f32 %v4652_v22  ;;  %v4005_v58 = vor.u32 1.1754944e-38, %v4004_v29 }
0x168d   :  { %5034 = vrcp.f32 %v3974_v53 }
0x1690   :  { %v5029_v49 = vpop.eup %5028 }
0x1691   :  { %v5031_v50 = vpop.eup %5030  ;;  %v3994_v35 = vmul.f32 %v5029_v49, %v3975_v17  ;;  %vm3999_vm6 = vweird.f32 %v5029_v49 }
0x1692   :  { %v5033_v19 = vpop.eup %5032  ;;  %v3976_v24 = vadd.f32 1.0, %v5031_v50  ;;  %vm8847_vm9 = vmor %vm3998_vm8, %vm3999_vm6  ;;  %vm4003_vm6 = vcmp.eq.f32.partialorder %v4002_v44, 8.507059e+37  ;;  %vm3988_vm8 = vcmp.eq.f32.partialorder %v3987_v16, 8.507059e+37 }
0x1693   :  { %v5035_v11 = vpop.eup %5034  ;;  %v3977_v0 = vadd.f32 1.0, %v5033_v19  ;;  %v3995_v33 = vsub.f32 1.0, %v3994_v35 }
0x1694   :  { %v3979_v54 = vmul.f32 %v5035_v11, %v3974_v53  ;;  %vm3984_vm10 = vweird.f32 %v5035_v11  ;;  %v4019_v20 = vand.u32 2147483648, %v3976_v24  ;;  %v4017_v63 = vand.u32 2147483647, %v3976_v24 }
0x1695   :  { %5036 = vrcp.f32 %v3977_v0  ;;  %v3996_v56 = vmul.f32 %v5029_v49, %v3995_v33  ;;  %v4034_v46 = vand.u32 2147483648, %v3977_v0  ;;  %v4032_v15 = vand.u32 2147483647, %v3977_v0  ;;  %vm3985_vm15 = vmor %vm3983_vm12, %vm3984_vm10 }
0x1696   :  { %5038 = vrcp.f32 %v3976_v24  ;;  %v3980_v28 = vsub.f32 1.0, %v3979_v54  ;;  %vm4028_vm11 = vweird.f32 %v3977_v0  ;;  %vm4013_vm10 = vweird.f32 %v3976_v24 }
0x1697   :  { %v3997_v10 = vadd.f32 %v5029_v49, %v3996_v56  ;;  %v4035_v40 = vor.u32 1.1754944e-38, %v4034_v46  ;;  %vm4033_vm14 = vcmp.eq.f32.partialorder %v4032_v15, 8.507059e+37  ;;  %v4020_v55 = vor.u32 1.1754944e-38, %v4019_v20 }
0x1698   :  { %v3981_v61 = vmul.f32 %v5035_v11, %v3980_v28 }
0x1699   :  { %v4001_v38 = vsel %vm8847_vm9, %v5029_v49, %v3997_v10 }
0x169a   :  { %v3982_v37 = vadd.f32 %v5035_v11, %v3981_v61  ;;  %v4006_v62 = vsel %vm4003_vm6, %v4005_v58, %v4001_v38 }
0x169b   :  { %v5037_v31 = vpop.eup %5036  ;;  %v4040_v6 = vmul.f32 %v4006_v62, %v8776_v39 }
0x169c   :  { %v4024_v7 = vmul.f32 %v5037_v31, %v3977_v0  ;;  %v5039_v41 = vpop.eup %5038  ;;  %vm4029_vm7 = vweird.f32 %v5037_v31  ;;  %v3986_v3 = vsel %vm3985_vm15, %v5035_v11, %v3982_v37 }
0x169d   :  { %v4009_v9 = vmul.f32 %v5039_v41, %v3976_v24  ;;  %vm4030_vm13 = vmor %vm4028_vm11, %vm4029_vm7  ;;  %v3991_v2 = vsel %vm3988_vm8, %v3990_v48, %v3986_v3  ;;  %vm4014_vm7 = vweird.f32 %v5039_v41  ;;  %vm4018_vm11 = vcmp.eq.f32.partialorder %v4017_v63, 8.507059e+37 }
0x169e   :  { %v4025_v1 = vsub.f32 1.0, %v4024_v7  ;;  %vm4015_vm9 = vmor %vm4013_vm10, %vm4014_vm7 }
0x169f   :  { %v4010_v13 = vsub.f32 1.0, %v4009_v9 }
0x16a0   :  { %v4026_v43 = vmul.f32 %v5037_v31, %v4025_v1 }
0x16a1   :  { %v4011_v4 = vmul.f32 %v5039_v41, %v4010_v13 }
0x16a2   :  { %v4027_v59 = vadd.f32 %v5037_v31, %v4026_v43 }
0x16a3   :  { %v4012_v30 = vadd.f32 %v5039_v41, %v4011_v4 }
0x16a4   :  { %v4031_v51 = vsel %vm4030_vm13, %v5037_v31, %v4027_v59 }
0x16a5   :  { %v4036_v12 = vsel %vm4033_vm14, %v4035_v40, %v4031_v51  ;;  %v4016_v26 = vsel %vm4015_vm9, %v5039_v41, %v4012_v30 }
0x16a6   :  { %v4038_v27 = vmul.f32 2.0, %v4036_v12  ;;  %v4021_v45 = vsel %vm4018_vm11, %v4020_v55, %v4016_v26 }
0x16a8   :  { %v4653_v47 = vadd.f32 -1.0, %v4038_v27 }
0x16aa   :  { %v4041_v32 = vmul.f32 %v4653_v47, %v3991_v2 }
0x16ac   :  { %v8854_v5 = vadd.f32 %v4041_v32, %v4040_v6 }
0x16ae   :  { %5040 = vtanh.f32 %v8854_v5 }
0x16b4   :  { %v5041_v8 = vpop.eup %5040 }
0x16b5   :  { %v8857_v42 = vmul.f32 %v5041_v8, %v4021_v45 }
0x16b7   :  { %4089 = vrot.lane.b32.xlu0 %v8857_v42, %s5717_s28  ;;  %v4057_v39 = vmul.f32 %v8857_v42, %v8857_v42  ;;  %v4045_v18 = vsel %vm429_vm3, %v8857_v42, 0.0 }
0x16b9   :  { %4153 = vrot.lane.b32.xlu2 %v4057_v39, %s5716_s2  ;;  %4105 = vrot.lane.b32.xlu1 %v4057_v39, %s5717_s28  ;;  %v4058_v17 = vsel %vm429_vm3, %v4057_v39, 0.0 }
0x16bf   :  { %4138 = vrot.lane.b32.xlu0 %v8857_v42, %s5716_s2 }
0x16e3   :  { %4046 = vadd.xlane.f32.xlu1 %v4045_v18 }
0x16e9   :  { %4059 = vadd.xlane.f32.xlu0 %v4058_v17 }
0x1713   :  { %v4154_v50 = vpop.permute.xlu2 %4153 }
0x1714   :  { %v4156_v11 = vsel %vm429_vm3, %v4154_v50, 0.0 }
0x1729   :  { %v4090_v34 = vpop.permute.xlu0 %4089 }
0x172a   :  { %v4092_v22 = vsel %vm429_vm3, %v4090_v34, 0.0 }
0x172b   :  { %4093 = vadd.xlane.f32.xlu2 %v4092_v22  ;;  %v4106_v53 = vpop.permute.xlu1 %4105 }
0x172c   :  { %v4108_v49 = vsel %vm429_vm3, %v4106_v53, 0.0 }
0x172d   :  { %4109 = vadd.xlane.f32.xlu1 %v4108_v49 }
0x1731   :  { %v4139_v19 = vpop.permute.xlu0 %4138 }
0x1732   :  { %v4141_v0 = vsel %vm429_vm3, %v4139_v19, 0.0 }
0x1733   :  { %4157 = vadd.xlane.f32.xlu2 %v4156_v11  ;;  %4142 = vadd.xlane.f32.xlu0 %v4141_v0 }
0x1746   :  { %4188 = vrot.lane.b32.xlu1 %v8857_v42, %s5718_s29 }
0x1756   :  { %v4047_v35 = vpop.xlane.xlu1 %4046 }
0x1757   :  { %v4048_v24 = vrot.slane %v4047_v35, 4 }
0x1759   :  { %v4049_v54 = vadd.f32 %v4048_v24, %v4047_v35 }
0x175b   :  { %v4050_v33 = vrot.slane %v4049_v54, 2 }
0x175c   :  { %v4060_v28 = vpop.xlane.xlu0 %4059 }
0x175d   :  { %v4061_v31 = vrot.slane %v4060_v28, 4  ;;  %v4051_v56 = vadd.f32 %v4050_v33, %v4049_v54 }
0x175f   :  { %v4062_v7 = vadd.f32 %v4061_v31, %v4060_v28  ;;  %v4052_v41 = vrot.slane %v4051_v56, 1 }
0x1761   :  { %v4063_v61 = vrot.slane %v4062_v7, 2  ;;  %v4053_v1 = vadd.f32 %v4052_v41, %v4051_v56 }
0x1763   :  { %4780 = vpush %v4053_v1  ;;  %v4064_v46 = vadd.f32 %v4063_v61, %v4062_v7 }
0x1765   :  { %v4065_v10 = vrot.slane %v4064_v46, 1 }
0x1767   :  { %v4066_v43 = vadd.f32 %v4065_v10, %v4064_v46 }
0x1769   :  { %4782 = vpush %v4066_v43 }
0x1794   :  { %s4781_s2 = spop %4780 }
0x1795   :  { %v4055_v8 = vstv %s4781_s2 }
0x1796   :  { %v4056_v39 = vmul.f32 %v4055_v8, %v6394_v23 }
0x1798   :  { %v4070_v17 = vmul.f32 %v4056_v39, %v4056_v39 }
0x179a   :  { %s4783_s28 = spop %4782 }
0x179b   :  { %v4068_v45 = vstv %s4783_s28 }
0x179c   :  { %v4069_v18 = vmul.f32 %v4068_v45, %v6394_v23 }
0x179e   :  { %v4094_v15 = vpop.xlane.xlu2 %4093  ;;  %v4071_v34 = vsub.f32 %v4069_v18, %v4070_v17 }
0x179f   :  { %v4095_v44 = vrot.slane %v4094_v15, 4 }
0x17a0   :  { %v4110_v29 = vpop.xlane.xlu1 %4109  ;;  %v4073_v22 = vadd.f32 1e-05, %v4071_v34 }
0x17a1   :  { %v4096_v9 = vadd.f32 %v4095_v44, %v4094_v15  ;;  %v4111_v37 = vrot.slane %v4110_v29, 4 }
0x17a2   :  { %5042 = vrsqrt.f32 %v4073_v22  ;;  %vm4080_vm14 = vweird.f32 %v4073_v22 }
0x17a3   :  { %v4097_v14 = vrot.slane %v4096_v9, 2  ;;  %v4112_v59 = vadd.f32 %v4111_v37, %v4110_v29 }
0x17a5   :  { %v4113_v57 = vrot.slane %v4112_v59, 2  ;;  %v4098_v40 = vadd.f32 %v4097_v14, %v4096_v9 }
0x17a6   :  { %v4158_v16 = vpop.xlane.xlu2 %4157  ;;  %v4143_v38 = vpop.xlane.xlu0 %4142 }
0x17a7   :  { %v4159_v51 = vrot.slane %v4158_v16, 4  ;;  %v4144_v58 = vrot.slane %v4143_v38, 4  ;;  %v4099_v13 = vrot.slane %v4098_v40, 1  ;;  %v4114_v12 = vadd.f32 %v4113_v57, %v4112_v59 }
0x17a8   :  { %v5043_v19 = vpop.eup %5042 }
0x17a9   :  { %v4160_v3 = vadd.f32 %v4159_v51, %v4158_v16  ;;  %v4145_v27 = vadd.f32 %v4144_v58, %v4143_v38  ;;  %v4100_v48 = vadd.f32 %v4099_v13, %v4098_v40  ;;  %v4115_v62 = vrot.slane %v4114_v12, 1 }
0x17aa   :  { %v4075_v24 = vmul.f32 %v5043_v19, %v4073_v22  ;;  %vm4081_vm12 = vweird.f32 %v5043_v19  ;;  %v4072_v58 = vsub.f32 %v8857_v42, %v4056_v39 }
0x17ab   :  { %v4161_v47 = vrot.slane %v4160_v3, 2  ;;  %v4146_v2 = vrot.slane %v4145_v27, 2  ;;  %4784 = vpush %v4100_v48  ;;  %v4116_v4 = vadd.f32 %v4115_v62, %v4114_v12  ;;  %vm4082_vm15 = vmor %vm4080_vm14, %vm4081_vm12 }
0x17ac   :  { %v4076_v56 = vmul.f32 %v5043_v19, %v4075_v24 }
0x17ad   :  { %v4147_v6 = vadd.f32 %v4146_v2, %v4145_v27  ;;  %v4162_v32 = vadd.f32 %v4161_v47, %v4160_v3  ;;  %4786 = vpush %v4116_v4 }
0x17ae   :  { %v4077_v1 = vmul.f32 0.5, %v4076_v56 }
0x17af   :  { %v4148_v30 = vrot.slane %v4147_v6, 1  ;;  %v4163_v20 = vrot.slane %v4162_v32, 1 }
0x17b0   :  { %v4078_v15 = vsub.f32 1.5, %v4077_v1 }
0x17b1   :  { %v4149_v63 = vadd.f32 %v4148_v30, %v4147_v6  ;;  %v4164_v26 = vadd.f32 %v4163_v20, %v4162_v32 }
0x17b2   :  { %v4079_v37 = vmul.f32 %v5043_v19, %v4078_v15 }
0x17b3   :  { %4788 = vpush %v4149_v63 }
0x17b4   :  { %4790 = vpush %v4164_v26  ;;  %v4083_v38 = vsel %vm4082_vm15, %v5043_v19, %v4079_v37 }
0x17b5   :  { %v4084_v27 = vmul.f32 %v4083_v38, %v4072_v58 }
0x17b7   :  { %v4086_v2 = vmul.f32 0.01, %v4084_v27  ;;  %vm4085_vm12 = vcmp.ge.f32.partialorder %v4084_v27, 0.0 }
0x17b8   :  { %v8876_v55 = vpop.permute.xlu1 %4188 }
0x17b9   :  { %4655 = vmatmul.msk.f32.vlgmr.msra.gmra.mxu3 %vm8588_vm2, %v8876_v55  ;;  %4658 = vmatmul.msk.f32.vlgmr.msra.gmra.mxu2 %vm8588_vm2, %v8876_v55  ;;  %v4087_v20 = vsel %vm4085_vm12, %v4084_v27, %v4086_v2 }
0x17dc   :  { %s4785_s26 = spop %4784 }
0x17dd   :  { %v4102_v53 = vstv %s4785_s26 }
0x17de   :  { %v4103_v49 = vmul.f32 %v4102_v53, %v6394_v23  ;;  %s4787_s27 = spop %4786 }
0x17df   :  { %v4118_v50 = vstv %s4787_s27 }
0x17e0   :  { %v4120_v11 = vmul.f32 %v4103_v49, %v4103_v49  ;;  %v4119_v0 = vmul.f32 %v4118_v50, %v6394_v23  ;;  %v4122_v40 = vsub.f32 %v8857_v42, %v4103_v49 }
0x17e2   :  { %v4121_v35 = vsub.f32 %v4119_v0, %v4120_v11 }
0x17e4   :  { %s4789_s30 = spop %4788  ;;  %v4123_v54 = vadd.f32 1e-05, %v4121_v35 }
0x17e5   :  { %v4151_v33 = vstv %s4789_s30  ;;  %s4791_s6 = spop %4790 }
0x17e6   :  { %v4152_v28 = vmul.f32 %v4151_v33, %v6394_v23  ;;  %v4166_v31 = vstv %s4791_s6  ;;  %5044 = vrsqrt.f32 %v4123_v54  ;;  %vm4130_vm6 = vweird.f32 %v4123_v54 }
0x17e7   :  { %v4167_v41 = vmul.f32 %v4166_v31, %v6394_v23 }
0x17e8   :  { %v4168_v7 = vmul.f32 %v4152_v28, %v4152_v28  ;;  %v4170_v47 = vsub.f32 %v8857_v42, %v4152_v28 }
0x17ea   :  { %v4169_v61 = vsub.f32 %v4167_v41, %v4168_v7 }
0x17ec   :  { %v4171_v46 = vadd.f32 1e-05, %v4169_v61  ;;  %v5045_v10 = vpop.eup %5044 }
0x17ed   :  { %v4125_v43 = vmul.f32 %v5045_v10, %v4123_v54  ;;  %vm4131_vm13 = vweird.f32 %v5045_v10 }
0x17ee   :  { %5046 = vrsqrt.f32 %v4171_v46  ;;  %vm4132_vm8 = vmor %vm4130_vm6, %vm4131_vm13  ;;  %vm4178_vm10 = vweird.f32 %v4171_v46 }
0x17ef   :  { %v4126_v44 = vmul.f32 %v5045_v10, %v4125_v43 }
0x17f1   :  { %v4127_v29 = vmul.f32 0.5, %v4126_v44 }
0x17f3   :  { %v4128_v14 = vsub.f32 1.5, %v4127_v29 }
0x17f4   :  { %v5047_v9 = vpop.eup %5046 }
0x17f5   :  { %v4173_v59 = vmul.f32 %v5047_v9, %v4171_v46  ;;  %v4129_v57 = vmul.f32 %v5045_v10, %v4128_v14  ;;  %vm4179_vm7 = vweird.f32 %v5047_v9 }
0x17f6   :  { %vm4180_vm9 = vmor %vm4178_vm10, %vm4179_vm7 }
0x17f7   :  { %v4174_v16 = vmul.f32 %v5047_v9, %v4173_v59  ;;  %v4133_v51 = vsel %vm4132_vm8, %v5045_v10, %v4129_v57 }
0x17f8   :  { %v4134_v12 = vmul.f32 %v4133_v51, %v4122_v40 }
0x17f9   :  { %v4175_v13 = vmul.f32 0.5, %v4174_v16 }
0x17fa   :  { %v4136_v62 = vmul.f32 0.01, %v4134_v12  ;;  %vm4135_vm11 = vcmp.ge.f32.partialorder %v4134_v12, 0.0 }
0x17fb   :  { %v4176_v3 = vsub.f32 1.5, %v4175_v13 }
0x17fc   :  { %v4137_v32 = vsel %vm4135_vm11, %v4134_v12, %v4136_v62 }
0x17fd   :  { %v4177_v48 = vmul.f32 %v5047_v9, %v4176_v3  ;;  %v4186_v26 = vsel %vm578_vm1, %v4087_v20, %v4137_v32 }
0x17ff   :  { %v4181_v4 = vsel %vm4180_vm9, %v5047_v9, %v4177_v48 }
0x1800   :  { %v4182_v6 = vmul.f32 %v4181_v4, %v4170_v47 }
0x1802   :  { %vm4183_vm13 = vcmp.ge.f32.partialorder %v4182_v6, 0.0  ;;  %v4184_v30 = vmul.f32 0.01, %v4182_v6 }
0x1804   :  { %v4185_v63 = vsel %vm4183_vm13, %v4182_v6, %v4184_v30 }
0x1805   :  { %v4187_v8 = vsel %vm580_vm4, %v4186_v26, %v4185_v63 }
0x1806   :  { %4192 = vrot.lane.b32.xlu0 %v4187_v8, %s5718_s29 }
0x183c   :  { %v4217_v39 = vpop.f32.mrf.mxu3  ;;  %v4257_v18 = vpop.f32.mrf.mxu2 }
0x183d   :  { %v4218_v17 = vadd.f32 %v4217_v39, %v10155_v21  ;;  %v4258_v34 = vadd.f32 %v4257_v18, %v10156_v52 }
0x1878   :  { %v4193_v45 = vpop.permute.xlu0 %4192 }
0x1879   :  { %v4196_v42 = vsel %vm175_vm0, %v8876_v55, %v4193_v45 }
0x187a   :  { %4656 = vmatmul.msk.f32.vlgmr.msra.gmra.mxu1 %vm177_vm5, %v4196_v42  ;;  %4659 = vmatmul.msk.f32.vlgmr.msra.gmra.mxu0 %vm177_vm5, %v4196_v42 }
0x187b   :  { %4662 = vmatmul.msk.f32.vlgmr.msrb.gmra.mxu3 %vm177_vm5, %v4196_v42  ;;  %4665 = vmatmul.msk.f32.vlgmr.msrb.gmra.mxu2 %vm177_vm5, %v4196_v42 }
0x1882   :  { %4661 = vmatmul.msk.f32.vlgmr.msrb.gmra.mxu1 %vm8588_vm2, %v8876_v55  ;;  %4664 = vmatmul.msk.f32.vlgmr.msrb.gmra.mxu0 %vm8588_vm2, %v8876_v55 }
0x18f7   :  { %v4237_v22 = vpop.f32.mrf.mxu1  ;;  %v4277_v53 = vpop.f32.mrf.mxu0 }
0x18f8   :  { %v4238_v49 = vadd.f32 %v4237_v22, %v4218_v17  ;;  %v4278_v50 = vadd.f32 %v4277_v53, %v4258_v34 }
0x18fa   :  { %v4666_v19 = vmul.f32 -1.442695, %v4238_v49  ;;  %v4667_v11 = vmul.f32 -1.442695, %v4278_v50 }
0x18fc   :  { %5048 = vpow2.f32 %v4666_v19 }
0x18fd   :  { %5050 = vpow2.f32 %v4667_v11 }
0x18fe   :  { %v4317_v55 = vpop.f32.mrf.mxu3  ;;  %v4357_v54 = vpop.f32.mrf.mxu2 }
0x18ff   :  { %v4297_v0 = vpop.f32.mrf.mxu1  ;;  %v4337_v35 = vpop.f32.mrf.mxu0 }
0x1900   :  { %v4298_v24 = vadd.f32 %v4297_v0, %v10157_v25  ;;  %v4338_v60 = vadd.f32 %v4337_v35, %v10158_v36 }
0x1902   :  { %v5049_v33 = vpop.eup %5048  ;;  %v4318_v21 = vadd.f32 %v4317_v55, %v4298_v24  ;;  %v4358_v28 = vadd.f32 %v4357_v54, %v4338_v60 }
0x1903   :  { %v5051_v52 = vpop.eup %5050  ;;  %v4372_v41 = vadd.f32 1.0, %v5049_v33 }
0x1904   :  { %v4373_v31 = vadd.f32 1.0, %v5051_v52  ;;  %v4668_v56 = vmul.f32 -1.442695, %v4318_v21  ;;  %v4669_v7 = vmul.f32 -1.442695, %v4358_v28 }
0x1905   :  { %vm4381_vm6 = vweird.f32 %v4372_v41  ;;  %v4387_v47 = vand.u32 2147483648, %v4372_v41  ;;  %v4385_v4 = vand.u32 2147483647, %v4372_v41 }
0x1906   :  { %5052 = vrcp.f32 %v4373_v31  ;;  %vm4396_vm5 = vweird.f32 %v4373_v31  ;;  %v4400_v13 = vand.u32 2147483647, %v4373_v31  ;;  %v4402_v12 = vand.u32 2147483648, %v4373_v31 }
0x1907   :  { %5054 = vpow2.f32 %v4668_v56  ;;  %v4388_v45 = vor.u32 1.1754944e-38, %v4387_v47  ;;  %vm4386_vm11 = vcmp.eq.f32.partialorder %v4385_v4, 8.507059e+37 }
0x1908   :  { %5056 = vpow2.f32 %v4669_v7  ;;  %v4403_v30 = vor.u32 1.1754944e-38, %v4402_v12  ;;  %vm4401_vm9 = vcmp.eq.f32.partialorder %v4400_v13, 8.507059e+37 }
0x1909   :  { %5058 = vrcp.f32 %v4372_v41 }
0x190c   :  { %v5053_v61 = vpop.eup %5052 }
0x190d   :  { %v5055_v1 = vpop.eup %5054  ;;  %v4392_v36 = vmul.f32 %v5053_v61, %v4373_v31  ;;  %vm4397_vm0 = vweird.f32 %v5053_v61 }
0x190e   :  { %v5057_v46 = vpop.eup %5056  ;;  %v4374_v43 = vadd.f32 1.0, %v5055_v1  ;;  %vm8912_vm14 = vmor %vm4396_vm5, %vm4397_vm0 }
0x190f   :  { %v5059_v25 = vpop.eup %5058  ;;  %v4375_v10 = vadd.f32 1.0, %v5057_v46  ;;  %v4393_v44 = vsub.f32 1.0, %v4392_v36 }
0x1910   :  { %v4377_v15 = vmul.f32 %v5059_v25, %v4372_v41  ;;  %vm4382_vm2 = vweird.f32 %v5059_v25  ;;  %v4417_v50 = vand.u32 2147483648, %v4374_v43  ;;  %vm4411_vm13 = vweird.f32 %v4374_v43 }
0x1911   :  { %5060 = vrcp.f32 %v4375_v10  ;;  %v4394_v37 = vmul.f32 %v5053_v61, %v4393_v44  ;;  %v4432_v16 = vand.u32 2147483648, %v4375_v10  ;;  %v4430_v58 = vand.u32 2147483647, %v4375_v10  ;;  %vm4383_vm10 = vmor %vm4381_vm6, %vm4382_vm2 }
0x1912   :  { %5062 = vrcp.f32 %v4374_v43  ;;  %v4378_v29 = vsub.f32 1.0, %v4377_v15  ;;  %vm4426_vm15 = vweird.f32 %v4375_v10  ;;  %v4415_v19 = vand.u32 2147483647, %v4374_v43 }
0x1913   :  { %v4395_v38 = vadd.f32 %v5053_v61, %v4394_v37  ;;  %v4433_v2 = vor.u32 1.1754944e-38, %v4432_v16  ;;  %vm4431_vm7 = vcmp.eq.f32.partialorder %v4430_v58, 8.507059e+37  ;;  %v4418_v0 = vor.u32 1.1754944e-38, %v4417_v50  ;;  %v169_v37 = vld [vmem:[%s8948_s3 + $0x10] sm:$0xff]  ;;  %v167_v16 = vld [vmem:[%s8948_s3] sm:$0xff] }
0x1914   :  { %v4379_v57 = vmul.f32 %v5059_v25, %v4378_v29 }
0x1915   :  { %v4399_v6 = vsel %vm8912_vm14, %v5053_v61, %v4395_v38 }
0x1916   :  { %v4380_v27 = vadd.f32 %v5059_v25, %v4379_v57  ;;  %v4404_v42 = vsel %vm4401_vm9, %v4403_v30, %v4399_v6 }
0x1917   :  { %v5061_v9 = vpop.eup %5060  ;;  %v4438_v34 = vmul.f32 %v4404_v42, %v8854_v5 }
0x1918   :  { %v4422_v14 = vmul.f32 %v5061_v9, %v4375_v10  ;;  %v5063_v59 = vpop.eup %5062  ;;  %vm4427_vm4 = vweird.f32 %v5061_v9  ;;  %v4384_v26 = vsel %vm4383_vm10, %v5059_v25, %v4380_v27 }
0x1919   :  { %v4407_v3 = vmul.f32 %v5063_v59, %v4374_v43  ;;  %vm4428_vm8 = vmor %vm4426_vm15, %vm4427_vm4  ;;  %v4389_v18 = vsel %vm4386_vm11, %v4388_v45, %v4384_v26  ;;  %vm4412_vm12 = vweird.f32 %v5063_v59  ;;  %vm4416_vm4 = vcmp.eq.f32.partialorder %v4415_v19, 8.507059e+37 }
0x191a   :  { %v4423_v40 = vsub.f32 1.0, %v4422_v14  ;;  %vm4413_vm0 = vmor %vm4411_vm13, %vm4412_vm12  ;;  %vm4522_vm15 = vcmask 25600  }
0x191b   :  { %v4408_v20 = vsub.f32 1.0, %v4407_v3 }
0x191c   :  { %v4424_v51 = vmul.f32 %v5061_v9, %v4423_v40 }
0x191d   :  { %v4409_v17 = vmul.f32 %v5063_v59, %v4408_v20 }
0x191e   :  { %v4425_v62 = vadd.f32 %v5061_v9, %v4424_v51 }
0x191f   :  { %v4410_v49 = vadd.f32 %v5063_v59, %v4409_v17 }
0x1920   :  { %v4429_v32 = vsel %vm4428_vm8, %v5061_v9, %v4425_v62  ;;  %v170_v9 = vld [vmem:[%s8948_s3 + $0x18] sm:$0xff] }
0x1921   :  { %v4434_v63 = vsel %vm4431_vm7, %v4433_v2, %v4429_v32  ;;  %v4414_v11 = vsel %vm4413_vm0, %v5063_v59, %v4410_v49  ;;  %4514 = vmatpush.msra.mxu3 %v170_v9  ;;  %v168_v59 = vld [vmem:[%s8948_s3 + $0x8] sm:$0xff]  ;;  %v4805_v32 = vld [vmem:[%s8949_s4] ss:$0 sm:$0xff] }
0x1922   :  { %v4436_v8 = vmul.f32 2.0, %v4434_v63  ;;  %v4419_v24 = vsel %vm4416_vm4, %v4418_v0, %v4414_v11 }
0x1923   :  { %4515 = vmatpush.msra.mxu3 %v169_v37 }
0x1924   :  { %v4670_v39 = vadd.f32 -1.0, %v4436_v8 }
0x1925   :  { %4516 = vmatpush.msra.mxu3 %v168_v59 }
0x1926   :  { %v4439_v22 = vmul.f32 %v4670_v39, %v4389_v18 }
0x1927   :  { %4517 = vmatpush.msra.mxu3 %v167_v16 }
0x1928   :  { %v4440_v53 = vadd.f32 %v4439_v22, %v4438_v34 }
0x192a   :  { %5064 = vtanh.f32 %v4440_v53 }
0x1930   :  { %v5065_v35 = vpop.eup %5064 }
0x1931   :  { %v4442_v60 = vmul.f32 %v5065_v35, %v4419_v24 }
0x1933   :  { %4444 = vrot.lane.b32.xlu2 %v4442_v60, %s5714_s24  ;;  %v4459_v55 = vmul.f32 %v4442_v60, %v4442_v60 }
0x1935   :  { %4461 = vrot.lane.b32.xlu1 %v4459_v55, %s5714_s24 }
0x198d   :  { %v4445_v5 = vpop.permute.xlu2 %4444 }
0x198e   :  { %v4447_v54 = vsel %vm429_vm3, %v4445_v5, 0.0 }
0x198f   :  { %4448 = vadd.xlane.f32.xlu0 %v4447_v54 }
0x19a7   :  { %v4462_v33 = vpop.permute.xlu1 %4461 }
0x19a8   :  { %v4464_v21 = vsel %vm429_vm3, %v4462_v33, 0.0 }
0x19a9   :  { %4465 = vadd.xlane.f32.xlu2 %v4464_v21 }
0x1a02   :  { %v4449_v28 = vpop.xlane.xlu0 %4448 }
0x1a03   :  { %v4450_v52 = vrot.slane %v4449_v28, 4 }
0x1a05   :  { %v4451_v31 = vadd.f32 %v4450_v52, %v4449_v28 }
0x1a07   :  { %v4452_v56 = vrot.slane %v4451_v31, 2 }
0x1a09   :  { %v4453_v7 = vadd.f32 %v4452_v56, %v4451_v31 }
0x1a0b   :  { %v4454_v41 = vrot.slane %v4453_v7, 1 }
0x1a0d   :  { %v4455_v61 = vadd.f32 %v4454_v41, %v4453_v7 }
0x1a0f   :  { %4792 = vpush %v4455_v61 }
0x1a1c   :  { %v4466_v1 = vpop.xlane.xlu2 %4465 }
0x1a1d   :  { %v4467_v46 = vrot.slane %v4466_v1, 4 }
0x1a1f   :  { %v4468_v25 = vadd.f32 %v4467_v46, %v4466_v1 }
0x1a21   :  { %v4469_v10 = vrot.slane %v4468_v25, 2 }
0x1a23   :  { %v4470_v36 = vadd.f32 %v4469_v10, %v4468_v25 }
0x1a25   :  { %v4471_v43 = vrot.slane %v4470_v36, 1 }
0x1a27   :  { %v4472_v15 = vadd.f32 %v4471_v43, %v4470_v36 }
0x1a29   :  { %4794 = vpush %v4472_v15 }
0x1a40   :  { %s4793_s29 = spop %4792 }
0x1a41   :  { %v4457_v44 = vstv %s4793_s29 }
0x1a42   :  { %v4458_v29 = vmul.f32 %v4457_v44, %v6394_v23 }
0x1a44   :  { %v4476_v57 = vmul.f32 %v4458_v29, %v4458_v29  ;;  %v4478_v62 = vsub.f32 %v4442_v60, %v4458_v29 }
0x1a5a   :  { %s4795_s10 = spop %4794 }
0x1a5b   :  { %v4474_v14 = vstv %s4795_s10 }
0x1a5c   :  { %v4475_v40 = vmul.f32 %v4474_v14, %v6394_v23 }
0x1a5e   :  { %v4477_v38 = vsub.f32 %v4475_v40, %v4476_v57 }
0x1a60   :  { %v4479_v51 = vadd.f32 1e-05, %v4477_v38 }
0x1a62   :  { %5066 = vrsqrt.f32 %v4479_v51  ;;  %vm4486_vm5 = vweird.f32 %v4479_v51 }
0x1a68   :  { %v5067_v58 = vpop.eup %5066 }
0x1a69   :  { %v4481_v13 = vmul.f32 %v5067_v58, %v4479_v51  ;;  %vm4487_vm3 = vweird.f32 %v5067_v58 }
0x1a6a   :  { %vm4488_vm2 = vmor %vm4486_vm5, %vm4487_vm3 }
0x1a6b   :  { %v4482_v12 = vmul.f32 %v5067_v58, %v4481_v13 }
0x1a6d   :  { %v4483_v3 = vmul.f32 0.5, %v4482_v12 }
0x1a6f   :  { %v4484_v27 = vsub.f32 1.5, %v4483_v3 }
0x1a71   :  { %v4485_v48 = vmul.f32 %v5067_v58, %v4484_v27 }
0x1a73   :  { %v4489_v23 = vsel %vm4488_vm2, %v5067_v58, %v4485_v48 }
0x1a74   :  { %v4490_v47 = vmul.f32 %v4489_v23, %v4478_v62 }
0x1a76   :  { %vm4491_vm14 = vcmp.ge.f32.partialorder %v4490_v47, 0.0  ;;  %v4492_v2 = vmul.f32 0.01, %v4490_v47 }
0x1a78   :  { %v4493_v4 = vsel %vm4491_vm14, %v4490_v47, %v4492_v2 }
0x1a79   :  { %4498 = vrot.lane.b32.xlu1 %v4493_v4, %s5714_s24 }
0x1aeb   :  { %v4499_v6 = vpop.permute.xlu1 %4498 }
0x1aec   :  { %4671 = vmatmul.msk.f32.vlgmr.msra.gmra.mxu3 %vm578_vm1, %v4499_v6 }
0x1b6f   :  { %v4519_v30 = vpop.f32.mrf.mxu3 }
0x1b70   :  { %v4520_v20 = vadd.f32 %v4805_v32, %v4519_v30 }
0x1b72   :  { %4523 = vst.msk [vmem:[#allocation5] sm:$0x3] %vm4522_vm15, %v4520_v20 }
0x1b73   :  { %4534 = dma.vmem_to_hbm [thread:$0]  %s4530_s17, 32, %s4532_s20, [#allocation4]  }
0x1b74   :  { %5710 = dma.done.wait [#allocation4], 32  }
0x1b75   :  { %5711 = vsyncadd [#allocation4], 4294967264 }
0x1b76   :  { %4539 = vsyncpa [#allocation3], 1 }
0x1b77   :  { %4540 = vsyncpa [#allocation4], 1 }

</bundles_post_ra>
